<compile_context>
chip_gen: v7x
topology: tpu7x:2x2x1
jax: 0.10.0
libtpu: 0.0.40
codegen_flags: <defaults>
</compile_context>

<pallas_src>
import functools

import numpy as np

import jax
import jax.numpy as jnp
from jax import lax
from jax.experimental import pallas as pl
from jax.experimental.pallas import tpu as pltpu


# ---------------------------------------------------------------------------
# im2col plan (static, shape-only): per 3x3 tap the flat lane shift, the valid
# destination range, and a {0,1} mask for the W-boundary / H-boundary columns.
# ---------------------------------------------------------------------------
def _im2col_plan(H, W):
    HW = H * W
    p = np.arange(HW)
    h = p // W
    w = p % W
    taps = []
    mask = np.zeros((9, HW), np.float32)
    for kh in range(3):
        for kw in range(3):
            t = kh * 3 + kw
            d = (1 - kh) * W + (1 - kw)          # source_flat = dest_flat + d
            lo = max(0, -d)
            hi = min(HW, HW - d)
            hv = ((h + 1 - kh) >= 0) & ((h + 1 - kh) <= H - 1)
            wv = ((w + 1 - kw) >= 0) & ((w + 1 - kw) <= W - 1)
            mask[t] = (hv & wv).astype(np.float32)
            need_mask = not bool(np.all(mask[t, lo:hi] == 1.0))
            taps.append((int(d), int(lo), int(hi), bool(need_mask)))
    return taps, mask


# ---------------------------------------------------------------------------
# One-time parameter preparation (all weight reshapes / reductions hoisted here)
# ---------------------------------------------------------------------------
def prepare_params(params, x_shape):
    w1, b1, w2, b2 = params["w1"], params["b1"], params["w2"], params["b2"]
    N, C1, L = x_shape                         # conv1d view of x1
    C2, H, W = x_shape                         # conv2d view of x1
    O1 = w1.shape[1]
    O2, KH, KW = w2.shape[1], w2.shape[2], w2.shape[3]
    assert C1 == w1.shape[0] and C2 == w2.shape[0]

    # --- conv2d weight -> (O, 9*C), col index = (kh*3 + kw)*C + c, cast to bf16 once
    w2col = jnp.transpose(w2, (1, 2, 3, 0)).reshape(O2, KH * KW * C2).astype(jnp.bfloat16)

    # --- conv1d + mean algebraic collapse:
    #   mean(v1) = (1/(N*L*O1)) * sum_{c,l,n} x1[n,c,l] * wflat[c*L + l] + mean(b1)
    #   wflat[c*L+l] = sum_{o,k} w1[c,o,k]  -  (l==0)*sum_o w1[c,o,0]  -  (l==L-1)*sum_o w1[c,o,2]
    wk = jnp.sum(w1, axis=1)                   # (C1, 3)
    wA = jnp.sum(wk, axis=1)                   # (C1,)
    wflat2d = jnp.broadcast_to(wA[:, None], (C1, L))
    wflat2d = wflat2d.at[:, 0].add(-wk[:, 0]).at[:, L - 1].add(-wk[:, 2])
    wflat = (wflat2d * (1.0 / float(N * L * O1))).reshape(1, C1 * L).astype(jnp.float32)

    _, mask_np = _im2col_plan(H, W)

    return {
        "w2col": w2col,                                        # (512, 576) bf16
        "b2col": b2.reshape(-1, 1).astype(jnp.float32),        # (512, 1)   f32
        "wflat": wflat,                                        # (1, H*W)   f32 (pre-scaled)
        "b1_mean": jnp.reshape(jnp.mean(b1), (1,)).astype(jnp.float32),
        "mask": jnp.asarray(mask_np),                          # (9, H*W)   f32
    }


def _default_o_tile(O):
    """Single grid step on v5e/v6e; 2 parallel O-tiles on v7x (two TensorCores)."""
    try:
        kind = jax.devices()[0].device_kind.lower()
    except Exception:
        kind = ""
    if "v7" in kind and O >= 512 and O % 256 == 0:
        return 256
    return O


# ---------------------------------------------------------------------------
# Fused kernel: v4 = sigmoid(mean(conv_t1d(x)))  ;  out = conv_t2d(x) + b2 + v4
# ---------------------------------------------------------------------------
def _fused_kernel(x_ref, wflat_ref, mask_ref, w2_ref, b2_ref, bmean_ref,
                  out_ref, xcol_ref, *, taps):
    C, HW = x_ref.shape
    x = x_ref[...]                                             # (C, H*W) f32

    # ---- conv1d + mean + sigmoid, algebraically collapsed to one dot-and-reduce
    v3 = jnp.sum(x * wflat_ref[...]) + bmean_ref[0]
    v4 = 1.0 / (1.0 + jnp.exp(-v3))

    # ---- build the (9C, H*W) im2col matrix for the transposed conv2d in VMEM (bf16)
    xcol_ref[...] = jnp.zeros_like(xcol_ref)
    for t, (d, lo, hi, need_mask) in enumerate(taps):
        r0 = t * C
        src = x[:, lo + d:hi + d]                              # lane-shifted slice
        if need_mask:
            src = src * mask_ref[t:t + 1, lo:hi]               # zero W/H boundary cols
        xcol_ref[r0:r0 + C, lo:hi] = src.astype(xcol_ref.dtype)

    # ---- one deep-K MXU matmul (bf16 x bf16 -> f32); bias + v4 folded pre-broadcast
    acc = jnp.dot(w2_ref[...], xcol_ref[...], preferred_element_type=jnp.float32)
    out_ref[...] = acc + (b2_ref[...] + v4)


def model_forward(x1, prep, o_tile=None):
    # x1: (64, 64, Wd): conv1d sees (N=64, C=64, L=Wd); conv2d sees (C=64, H=64, W=Wd)
    C2, H, W = x1.shape
    HW = H * W
    O, K2 = prep["w2col"].shape
    to = o_tile if o_tile is not None else _default_o_tile(O)
    if O % to:
        to = O

    taps, _ = _im2col_plan(H, W)
    x_flat = x1.reshape(C2, HW)                                # free (contiguous) reshape

    kern = functools.partial(_fused_kernel, taps=tuple(taps))
    n_steps = O // to
    out_flat = pl.pallas_call(
        kern,
        out_shape=jax.ShapeDtypeStruct((O, HW), jnp.float32),
        grid=(n_steps,),
        in_specs=[
            pl.BlockSpec((C2, HW), lambda j: (0, 0)),          # x (flat)
            pl.BlockSpec((1, HW), lambda j: (0, 0)),           # collapsed conv1d weights
            pl.BlockSpec((9, HW), lambda j: (0, 0)),           # im2col boundary masks
            pl.BlockSpec((to, K2), lambda j: (j, 0)),          # conv2d weight O-tile (bf16)
            pl.BlockSpec((to, 1), lambda j: (j, 0)),           # conv2d bias O-tile
            pl.BlockSpec(memory_space=pltpu.MemorySpace.SMEM), # mean(b1) scalar
        ],
        out_specs=pl.BlockSpec((to, HW), lambda j: (j, 0)),
        scratch_shapes=[pltpu.VMEM((K2, HW), jnp.bfloat16)],   # im2col matrix
        compiler_params=pltpu.CompilerParams(
            dimension_semantics=("parallel",) if n_steps > 1 else ("arbitrary",)),
    )(x_flat, prep["wflat"], prep["mask"], prep["w2col"], prep["b2col"], prep["b1_mean"])

    return out_flat.reshape(O, H, W)                           # torch (O, H, W) layout


# ---------------------------------------------------------------------------
# Pure-JAX reference (stride-1 conv-transpose == correlation w/ flipped kernel)
# ---------------------------------------------------------------------------
def reference_forward(x1, params):
    w1, b1, w2, b2 = params["w1"], params["b1"], params["w2"], params["b2"]
    wf1 = jnp.flip(jnp.transpose(w1, (1, 0, 2)), axis=2)            # (O, C, K)
    v1 = lax.conv_general_dilated(
        x1, wf1, (1,), [(1, 1)],
        dimension_numbers=("NCH", "OIH", "NCH"),
        precision=lax.Precision.HIGHEST) + b1[None, :, None]
    wf2 = jnp.flip(jnp.transpose(w2, (1, 0, 2, 3)), axis=(2, 3))    # (O, C, KH, KW)
    v2 = lax.conv_general_dilated(
        x1[None], wf2, (1, 1), [(1, 1), (1, 1)],
        dimension_numbers=("NCHW", "OIHW", "NCHW"),
        precision=lax.Precision.HIGHEST)[0] + b2[:, None, None]
    v4 = jax.nn.sigmoid(jnp.mean(v1))
    return v1, v4, v4 + v2


if __name__ == "__main__":
    key = jax.random.PRNGKey(0)
    kx, kw1, kb1, kw2, kb2 = jax.random.split(key, 5)

    CH_IN, CH_OUT, K = 64, 512, 3
    SPATIAL = 16  # the one free spatial dim, kept small

    x1 = jax.random.normal(kx, (CH_IN, CH_IN, SPATIAL), dtype=jnp.float32)

    bound1 = 1.0 / (CH_IN * K) ** 0.5
    bound2 = 1.0 / (CH_IN * K * K) ** 0.5
    params = {
        "w1": jax.random.uniform(kw1, (CH_IN, CH_OUT, K), jnp.float32, -bound1, bound1),
        "b1": jax.random.uniform(kb1, (CH_OUT,), jnp.float32, -bound1, bound1),
        "w2": jax.random.uniform(kw2, (CH_IN, CH_OUT, K, K), jnp.float32, -bound2, bound2),
        "b2": jax.random.uniform(kb2, (CH_OUT,), jnp.float32, -bound2, bound2),
    }

    # One-time parameter prep (weight transposes / reductions / bf16 casts hoisted here).
    prep = jax.block_until_ready(prepare_params(params, x1.shape))

    fwd = jax.jit(model_forward)
    out = jax.block_until_ready(fwd(x1, prep))
    assert out.shape == (CH_OUT, CH_IN, SPATIAL), out.shape

    v1_ref, v4_ref, out_ref = reference_forward(x1, params)
    diff = out - out_ref
    max_abs = jnp.max(jnp.abs(diff))

    # bf16 MXU operands with f32 accumulation -> 1e-2 tolerance on the full output.
    if not jnp.allclose(out, out_ref, atol=1e-2, rtol=1e-2):
        raise AssertionError(f"final output mismatch, max diff {max_abs}")

    # The fused v4 (conv1d+mean+sigmoid, kept in f32) enters additively; the mean of the
    # difference isolates it from the zero-mean bf16 matmul noise -> tight check.
    mean_shift = jnp.abs(jnp.mean(diff))
    if mean_shift > 1e-3:
        raise AssertionError(f"fused mean/sigmoid path mismatch: mean diff {mean_shift}")

    print("KERNEL_OK")
</pallas_src>

<mosaic_0001>
module attributes {stable_mosaic.version = 11 : i64} {
  func.func @_fused_kernel(%arg0: i32, %arg1: memref<64x1024xf32, #tpu.memory_space<vmem>>, %arg2: memref<1x1024xf32, #tpu.memory_space<vmem>>, %arg3: memref<9x1024xf32, #tpu.memory_space<vmem>>, %arg4: memref<512x576xbf16, #tpu.memory_space<vmem>>, %arg5: memref<512x1xf32, #tpu.memory_space<vmem>>, %arg6: memref<1xf32, #tpu.memory_space<smem>>, %arg7: memref<512x1024xf32, #tpu.memory_space<vmem>>, %arg8: memref<576x1024xbf16, #tpu.memory_space<vmem>>) attributes {dimension_semantics = [#tpu.dimension_semantics<arbitrary>], iteration_bounds = array<i64: 1>, scalar_prefetch = 0 : i64, scratch_operands = 1 : i64, tpu.core_type = #tpu.core_type<tc>, window_params = [{pipeline_mode = #tpu.pipeline_mode<synchronous>, transform_indices = @transform_0, window_bounds = array<i64: 64, 1024>}, {pipeline_mode = #tpu.pipeline_mode<synchronous>, transform_indices = @transform_1, window_bounds = array<i64: 1, 1024>}, {pipeline_mode = #tpu.pipeline_mode<synchronous>, transform_indices = @transform_2, window_bounds = array<i64: 9, 1024>}, {transform_indices = @transform_3, window_bounds = array<i64: 512, 576>}, {transform_indices = @transform_4, window_bounds = array<i64: 512, 1>}, {transform_indices = @transform_5, window_bounds = array<i64: 1>}, {transform_indices = @transform_6, window_bounds = array<i64: 512, 1024>}]} {
    %c0 = arith.constant 0 : index
    %c0_0 = arith.constant 0 : index
    %0 = vector.load %arg1[%c0, %c0_0] : memref<64x1024xf32, #tpu.memory_space<vmem>>, vector<64x1024xf32>
    %c0_1 = arith.constant 0 : index
    %c0_2 = arith.constant 0 : index
    %1 = vector.load %arg2[%c0_1, %c0_2] : memref<1x1024xf32, #tpu.memory_space<vmem>>, vector<1x1024xf32>
    %2 = vector.broadcast %1 : vector<1x1024xf32> to vector<64x1024xf32>
    %3 = arith.mulf %0, %2 : vector<64x1024xf32>
    %4 = vector.shape_cast %3 : vector<64x1024xf32> to vector<1x64x1024xf32>
    %cst = arith.constant dense<0.000000e+00> : vector<1xf32>
    %5 = vector.multi_reduction <add>, %4, %cst [1, 2] : vector<1x64x1024xf32> to vector<1xf32>
    %6 = vector.shape_cast %5 : vector<1xf32> to vector<1x1x1xf32>
    %7 = vector.extract %6[0, 0, 0] : f32 from vector<1x1x1xf32>
    %c0_3 = arith.constant 0 : index
    %8 = memref.load %arg6[%c0_3] : memref<1xf32, #tpu.memory_space<smem>>
    %9 = arith.addf %7, %8 : f32
    %cst_4 = arith.constant 0.000000e+00 : f32
    %10 = arith.subf %cst_4, %9 : f32
    %11 = math.exp %10 : f32
    %cst_5 = arith.constant 1.000000e+00 : f32
    %12 = arith.addf %cst_5, %11 : f32
    %cst_6 = arith.constant 1.000000e+00 : f32
    %13 = arith.divf %cst_6, %12 : f32
    %cst_7 = arith.constant 0.000000e+00 : bf16
    %14 = vector.broadcast %cst_7 : bf16 to vector<576x1024xbf16>
    %c0_8 = arith.constant 0 : index
    %c0_9 = arith.constant 0 : index
    %15 = vector.load %arg8[%c0_8, %c0_9] : memref<576x1024xbf16, #tpu.memory_space<vmem>>, vector<576x1024xbf16>
    tpu.vector_store %arg8[%c0_8, %c0_9], %14 {strides = array<i32>} : memref<576x1024xbf16, #tpu.memory_space<vmem>>, vector<576x1024xbf16>,
    %16 = vector.extract_strided_slice %0 {offsets = [0, 17], sizes = [64, 1007], strides = [1, 1]} : vector<64x1024xf32> to vector<64x1007xf32>
    %c0_10 = arith.constant 0 : index
    %c0_11 = arith.constant 0 : index
    %17 = vector.load %arg3[%c0_10, %c0_11] : memref<9x1024xf32, #tpu.memory_space<vmem>>, vector<1x1007xf32>
    %18 = vector.broadcast %17 : vector<1x1007xf32> to vector<64x1007xf32>
    %19 = arith.mulf %16, %18 : vector<64x1007xf32>
    %20 = arith.truncf %19 : vector<64x1007xf32> to vector<64x1007xbf16>
    %c0_12 = arith.constant 0 : index
    %c0_13 = arith.constant 0 : index
    %21 = vector.load %arg8[%c0_12, %c0_13] : memref<576x1024xbf16, #tpu.memory_space<vmem>>, vector<64x1007xbf16>
    tpu.vector_store %arg8[%c0_12, %c0_13], %20 {strides = array<i32>} : memref<576x1024xbf16, #tpu.memory_space<vmem>>, vector<64x1007xbf16>,
    %22 = vector.extract_strided_slice %0 {offsets = [0, 16], sizes = [64, 1008], strides = [1, 1]} : vector<64x1024xf32> to vector<64x1008xf32>
    %23 = arith.truncf %22 : vector<64x1008xf32> to vector<64x1008xbf16>
    %c64 = arith.constant 64 : index
    %c0_14 = arith.constant 0 : index
    %24 = vector.load %arg8[%c64, %c0_14] : memref<576x1024xbf16, #tpu.memory_space<vmem>>, vector<64x1008xbf16>
    tpu.vector_store %arg8[%c64, %c0_14], %23 {strides = array<i32>} : memref<576x1024xbf16, #tpu.memory_space<vmem>>, vector<64x1008xbf16>,
    %25 = vector.extract_strided_slice %0 {offsets = [0, 15], sizes = [64, 1009], strides = [1, 1]} : vector<64x1024xf32> to vector<64x1009xf32>
    %c2 = arith.constant 2 : index
    %c0_15 = arith.constant 0 : index
    %26 = vector.load %arg3[%c2, %c0_15] : memref<9x1024xf32, #tpu.memory_space<vmem>>, vector<1x1009xf32>
    %27 = vector.broadcast %26 : vector<1x1009xf32> to vector<64x1009xf32>
    %28 = arith.mulf %25, %27 : vector<64x1009xf32>
    %29 = arith.truncf %28 : vector<64x1009xf32> to vector<64x1009xbf16>
    %c128 = arith.constant 128 : index
    %c0_16 = arith.constant 0 : index
    %30 = vector.load %arg8[%c128, %c0_16] : memref<576x1024xbf16, #tpu.memory_space<vmem>>, vector<64x1009xbf16>
    tpu.vector_store %arg8[%c128, %c0_16], %29 {strides = array<i32>} : memref<576x1024xbf16, #tpu.memory_space<vmem>>, vector<64x1009xbf16>,
    %31 = vector.extract_strided_slice %0 {offsets = [0, 1], sizes = [64, 1023], strides = [1, 1]} : vector<64x1024xf32> to vector<64x1023xf32>
    %c3 = arith.constant 3 : index
    %c0_17 = arith.constant 0 : index
    %32 = vector.load %arg3[%c3, %c0_17] : memref<9x1024xf32, #tpu.memory_space<vmem>>, vector<1x1023xf32>
    %33 = vector.broadcast %32 : vector<1x1023xf32> to vector<64x1023xf32>
    %34 = arith.mulf %31, %33 : vector<64x1023xf32>
    %35 = arith.truncf %34 : vector<64x1023xf32> to vector<64x1023xbf16>
    %c192 = arith.constant 192 : index
    %c0_18 = arith.constant 0 : index
    %36 = vector.load %arg8[%c192, %c0_18] : memref<576x1024xbf16, #tpu.memory_space<vmem>>, vector<64x1023xbf16>
    tpu.vector_store %arg8[%c192, %c0_18], %35 {strides = array<i32>} : memref<576x1024xbf16, #tpu.memory_space<vmem>>, vector<64x1023xbf16>,
    %37 = arith.truncf %0 : vector<64x1024xf32> to vector<64x1024xbf16>
    %c256 = arith.constant 256 : index
    %c0_19 = arith.constant 0 : index
    %38 = vector.load %arg8[%c256, %c0_19] : memref<576x1024xbf16, #tpu.memory_space<vmem>>, vector<64x1024xbf16>
    tpu.vector_store %arg8[%c256, %c0_19], %37 {strides = array<i32>} : memref<576x1024xbf16, #tpu.memory_space<vmem>>, vector<64x1024xbf16>,
    %39 = vector.extract_strided_slice %0 {offsets = [0, 0], sizes = [64, 1023], strides = [1, 1]} : vector<64x1024xf32> to vector<64x1023xf32>
    %c5 = arith.constant 5 : index
    %c1 = arith.constant 1 : index
    %40 = vector.load %arg3[%c5, %c1] : memref<9x1024xf32, #tpu.memory_space<vmem>>, vector<1x1023xf32>
    %41 = vector.broadcast %40 : vector<1x1023xf32> to vector<64x1023xf32>
    %42 = arith.mulf %39, %41 : vector<64x1023xf32>
    %43 = arith.truncf %42 : vector<64x1023xf32> to vector<64x1023xbf16>
    %c320 = arith.constant 320 : index
    %c1_20 = arith.constant 1 : index
    %44 = vector.load %arg8[%c320, %c1_20] : memref<576x1024xbf16, #tpu.memory_space<vmem>>, vector<64x1023xbf16>
    tpu.vector_store %arg8[%c320, %c1_20], %43 {strides = array<i32>} : memref<576x1024xbf16, #tpu.memory_space<vmem>>, vector<64x1023xbf16>,
    %45 = vector.extract_strided_slice %0 {offsets = [0, 0], sizes = [64, 1009], strides = [1, 1]} : vector<64x1024xf32> to vector<64x1009xf32>
    %c6 = arith.constant 6 : index
    %c15 = arith.constant 15 : index
    %46 = vector.load %arg3[%c6, %c15] : memref<9x1024xf32, #tpu.memory_space<vmem>>, vector<1x1009xf32>
    %47 = vector.broadcast %46 : vector<1x1009xf32> to vector<64x1009xf32>
    %48 = arith.mulf %45, %47 : vector<64x1009xf32>
    %49 = arith.truncf %48 : vector<64x1009xf32> to vector<64x1009xbf16>
    %c384 = arith.constant 384 : index
    %c15_21 = arith.constant 15 : index
    %50 = vector.load %arg8[%c384, %c15_21] : memref<576x1024xbf16, #tpu.memory_space<vmem>>, vector<64x1009xbf16>
    tpu.vector_store %arg8[%c384, %c15_21], %49 {strides = array<i32>} : memref<576x1024xbf16, #tpu.memory_space<vmem>>, vector<64x1009xbf16>,
    %51 = vector.extract_strided_slice %0 {offsets = [0, 0], sizes = [64, 1008], strides = [1, 1]} : vector<64x1024xf32> to vector<64x1008xf32>
    %52 = arith.truncf %51 : vector<64x1008xf32> to vector<64x1008xbf16>
    %c448 = arith.constant 448 : index
    %c16 = arith.constant 16 : index
    %53 = vector.load %arg8[%c448, %c16] : memref<576x1024xbf16, #tpu.memory_space<vmem>>, vector<64x1008xbf16>
    tpu.vector_store %arg8[%c448, %c16], %52 {strides = array<i32>} : memref<576x1024xbf16, #tpu.memory_space<vmem>>, vector<64x1008xbf16>,
    %54 = vector.extract_strided_slice %0 {offsets = [0, 0], sizes = [64, 1007], strides = [1, 1]} : vector<64x1024xf32> to vector<64x1007xf32>
    %c8 = arith.constant 8 : index
    %c17 = arith.constant 17 : index
    %55 = vector.load %arg3[%c8, %c17] : memref<9x1024xf32, #tpu.memory_space<vmem>>, vector<1x1007xf32>
    %56 = vector.broadcast %55 : vector<1x1007xf32> to vector<64x1007xf32>
    %57 = arith.mulf %54, %56 : vector<64x1007xf32>
    %58 = arith.truncf %57 : vector<64x1007xf32> to vector<64x1007xbf16>
    %c512 = arith.constant 512 : index
    %c17_22 = arith.constant 17 : index
    %59 = vector.load %arg8[%c512, %c17_22] : memref<576x1024xbf16, #tpu.memory_space<vmem>>, vector<64x1007xbf16>
    tpu.vector_store %arg8[%c512, %c17_22], %58 {strides = array<i32>} : memref<576x1024xbf16, #tpu.memory_space<vmem>>, vector<64x1007xbf16>,
    %c0_23 = arith.constant 0 : index
    %c0_24 = arith.constant 0 : index
    %60 = vector.load %arg4[%c0_23, %c0_24] : memref<512x576xbf16, #tpu.memory_space<vmem>>, vector<512x576xbf16>
    %c0_25 = arith.constant 0 : index
    %c0_26 = arith.constant 0 : index
    %61 = vector.load %arg8[%c0_25, %c0_26] : memref<576x1024xbf16, #tpu.memory_space<vmem>>, vector<576x1024xbf16>
    %cst_27 = arith.constant dense<0.000000e+00> : vector<512x1024xf32>
    %62 = tpu.matmul %60, %61, %cst_27 {dimension_numbers = #tpu.dot_dimension_numbers<[1], [0], [0], [1], [0, 0, 1, 1], [], []>} : vector<512x576xbf16>, vector<576x1024xbf16>, vector<512x1024xf32> -> vector<512x1024xf32>
    %c0_28 = arith.constant 0 : index
    %c0_29 = arith.constant 0 : index
    %63 = vector.load %arg5[%c0_28, %c0_29] : memref<512x1xf32, #tpu.memory_space<vmem>>, vector<512x1xf32>
    %64 = vector.broadcast %13 : f32 to vector<512x1xf32>
    %65 = arith.addf %63, %64 : vector<512x1xf32>
    %66 = vector.broadcast %65 : vector<512x1xf32> to vector<512x1024xf32>
    %67 = arith.addf %62, %66 : vector<512x1024xf32>
    %c0_30 = arith.constant 0 : index
    %c0_31 = arith.constant 0 : index
    %68 = vector.load %arg7[%c0_30, %c0_31] : memref<512x1024xf32, #tpu.memory_space<vmem>>, vector<512x1024xf32>
    tpu.vector_store %arg7[%c0_30, %c0_31], %67 {strides = array<i32>} : memref<512x1024xf32, #tpu.memory_space<vmem>>, vector<512x1024xf32>,
    return
  }
  func.func @transform_0(%arg0: i32) -> (i32, i32) {
    %c0_i32 = arith.constant 0 : i32
    %c0_i32_0 = arith.constant 0 : i32
    %c0_i32_1 = arith.constant 0 : i32
    return %c0_i32, %c0_i32_0 : i32, i32
  }
  func.func @transform_1(%arg0: i32) -> (i32, i32) {
    %c0_i32 = arith.constant 0 : i32
    %c0_i32_0 = arith.constant 0 : i32
    %c0_i32_1 = arith.constant 0 : i32
    return %c0_i32, %c0_i32_0 : i32, i32
  }
  func.func @transform_2(%arg0: i32) -> (i32, i32) {
    %c0_i32 = arith.constant 0 : i32
    %c0_i32_0 = arith.constant 0 : i32
    %c0_i32_1 = arith.constant 0 : i32
    return %c0_i32, %c0_i32_0 : i32, i32
  }
  func.func @transform_3(%arg0: i32) -> (i32, i32) {
    %c0_i32 = arith.constant 0 : i32
    %c0_i32_0 = arith.constant 0 : i32
    return %arg0, %c0_i32 : i32, i32
  }
  func.func @transform_4(%arg0: i32) -> (i32, i32) {
    %c0_i32 = arith.constant 0 : i32
    %c0_i32_0 = arith.constant 0 : i32
    return %arg0, %c0_i32 : i32, i32
  }
  func.func @transform_5(%arg0: i32) -> i32 {
    %c0_i32 = arith.constant 0 : i32
    %c0_i32_0 = arith.constant 0 : i32
    return %c0_i32 : i32
  }
  func.func @transform_6(%arg0: i32) -> (i32, i32) {
    %c0_i32 = arith.constant 0 : i32
    %c0_i32_0 = arith.constant 0 : i32
    return %arg0, %c0_i32 : i32, i32
  }
}

</mosaic_0001>

<bundles_post_ra>
// kernel: model_forward.1
= control target key start
LH: loop header
LB: loop body
LE: loop exit
PB: predicated region body
PF: predicated region fallthrough
CT: control target
= control target key end

     0   :  { %v91_v0 = vlaneseq  ;;  %v12086_v3 = vmov 0   ;;  %s12087_s9 = smov 17   ;;  %s12088_s29 = smov 15   ;;  %vm618_vm0 = vcmask 138240   ;;  %vm1048_vm1 = vcmask 916480   ;;  %s19719_s2 = inlined_call_operand.vmem [shape: f32[9,1024], index: 2, kind: input, shape index: {}]   ;;  %s19720_s0 = inlined_call_operand.vmem [shape: f32[64,1024], index: 0, kind: input, shape index: {}]   ;;  %s19721_s3 = inlined_call_operand.vmem [shape: bf16[512,576], index: 3, kind: input, shape index: {}]   ;;  %s19722_s1 = inlined_call_operand.vmem [shape: f32[1,1024], index: 1, kind: input, shape index: {}]   ;;  %s19723_s5 = inlined_call_operand.<no memory space> [shape: f32[1], index: 5, kind: input, shape index: {}]   ;;  %s19724_s4 = inlined_call_operand.vmem [shape: f32[512,1], index: 4, kind: input, shape index: {}]   ;;  %s19725_s6 = inlined_call_operand.vmem [shape: f32[512,1024], index: 6, kind: output, shape index: {}]  }
   0x1   :  { %v566_v1 = vld [vmem:[%s19719_s2] ss:$8 sm:$0xf]  ;;  %285 = vst [vmem:[#allocation2 + $0x38] sm:$0xff] %v12086_v3  ;;  %293 = vst [vmem:[#allocation2 + $0x78] sm:$0xff] %v12086_v3  ;;  %11532 = vset.pattern.permute.xlu0 %v12086_v3  ;;  %11531 = vset.pattern.permute.xlu1 %v12086_v3  ;;  %s12089_s23 = smov 1  }
   0x2   :  { %v567_v2 = vld [vmem:[%s19719_s2] ss:$8 sm:$0xf0]  ;;  %301 = vst [vmem:[#allocation2 + $0xb8] sm:$0xff] %v12086_v3  ;;  %309 = vst [vmem:[#allocation2 + $0xf8] sm:$0xff] %v12086_v3  ;;  %v12136_v4 = vshrl.u32 %v91_v0, 7 }
   0x3   :  { %317 = vst [vmem:[#allocation2 + $0x138] sm:$0xff] %v12086_v3  ;;  %325 = vst [vmem:[#allocation2 + $0x178] sm:$0xff] %v12086_v3  ;;  %v12138_v5 = vor.u32 %v567_v2, %v566_v1  ;;  %v12155_v10 = vld [vmem:[%s19720_s0 + $0x10] sm:$0xff]  ;;  %v12191_v21 = vld [vmem:[%s19720_s0 + $0x8] sm:$0xff]  ;;  %s12090_s24 = smov 112   ;;  %s12091_s25 = smov 111  }
   0x4   :  { %333 = vst [vmem:[#allocation2 + $0x1b8] sm:$0xff] %v12086_v3  ;;  %341 = vst [vmem:[#allocation2 + $0x1f8] sm:$0xff] %v12086_v3  ;;  %v12141_v6 = vsub.s32 2, %v12136_v4  ;;  %v12144_v7 = vsub.s32 0, %v12136_v4  ;;  %v12147_v8 = vsub.s32 3, %v12136_v4  ;;  %v12150_v9 = vsub.s32 1, %v12136_v4 }
   0x5   :  { %349 = vst [vmem:[#allocation2 + $0x238] sm:$0xff] %v12086_v3  ;;  %357 = vst [vmem:[#allocation2 + $0x278] sm:$0xff] %v12086_v3  ;;  %v12160_v11 = vld [vmem:[%s19720_s0 + $0x50] sm:$0xff]  ;;  %v12186_v20 = vsub.s32 4, %v12136_v4  ;;  %v12196_v22 = vld [vmem:[%s19720_s0 + $0x48] sm:$0xff]  ;;  %s12092_s26 = smov 113  }
   0x6   :  { %365 = vst [vmem:[#allocation2 + $0x2b8] sm:$0xff] %v12086_v3  ;;  %373 = vst [vmem:[#allocation2 + $0x2f8] sm:$0xff] %v12086_v3  ;;  %v9682_v12 = vld [vmem:[%s19719_s2 + $0x2] ss:$8 sm:$0xf]  ;;  %v12170_v14 = vpack.c.bf16 %v12160_v11, %v12155_v10  ;;  %v581_v15 = vrot.slane %v12138_v5, %v12141_v6  ;;  %v573_v16 = vrot.slane %v12138_v5, %v12144_v7  ;;  %vm1195_vm2 = vcmask 121856  }
   0x7   :  { %381 = vst [vmem:[#allocation2 + $0x338] sm:$0xff] %v12086_v3  ;;  %389 = vst [vmem:[#allocation2 + $0x378] sm:$0xff] %v12086_v3  ;;  %v9683_v13 = vld [vmem:[%s19719_s2 + $0x2] ss:$8 sm:$0xf0]  ;;  %v585_v17 = vrot.slane %v12138_v5, %v12147_v8  ;;  %v577_v18 = vrot.slane %v12138_v5, %v12150_v9  ;;  %v12215_v26 = vpack.c.bf16 %v12196_v22, %v12191_v21  ;;  %vm1550_vm3 = vcmask 7168  }
   0x8   :  { %397 = vst [vmem:[#allocation2 + $0x3b8] sm:$0xff] %v12086_v3  ;;  %405 = vst [vmem:[#allocation2 + $0x3f8] sm:$0xff] %v12086_v3  ;;  %606 = vrot.lane.b32.xlu1 %v581_v15, %s12087_s9  ;;  %602 = vrot.lane.b32.xlu0 %v573_v16, %s12087_s9  ;;  %v12183_v19 = vor.u32 %v9683_v13, %v9682_v12  ;;  %v12201_v23 = vld [vmem:[%s19720_s0 + $0x20] sm:$0xff]  ;;  %v12211_v25 = vld [vmem:[%s19720_s0 + $0x18] sm:$0xff]  ;;  %v589_v31 = vrot.slane %v12138_v5, %v12186_v20  ;;  %s12093_s27 = smov 127   ;;  %vm826_vm4 = vcmask 908288  }
   0x9   :  { %438 = vst [vmem:[#allocation2 + $0x500] sm:$0xff] %v12086_v3  ;;  %446 = vst [vmem:[#allocation2 + $0x540] sm:$0xff] %v12086_v3  ;;  %v12206_v24 = vld [vmem:[%s19720_s0 + $0x60] sm:$0xff]  ;;  %v12220_v27 = vld [vmem:[%s19720_s0 + $0x58] sm:$0xff]  ;;  %vm1403_vm5 = vcmask 924672   ;;  %vm1758_vm6 = vcmask 1039360  }
   0xa   :  { %454 = vst [vmem:[#allocation2 + $0x580] sm:$0xff] %v12086_v3  ;;  %462 = vst [vmem:[#allocation2 + $0x5c0] sm:$0xff] %v12086_v3  ;;  %v12225_v28 = vld [vmem:[%s19720_s0 + $0x88] sm:$0xff]  ;;  %v1150_v30 = vrot.slane %v12183_v19, %v12144_v7  ;;  %v12241_v32 = vld [vmem:[%s19720_s0] sm:$0xff]  ;;  %v12251_v34 = vpack.c.bf16 %v12206_v24, %v12201_v23  ;;  %v12276_v40 = vpack.c.bf16 %v12220_v27, %v12211_v25  ;;  %s12094_s18 = smov 16   ;;  %vm2205_vm7 = vcmask 1047560  }
   0xb   :  { %470 = vst [vmem:[#allocation2 + $0x600] sm:$0xff] %v12086_v3  ;;  %478 = vst [vmem:[#allocation2 + $0x640] sm:$0xff] %v12086_v3  ;;  %v12230_v29 = vld [vmem:[%s19720_s0 + $0xc8] sm:$0xff]  ;;  %v12246_v33 = vld [vmem:[%s19720_s0 + $0x40] sm:$0xff]  ;;  %v1154_v49 = vrot.slane %v12183_v19, %v12150_v9  ;;  %v1158_v50 = vrot.slane %v12183_v19, %v12141_v6  ;;  %v1166_v12 = vrot.slane %v12183_v19, %v12186_v20  ;;  %vm2559_vm8 = vcmask 1047672  }
   0xc   :  { %486 = vst [vmem:[#allocation2 + $0x680] sm:$0xff] %v12086_v3  ;;  %494 = vst [vmem:[#allocation2 + $0x6c0] sm:$0xff] %v12086_v3  ;;  %608 = vrot.lane.b32.xlu1 %v585_v17, %s12087_s9  ;;  %604 = vrot.lane.b32.xlu0 %v577_v18, %s12087_s9  ;;  %v12256_v35 = vld [vmem:[%s19720_s0 + $0x98] sm:$0xff]  ;;  %v12266_v37 = vld [vmem:[%s19720_s0 + $0x90] sm:$0xff]  ;;  %v12296_v44 = vpack.c.bf16 %v12230_v29, %v12225_v28  ;;  %v12300_v45 = vpack.c.bf16 %v12246_v33, %v12241_v32  ;;  %vm2717_vm9 = vcmask 1047680   ;;  %vm2656_vm10 = vcmask 130048  }
   0xd   :  { %502 = vst [vmem:[#allocation2 + $0x700] sm:$0xff] %v12086_v3  ;;  %510 = vst [vmem:[#allocation2 + $0x740] sm:$0xff] %v12086_v3  ;;  %v12261_v36 = vld [vmem:[%s19720_s0 + $0xd8] sm:$0xff]  ;;  %v12281_v41 = vld [vmem:[%s19720_s0 + $0xd0] sm:$0xff]  ;;  %vm3071_vm11 = vcmask 1047688   ;;  %vm4833_vm12 = vcmask 523264  }
   0xe   :  { %518 = vst [vmem:[#allocation2 + $0x780] sm:$0xff] %v12086_v3  ;;  %526 = vst [vmem:[#allocation2 + $0x7c0] sm:$0xff] %v12086_v3  ;;  %v9684_v38 = vld [vmem:[%s19719_s2 + $0x3] ss:$8 sm:$0xf]  ;;  %v12326_v51 = vpack.c.bf16 %v12261_v36, %v12256_v35  ;;  %v12342_v54 = vpack.c.bf16 %v12281_v41, %v12266_v37 }
   0xf   :  { %534 = vst [vmem:[#allocation2 + $0x800] sm:$0xff] %v12086_v3  ;;  %542 = vst [vmem:[#allocation2 + $0x840] sm:$0xff] %v12086_v3  ;;  %v9685_v39 = vld [vmem:[%s19719_s2 + $0x3] ss:$8 sm:$0xf0] }
  0x10   :  { %550 = vst [vmem:[#allocation2 + $0x880] sm:$0xff] %v12086_v3  ;;  %558 = vst [vmem:[#allocation2 + $0x8c0] sm:$0xff] %v12086_v3  ;;  %v12286_v42 = vld [vmem:[%s19720_s0 + $0x80] sm:$0xff]  ;;  %v12315_v48 = vld [vmem:[%s19720_s0 + $0x110] sm:$0xff]  ;;  %1179 = vrot.lane.b32.xlu1 %v1150_v30, %s12088_s29  ;;  %610 = vrot.lane.b32.xlu0 %v589_v31, %s12087_s9  ;;  %v12379_v62 = vor.u32 %v9685_v39, %v9684_v38  ;;  %v1162_v3 = vrot.slane %v12183_v19, %v12147_v8 }
  0x11   :  { %19856 = vst [vmem:[#allocation4_spill] sm:$0xff] %v12136_v4  ;;  %19857 = vst [vmem:[#allocation5_spill] sm:$0xff] %v12138_v5  ;;  %v12291_v43 = vld [vmem:[%s19720_s0 + $0xc0] sm:$0xff]  ;;  %v12331_v52 = vld [vmem:[%s19720_s0 + $0x150] sm:$0xff] }
  0x12   :  { %19858 = vst [vmem:[#allocation6_spill] sm:$0xff] %v12141_v6  ;;  %19859 = vst [vmem:[#allocation7_spill] sm:$0xff] %v12144_v7  ;;  %v12305_v46 = vld [vmem:[%s19720_s0 + $0xa0] sm:$0xff]  ;;  %v12336_v53 = vld [vmem:[%s19720_s0 + $0x108] sm:$0xff]  ;;  %v12362_v58 = vpack.c.bf16 %v12291_v43, %v12286_v42  ;;  %v938_v13 = vpack.c.bf16 %v12331_v52, %v12315_v48 }
  0x13   :  { %19860 = vst [vmem:[#allocation8_spill] sm:$0xff] %v12147_v8  ;;  %19861 = vst [vmem:[#allocation9_spill] sm:$0xff] %v12150_v9  ;;  %v12310_v47 = vld [vmem:[%s19720_s0 + $0xe0] sm:$0xff]  ;;  %v12347_v55 = vld [vmem:[%s19720_s0 + $0x148] sm:$0xff] }
  0x14   :  { %1854 = vst [vmem:[#allocation2 + $0x410] sm:$0xff] %v12170_v14  ;;  %19862 = vst [vmem:[#allocation10_spill] sm:$0xff] %v12183_v19  ;;  %v12352_v56 = vld [vmem:[%s19720_s0 + $0x120] sm:$0xff]  ;;  %v12367_v59 = vld [vmem:[%s19720_s0 + $0x118] sm:$0xff]  ;;  %v932_v63 = vpack.c.bf16 %v12310_v47, %v12305_v46  ;;  %1181 = vrot.lane.b32.xlu0 %v1154_v49, %s12088_s29  ;;  %1183 = vrot.lane.b32.xlu1 %v1158_v50, %s12088_s29  ;;  %v937_v17 = vpack.c.bf16 %v12347_v55, %v12336_v53 }
  0x15   :  { %19863 = vst [vmem:[#allocation11_spill] sm:$0xff] %v12186_v20  ;;  %19864 = vst [vmem:[#allocation12_spill] sm:$0xff] %v12241_v32  ;;  %v12357_v57 = vld [vmem:[%s19720_s0 + $0x160] sm:$0xff]  ;;  %v12372_v60 = vld [vmem:[%s19720_s0 + $0x158] sm:$0xff]  ;;  %v1505_v19 = vrot.slane %v12379_v62, %v12144_v7 }
  0x16   :  { %19865 = vst [vmem:[#allocation13_spill] sm:$0xff] %v12246_v33  ;;  %1853 = vst [vmem:[#allocation2 + $0x408] sm:$0xff] %v12215_v26  ;;  %v12377_v61 = vld [vmem:[%s19720_s0 + $0x188] sm:$0xff]  ;;  %v12392_v1 = vld [vmem:[%s19720_s0 + $0x100] sm:$0xff]  ;;  %v940_v38 = vpack.c.bf16 %v12357_v57, %v12352_v56  ;;  %v939_v5 = vpack.c.bf16 %v12372_v60, %v12367_v59 }
  0x17   :  { %19866 = vst [vmem:[#allocation14_spill] sm:$0xff] %v12286_v42  ;;  %19867 = vst [vmem:[#allocation15_spill] sm:$0xff] %v12291_v43  ;;  %v12387_v0 = vld [vmem:[%s19720_s0 + $0x1c8] sm:$0xff]  ;;  %v12397_v2 = vld [vmem:[%s19720_s0 + $0x140] sm:$0xff] }
  0x18   :  { %1856 = vst [vmem:[#allocation2 + $0x420] sm:$0xff] %v12251_v34  ;;  %1855 = vst [vmem:[#allocation2 + $0x418] sm:$0xff] %v12276_v40  ;;  %v12411_v15 = vld [vmem:[%s19720_s0 + $0x198] sm:$0xff]  ;;  %v12423_v18 = vld [vmem:[%s19720_s0 + $0x180] sm:$0xff]  ;;  %v945_v4 = vpack.c.bf16 %v12387_v0, %v12377_v61  ;;  %1185 = vrot.lane.b32.xlu0 %v1162_v3, %s12088_s29  ;;  %1187 = vrot.lane.b32.xlu1 %v1166_v12, %s12088_s29 }
  0x19   :  { %1861 = vst [vmem:[#allocation2 + $0x448] sm:$0xff] %v12296_v44  ;;  %1852 = vst [vmem:[#allocation2 + $0x400] sm:$0xff] %v12300_v45  ;;  %v12416_v16 = vld [vmem:[%s19720_s0 + $0x1d8] sm:$0xff]  ;;  %v12428_v30 = vld [vmem:[%s19720_s0 + $0x1c0] sm:$0xff] }
  0x1a   :  { %19868 = vst [vmem:[#allocation16_spill] sm:$0xff] %v12352_v56  ;;  %19869 = vst [vmem:[#allocation17_spill] sm:$0xff] %v12357_v57  ;;  %v12433_v31 = vld [vmem:[%s19720_s0 + $0x190] sm:$0xff]  ;;  %v12445_v49 = vld [vmem:[%s19720_s0 + $0x1a0] sm:$0xff]  ;;  %v1509_v57 = vrot.slane %v12379_v62, %v12150_v9  ;;  %v936_v56 = vpack.c.bf16 %v12397_v2, %v12392_v1  ;;  %v947_v7 = vpack.c.bf16 %v12416_v16, %v12411_v15 }
  0x1b   :  { %1863 = vst [vmem:[#allocation2 + $0x458] sm:$0xff] %v12326_v51  ;;  %19870 = vst [vmem:[#allocation18_spill] sm:$0xff] %v12372_v60  ;;  %v12440_v39 = vld [vmem:[%s19720_s0 + $0x1d0] sm:$0xff]  ;;  %v12450_v50 = vld [vmem:[%s19720_s0 + $0x1e0] sm:$0xff]  ;;  %v944_v60 = vpack.c.bf16 %v12428_v30, %v12423_v18  ;;  %v1513_v9 = vrot.slane %v12379_v62, %v12141_v6 }
  0x1c   :  { %19871 = vst [vmem:[#allocation19_spill] sm:$0xff] %v12379_v62  ;;  %1862 = vst [vmem:[#allocation2 + $0x450] sm:$0xff] %v12342_v54  ;;  %v946_v3 = vpack.c.bf16 %v12440_v39, %v12433_v31  ;;  %v948_v12 = vpack.c.bf16 %v12450_v50, %v12445_v49  ;;  %1534 = vrot.lane.b32.xlu0 %v1505_v19, %s12089_s23  ;;  %1536 = vrot.lane.b32.xlu1 %v1509_v57, %s12089_s23 }
  0x1d   :  { %1860 = vst [vmem:[#allocation2 + $0x440] sm:$0xff] %v12362_v58  ;;  %19872 = vst [vmem:[#allocation20_spill] sm:$0xff] %v12416_v16  ;;  %v1517_v16 = vrot.slane %v12379_v62, %v12147_v8 }
  0x1e   :  { %1864 = vst [vmem:[#allocation2 + $0x460] sm:$0xff] %v932_v63  ;;  %1870 = vst [vmem:[#allocation2 + $0x490] sm:$0xff] %v938_v13 }
  0x1f   :  { %19873 = vst [vmem:[#allocation21_spill] sm:$0xff] %v12450_v50  ;;  %1869 = vst [vmem:[#allocation2 + $0x488] sm:$0xff] %v937_v17  ;;  %v1521_v50 = vrot.slane %v12379_v62, %v12186_v20 }
  0x20   :  { %1872 = vst [vmem:[#allocation2 + $0x4a0] sm:$0xff] %v940_v38  ;;  %1871 = vst [vmem:[#allocation2 + $0x498] sm:$0xff] %v939_v5  ;;  %1538 = vrot.lane.b32.xlu0 %v1513_v9, %s12089_s23  ;;  %1540 = vrot.lane.b32.xlu1 %v1517_v16, %s12089_s23 }
  0x21   :  { %1877 = vst [vmem:[#allocation2 + $0x4c8] sm:$0xff] %v945_v4  ;;  %1868 = vst [vmem:[#allocation2 + $0x480] sm:$0xff] %v936_v56 }
  0x22   :  { %1879 = vst [vmem:[#allocation2 + $0x4d8] sm:$0xff] %v947_v7  ;;  %1876 = vst [vmem:[#allocation2 + $0x4c0] sm:$0xff] %v944_v60  ;;  %v19878_v8 = vld [vmem:[#allocation18_spill] sm:$0xff] }
  0x23   :  { %1878 = vst [vmem:[#allocation2 + $0x4d0] sm:$0xff] %v946_v3  ;;  %1880 = vst [vmem:[#allocation2 + $0x4e0] sm:$0xff] %v948_v12 }
  0x24   :  { %1542 = vrot.lane.b32.xlu0 %v1521_v50, %s12089_s23  ;;  %986 = vrot.lane.b32.xlu1 %v12215_v26, %s12090_s24 }
  0x28   :  { %988 = vrot.lane.b32.xlu0 %v12170_v14, %s12090_s24  ;;  %990 = vrot.lane.b32.xlu1 %v12276_v40, %s12090_s24 }
  0x2c   :  { %992 = vrot.lane.b32.xlu0 %v12251_v34, %s12090_s24  ;;  %984 = vrot.lane.b32.xlu1 %v12300_v45, %s12090_s24 }
  0x30   :  { %1002 = vrot.lane.b32.xlu0 %v12296_v44, %s12090_s24  ;;  %1004 = vrot.lane.b32.xlu1 %v12342_v54, %s12090_s24 }
  0x34   :  { %1006 = vrot.lane.b32.xlu0 %v12326_v51, %s12090_s24  ;;  %1008 = vrot.lane.b32.xlu1 %v932_v63, %s12090_s24 }
  0x38   :  { %1000 = vrot.lane.b32.xlu0 %v12362_v58, %s12090_s24  ;;  %1018 = vrot.lane.b32.xlu1 %v937_v17, %s12090_s24 }
  0x3c   :  { %1020 = vrot.lane.b32.xlu0 %v938_v13, %s12090_s24  ;;  %1022 = vrot.lane.b32.xlu1 %v939_v5, %s12090_s24 }
  0x40   :  { %1024 = vrot.lane.b32.xlu0 %v940_v38, %s12090_s24  ;;  %1016 = vrot.lane.b32.xlu1 %v936_v56, %s12090_s24 }
  0x44   :  { %1034 = vrot.lane.b32.xlu0 %v945_v4, %s12090_s24  ;;  %1036 = vrot.lane.b32.xlu1 %v946_v3, %s12090_s24 }
  0x48   :  { %1038 = vrot.lane.b32.xlu0 %v947_v7, %s12090_s24  ;;  %1040 = vrot.lane.b32.xlu1 %v948_v12, %s12090_s24 }
  0x4c   :  { %1032 = vrot.lane.b32.xlu0 %v944_v60, %s12090_s24 }
  0x7a   :  { %v607_v9 = vpop.permute.xlu1 %606  ;;  %v603_v14 = vpop.permute.xlu0 %602 }
  0x7b   :  { %v650_v19 = vmul.f32 %v603_v14, %v12286_v42  ;;  %v658_v5 = vmul.f32 %v603_v14, %v12291_v43  ;;  %v634_v26 = vmul.f32 %v603_v14, %v12241_v32  ;;  %v642_v34 = vmul.f32 %v603_v14, %v12246_v33 }
  0x7c   :  { %v682_v4 = vmul.f32 %v603_v14, %v12423_v18  ;;  %v690_v40 = vmul.f32 %v603_v14, %v12428_v30  ;;  %v666_v45 = vmul.f32 %v603_v14, %v12392_v1  ;;  %v674_v51 = vmul.f32 %v603_v14, %v12397_v2 }
  0x7d   :  { %v706_v44 = vpack.c.bf16 %v658_v5, %v650_v19  ;;  %v698_v7 = vpack.c.bf16 %v642_v34, %v634_v26 }
  0x7e   :  { %v609_v54 = vpop.permute.xlu1 %608  ;;  %v605_v56 = vpop.permute.xlu0 %604  ;;  %v722_v57 = vpack.c.bf16 %v690_v40, %v682_v4  ;;  %v714_v58 = vpack.c.bf16 %v674_v51, %v666_v45 }
  0x7f   :  { %778 = vrot.lane.b32.xlu0 %v706_v44, %s12091_s25  ;;  %762 = vrot.lane.b32.xlu1 %v698_v7, %s12091_s25  ;;  %v12523_v60 = vsel %vm618_vm0, %v605_v56, %v607_v9  ;;  %v12530_v16 = vsel %vm618_vm0, %v603_v14, %v605_v56  ;;  %v12559_v7 = vsel %vm618_vm0, %v607_v9, %v609_v54 }
  0x80   :  { %v636_v14 = vmul.f32 %v12523_v60, %v12155_v10  ;;  %v644_v19 = vmul.f32 %v12523_v60, %v12160_v11  ;;  %v635_v4 = vmul.f32 %v12530_v16, %v12191_v21  ;;  %v643_v40 = vmul.f32 %v12530_v16, %v12196_v22 }
  0x81   :  { %v645_v9 = vmul.f32 %v12559_v7, %v12220_v27  ;;  %v669_v6 = vmul.f32 %v12559_v7, %v12367_v59 }
  0x82   :  { %v12525_v63 = vpop.permute.xlu1 %1179  ;;  %v12527_v13 = vpop.permute.xlu0 %610  ;;  %v700_v45 = vpack.c.bf16 %v644_v19, %v636_v14  ;;  %v652_v14 = vmul.f32 %v12523_v60, %v12266_v37  ;;  %v660_v19 = vmul.f32 %v12523_v60, %v12281_v41 }
  0x83   :  { %19874 = vst [vmem:[#allocation22_spill] sm:$0xff] %v12527_v13  ;;  %810 = vrot.lane.b32.xlu0 %v722_v57, %s12091_s25  ;;  %794 = vrot.lane.b32.xlu1 %v714_v58, %s12091_s25  ;;  %v1227_v17 = vmul.f32 %v12525_v63, %v12286_v42  ;;  %v1235_v38 = vmul.f32 %v12525_v63, %v12291_v43 }
  0x84   :  { %v1211_v50 = vmul.f32 %v12525_v63, %v12241_v32  ;;  %v1219_v3 = vmul.f32 %v12525_v63, %v12246_v33  ;;  %v12548_v5 = vsel %vm618_vm0, %v609_v54, %v12527_v13  ;;  %v699_v57 = vpack.c.bf16 %v643_v40, %v635_v4 }
  0x85   :  { %v1283_v12 = vpack.c.bf16 %v1235_v38, %v1227_v17  ;;  %v638_v51 = vmul.f32 %v12548_v5, %v12201_v23  ;;  %v646_v56 = vmul.f32 %v12548_v5, %v12206_v24  ;;  %v637_v58 = vmul.f32 %v12559_v7, %v12211_v25 }
  0x86   :  { %v12550_v26 = vpop.permute.xlu0 %1181  ;;  %v1275_v34 = vpack.c.bf16 %v1219_v3, %v1211_v50  ;;  %v12556_v44 = vpop.permute.xlu1 %1183  ;;  %v651_v50 = vmul.f32 %v12530_v16, %v12225_v28  ;;  %v659_v3 = vmul.f32 %v12530_v16, %v12230_v29  ;;  %v677_v43 = vmul.f32 %v12559_v7, %v19878_v8 }
  0x87   :  { %1355 = vrot.lane.b32.xlu0 %v1283_v12, %s12092_s26  ;;  %v702_v38 = vpack.c.bf16 %v646_v56, %v638_v51  ;;  %v701_v12 = vpack.c.bf16 %v645_v9, %v637_v58  ;;  %v661_v51 = vmul.f32 %v12559_v7, %v12261_v36  ;;  %v708_v56 = vpack.c.bf16 %v660_v19, %v652_v14 }
  0x88   :  { %1339 = vrot.lane.b32.xlu1 %v1275_v34, %s12092_s26  ;;  %v707_v40 = vpack.c.bf16 %v659_v3, %v651_v50  ;;  %v662_v58 = vmul.f32 %v12548_v5, %v12310_v47  ;;  %v668_v50 = vmul.f32 %v12523_v60, %v12315_v48  ;;  %v676_v3 = vmul.f32 %v12523_v60, %v12331_v52 }
  0x89   :  { %v667_v14 = vmul.f32 %v12530_v16, %v12336_v53  ;;  %v675_v19 = vmul.f32 %v12530_v16, %v12347_v55  ;;  %v684_v32 = vmul.f32 %v12523_v60, %v12433_v31 }
  0x8a   :  { %v12571_v54 = vpop.permute.xlu0 %1185  ;;  %v12573_v17 = vpop.permute.xlu1 %1187 }
  0x8b   :  { %19875 = vst [vmem:[#allocation23_spill] sm:$0xff] %v12573_v17  ;;  %766 = vrot.lane.b32.xlu0 %v700_v45, %s12091_s25  ;;  %v653_v45 = vmul.f32 %v12559_v7, %v12256_v35 }
  0x8c   :  { %764 = vrot.lane.b32.xlu1 %v699_v57, %s12091_s25  ;;  %v654_v57 = vmul.f32 %v12548_v5, %v12305_v46 }
  0x8e   :  { %v12585_v34 = vpop.permute.xlu0 %1534  ;;  %v12587_v4 = vpop.permute.xlu1 %1536 }
  0x8f   :  { %770 = vrot.lane.b32.xlu0 %v702_v38, %s12091_s25  ;;  %v709_v38 = vpack.c.bf16 %v661_v51, %v653_v45  ;;  %v19876_v45 = vld [vmem:[#allocation16_spill] sm:$0xff] }
  0x90   :  { %768 = vrot.lane.b32.xlu1 %v701_v12, %s12091_s25  ;;  %v710_v12 = vpack.c.bf16 %v662_v58, %v654_v57  ;;  %v670_v51 = vmul.f32 %v12548_v5, %v19876_v45  ;;  %v715_v58 = vpack.c.bf16 %v675_v19, %v667_v14  ;;  %v691_v14 = vmul.f32 %v12530_v16, %v12387_v0 }
  0x91   :  { %v717_v19 = vpack.c.bf16 %v677_v43, %v669_v6  ;;  %v12655_v6 = vsel %vm1195_vm2, %v12550_v26, %v12556_v44 }
  0x92   :  { %v12599_v9 = vpop.permute.xlu0 %1538  ;;  %v12601_v13 = vpop.permute.xlu1 %1540 }
  0x93   :  { %780 = vrot.lane.b32.xlu0 %v707_v40, %s12091_s25  ;;  %v716_v40 = vpack.c.bf16 %v676_v3, %v668_v50 }
  0x94   :  { %782 = vrot.lane.b32.xlu1 %v708_v56, %s12091_s25  ;;  %v19877_v56 = vld [vmem:[#allocation17_spill] sm:$0xff] }
  0x95   :  { %v678_v57 = vmul.f32 %v12548_v5, %v19877_v56 }
  0x96   :  { %v12613_v62 = vpop.permute.xlu0 %1542  ;;  %v987_v20 = vpop.permute.xlu1 %986 }
  0x97   :  { %784 = vrot.lane.b32.xlu0 %v709_v38, %s12091_s25  ;;  %v718_v3 = vpack.c.bf16 %v678_v57, %v670_v51 }
  0x98   :  { %786 = vrot.lane.b32.xlu1 %v710_v12, %s12091_s25  ;;  %v683_v12 = vmul.f32 %v12530_v16, %v12377_v61  ;;  %v19884_v16 = vld [vmem:[#allocation20_spill] sm:$0xff] }
  0x9a   :  { %v989_v42 = vpop.permute.xlu0 %988  ;;  %v991_v33 = vpop.permute.xlu1 %990  ;;  %v723_v43 = vpack.c.bf16 %v691_v14, %v683_v12 }
  0x9b   :  { %798 = vrot.lane.b32.xlu0 %v716_v40, %s12091_s25  ;;  %v12627_v38 = vsel %vm1048_vm1, %v987_v20, %v989_v42  ;;  %v12630_v50 = vsel %vm1048_vm1, %v989_v42, %v991_v33  ;;  %v692_v40 = vmul.f32 %v12523_v60, %v12440_v39  ;;  %v685_v60 = vmul.f32 %v12559_v7, %v12411_v15 }
  0x9c   :  { %19879 = vst [vmem:[#allocation16_spill] sm:$0xff] %v12627_v38  ;;  %19880 = vst [vmem:[#allocation17_spill] sm:$0xff] %v12630_v50  ;;  %796 = vrot.lane.b32.xlu1 %v715_v58, %s12091_s25  ;;  %v693_v58 = vmul.f32 %v12559_v7, %v19884_v16  ;;  %v12674_v7 = vsel %vm1195_vm2, %v12571_v54, %v12573_v17 }
  0x9e   :  { %v12641_v38 = vpop.permute.xlu0 %992  ;;  %v985_v42 = vpop.permute.xlu1 %984 }
  0x9f   :  { %19881 = vst [vmem:[#allocation18_spill] sm:$0xff] %v12641_v38  ;;  %802 = vrot.lane.b32.xlu0 %v718_v3, %s12091_s25  ;;  %v12646_v51 = vsel %vm1048_vm1, %v991_v33, %v12641_v38  ;;  %v12649_v57 = vsel %vm1048_vm1, %v985_v42, %v987_v20  ;;  %v12664_v33 = vsel %vm1195_vm2, %v12525_v63, %v12550_v26 }
  0xa0   :  { %19882 = vst [vmem:[#allocation24_spill] sm:$0xff] %v12646_v51  ;;  %19883 = vst [vmem:[#allocation25_spill] sm:$0xff] %v12649_v57  ;;  %800 = vrot.lane.b32.xlu1 %v717_v19, %s12091_s25  ;;  %v724_v20 = vpack.c.bf16 %v692_v40, %v684_v32  ;;  %v686_v3 = vmul.f32 %v12548_v5, %v12445_v49  ;;  %v19885_v19 = vld [vmem:[#allocation21_spill] sm:$0xff]  ;;  %v1213_v26 = vmul.f32 %v12655_v6, %v12155_v10 }
  0xa1   :  { %v694_v42 = vmul.f32 %v12548_v5, %v19885_v19  ;;  %v1221_v32 = vmul.f32 %v12655_v6, %v12160_v11  ;;  %v12687_v5 = vsel %vm1195_vm2, %v12556_v44, %v12571_v54  ;;  %v725_v40 = vpack.c.bf16 %v693_v58, %v685_v60 }
  0xa2   :  { %v1003_v38 = vpop.permute.xlu0 %1002  ;;  %v1005_v12 = vpop.permute.xlu1 %1004  ;;  %v1212_v17 = vmul.f32 %v12664_v33, %v12191_v21  ;;  %v1220_v50 = vmul.f32 %v12664_v33, %v12196_v22  ;;  %v1215_v51 = vmul.f32 %v12674_v7, %v12201_v23  ;;  %v1223_v44 = vmul.f32 %v12674_v7, %v12206_v24 }
  0xa3   :  { %812 = vrot.lane.b32.xlu0 %v723_v43, %s12091_s25  ;;  %v12681_v14 = vsel %vm1048_vm1, %v1003_v38, %v1005_v12  ;;  %v726_v43 = vpack.c.bf16 %v694_v42, %v686_v3  ;;  %v1214_v3 = vmul.f32 %v12687_v5, %v12211_v25  ;;  %v1222_v42 = vmul.f32 %v12687_v5, %v12220_v27 }
  0xa4   :  { %19886 = vst [vmem:[#allocation20_spill] sm:$0xff] %v12681_v14  ;;  %814 = vrot.lane.b32.xlu1 %v724_v20, %s12091_s25  ;;  %v1277_v20 = vpack.c.bf16 %v1221_v32, %v1213_v26  ;;  %v1276_v58 = vpack.c.bf16 %v1220_v50, %v1212_v17  ;;  %v1236_v17 = vmul.f32 %v12664_v33, %v12230_v29 }
  0xa5   :  { %v1278_v50 = vpack.c.bf16 %v1222_v42, %v1214_v3  ;;  %v1230_v3 = vmul.f32 %v12687_v5, %v12256_v35  ;;  %v1238_v42 = vmul.f32 %v12687_v5, %v12261_v36 }
  0xa6   :  { %v1007_v57 = vpop.permute.xlu0 %1006  ;;  %v12695_v14 = vpop.permute.xlu1 %1008 }
  0xa7   :  { %19887 = vst [vmem:[#allocation21_spill] sm:$0xff] %v12695_v14  ;;  %816 = vrot.lane.b32.xlu0 %v725_v40, %s12091_s25  ;;  %v12701_v54 = vsel %vm1048_vm1, %v1005_v12, %v1007_v57  ;;  %v12705_v60 = vsel %vm1048_vm1, %v1007_v57, %v12695_v14  ;;  %v1279_v40 = vpack.c.bf16 %v1223_v44, %v1215_v51 }
  0xa8   :  { %19888 = vst [vmem:[#allocation26_spill] sm:$0xff] %v12701_v54  ;;  %19889 = vst [vmem:[#allocation27_spill] sm:$0xff] %v12705_v60  ;;  %818 = vrot.lane.b32.xlu1 %v726_v43, %s12091_s25  ;;  %v1228_v57 = vmul.f32 %v12664_v33, %v12225_v28  ;;  %v1229_v43 = vmul.f32 %v12655_v6, %v12266_v37  ;;  %v1237_v14 = vmul.f32 %v12655_v6, %v12281_v41 }
  0xa9   :  { %v1231_v54 = vmul.f32 %v12674_v7, %v12305_v46 }
  0xaa   :  { %v1001_v26 = vpop.permute.xlu0 %1000  ;;  %v1019_v32 = vpop.permute.xlu1 %1018 }
  0xab   :  { %1343 = vrot.lane.b32.xlu0 %v1277_v20, %s12092_s26  ;;  %v12714_v12 = vsel %vm1048_vm1, %v1001_v26, %v1003_v38  ;;  %v1285_v26 = vpack.c.bf16 %v1237_v14, %v1229_v43  ;;  %v1286_v14 = vpack.c.bf16 %v1238_v42, %v1230_v3  ;;  %v1253_v43 = vmul.f32 %v12655_v6, %v12331_v52 }
  0xac   :  { %1341 = vrot.lane.b32.xlu1 %v1276_v58, %s12092_s26  ;;  %v1284_v58 = vpack.c.bf16 %v1236_v17, %v1228_v57  ;;  %v1247_v42 = vmul.f32 %v12674_v7, %v19876_v45 }
  0xae   :  { %v1021_v20 = vpop.permute.xlu0 %1020  ;;  %v1023_v51 = vpop.permute.xlu1 %1022 }
  0xaf   :  { %1347 = vrot.lane.b32.xlu0 %v1279_v40, %s12092_s26  ;;  %v12727_v38 = vsel %vm1048_vm1, %v1019_v32, %v1021_v20  ;;  %v12730_v44 = vsel %vm1048_vm1, %v1021_v20, %v1023_v51  ;;  %v1239_v40 = vmul.f32 %v12674_v7, %v12310_v47 }
  0xb0   :  { %19890 = vst [vmem:[#allocation28_spill] sm:$0xff] %v12730_v44  ;;  %1345 = vrot.lane.b32.xlu1 %v1278_v50, %s12092_s26  ;;  %v1245_v50 = vmul.f32 %v12655_v6, %v12315_v48 }
  0xb1   :  { %v1287_v44 = vpack.c.bf16 %v1239_v40, %v1231_v54  ;;  %v1255_v54 = vmul.f32 %v12674_v7, %v19877_v56  ;;  %v1246_v40 = vmul.f32 %v12687_v5, %v12367_v59 }
  0xb2   :  { %v12741_v60 = vpop.permute.xlu0 %1024  ;;  %v1017_v20 = vpop.permute.xlu1 %1016  ;;  %v1293_v3 = vpack.c.bf16 %v1253_v43, %v1245_v50 }
  0xb3   :  { %19891 = vst [vmem:[#allocation29_spill] sm:$0xff] %v12741_v60  ;;  %1357 = vrot.lane.b32.xlu0 %v1284_v58, %s12092_s26  ;;  %v12746_v57 = vsel %vm1048_vm1, %v1023_v51, %v12741_v60  ;;  %v12749_v17 = vsel %vm1048_vm1, %v1017_v20, %v1019_v32  ;;  %v1244_v58 = vmul.f32 %v12664_v33, %v12336_v53 }
  0xb4   :  { %19892 = vst [vmem:[#allocation30_spill] sm:$0xff] %v12746_v57  ;;  %19893 = vst [vmem:[#allocation31_spill] sm:$0xff] %v12749_v17  ;;  %1359 = vrot.lane.b32.xlu1 %v1285_v26, %s12092_s26  ;;  %v1252_v51 = vmul.f32 %v12664_v33, %v12347_v55  ;;  %v1254_v20 = vmul.f32 %v12687_v5, %v19878_v8  ;;  %v1295_v43 = vpack.c.bf16 %v1255_v54, %v1247_v42 }
  0xb5   :  { %v1262_v54 = vmul.f32 %v12687_v5, %v12411_v15 }
  0xb6   :  { %v1035_v60 = vpop.permute.xlu0 %1034  ;;  %v1037_v57 = vpop.permute.xlu1 %1036  ;;  %v1292_v26 = vpack.c.bf16 %v1252_v51, %v1244_v58  ;;  %v1260_v58 = vmul.f32 %v12664_v33, %v12377_v61  ;;  %v1268_v51 = vmul.f32 %v12664_v33, %v12387_v0  ;;  %v1270_v33 = vmul.f32 %v12687_v5, %v19884_v16 }
  0xb7   :  { %1361 = vrot.lane.b32.xlu0 %v1286_v14, %s12092_s26  ;;  %v12762_v32 = vsel %vm1048_vm1, %v1035_v60, %v1037_v57  ;;  %v12814_v5 = vsel %vm1550_vm3, %v12587_v4, %v12599_v9 }
  0xb8   :  { %19894 = vst [vmem:[#allocation32_spill] sm:$0xff] %v12762_v32  ;;  %1363 = vrot.lane.b32.xlu1 %v1287_v44, %s12092_s26  ;;  %v1294_v32 = vpack.c.bf16 %v1254_v20, %v1246_v40  ;;  %v1300_v42 = vpack.c.bf16 %v1268_v51, %v1260_v58  ;;  %v1261_v40 = vmul.f32 %v12655_v6, %v12433_v31 }
  0xb9   :  { %v1269_v20 = vmul.f32 %v12655_v6, %v12440_v39  ;;  %v1263_v6 = vmul.f32 %v12674_v7, %v12445_v49  ;;  %v1271_v58 = vmul.f32 %v12674_v7, %v19885_v19  ;;  %v12823_v51 = vsel %vm1550_vm3, %v12585_v34, %v12587_v4 }
  0xba   :  { %v1039_v14 = vpop.permute.xlu0 %1038  ;;  %v12773_v17 = vpop.permute.xlu1 %1040  ;;  %v12834_v7 = vsel %vm1550_vm3, %v12601_v13, %v12613_v62  ;;  %v1567_v4 = vmul.f32 %v12823_v51, %v12191_v21 }
  0xbb   :  { %19895 = vst [vmem:[#allocation33_spill] sm:$0xff] %v12773_v17  ;;  %1375 = vrot.lane.b32.xlu0 %v1293_v3, %s12092_s26  ;;  %v12777_v44 = vsel %vm1048_vm1, %v1037_v57, %v1039_v14  ;;  %v12781_v50 = vsel %vm1048_vm1, %v1039_v14, %v12773_v17  ;;  %v1243_v3 = vmul.f32 %v12525_v63, %v12392_v1 }
  0xbc   :  { %19896 = vst [vmem:[#allocation34_spill] sm:$0xff] %v12777_v44  ;;  %1373 = vrot.lane.b32.xlu1 %v1292_v26, %s12092_s26  ;;  %v1251_v57 = vmul.f32 %v12525_v63, %v12397_v2 }
  0xbe   :  { %v1033_v44 = vpop.permute.xlu0 %1032  ;;  %v1291_v26 = vpack.c.bf16 %v1251_v57, %v1243_v3  ;;  %v1568_v3 = vmul.f32 %v12814_v5, %v12155_v10  ;;  %v1576_v57 = vmul.f32 %v12814_v5, %v12160_v11  ;;  %v1570_v11 = vmul.f32 %v12834_v7, %v12201_v23 }
  0xbf   :  { %1379 = vrot.lane.b32.xlu0 %v1295_v43, %s12092_s26  ;;  %v12794_v14 = vsel %vm1048_vm1, %v1033_v44, %v1035_v60  ;;  %v1302_v60 = vpack.c.bf16 %v1270_v33, %v1262_v54  ;;  %v1267_v44 = vmul.f32 %v12525_v63, %v12428_v30  ;;  %v1301_v43 = vpack.c.bf16 %v1269_v20, %v1261_v40 }
  0xc0   :  { %1377 = vrot.lane.b32.xlu1 %v1294_v32, %s12092_s26  ;;  %v1259_v32 = vmul.f32 %v12525_v63, %v12423_v18  ;;  %v1575_v54 = vmul.f32 %v12823_v51, %v12196_v22  ;;  %v1553_v33 = vsel %vm1550_vm3, %v12599_v9, %v12601_v13  ;;  %v1632_v10 = vpack.c.bf16 %v1576_v57, %v1568_v3  ;;  %v19900_v57 = vld [vmem:[#allocation15_spill] sm:$0xff] }
  0xc1   :  { %v1569_v21 = vmul.f32 %v1553_v33, %v12211_v25  ;;  %v1577_v22 = vmul.f32 %v1553_v33, %v12220_v27  ;;  %v1583_v9 = vmul.f32 %v12823_v51, %v12225_v28  ;;  %v1591_v23 = vmul.f32 %v12823_v51, %v12230_v29 }
  0xc2   :  { %v1299_v63 = vpack.c.bf16 %v1267_v44, %v1259_v32  ;;  %v1631_v40 = vpack.c.bf16 %v1575_v54, %v1567_v4  ;;  %v19898_v32 = vld [vmem:[#allocation13_spill] sm:$0xff]  ;;  %v1585_v44 = vmul.f32 %v1553_v33, %v12256_v35  ;;  %v1584_v29 = vmul.f32 %v12814_v5, %v12266_v37 }
  0xc3   :  { %1389 = vrot.lane.b32.xlu0 %v1300_v42, %s12092_s26  ;;  %v1303_v42 = vpack.c.bf16 %v1271_v58, %v1263_v6  ;;  %v1633_v20 = vpack.c.bf16 %v1577_v22, %v1569_v21  ;;  %v1574_v25 = vmul.f32 %v12585_v34, %v19898_v32  ;;  %v1639_v27 = vpack.c.bf16 %v1591_v23, %v1583_v9  ;;  %v19902_v32 = vld [vmem:[#allocation7_spill] sm:$0xff] }
  0xc4   :  { %1371 = vrot.lane.b32.xlu1 %v1291_v26, %s12092_s26  ;;  %v1578_v26 = vmul.f32 %v12834_v7, %v12206_v24  ;;  %v1592_v6 = vmul.f32 %v12814_v5, %v12281_v41  ;;  %v1590_v35 = vmul.f32 %v12585_v34, %v19900_v57  ;;  %v1594_v37 = vmul.f32 %v12834_v7, %v12310_v47 }
  0xc5   :  { %v1600_v4 = vmul.f32 %v12814_v5, %v12315_v48  ;;  %v1608_v54 = vmul.f32 %v12814_v5, %v12331_v52  ;;  %v1610_v48 = vmul.f32 %v12834_v7, %v19877_v56  ;;  %v1601_v52 = vmul.f32 %v1553_v33, %v12367_v59 }
  0xc6   :  { %v1634_v13 = vpack.c.bf16 %v1578_v26, %v1570_v11  ;;  %v1599_v11 = vmul.f32 %v12823_v51, %v12336_v53  ;;  %v1602_v26 = vmul.f32 %v12834_v7, %v19876_v45  ;;  %v1609_v21 = vmul.f32 %v1553_v33, %v19878_v8 }
  0xc7   :  { %1393 = vrot.lane.b32.xlu0 %v1302_v60, %s12092_s26  ;;  %v19897_v60 = vld [vmem:[#allocation12_spill] sm:$0xff]  ;;  %v1648_v47 = vpack.c.bf16 %v1608_v54, %v1600_v4  ;;  %v1623_v22 = vmul.f32 %v12823_v51, %v12387_v0  ;;  %v1598_v56 = vmul.f32 %v12585_v34, %v12392_v1  ;;  %v1606_v59 = vmul.f32 %v12585_v34, %v12397_v2 }
  0xc8   :  { %1391 = vrot.lane.b32.xlu1 %v1301_v43, %s12092_s26  ;;  %v1566_v24 = vmul.f32 %v12585_v34, %v19897_v60  ;;  %v1593_v43 = vmul.f32 %v1553_v33, %v12261_v36  ;;  %v1586_v36 = vmul.f32 %v12834_v7, %v12305_v46  ;;  %v1607_v46 = vmul.f32 %v12823_v51, %v12347_v55  ;;  %v9686_v1 = vld [vmem:[%s19719_s2 + $0x5] ss:$8 sm:$0xf] }
  0xc9   :  { %v1650_v53 = vpack.c.bf16 %v1610_v48, %v1602_v26  ;;  %v1615_v55 = vmul.f32 %v12823_v51, %v12377_v61  ;;  %v1649_v45 = vpack.c.bf16 %v1609_v21, %v1601_v52  ;;  %v1625_v9 = vmul.f32 %v1553_v33, %v19884_v16  ;;  %v9687_v2 = vld [vmem:[%s19719_s2 + $0x5] ss:$8 sm:$0xf0] }
  0xca   :  { %v1630_v28 = vpack.c.bf16 %v1574_v25, %v1566_v24  ;;  %v1641_v58 = vpack.c.bf16 %v1593_v43, %v1585_v44  ;;  %v1646_v61 = vpack.c.bf16 %v1606_v59, %v1598_v56  ;;  %v1616_v0 = vmul.f32 %v12814_v5, %v12433_v31  ;;  %v19903_v43 = vld [vmem:[#allocation8_spill] sm:$0xff] }
  0xcb   :  { %1387 = vrot.lane.b32.xlu0 %v1299_v63, %s12092_s26  ;;  %v19899_v63 = vld [vmem:[#allocation14_spill] sm:$0xff]  ;;  %v1655_v8 = vpack.c.bf16 %v1623_v22, %v1615_v55  ;;  %v1624_v51 = vmul.f32 %v12814_v5, %v12440_v39  ;;  %v1614_v16 = vmul.f32 %v12585_v34, %v12423_v18  ;;  %v1622_v31 = vmul.f32 %v12585_v34, %v12428_v30  ;;  %v11533_v18 = vld [vmem:[%s19721_s3 + $0x4] ss:$20 sps:$4 sm:$0xff]  }
  0xcc   :  { %1395 = vrot.lane.b32.xlu1 %v1303_v42, %s12092_s26  ;;  %v1582_v3 = vmul.f32 %v12585_v34, %v19899_v63  ;;  %v1640_v42 = vpack.c.bf16 %v1592_v6, %v1584_v29  ;;  %v1618_v5 = vmul.f32 %v12834_v7, %v12445_v49  ;;  %v12932_v23 = vor.u32 %v9687_v2, %v9686_v1  ;;  %v9688_v49 = vld [vmem:[%s19719_s2 + $0x6] ss:$8 sm:$0xf] }
  0xcd   :  { %v1656_v39 = vpack.c.bf16 %v1624_v51, %v1616_v0  ;;  %v1654_v24 = vpack.c.bf16 %v1622_v31, %v1614_v16  ;;  %v19901_v34 = vld [vmem:[#allocation9_spill] sm:$0xff]  ;;  %4962 = vmatprep.mubr.bf16.mxu0 %v11533_v18  ;;  %6021 = vmatprep.mubr.bf16.mxu1 %v11533_v18  ;;  %v19904_v6 = vld [vmem:[#allocation6_spill] sm:$0xff] }
  0xce   :  { %v1638_v41 = vpack.c.bf16 %v1590_v35, %v1582_v3  ;;  %v1892_v25 = vrot.slane %v12932_v23, %v19902_v32  ;;  %v19905_v35 = vld [vmem:[#allocation11_spill] sm:$0xff] }
  0xcf   :  { %1698 = vrot.lane.b32.xlu0 %v1632_v10, %s12093_s27  ;;  %v1642_v10 = vpack.c.bf16 %v1594_v37, %v1586_v36 }
  0xd0   :  { %1696 = vrot.lane.b32.xlu1 %v1631_v40, %s12093_s27  ;;  %v1647_v40 = vpack.c.bf16 %v1607_v46, %v1599_v11 }
  0xd3   :  { %1702 = vrot.lane.b32.xlu0 %v1634_v13, %s12093_s27  ;;  %v1617_v13 = vmul.f32 %v1553_v33, %v12411_v15  ;;  %v1626_v33 = vmul.f32 %v12834_v7, %v19885_v19  ;;  %v1896_v19 = vrot.slane %v12932_v23, %v19901_v34  ;;  %v9689_v7 = vld [vmem:[%s19719_s2 + $0x6] ss:$8 sm:$0xf0] }
  0xd4   :  { %1700 = vrot.lane.b32.xlu1 %v1633_v20, %s12093_s27  ;;  %v12953_v29 = vor.u32 %v9689_v7, %v9688_v49  ;;  %v19911_v7 = vld [vmem:[#allocation24_spill] sm:$0xff] }
  0xd5   :  { %v1657_v15 = vpack.c.bf16 %v1625_v9, %v1617_v13  ;;  %v1658_v30 = vpack.c.bf16 %v1626_v33, %v1618_v5 }
  0xd6   :  { %v2246_v57 = vrot.slane %v12953_v29, %v19902_v32  ;;  %v2254_v54 = vrot.slane %v12953_v29, %v19904_v6  ;;  %v2262_v48 = vrot.slane %v12953_v29, %v19905_v35 }
  0xd7   :  { %1712 = vrot.lane.b32.xlu0 %v1639_v27, %s12093_s27 }
  0xd8   :  { %1694 = vrot.lane.b32.xlu1 %v1630_v28, %s12093_s27  ;;  %v1904_v28 = vrot.slane %v12932_v23, %v19903_v43 }
  0xdb   :  { %1716 = vrot.lane.b32.xlu0 %v1641_v58, %s12093_s27  ;;  %v1900_v58 = vrot.slane %v12932_v23, %v19904_v6 }
  0xdc   :  { %1714 = vrot.lane.b32.xlu1 %v1640_v42, %s12093_s27  ;;  %v1908_v42 = vrot.slane %v12932_v23, %v19905_v35 }
  0xdf   :  { %1710 = vrot.lane.b32.xlu0 %v1638_v41, %s12093_s27 }
  0xe0   :  { %1718 = vrot.lane.b32.xlu1 %v1642_v10, %s12093_s27  ;;  %v2250_v10 = vrot.slane %v12953_v29, %v19901_v34 }
  0xe3   :  { %1730 = vrot.lane.b32.xlu0 %v1648_v47, %s12093_s27 }
  0xe4   :  { %1728 = vrot.lane.b32.xlu1 %v1647_v40, %s12093_s27  ;;  %v2258_v40 = vrot.slane %v12953_v29, %v19903_v43 }
  0xe7   :  { %1734 = vrot.lane.b32.xlu0 %v1650_v53, %s12093_s27 }
  0xe8   :  { %1732 = vrot.lane.b32.xlu1 %v1649_v45, %s12093_s27 }
  0xeb   :  { %1744 = vrot.lane.b32.xlu0 %v1655_v8, %s12093_s27 }
  0xec   :  { %1726 = vrot.lane.b32.xlu1 %v1646_v61, %s12093_s27 }
  0xef   :  { %1748 = vrot.lane.b32.xlu0 %v1657_v15, %s12093_s27 }
  0xf0   :  { %1746 = vrot.lane.b32.xlu1 %v1656_v39, %s12093_s27 }
  0xf1   :  { %v779_v20 = vpop.permute.xlu0 %778  ;;  %v763_v60 = vpop.permute.xlu1 %762 }
  0xf3   :  { %1742 = vrot.lane.b32.xlu0 %v1654_v24, %s12093_s27 }
  0xf4   :  { %1750 = vrot.lane.b32.xlu1 %v1658_v30, %s12093_s27  ;;  %v19909_v30 = vld [vmem:[#allocation25_spill] sm:$0xff] }
  0xf5   :  { %v811_v27 = vpop.permute.xlu0 %810  ;;  %v795_v44 = vpop.permute.xlu1 %794 }
  0xf7   :  { %1923 = vrot.lane.b32.xlu0 %v1896_v19, %s12093_s27  ;;  %v19910_v19 = vld [vmem:[#allocation20_spill] sm:$0xff] }
  0xf8   :  { %1921 = vrot.lane.b32.xlu1 %v1892_v25, %s12093_s27 }
  0xf9   :  { %v12958_v63 = vpop.permute.xlu0 %1355 }
  0xfa   :  { %v12960_v3 = vpop.permute.xlu1 %1339 }
  0xfb   :  { %1927 = vrot.lane.b32.xlu0 %v1904_v28, %s12093_s27  ;;  %v19913_v28 = vld [vmem:[#allocation17_spill] sm:$0xff] }
  0xfc   :  { %1925 = vrot.lane.b32.xlu1 %v1900_v58, %s12093_s27 }
  0xfd   :  { %v767_v36 = vpop.permute.xlu0 %766 }
  0xfe   :  { %v765_v37 = vpop.permute.xlu1 %764 }
  0xff   :  { %v827_v41 = vsel %vm826_vm4, %v763_v60, %v765_v37  ;;  %v828_v4 = vsel %vm826_vm4, %v765_v37, %v767_v36  ;;  %2275 = vrot.lane.b32.xlu0 %v2246_v57, %s12092_s26  ;;  %v19908_v60 = vld [vmem:[#allocation16_spill] sm:$0xff]  ;;  %v19914_v57 = vld [vmem:[#allocation27_spill] sm:$0xff] }
 0x100   :  { %1929 = vrot.lane.b32.xlu1 %v1908_v42, %s12093_s27  ;;  %4930 = vmatprep.subr.bf16.mxu0 %v828_v4 }
 0x101   :  { %v12976_v11 = vpop.permute.xlu0 %770  ;;  %4931 = vmatpush1.bf16.msra.mxu0 %v827_v41  ;;  %v19916_v41 = vld [vmem:[#allocation26_spill] sm:$0xff] }
 0x102   :  { %v769_v46 = vpop.permute.xlu1 %768 }
 0x103   :  { %v829_v47 = vsel %vm826_vm4, %v767_v36, %v769_v46  ;;  %v830_v26 = vsel %vm826_vm4, %v769_v46, %v12976_v11  ;;  %2279 = vrot.lane.b32.xlu0 %v2254_v54, %s12092_s26  ;;  %v19917_v54 = vld [vmem:[#allocation32_spill] sm:$0xff] }
 0x104   :  { %5989 = vmatprep.subr.bf16.mxu1 %v830_v26  ;;  %2277 = vrot.lane.b32.xlu1 %v2250_v10, %s12092_s26  ;;  %v19918_v10 = vld [vmem:[#allocation30_spill] sm:$0xff] }
 0x105   :  { %v781_v52 = vpop.permute.xlu0 %780  ;;  %5990 = vmatpush1.bf16.msra.mxu1 %v829_v47  ;;  %v19919_v47 = vld [vmem:[#allocation28_spill] sm:$0xff] }
 0x106   :  { %v834_v21 = vsel %vm826_vm4, %v779_v20, %v781_v52  ;;  %v783_v53 = vpop.permute.xlu1 %782 }
 0x107   :  { %v835_v55 = vsel %vm826_vm4, %v781_v52, %v783_v53  ;;  %2283 = vrot.lane.b32.xlu0 %v2262_v48, %s12092_s26  ;;  %v19921_v52 = vld [vmem:[#allocation34_spill] sm:$0xff] }
 0x108   :  { %4932 = vmatprep.subr.bf16.mxu0 %v835_v55  ;;  %2281 = vrot.lane.b32.xlu1 %v2258_v40, %s12092_s26 }
 0x109   :  { %v785_v22 = vpop.permute.xlu0 %784  ;;  %4933 = vmatpush1.bf16.msra.mxu0 %v834_v21 }
 0x10a   :  { %v836_v45 = vsel %vm826_vm4, %v783_v53, %v785_v22  ;;  %v12992_v56 = vpop.permute.xlu1 %786 }
 0x10b   :  { %v837_v59 = vsel %vm826_vm4, %v785_v22, %v12992_v56 }
 0x10c   :  { %5991 = vmatprep.subr.bf16.mxu1 %v837_v59 }
 0x10d   :  { %v799_v8 = vpop.permute.xlu0 %798  ;;  %5992 = vmatpush1.bf16.msra.mxu1 %v836_v45 }
 0x10e   :  { %v797_v13 = vpop.permute.xlu1 %796 }
 0x10f   :  { %v841_v9 = vsel %vm826_vm4, %v795_v44, %v797_v13  ;;  %v842_v61 = vsel %vm826_vm4, %v797_v13, %v799_v8 }
 0x110   :  { %4934 = vmatprep.subr.bf16.mxu0 %v842_v61 }
 0x111   :  { %v12998_v0 = vpop.permute.xlu0 %802  ;;  %4935 = vmatpush1.bf16.msra.mxu0 %v841_v9 }
 0x112   :  { %19906 = vst [vmem:[#allocation12_spill] sm:$0xff] %v12998_v0  ;;  %v801_v51 = vpop.permute.xlu1 %800 }
 0x113   :  { %v843_v1 = vsel %vm826_vm4, %v799_v8, %v801_v51  ;;  %v844_v2 = vsel %vm826_vm4, %v801_v51, %v12998_v0 }
 0x114   :  { %5993 = vmatprep.subr.bf16.mxu1 %v844_v2 }
 0x115   :  { %v813_v15 = vpop.permute.xlu0 %812  ;;  %5994 = vmatpush1.bf16.msra.mxu1 %v843_v1 }
 0x116   :  { %v848_v16 = vsel %vm826_vm4, %v811_v27, %v813_v15  ;;  %v815_v31 = vpop.permute.xlu1 %814 }
 0x117   :  { %v849_v39 = vsel %vm826_vm4, %v813_v15, %v815_v31 }
 0x118   :  { %4936 = vmatprep.subr.bf16.mxu0 %v849_v39 }
 0x119   :  { %v817_v5 = vpop.permute.xlu0 %816  ;;  %4937 = vmatpush1.bf16.msra.mxu0 %v848_v16 }
 0x11a   :  { %v850_v33 = vsel %vm826_vm4, %v815_v31, %v817_v5  ;;  %v13006_v20 = vpop.permute.xlu1 %818  ;;  %4938 = vmatprep.subr.bf16.mxu0 %v19908_v60 }
 0x11b   :  { %19907 = vst [vmem:[#allocation13_spill] sm:$0xff] %v13006_v20  ;;  %v851_v24 = vsel %vm826_vm4, %v817_v5, %v13006_v20 }
 0x11c   :  { %5995 = vmatprep.subr.bf16.mxu1 %v851_v24 }
 0x11d   :  { %v1344_v18 = vpop.permute.xlu0 %1343  ;;  %4939 = vmatpush1.bf16.msra.mxu0 %v19909_v30  ;;  %5996 = vmatpush1.bf16.msra.mxu1 %v850_v33 }
 0x11e   :  { %v1342_v49 = vpop.permute.xlu1 %1341  ;;  %4940 = vmatprep.subr.bf16.mxu0 %v19910_v19  ;;  %5997 = vmatprep.subr.bf16.mxu1 %v19911_v7 }
 0x11f   :  { %v1404_v25 = vsel %vm1403_vm5, %v12960_v3, %v1342_v49  ;;  %v1405_v27 = vsel %vm1403_vm5, %v1342_v49, %v1344_v18  ;;  %v19915_v3 = vld [vmem:[#allocation31_spill] sm:$0xff] }
 0x121   :  { %v13017_v44 = vpop.permute.xlu0 %1347  ;;  %4941 = vmatpush1.bf16.msra.mxu0 %v12714_v12  ;;  %5998 = vmatpush1.bf16.msra.mxu1 %v19913_v28 }
 0x122   :  { %19912 = vst [vmem:[#allocation14_spill] sm:$0xff] %v13017_v44  ;;  %v1346_v58 = vpop.permute.xlu1 %1345  ;;  %4942 = vmatprep.subr.bf16.mxu0 %v12727_v38  ;;  %5999 = vmatprep.subr.bf16.mxu1 %v19914_v57 }
 0x123   :  { %v1406_v42 = vsel %vm1403_vm5, %v1344_v18, %v1346_v58  ;;  %v1407_v36 = vsel %vm1403_vm5, %v1346_v58, %v13017_v44  ;;  %v3451_v44 = vld [vmem:[#allocation2 + $0x4d8] sm:$0xff] }
 0x125   :  { %v1358_v37 = vpop.permute.xlu0 %1357  ;;  %4943 = vmatpush1.bf16.msra.mxu0 %v19915_v3  ;;  %6000 = vmatpush1.bf16.msra.mxu1 %v19916_v41 }
 0x126   :  { %v1411_v12 = vsel %vm1403_vm5, %v12958_v63, %v1358_v37  ;;  %v1360_v4 = vpop.permute.xlu1 %1359  ;;  %4944 = vmatprep.subr.bf16.mxu0 %v19917_v54  ;;  %6001 = vmatprep.subr.bf16.mxu1 %v19918_v10 }
 0x127   :  { %v1412_v38 = vsel %vm1403_vm5, %v1358_v37, %v1360_v4 }
 0x129   :  { %v1362_v46 = vpop.permute.xlu0 %1361  ;;  %4945 = vmatpush1.bf16.msra.mxu0 %v12794_v14  ;;  %6002 = vmatpush1.bf16.msra.mxu1 %v19919_v47 }
 0x12a   :  { %v1413_v26 = vsel %vm1403_vm5, %v1360_v4, %v1362_v46  ;;  %v13036_v48 = vpop.permute.xlu1 %1363  ;;  %4946 = vmatprep.subr.bf16.mxu0 %v1405_v27  ;;  %6003 = vmatprep.subr.bf16.mxu1 %v12781_v50 }
 0x12b   :  { %19920 = vst [vmem:[#allocation15_spill] sm:$0xff] %v13036_v48  ;;  %v1414_v63 = vsel %vm1403_vm5, %v1362_v46, %v13036_v48  ;;  %v11547_v48 = vld [vmem:[%s19721_s3 + $0xa0] ss:$20 sps:$4 sm:$0xff]  }
 0x12d   :  { %v1376_v40 = vpop.permute.xlu0 %1375  ;;  %4947 = vmatpush1.bf16.msra.mxu0 %v1404_v25  ;;  %6004 = vmatpush1.bf16.msra.mxu1 %v19921_v52 }
 0x12e   :  { %v1374_v21 = vpop.permute.xlu1 %1373  ;;  %4948 = vmatprep.subr.bf16.mxu0 %v1412_v38  ;;  %6005 = vmatprep.subr.bf16.mxu1 %v1407_v36 }
 0x12f   :  { %v1419_v14 = vsel %vm1403_vm5, %v1374_v21, %v1376_v40 }
 0x131   :  { %v13043_v53 = vpop.permute.xlu0 %1379  ;;  %4949 = vmatpush1.bf16.msra.mxu0 %v1411_v12  ;;  %6006 = vmatpush1.bf16.msra.mxu1 %v1406_v42 }
 0x132   :  { %19922 = vst [vmem:[#allocation16_spill] sm:$0xff] %v13043_v53  ;;  %v1378_v55 = vpop.permute.xlu1 %1377  ;;  %4950 = vmatprep.subr.bf16.mxu0 %v1419_v14  ;;  %6007 = vmatprep.subr.bf16.mxu1 %v1414_v63  ;;  %v3425_v14 = vld [vmem:[#allocation2 + $0x408] sm:$0xff] }
 0x133   :  { %v1420_v50 = vsel %vm1403_vm5, %v1376_v40, %v1378_v55  ;;  %v1421_v22 = vsel %vm1403_vm5, %v1378_v55, %v13043_v53  ;;  %v3442_v53 = vld [vmem:[#allocation2 + $0x490] sm:$0xff] }
 0x135   :  { %v1390_v45 = vpop.permute.xlu0 %1389  ;;  %6008 = vmatpush1.bf16.msra.mxu1 %v1413_v26 }
 0x136   :  { %v1372_v59 = vpop.permute.xlu1 %1371  ;;  %6009 = vmatprep.subr.bf16.mxu1 %v1421_v22  ;;  %v11535_v22 = vld [vmem:[%s19721_s3] ss:$20 sps:$4 sm:$0xff]  }
 0x137   :  { %v1418_v8 = vsel %vm1403_vm5, %v1372_v59, %v1374_v21  ;;  %v11536_v59 = vld [vmem:[%s19721_s3 + $0x2c] ss:$20 sps:$4 sm:$0xff]  }
 0x138   :  { %4951 = vmatpush1.bf16.msra.mxu0 %v1418_v8  ;;  %v3427_v8 = vld [vmem:[#allocation2 + $0x418] sm:$0xff] }
 0x139   :  { %v1394_v13 = vpop.permute.xlu0 %1393  ;;  %6010 = vmatpush1.bf16.msra.mxu1 %v1420_v50 }
 0x13a   :  { %v1392_v9 = vpop.permute.xlu1 %1391 }
 0x13b   :  { %v1426_v61 = vsel %vm1403_vm5, %v1390_v45, %v1392_v9  ;;  %v1427_v51 = vsel %vm1403_vm5, %v1392_v9, %v1394_v13 }
 0x13c   :  { %4952 = vmatprep.subr.bf16.mxu0 %v1426_v61 }
 0x13d   :  { %v1388_v1 = vpop.permute.xlu0 %1387 }
 0x13e   :  { %v1425_v2 = vsel %vm1403_vm5, %v1388_v1, %v1390_v45  ;;  %v13052_v15 = vpop.permute.xlu1 %1395  ;;  %v3426_v1 = vld [vmem:[#allocation2 + $0x410] sm:$0xff] }
 0x13f   :  { %19923 = vst [vmem:[#allocation25_spill] sm:$0xff] %v13052_v15  ;;  %v1428_v16 = vsel %vm1403_vm5, %v1394_v13, %v13052_v15  ;;  %4953 = vmatpush1.bf16.msra.mxu0 %v1425_v2  ;;  %v3424_v13 = vld [vmem:[#allocation2 + $0x400] sm:$0xff]  ;;  %v3433_v2 = vld [vmem:[#allocation2 + $0x448] sm:$0xff] }
 0x140   :  { %6011 = vmatprep.subr.bf16.mxu1 %v1428_v16  ;;  %v13096_v16 = vld [vmem:[%s19720_s0] sm:$0xff]  ;;  %v13340_v15 = vld [vmem:[%s19720_s0 + $0x1c8] sm:$0xff] }
 0x141   :  { %v1699_v31 = vpop.permute.xlu0 %1698  ;;  %6012 = vmatpush1.bf16.msra.mxu1 %v1427_v51 }
 0x142   :  { %v1697_v39 = vpop.permute.xlu1 %1696 }
 0x143   :  { %v1760_v5 = vsel %vm1758_vm6, %v1697_v39, %v1699_v31 }
 0x144   :  { %4954 = vmatprep.subr.bf16.mxu0 %v1760_v5 }
 0x145   :  { %v13057_v33 = vpop.permute.xlu0 %1702 }
 0x146   :  { %19924 = vst [vmem:[#allocation20_spill] sm:$0xff] %v13057_v33  ;;  %v1701_v60 = vpop.permute.xlu1 %1700 }
 0x147   :  { %v1761_v24 = vsel %vm1758_vm6, %v1699_v31, %v1701_v60  ;;  %v1762_v18 = vsel %vm1758_vm6, %v1701_v60, %v13057_v33  ;;  %v3435_v60 = vld [vmem:[#allocation2 + $0x458] sm:$0xff] }
 0x148   :  { %6013 = vmatprep.subr.bf16.mxu1 %v1762_v18 }
 0x149   :  { %v1713_v30 = vpop.permute.xlu0 %1712  ;;  %6014 = vmatpush1.bf16.msra.mxu1 %v1761_v24 }
 0x14a   :  { %v1695_v49 = vpop.permute.xlu1 %1694 }
 0x14b   :  { %v1759_v19 = vsel %vm1758_vm6, %v1695_v49, %v1697_v39  ;;  %v13103_v39 = vld [vmem:[%s19720_s0 + $0x40] sm:$0xff] }
 0x14c   :  { %4955 = vmatpush1.bf16.msra.mxu0 %v1759_v19  ;;  %v13110_v49 = vld [vmem:[%s19720_s0 + $0x80] sm:$0xff] }
 0x14d   :  { %v1717_v7 = vpop.permute.xlu0 %1716 }
 0x14e   :  { %v1715_v25 = vpop.permute.xlu1 %1714 }
 0x14f   :  { %v1767_v27 = vsel %vm1758_vm6, %v1713_v30, %v1715_v25  ;;  %v1768_v28 = vsel %vm1758_vm6, %v1715_v25, %v1717_v7 }
 0x150   :  { %4956 = vmatprep.subr.bf16.mxu0 %v1767_v27  ;;  %v11538_v27 = vld [vmem:[%s19721_s3 + $0x28] ss:$20 sps:$4 sm:$0xff]  }
 0x151   :  { %v1711_v58 = vpop.permute.xlu0 %1710 }
 0x152   :  { %v1766_v57 = vsel %vm1758_vm6, %v1711_v58, %v1713_v30  ;;  %v13066_v42 = vpop.permute.xlu1 %1718 }
 0x153   :  { %19925 = vst [vmem:[#allocation24_spill] sm:$0xff] %v13066_v42  ;;  %v1769_v36 = vsel %vm1758_vm6, %v1717_v7, %v13066_v42  ;;  %4957 = vmatpush1.bf16.msra.mxu0 %v1766_v57  ;;  %v13117_v7 = vld [vmem:[%s19720_s0 + $0xc0] sm:$0xff] }
 0x154   :  { %6015 = vmatprep.subr.bf16.mxu1 %v1769_v36  ;;  %v11539_v36 = vld [vmem:[%s19721_s3 + $0x54] ss:$20 sps:$4 sm:$0xff]  }
 0x155   :  { %v1731_v37 = vpop.permute.xlu0 %1730  ;;  %6016 = vmatpush1.bf16.msra.mxu1 %v1768_v28  ;;  %v3432_v28 = vld [vmem:[#allocation2 + $0x440] sm:$0xff] }
 0x156   :  { %v1729_v3 = vpop.permute.xlu1 %1728 }
 0x157   :  { %v1774_v41 = vsel %vm1758_vm6, %v1729_v3, %v1731_v37 }
 0x158   :  { %4958 = vmatprep.subr.bf16.mxu0 %v1774_v41  ;;  %v13144_v41 = vld [vmem:[%s19720_s0 + $0x50] sm:$0xff] }
 0x159   :  { %v13071_v12 = vpop.permute.xlu0 %1734 }
 0x15a   :  { %19926 = vst [vmem:[#allocation17_spill] sm:$0xff] %v13071_v12  ;;  %v1733_v4 = vpop.permute.xlu1 %1732 }
 0x15b   :  { %v1775_v54 = vsel %vm1758_vm6, %v1731_v37, %v1733_v4  ;;  %v1776_v10 = vsel %vm1758_vm6, %v1733_v4, %v13071_v12  ;;  %v13137_v37 = vld [vmem:[%s19720_s0 + $0x10] sm:$0xff] }
 0x15c   :  { %6017 = vmatprep.subr.bf16.mxu1 %v1776_v10  ;;  %v13324_v12 = vld [vmem:[%s19720_s0 + $0x1d0] sm:$0xff] }
 0x15d   :  { %v1745_v38 = vpop.permute.xlu0 %1744  ;;  %6018 = vmatpush1.bf16.msra.mxu1 %v1775_v54  ;;  %v13151_v54 = vld [vmem:[%s19720_s0 + $0x8] sm:$0xff] }
 0x15e   :  { %v1727_v46 = vpop.permute.xlu1 %1726 }
 0x15f   :  { %v1773_v47 = vsel %vm1758_vm6, %v1727_v46, %v1729_v3 }
 0x160   :  { %4959 = vmatpush1.bf16.msra.mxu0 %v1773_v47 }
 0x161   :  { %v1749_v26 = vpop.permute.xlu0 %1748 }
 0x162   :  { %v1747_v63 = vpop.permute.xlu1 %1746 }
 0x163   :  { %v1781_v40 = vsel %vm1758_vm6, %v1745_v38, %v1747_v63  ;;  %v1782_v52 = vsel %vm1758_vm6, %v1747_v63, %v1749_v26 }
 0x164   :  { %4960 = vmatprep.subr.bf16.mxu0 %v1781_v40 }
 0x165   :  { %v1743_v21 = vpop.permute.xlu0 %1742 }
 0x166   :  { %v1780_v55 = vsel %vm1758_vm6, %v1743_v21, %v1745_v38  ;;  %v13080_v50 = vpop.permute.xlu1 %1750  ;;  %v13158_v38 = vld [vmem:[%s19720_s0 + $0x48] sm:$0xff]  ;;  %v13171_v21 = vld [vmem:[%s19720_s0 + $0x90] sm:$0xff] }
 0x167   :  { %19927 = vst [vmem:[#allocation27_spill] sm:$0xff] %v13080_v50  ;;  %v1783_v45 = vsel %vm1758_vm6, %v1749_v26, %v13080_v50  ;;  %4961 = vmatpush1.bf16.msra.mxu0 %v1780_v55  ;;  %v13178_v55 = vld [vmem:[%s19720_s0 + $0xd0] sm:$0xff] }
 0x168   :  { %6019 = vmatprep.subr.bf16.mxu1 %v1783_v45  ;;  %5283 = vmatprep.subr.bf16.mxu0 %v3425_v14  ;;  %v13185_v45 = vld [vmem:[%s19720_s0 + $0x88] sm:$0xff] }
 0x169   :  { %v1924_v9 = vpop.permute.xlu0 %1923  ;;  %6020 = vmatpush1.bf16.msra.mxu1 %v1782_v52 }
 0x16a   :  { %v1922_v61 = vpop.permute.xlu1 %1921  ;;  %4963 = vmatmul.mubr.bf16.vlgmr.msra.gmra.mrb[0].mxu0 %v11535_v22  ;;  %6342 = vmatprep.subr.bf16.mxu1 %v3427_v8  ;;  %v13194_v8 = vld [vmem:[%s19720_s0 + $0x18] sm:$0xff] }
 0x16b   :  { %v13091_v51 = vsel %vm1758_vm6, %v1922_v61, %v1924_v9  ;;  %4972 = vmatprep.mubr.bf16.mxu0 %v11536_v59  ;;  %5284 = vmatpush1.bf16.msra.mxu0 %v3424_v13 }
 0x16c   :  { %v1952_v31 = vmul.f32 %v13096_v16, %v13091_v51  ;;  %v1960_v5 = vmul.f32 %v13103_v39, %v13091_v51  ;;  %6022 = vmatmul.mubr.bf16.vlgmr.msra.gmra.mrb[0].mxu1 %v11535_v22  ;;  %v1968_v19 = vmul.f32 %v13110_v49, %v13091_v51  ;;  %v1976_v25 = vmul.f32 %v13117_v7, %v13091_v51 }
 0x16d   :  { %v1928_v24 = vpop.permute.xlu0 %1927  ;;  %6031 = vmatprep.mubr.bf16.mxu1 %v11536_v59  ;;  %6343 = vmatpush1.bf16.msra.mxu1 %v3426_v1  ;;  %v13208_v1 = vld [vmem:[%s19720_s0 + $0xc8] sm:$0xff] }
 0x16e   :  { %v1926_v18 = vpop.permute.xlu1 %1925  ;;  %v2016_v30 = vpack.c.bf16 %v1960_v5, %v1952_v31  ;;  %5285 = vmatprep.subr.bf16.mxu0 %v3433_v2  ;;  %6344 = vmatprep.subr.bf16.mxu1 %v3435_v60  ;;  %v2024_v40 = vpack.c.bf16 %v1976_v25, %v1968_v19  ;;  %v3434_v31 = vld [vmem:[#allocation2 + $0x450] sm:$0xff]  ;;  %v13225_v25 = vld [vmem:[%s19720_s0 + $0x140] sm:$0xff] }
 0x16f   :  { %v13125_v58 = vsel %vm1758_vm6, %v1924_v9, %v1926_v18  ;;  %v13128_v57 = vsel %vm1758_vm6, %v1926_v18, %v1928_v24  ;;  %5286 = vmatpush1.bf16.msra.mxu0 %v3432_v28  ;;  %v13201_v9 = vld [vmem:[%s19720_s0 + $0x58] sm:$0xff]  ;;  %v11541_v60 = vld [vmem:[%s19721_s3 + $0x50] ss:$20 sps:$4 sm:$0xff]  }
 0x170   :  { %2080 = vrot.lane.b32.xlu1 %v2016_v30, %s12089_s23  ;;  %v1954_v3 = vmul.f32 %v13137_v37, %v13128_v57  ;;  %v1962_v4 = vmul.f32 %v13144_v41, %v13128_v57  ;;  %v1953_v10 = vmul.f32 %v13151_v54, %v13125_v58  ;;  %v1961_v46 = vmul.f32 %v13158_v38, %v13125_v58  ;;  %v13218_v30 = vld [vmem:[%s19720_s0 + $0x100] sm:$0xff]  ;;  %v11542_v28 = vld [vmem:[%s19721_s3 + $0x7c] ss:$20 sps:$4 sm:$0xff]  }
 0x171   :  { %v1970_v14 = vmul.f32 %v13171_v21, %v13128_v57  ;;  %v1978_v22 = vmul.f32 %v13178_v55, %v13128_v57  ;;  %v1969_v59 = vmul.f32 %v13185_v45, %v13125_v58  ;;  %v1977_v2 = vmul.f32 %v13208_v1, %v13125_v58  ;;  %6345 = vmatpush1.bf16.msra.mxu1 %v3434_v31 }
 0x172   :  { %v13162_v47 = vpop.permute.xlu1 %1929  ;;  %v2018_v26 = vpack.c.bf16 %v1962_v4, %v1954_v3  ;;  %v2017_v63 = vpack.c.bf16 %v1961_v46, %v1953_v10  ;;  %4973 = vmatmul.mubr.bf16.gmra.mrb[4].mxu0 %v11538_v27  ;;  %v1984_v19 = vmul.f32 %v13218_v30, %v13091_v51  ;;  %v13237_v3 = vld [vmem:[%s19720_s0 + $0x98] sm:$0xff]  ;;  %v2010_v42 = vmul.f32 %v13324_v12, %v13128_v57 }
 0x173   :  { %19928 = vst [vmem:[#allocation31_spill] sm:$0xff] %v13162_v47  ;;  %v13166_v52 = vsel %vm1758_vm6, %v1928_v24, %v13162_v47  ;;  %4982 = vmatprep.mubr.bf16.mxu0 %v11539_v36  ;;  %v3441_v24 = vld [vmem:[#allocation2 + $0x488] sm:$0xff]  ;;  %v2026_v18 = vpack.c.bf16 %v1978_v22, %v1970_v14  ;;  %v13244_v10 = vld [vmem:[%s19720_s0 + $0xd8] sm:$0xff]  ;;  %v13258_v14 = vld [vmem:[%s19720_s0 + $0x150] sm:$0xff] }
 0x174   :  { %2084 = vrot.lane.b32.xlu1 %v2018_v26, %s12089_s23  ;;  %2082 = vrot.lane.b32.xlu0 %v2017_v63, %s12089_s23  ;;  %v1955_v13 = vmul.f32 %v13194_v8, %v13166_v52  ;;  %v1963_v61 = vmul.f32 %v13201_v9, %v13166_v52  ;;  %v1971_v4 = vmul.f32 %v13237_v3, %v13166_v52  ;;  %v13251_v63 = vld [vmem:[%s19720_s0 + $0x110] sm:$0xff] }
 0x175   :  { %6032 = vmatmul.mubr.bf16.gmra.mrb[4].mxu1 %v11538_v27  ;;  %v1992_v27 = vmul.f32 %v13225_v25, %v13091_v51  ;;  %v1979_v46 = vmul.f32 %v13244_v10, %v13166_v52  ;;  %5287 = vmatprep.subr.bf16.mxu0 %v3441_v24  ;;  %v1994_v22 = vmul.f32 %v13258_v14, %v13128_v57  ;;  %v3440_v24 = vld [vmem:[#allocation2 + $0x480] sm:$0xff] }
 0x176   :  { %v2019_v5 = vpack.c.bf16 %v1963_v61, %v1955_v13  ;;  %6041 = vmatprep.mubr.bf16.mxu1 %v11539_v36  ;;  %v2025_v36 = vpack.c.bf16 %v1977_v2, %v1969_v59  ;;  %v13267_v13 = vld [vmem:[%s19720_s0 + $0x108] sm:$0xff]  ;;  %5288 = vmatpush1.bf16.msra.mxu0 %v3440_v24 }
 0x177   :  { %v2032_v26 = vpack.c.bf16 %v1992_v27, %v1984_v19  ;;  %v2027_v59 = vpack.c.bf16 %v1979_v46, %v1971_v4  ;;  %v1985_v61 = vmul.f32 %v13267_v13, %v13125_v58  ;;  %v13274_v2 = vld [vmem:[%s19720_s0 + $0x148] sm:$0xff]  ;;  %v13291_v46 = vld [vmem:[%s19720_s0 + $0x1c0] sm:$0xff] }
 0x178   :  { %2096 = vrot.lane.b32.xlu1 %v2024_v40, %s12089_s23  ;;  %2086 = vrot.lane.b32.xlu0 %v2019_v5, %s12089_s23  ;;  %v1986_v40 = vmul.f32 %v13251_v63, %v13128_v57  ;;  %v1993_v31 = vmul.f32 %v13274_v2, %v13125_v58  ;;  %v2276_v5 = vpop.permute.xlu0 %2275  ;;  %v3449_v19 = vld [vmem:[#allocation2 + $0x4c8] sm:$0xff] }
 0x179   :  { %5289 = vmatprep.subr.bf16.mxu0 %v3449_v19  ;;  %v3443_v19 = vld [vmem:[#allocation2 + $0x498] sm:$0xff] }
 0x17a   :  { %4983 = vmatmul.mubr.bf16.gmra.mrb[8].mxu0 %v11541_v60  ;;  %v2034_v27 = vpack.c.bf16 %v1994_v22, %v1986_v40  ;;  %v2033_v40 = vpack.c.bf16 %v1993_v31, %v1985_v61  ;;  %v13303_v22 = vld [vmem:[%s19720_s0 + $0x118] sm:$0xff]  ;;  %v13317_v31 = vld [vmem:[%s19720_s0 + $0x190] sm:$0xff]  ;;  %6346 = vmatprep.subr.bf16.mxu1 %v3443_v19 }
 0x17b   :  { %4992 = vmatprep.mubr.bf16.mxu0 %v11542_v28  ;;  %v1987_v47 = vmul.f32 %v13303_v22, %v13166_v52  ;;  %v2002_v50 = vmul.f32 %v13317_v31, %v13128_v57  ;;  %v2009_v57 = vmul.f32 %v13340_v15, %v13125_v58  ;;  %6347 = vmatpush1.bf16.msra.mxu1 %v3442_v53 }
 0x17c   :  { %2100 = vrot.lane.b32.xlu1 %v2026_v18, %s12089_s23  ;;  %2098 = vrot.lane.b32.xlu0 %v2025_v36, %s12089_s23  ;;  %v11544_v18 = vld [vmem:[%s19721_s3 + $0x78] ss:$20 sps:$4 sm:$0xff]   ;;  %v13284_v36 = vld [vmem:[%s19720_s0 + $0x180] sm:$0xff] }
 0x17d   :  { %6042 = vmatmul.mubr.bf16.gmra.mrb[8].mxu1 %v11541_v60  ;;  %v2000_v4 = vmul.f32 %v13284_v36, %v13091_v51  ;;  %v2008_v60 = vmul.f32 %v13291_v46, %v13091_v51  ;;  %v13310_v51 = vld [vmem:[%s19720_s0 + $0x158] sm:$0xff]  ;;  %v2042_v17 = vpack.c.bf16 %v2010_v42, %v2002_v50  ;;  %v11548_v42 = vld [vmem:[%s19721_s3 + $0xcc] ss:$20 sps:$4 sm:$0xff]   ;;  %6348 = vmatprep.subr.bf16.mxu1 %v3451_v44 }
 0x17e   :  { %6051 = vmatprep.mubr.bf16.mxu1 %v11542_v28  ;;  %v11545_v28 = vld [vmem:[%s19721_s3 + $0xa4] ss:$20 sps:$4 sm:$0xff]   ;;  %v1995_v24 = vmul.f32 %v13310_v51, %v13166_v52 }
 0x17f   :  { %v2040_v61 = vpack.c.bf16 %v2008_v60, %v2000_v4  ;;  %v13333_v60 = vld [vmem:[%s19720_s0 + $0x188] sm:$0xff] }
 0x180   :  { %2112 = vrot.lane.b32.xlu1 %v2032_v26, %s12089_s23  ;;  %2102 = vrot.lane.b32.xlu0 %v2027_v59, %s12089_s23  ;;  %v2278_v26 = vpop.permute.xlu1 %2277  ;;  %v2280_v59 = vpop.permute.xlu0 %2279  ;;  %v2035_v4 = vpack.c.bf16 %v1995_v24, %v1987_v47  ;;  %v2001_v33 = vmul.f32 %v13333_v60, %v13125_v58  ;;  %v13356_v58 = vld [vmem:[%s19720_s0 + $0x198] sm:$0xff] }
 0x181   :  { %v13345_v47 = vsel %vm1403_vm5, %v2276_v5, %v2278_v26  ;;  %v2003_v5 = vmul.f32 %v13356_v58, %v13166_v52 }
 0x182   :  { %4993 = vmatmul.mubr.bf16.gmra.mrb[12].mxu0 %v11544_v18  ;;  %v2041_v50 = vpack.c.bf16 %v2009_v57, %v2001_v33  ;;  %v2306_v19 = vmul.f32 %v13096_v16, %v13345_v47  ;;  %v2314_v20 = vmul.f32 %v13103_v39, %v13345_v47 }
 0x183   :  { %5002 = vmatprep.mubr.bf16.mxu0 %v11545_v28 }
 0x184   :  { %2116 = vrot.lane.b32.xlu1 %v2034_v27, %s12089_s23  ;;  %2114 = vrot.lane.b32.xlu0 %v2033_v40, %s12089_s23  ;;  %v3448_v27 = vld [vmem:[#allocation2 + $0x4c0] sm:$0xff]  ;;  %v13348_v40 = vsel %vm1403_vm5, %v2278_v26, %v2280_v59  ;;  %v2282_v24 = vpop.permute.xlu1 %2281  ;;  %v2370_v39 = vpack.c.bf16 %v2314_v20, %v2306_v19  ;;  %v11551_v20 = vld [vmem:[%s19721_s3 + $0xf4] ss:$20 sps:$4 sm:$0xff]  }
 0x185   :  { %6052 = vmatmul.mubr.bf16.gmra.mrb[12].mxu1 %v11544_v18  ;;  %v13363_v18 = vld [vmem:[%s19720_s0 + $0x1d8] sm:$0xff]  ;;  %5290 = vmatpush1.bf16.msra.mxu0 %v3448_v27  ;;  %v13379_v0 = vsel %vm1403_vm5, %v2280_v59, %v2282_v24  ;;  %v2307_v53 = vmul.f32 %v13151_v54, %v13348_v40  ;;  %v2315_v16 = vmul.f32 %v13158_v38, %v13348_v40 }
 0x186   :  { %6061 = vmatprep.mubr.bf16.mxu1 %v11545_v28  ;;  %v2011_v26 = vmul.f32 %v13363_v18, %v13166_v52  ;;  %v13372_v28 = vpop.permute.xlu0 %2283  ;;  %v3450_v52 = vld [vmem:[#allocation2 + $0x4d0] sm:$0xff]  ;;  %v2308_v44 = vmul.f32 %v13137_v37, %v13379_v0  ;;  %v2316_v54 = vmul.f32 %v13144_v41, %v13379_v0  ;;  %v11550_v59 = vld [vmem:[%s19721_s3 + $0xc8] ss:$20 sps:$4 sm:$0xff]   ;;  %v2330_v41 = vmul.f32 %v13117_v7, %v13345_v47 }
 0x187   :  { %19929 = vst [vmem:[#allocation26_spill] sm:$0xff] %v13372_v28  ;;  %v13385_v33 = vsel %vm1403_vm5, %v2282_v24, %v13372_v28  ;;  %6349 = vmatpush1.bf16.msra.mxu1 %v3450_v52  ;;  %v2371_v38 = vpack.c.bf16 %v2315_v16, %v2307_v53  ;;  %v2324_v57 = vmul.f32 %v13171_v21, %v13379_v0 }
 0x188   :  { %2128 = vrot.lane.b32.xlu1 %v2040_v61, %s12089_s23  ;;  %2118 = vrot.lane.b32.xlu0 %v2035_v4, %s12089_s23  ;;  %v2043_v61 = vpack.c.bf16 %v2011_v26, %v2003_v5  ;;  %v2309_v4 = vmul.f32 %v13194_v8, %v13385_v33  ;;  %v2317_v37 = vmul.f32 %v13201_v9, %v13385_v33  ;;  %v11554_v5 = vld [vmem:[%s19721_s3 + $0x11c] ss:$20 sps:$4 sm:$0xff]  }
 0x189   :  { %v2323_v8 = vmul.f32 %v13185_v45, %v13348_v40  ;;  %v2332_v7 = vmul.f32 %v13178_v55, %v13379_v0  ;;  %v11553_v45 = vld [vmem:[%s19721_s3 + $0xf0] ss:$20 sps:$4 sm:$0xff]   ;;  %v2325_v21 = vmul.f32 %v13237_v3, %v13385_v33  ;;  %v2333_v24 = vmul.f32 %v13244_v10, %v13385_v33 }
 0x18a   :  { %5003 = vmatmul.mubr.bf16.gmra.mrb[16].mxu0 %v11547_v48  ;;  %v2373_v27 = vpack.c.bf16 %v2317_v37, %v2309_v4  ;;  %v2338_v26 = vmul.f32 %v13218_v30, %v13345_v47  ;;  %v2339_v10 = vmul.f32 %v13267_v13, %v13348_v40  ;;  %v2340_v30 = vmul.f32 %v13251_v63, %v13379_v0  ;;  %v11556_v13 = vld [vmem:[%s19721_s3 + $0x118] ss:$20 sps:$4 sm:$0xff]   ;;  %v11566_v4 = vld [vmem:[%s19721_s3 + $0x1bc] ss:$20 sps:$4 sm:$0xff]  }
 0x18b   :  { %5012 = vmatprep.mubr.bf16.mxu0 %v11548_v42  ;;  %v2380_v55 = vpack.c.bf16 %v2332_v7, %v2324_v57  ;;  %v2381_v3 = vpack.c.bf16 %v2333_v24, %v2325_v21  ;;  %v2349_v53 = vmul.f32 %v13310_v51, %v13385_v33  ;;  %v11557_v63 = vld [vmem:[%s19721_s3 + $0x144] ss:$20 sps:$4 sm:$0xff]   ;;  %v2362_v16 = vmul.f32 %v13291_v46, %v13345_v47  ;;  %v11785_v37 = vld [vmem:[#allocation2 + $0x450] sm:$0xff]  ;;  %v11572_v21 = vld [vmem:[%s19721_s3 + $0x20c] ss:$20 sps:$4 sm:$0xff]  }
 0x18c   :  { %2132 = vrot.lane.b32.xlu1 %v2042_v17, %s12089_s23  ;;  %2130 = vrot.lane.b32.xlu0 %v2041_v50, %s12089_s23  ;;  %v2322_v17 = vmul.f32 %v13110_v49, %v13345_v47  ;;  %v2331_v49 = vmul.f32 %v13208_v1, %v13348_v40  ;;  %v2347_v50 = vmul.f32 %v13274_v2, %v13348_v40  ;;  %v11787_v57 = vld [vmem:[#allocation2 + $0x480] sm:$0xff]  ;;  %v11790_v24 = vld [vmem:[#allocation2 + $0x498] sm:$0xff] }
 0x18d   :  { %6062 = vmatmul.mubr.bf16.gmra.mrb[16].mxu1 %v11547_v48  ;;  %v2372_v48 = vpack.c.bf16 %v2316_v54, %v2308_v44  ;;  %v2341_v2 = vmul.f32 %v13303_v22, %v13385_v33  ;;  %v2355_v51 = vmul.f32 %v13333_v60, %v13348_v40  ;;  %v2364_v46 = vmul.f32 %v13324_v12, %v13379_v0  ;;  %v11559_v60 = vld [vmem:[%s19721_s3 + $0x140] ss:$20 sps:$4 sm:$0xff]  }
 0x18e   :  { %6071 = vmatprep.mubr.bf16.mxu1 %v11548_v42  ;;  %v2378_v9 = vpack.c.bf16 %v2330_v41, %v2322_v17  ;;  %v2379_v1 = vpack.c.bf16 %v2331_v49, %v2323_v8  ;;  %v2346_v42 = vmul.f32 %v13225_v25, %v13345_v47  ;;  %v2348_v25 = vmul.f32 %v13258_v14, %v13379_v0  ;;  %v11563_v54 = vld [vmem:[%s19721_s3 + $0x194] ss:$20 sps:$4 sm:$0xff]   ;;  %v11782_v17 = vld [vmem:[#allocation2 + $0x418] sm:$0xff] }
 0x18f   :  { %v2387_v52 = vpack.c.bf16 %v2347_v50, %v2339_v10  ;;  %v2389_v22 = vpack.c.bf16 %v2349_v53, %v2341_v2  ;;  %v11568_v41 = vld [vmem:[%s19721_s3 + $0x1b8] ss:$20 sps:$4 sm:$0xff]   ;;  %v11574_v10 = vld [vmem:[%s19721_s3 + $0x208] ss:$20 sps:$4 sm:$0xff]  }
 0x190   :  { %2134 = vrot.lane.b32.xlu0 %v2043_v61, %s12089_s23  ;;  %2434 = vrot.lane.b32.xlu1 %v2370_v39, %s12088_s29  ;;  %v2386_v19 = vpack.c.bf16 %v2346_v42, %v2338_v26  ;;  %v2388_v14 = vpack.c.bf16 %v2348_v25, %v2340_v30  ;;  %v2354_v61 = vmul.f32 %v13284_v36, %v13345_v47  ;;  %v11560_v47 = vld [vmem:[%s19721_s3 + $0x16c] ss:$20 sps:$4 sm:$0xff]   ;;  %v11569_v8 = vld [vmem:[%s19721_s3 + $0x1e4] ss:$20 sps:$4 sm:$0xff]   ;;  %v11793_v42 = vld [vmem:[#allocation2 + $0x4d0] sm:$0xff] }
 0x191   :  { %v2363_v39 = vmul.f32 %v13340_v15, %v13348_v40  ;;  %v2356_v36 = vmul.f32 %v13317_v31, %v13379_v0  ;;  %v2357_v15 = vmul.f32 %v13356_v58, %v13385_v33  ;;  %v2365_v0 = vmul.f32 %v13363_v18, %v13385_v33  ;;  %v11562_v58 = vld [vmem:[%s19721_s3 + $0x168] ss:$20 sps:$4 sm:$0xff]   ;;  %v11779_v18 = vld [vmem:[#allocation2 + $0x400] sm:$0xff] }
 0x192   :  { %5013 = vmatmul.mubr.bf16.gmra.mrb[20].mxu0 %v11550_v59  ;;  %v2394_v44 = vpack.c.bf16 %v2362_v16, %v2354_v61  ;;  %v11780_v33 = vld [vmem:[#allocation2 + $0x408] sm:$0xff]  ;;  %v11786_v49 = vld [vmem:[#allocation2 + $0x458] sm:$0xff] }
 0x193   :  { %5022 = vmatprep.mubr.bf16.mxu0 %v11551_v20  ;;  %v2395_v31 = vpack.c.bf16 %v2363_v39, %v2355_v51  ;;  %v2396_v40 = vpack.c.bf16 %v2364_v46, %v2356_v36  ;;  %v2397_v12 = vpack.c.bf16 %v2365_v0, %v2357_v15  ;;  %v9690_v7 = vld [vmem:[%s19719_s2 + $0x40] ss:$8 sm:$0xf] }
 0x194   :  { %2436 = vrot.lane.b32.xlu0 %v2371_v38, %s12088_s29  ;;  %2438 = vrot.lane.b32.xlu1 %v2372_v48, %s12088_s29  ;;  %v11565_v38 = vld [vmem:[%s19721_s3 + $0x190] ss:$20 sps:$4 sm:$0xff]   ;;  %v11784_v48 = vld [vmem:[#allocation2 + $0x448] sm:$0xff]  ;;  %v3194_v61 = vld [vmem:[%s19721_s3 + $0x258] sm:$0xff] }
 0x195   :  { %6072 = vmatmul.mubr.bf16.gmra.mrb[20].mxu1 %v11550_v59  ;;  %v11781_v59 = vld [vmem:[#allocation2 + $0x410] sm:$0xff]  ;;  %v11792_v26 = vld [vmem:[#allocation2 + $0x4c8] sm:$0xff]  ;;  %v11579_v51 = vld [vmem:[%s19721_s3 + $0x284] ss:$20 sps:$4 sm:$0xff]  }
 0x196   :  { %6081 = vmatprep.mubr.bf16.mxu1 %v11551_v20  ;;  %v11783_v20 = vld [vmem:[#allocation2 + $0x440] sm:$0xff]  ;;  %v11575_v50 = vld [vmem:[%s19721_s3 + $0x234] ss:$20 sps:$4 sm:$0xff]   ;;  %v3197_v16 = vld [vmem:[%s19721_s3 + $0x26c] sm:$0xff] }
 0x197   :  { %v3203_v36 = vld [vmem:[%s19721_s3 + $0x294] sm:$0xff] }
 0x198   :  { %2440 = vrot.lane.b32.xlu0 %v2373_v27, %s12088_s29  ;;  %2450 = vrot.lane.b32.xlu1 %v2378_v9, %s12088_s29  ;;  %v11788_v27 = vld [vmem:[#allocation2 + $0x488] sm:$0xff]  ;;  %v11789_v9 = vld [vmem:[#allocation2 + $0x490] sm:$0xff] }
 0x19a   :  { %5023 = vmatmul.mubr.bf16.gmra.mrb[24].mxu0 %v11553_v45 }
 0x19b   :  { %5032 = vmatprep.mubr.bf16.mxu0 %v11554_v5 }
 0x19c   :  { %2452 = vrot.lane.b32.xlu0 %v2379_v1, %s12088_s29  ;;  %2454 = vrot.lane.b32.xlu1 %v2380_v55, %s12088_s29  ;;  %v11571_v1 = vld [vmem:[%s19721_s3 + $0x1e0] ss:$20 sps:$4 sm:$0xff]  }
 0x19d   :  { %6082 = vmatmul.mubr.bf16.gmra.mrb[24].mxu1 %v11553_v45  ;;  %v9691_v45 = vld [vmem:[%s19719_s2 + $0x40] ss:$8 sm:$0xf0] }
 0x19e   :  { %6091 = vmatprep.mubr.bf16.mxu1 %v11554_v5  ;;  %v11791_v5 = vld [vmem:[#allocation2 + $0x4c0] sm:$0xff]  ;;  %v13531_v55 = vor.u32 %v9691_v45, %v9690_v7 }
 0x1a0   :  { %2456 = vrot.lane.b32.xlu0 %v2381_v3, %s12088_s29  ;;  %2466 = vrot.lane.b32.xlu1 %v2386_v19, %s12088_s29  ;;  %19930 = vst [vmem:[#allocation32_spill] sm:$0xff] %v13531_v55  ;;  %v2758_v3 = vrot.slane %v13531_v55, %v19902_v32  ;;  %v11794_v19 = vld [vmem:[#allocation2 + $0x4d8] sm:$0xff]  ;;  %v2762_v30 = vrot.slane %v13531_v55, %v19901_v34 }
 0x1a1   :  { %v2766_v25 = vrot.slane %v13531_v55, %v19904_v6  ;;  %v2770_v2 = vrot.slane %v13531_v55, %v19903_v43  ;;  %v2774_v53 = vrot.slane %v13531_v55, %v19905_v35 }
 0x1a2   :  { %5033 = vmatmul.mubr.bf16.gmra.mrb[28].mxu0 %v11556_v13 }
 0x1a3   :  { %5042 = vmatprep.mubr.bf16.mxu0 %v11557_v63 }
 0x1a4   :  { %2468 = vrot.lane.b32.xlu0 %v2387_v52, %s12088_s29  ;;  %2470 = vrot.lane.b32.xlu1 %v2388_v14, %s12088_s29  ;;  %v3191_v52 = vld [vmem:[%s19721_s3 + $0x244] sm:$0xff]  ;;  %v11577_v14 = vld [vmem:[%s19721_s3 + $0x25c] ss:$20 sps:$4 sm:$0xff]  }
 0x1a5   :  { %6092 = vmatmul.mubr.bf16.gmra.mrb[28].mxu1 %v11556_v13  ;;  %v3188_v13 = vld [vmem:[%s19721_s3 + $0x230] sm:$0xff] }
 0x1a6   :  { %6101 = vmatprep.mubr.bf16.mxu1 %v11557_v63  ;;  %v13561_v63 = vcombine.low %v3188_v13, %v3191_v52 }
 0x1a8   :  { %2472 = vrot.lane.b32.xlu0 %v2389_v22, %s12088_s29  ;;  %2482 = vrot.lane.b32.xlu1 %v2394_v44, %s12088_s29  ;;  %19931 = vst [vmem:[#allocation30_spill] sm:$0xff] %v13561_v63  ;;  %v13576_v22 = vcombine.low %v3194_v61, %v3197_v16  ;;  %v3200_v44 = vld [vmem:[%s19721_s3 + $0x280] sm:$0xff] }
 0x1a9   :  { %v13590_v15 = vcombine.low %v3200_v44, %v3203_v36 }
 0x1aa   :  { %5043 = vmatmul.mubr.bf16.gmra.mrb[32].mxu0 %v11559_v60  ;;  %19932 = vst [vmem:[#allocation28_spill] sm:$0xff] %v13576_v22 }
 0x1ab   :  { %5052 = vmatprep.mubr.bf16.mxu0 %v11560_v47  ;;  %19933 = vst [vmem:[#allocation34_spill] sm:$0xff] %v13590_v15 }
 0x1ac   :  { %2484 = vrot.lane.b32.xlu0 %v2395_v31, %s12088_s29  ;;  %2486 = vrot.lane.b32.xlu1 %v2396_v40, %s12088_s29  ;;  %v11581_v40 = vld [vmem:[%s19721_s3 + $0x2ac] ss:$20 sps:$4 sm:$0xff]  }
 0x1ad   :  { %6102 = vmatmul.mubr.bf16.gmra.mrb[32].mxu1 %v11559_v60 }
 0x1ae   :  { %6111 = vmatprep.mubr.bf16.mxu1 %v11560_v47 }
 0x1b0   :  { %2488 = vrot.lane.b32.xlu0 %v2397_v12, %s12088_s29  ;;  %2592 = vrot.lane.b32.xlu1 %v11779_v18, %s12094_s18  ;;  %v3206_v18 = vld [vmem:[%s19721_s3 + $0x2a8] sm:$0xff] }
 0x1b2   :  { %5053 = vmatmul.mubr.bf16.gmra.mrb[36].mxu0 %v11562_v58 }
 0x1b3   :  { %5062 = vmatprep.mubr.bf16.mxu0 %v11563_v54 }
 0x1b4   :  { %2594 = vrot.lane.b32.xlu0 %v11780_v33, %s12094_s18  ;;  %2596 = vrot.lane.b32.xlu1 %v11781_v59, %s12094_s18  ;;  %v3209_v33 = vld [vmem:[%s19721_s3 + $0x2bc] sm:$0xff] }
 0x1b5   :  { %6112 = vmatmul.mubr.bf16.gmra.mrb[36].mxu1 %v11562_v58 }
 0x1b6   :  { %6121 = vmatprep.mubr.bf16.mxu1 %v11563_v54 }
 0x1b8   :  { %2598 = vrot.lane.b32.xlu0 %v11782_v17, %s12094_s18  ;;  %2608 = vrot.lane.b32.xlu1 %v11783_v20, %s12094_s18 }
 0x1ba   :  { %5063 = vmatmul.mubr.bf16.gmra.mrb[40].mxu0 %v11565_v38 }
 0x1bb   :  { %5072 = vmatprep.mubr.bf16.mxu0 %v11566_v4 }
 0x1bc   :  { %2610 = vrot.lane.b32.xlu0 %v11784_v48, %s12094_s18  ;;  %2612 = vrot.lane.b32.xlu1 %v11785_v37, %s12094_s18  ;;  %v11583_v48 = vld [vmem:[%s19721_s3 + $0x2d4] ss:$20 sps:$4 sm:$0xff]  }
 0x1bd   :  { %6122 = vmatmul.mubr.bf16.gmra.mrb[40].mxu1 %v11565_v38 }
 0x1be   :  { %6131 = vmatprep.mubr.bf16.mxu1 %v11566_v4  ;;  %v13610_v4 = vcombine.low %v3206_v18, %v3209_v33  ;;  %v3230_v18 = vld [vmem:[%s19721_s3 + $0x348] sm:$0xff]  ;;  %v3233_v33 = vld [vmem:[%s19721_s3 + $0x35c] sm:$0xff] }
 0x1c0   :  { %2614 = vrot.lane.b32.xlu0 %v11786_v49, %s12094_s18  ;;  %2624 = vrot.lane.b32.xlu1 %v11787_v57, %s12094_s18  ;;  %19935 = vst [vmem:[#allocation36_spill] sm:$0xff] %v13610_v4  ;;  %v3212_v57 = vld [vmem:[%s19721_s3 + $0x2d0] sm:$0xff] }
 0x1c2   :  { %5073 = vmatmul.mubr.bf16.gmra.mrb[44].mxu0 %v11568_v41 }
 0x1c3   :  { %5082 = vmatprep.mubr.bf16.mxu0 %v11569_v8 }
 0x1c4   :  { %2626 = vrot.lane.b32.xlu0 %v11788_v27, %s12094_s18  ;;  %2628 = vrot.lane.b32.xlu1 %v11789_v9, %s12094_s18  ;;  %v3215_v27 = vld [vmem:[%s19721_s3 + $0x2e4] sm:$0xff] }
 0x1c5   :  { %6132 = vmatmul.mubr.bf16.gmra.mrb[44].mxu1 %v11568_v41  ;;  %v13630_v45 = vcombine.low %v3212_v57, %v3215_v27 }
 0x1c6   :  { %6141 = vmatprep.mubr.bf16.mxu1 %v11569_v8 }
 0x1c7   :  { %19937 = vst [vmem:[#allocation38_spill] sm:$0xff] %v13630_v45 }
 0x1c8   :  { %2630 = vrot.lane.b32.xlu0 %v11790_v24, %s12094_s18  ;;  %2640 = vrot.lane.b32.xlu1 %v11791_v5, %s12094_s18  ;;  %v11585_v24 = vld [vmem:[%s19721_s3 + $0x2fc] ss:$20 sps:$4 sm:$0xff]  }
 0x1ca   :  { %5083 = vmatmul.mubr.bf16.gmra.mrb[48].mxu0 %v11571_v1 }
 0x1cb   :  { %5092 = vmatprep.mubr.bf16.mxu0 %v11572_v21 }
 0x1cc   :  { %2642 = vrot.lane.b32.xlu0 %v11792_v26, %s12094_s18  ;;  %2644 = vrot.lane.b32.xlu1 %v11793_v42, %s12094_s18 }
 0x1cd   :  { %6142 = vmatmul.mubr.bf16.gmra.mrb[48].mxu1 %v11571_v1 }
 0x1ce   :  { %6151 = vmatprep.mubr.bf16.mxu1 %v11572_v21 }
 0x1d0   :  { %2646 = vrot.lane.b32.xlu0 %v11794_v19, %s12094_s18  ;;  %2787 = vrot.lane.b32.xlu1 %v2758_v3, %s12091_s25 }
 0x1d2   :  { %5093 = vmatmul.mubr.bf16.gmra.mrb[52].mxu0 %v11574_v10 }
 0x1d3   :  { %5102 = vmatprep.mubr.bf16.mxu0 %v11575_v50 }
 0x1d4   :  { %2789 = vrot.lane.b32.xlu0 %v2762_v30, %s12091_s25  ;;  %2791 = vrot.lane.b32.xlu1 %v2766_v25, %s12091_s25 }
 0x1d5   :  { %6152 = vmatmul.mubr.bf16.gmra.mrb[52].mxu1 %v11574_v10  ;;  %v3218_v10 = vld [vmem:[%s19721_s3 + $0x2f8] sm:$0xff] }
 0x1d6   :  { %6161 = vmatprep.mubr.bf16.mxu1 %v11575_v50  ;;  %v3221_v50 = vld [vmem:[%s19721_s3 + $0x30c] sm:$0xff] }
 0x1d7   :  { %v13650_v25 = vcombine.low %v3218_v10, %v3221_v50 }
 0x1d8   :  { %2793 = vrot.lane.b32.xlu0 %v2770_v2, %s12091_s25  ;;  %2795 = vrot.lane.b32.xlu1 %v2774_v53, %s12091_s25  ;;  %v11587_v2 = vld [vmem:[%s19721_s3 + $0x324] ss:$20 sps:$4 sm:$0xff]  }
 0x1d9   :  { %19939 = vst [vmem:[#allocation40_spill] sm:$0xff] %v13650_v25 }
 0x1da   :  { %5103 = vmatmul.mubr.bf16.gmra.mrb[56].mxu0 %v13561_v63 }
 0x1db   :  { %5112 = vmatprep.mubr.bf16.mxu0 %v11577_v14 }
 0x1dd   :  { %6162 = vmatmul.mubr.bf16.gmra.mrb[56].mxu1 %v13561_v63  ;;  %v11634_v63 = vld [vmem:[%s19721_s3 + $0xd0] ss:$20 sps:$4 sm:$0xff]  }
 0x1de   :  { %6171 = vmatprep.mubr.bf16.mxu1 %v11577_v14 }
 0x1e2   :  { %v2081_v39 = vpop.permute.xlu1 %2080  ;;  %5113 = vmatmul.mubr.bf16.gmra.mrb[60].mxu0 %v13576_v22 }
 0x1e3   :  { %2206 = vst.msk [vmem:[#allocation2 + $0x500] sm:$0xff] %vm2205_vm7, %v2081_v39  ;;  %5122 = vmatprep.mubr.bf16.mxu0 %v11579_v51 }
 0x1e5   :  { %6172 = vmatmul.mubr.bf16.gmra.mrb[60].mxu1 %v13576_v22 }
 0x1e6   :  { %v2083_v46 = vpop.permute.xlu0 %2082  ;;  %v2085_v60 = vpop.permute.xlu1 %2084  ;;  %6181 = vmatprep.mubr.bf16.mxu1 %v11579_v51  ;;  %v3224_v51 = vld [vmem:[%s19721_s3 + $0x320] sm:$0xff] }
 0x1e7   :  { %v2145_v47 = vsel %vm1550_vm3, %v2081_v39, %v2083_v46  ;;  %v2146_v31 = vsel %vm1550_vm3, %v2083_v46, %v2085_v60  ;;  %v3227_v39 = vld [vmem:[%s19721_s3 + $0x334] sm:$0xff] }
 0x1e8   :  { %5291 = vmatprep.subr.bf16.mxu0 %v2145_v47  ;;  %v13670_v46 = vcombine.low %v3224_v51, %v3227_v39  ;;  %v11595_v39 = vld [vmem:[%s19721_s3 + $0x3c4] ss:$20 sps:$4 sm:$0xff]  }
 0x1ea   :  { %v13597_v0 = vpop.permute.xlu0 %2086  ;;  %v2097_v12 = vpop.permute.xlu1 %2096  ;;  %v3456_v58 = vld [vmem:[#allocation2 + $0x500] sm:$0xff]  ;;  %5123 = vmatmul.mubr.bf16.gmra.mrb[64].mxu0 %v13590_v15  ;;  %19941 = vst [vmem:[#allocation42_spill] sm:$0xff] %v13670_v46 }
 0x1eb   :  { %19934 = vst [vmem:[#allocation35_spill] sm:$0xff] %v13597_v0  ;;  %v2147_v54 = vsel %vm1550_vm3, %v2085_v60, %v13597_v0  ;;  %2214 = vst.msk [vmem:[#allocation2 + $0x540] sm:$0xff] %vm2205_vm7, %v2097_v12  ;;  %5292 = vmatpush1.bf16.msra.mxu0 %v3456_v58  ;;  %5132 = vmatprep.mubr.bf16.mxu0 %v11581_v40  ;;  %v11665_v0 = vld [vmem:[%s19721_s3 + $0x28c] ss:$20 sps:$4 sm:$0xff]  }
 0x1ec   :  { %6350 = vmatprep.subr.bf16.mxu1 %v2147_v54 }
 0x1ed   :  { %6182 = vmatmul.mubr.bf16.gmra.mrb[64].mxu1 %v13590_v15 }
 0x1ee   :  { %v2099_v59 = vpop.permute.xlu0 %2098  ;;  %v2101_v38 = vpop.permute.xlu1 %2100  ;;  %6351 = vmatpush1.bf16.msra.mxu1 %v2146_v31  ;;  %6191 = vmatprep.mubr.bf16.mxu1 %v11581_v40  ;;  %v11589_v31 = vld [vmem:[%s19721_s3 + $0x34c] ss:$20 sps:$4 sm:$0xff]  }
 0x1ef   :  { %v2152_v17 = vsel %vm1550_vm3, %v2097_v12, %v2099_v59  ;;  %v2153_v20 = vsel %vm1550_vm3, %v2099_v59, %v2101_v38 }
 0x1f0   :  { %5293 = vmatprep.subr.bf16.mxu0 %v2152_v17  ;;  %v13690_v17 = vcombine.low %v3230_v18, %v3233_v33 }
 0x1f2   :  { %v13617_v37 = vpop.permute.xlu0 %2102  ;;  %v2113_v41 = vpop.permute.xlu1 %2112  ;;  %v3464_v8 = vld [vmem:[#allocation2 + $0x540] sm:$0xff]  ;;  %5133 = vmatmul.mubr.bf16.gmra.mrb[68].mxu0 %v13610_v4  ;;  %19943 = vst [vmem:[#allocation44_spill] sm:$0xff] %v13690_v17 }
 0x1f3   :  { %19936 = vst [vmem:[#allocation37_spill] sm:$0xff] %v13617_v37  ;;  %v2154_v49 = vsel %vm1550_vm3, %v2101_v38, %v13617_v37  ;;  %2222 = vst.msk [vmem:[#allocation2 + $0x580] sm:$0xff] %vm2205_vm7, %v2113_v41  ;;  %5294 = vmatpush1.bf16.msra.mxu0 %v3464_v8  ;;  %5142 = vmatprep.mubr.bf16.mxu0 %v11583_v48 }
 0x1f4   :  { %6352 = vmatprep.subr.bf16.mxu1 %v2154_v49 }
 0x1f5   :  { %6192 = vmatmul.mubr.bf16.gmra.mrb[68].mxu1 %v13610_v4  ;;  %v14211_v4 = vld [vmem:[%s19720_s0 + $0x1f0] sm:$0xff] }
 0x1f6   :  { %v2115_v9 = vpop.permute.xlu0 %2114  ;;  %v2117_v7 = vpop.permute.xlu1 %2116  ;;  %6353 = vmatpush1.bf16.msra.mxu1 %v2153_v20  ;;  %6201 = vmatprep.mubr.bf16.mxu1 %v11583_v48 }
 0x1f7   :  { %v2159_v1 = vsel %vm1550_vm3, %v2113_v41, %v2115_v9  ;;  %v2160_v21 = vsel %vm1550_vm3, %v2115_v9, %v2117_v7  ;;  %v11591_v41 = vld [vmem:[%s19721_s3 + $0x374] ss:$20 sps:$4 sm:$0xff]  }
 0x1f8   :  { %5295 = vmatprep.subr.bf16.mxu0 %v2159_v1  ;;  %v3236_v9 = vld [vmem:[%s19721_s3 + $0x370] sm:$0xff] }
 0x1fa   :  { %v13637_v5 = vpop.permute.xlu0 %2118  ;;  %v2129_v26 = vpop.permute.xlu1 %2128  ;;  %v3472_v42 = vld [vmem:[#allocation2 + $0x580] sm:$0xff]  ;;  %5143 = vmatmul.mubr.bf16.gmra.mrb[72].mxu0 %v13630_v45 }
 0x1fb   :  { %19938 = vst [vmem:[#allocation39_spill] sm:$0xff] %v13637_v5  ;;  %v2161_v3 = vsel %vm1550_vm3, %v2117_v7, %v13637_v5  ;;  %2230 = vst.msk [vmem:[#allocation2 + $0x5c0] sm:$0xff] %vm2205_vm7, %v2129_v26  ;;  %5296 = vmatpush1.bf16.msra.mxu0 %v3472_v42  ;;  %5152 = vmatprep.mubr.bf16.mxu0 %v11585_v24  ;;  %v3239_v7 = vld [vmem:[%s19721_s3 + $0x384] sm:$0xff] }
 0x1fc   :  { %6354 = vmatprep.subr.bf16.mxu1 %v2161_v3  ;;  %v11593_v3 = vld [vmem:[%s19721_s3 + $0x39c] ss:$20 sps:$4 sm:$0xff]  }
 0x1fd   :  { %6202 = vmatmul.mubr.bf16.gmra.mrb[72].mxu1 %v13630_v45  ;;  %v14206_v45 = vld [vmem:[%s19720_s0 + $0x1b0] sm:$0xff] }
 0x1fe   :  { %v2131_v19 = vpop.permute.xlu0 %2130  ;;  %v2133_v30 = vpop.permute.xlu1 %2132  ;;  %6355 = vmatpush1.bf16.msra.mxu1 %v2160_v21  ;;  %6211 = vmatprep.mubr.bf16.mxu1 %v11585_v24  ;;  %v13710_v24 = vcombine.low %v3236_v9, %v3239_v7  ;;  %v14219_v22 = vpack.c.bf16 %v14211_v4, %v14206_v45 }
 0x1ff   :  { %v2166_v13 = vsel %vm1550_vm3, %v2129_v26, %v2131_v19  ;;  %v2167_v52 = vsel %vm1550_vm3, %v2131_v19, %v2133_v30 }
 0x200   :  { %5297 = vmatprep.subr.bf16.mxu0 %v2166_v13  ;;  %19945 = vst [vmem:[#allocation46_spill] sm:$0xff] %v13710_v24  ;;  %v3242_v13 = vld [vmem:[%s19721_s3 + $0x398] sm:$0xff]  ;;  %1882 = vst [vmem:[#allocation2 + $0x4f0] sm:$0xff] %v14219_v22 }
 0x202   :  { %v13657_v53 = vpop.permute.xlu0 %2134  ;;  %v2435_v14 = vpop.permute.xlu1 %2434  ;;  %v3480_v61 = vld [vmem:[#allocation2 + $0x5c0] sm:$0xff]  ;;  %5153 = vmatmul.mubr.bf16.gmra.mrb[76].mxu0 %v13650_v25 }
 0x203   :  { %19940 = vst [vmem:[#allocation41_spill] sm:$0xff] %v13657_v53  ;;  %v2168_v16 = vsel %vm1550_vm3, %v2133_v30, %v13657_v53  ;;  %2560 = vst.msk [vmem:[#allocation2 + $0x600] sm:$0xff] %vm2559_vm8, %v2435_v14  ;;  %5298 = vmatpush1.bf16.msra.mxu0 %v3480_v61  ;;  %5162 = vmatprep.mubr.bf16.mxu0 %v11587_v2 }
 0x204   :  { %6356 = vmatprep.subr.bf16.mxu1 %v2168_v16 }
 0x205   :  { %6212 = vmatmul.mubr.bf16.gmra.mrb[76].mxu1 %v13650_v25  ;;  %v14200_v25 = vld [vmem:[%s19720_s0 + $0x1e8] sm:$0xff] }
 0x206   :  { %v2437_v44 = vpop.permute.xlu0 %2436  ;;  %v2439_v36 = vpop.permute.xlu1 %2438  ;;  %6357 = vmatpush1.bf16.msra.mxu1 %v2167_v52  ;;  %6221 = vmatprep.mubr.bf16.mxu1 %v11587_v2  ;;  %v3245_v52 = vld [vmem:[%s19721_s3 + $0x3ac] sm:$0xff] }
 0x207   :  { %v2499_v60 = vsel %vm1195_vm2, %v2435_v14, %v2437_v44  ;;  %v2500_v47 = vsel %vm1195_vm2, %v2437_v44, %v2439_v36  ;;  %v13730_v61 = vcombine.low %v3242_v13, %v3245_v52 }
 0x208   :  { %5299 = vmatprep.subr.bf16.mxu0 %v2499_v60 }
 0x209   :  { %19947 = vst [vmem:[#allocation48_spill] sm:$0xff] %v13730_v61 }
 0x20a   :  { %v13677_v40 = vpop.permute.xlu0 %2440  ;;  %v2451_v12 = vpop.permute.xlu1 %2450  ;;  %v3488_v58 = vld [vmem:[#allocation2 + $0x600] sm:$0xff]  ;;  %5163 = vmatmul.mubr.bf16.gmra.mrb[80].mxu0 %v13670_v46 }
 0x20b   :  { %19942 = vst [vmem:[#allocation43_spill] sm:$0xff] %v13677_v40  ;;  %v2501_v54 = vsel %vm1195_vm2, %v2439_v36, %v13677_v40  ;;  %2568 = vst.msk [vmem:[#allocation2 + $0x640] sm:$0xff] %vm2559_vm8, %v2451_v12  ;;  %5300 = vmatpush1.bf16.msra.mxu0 %v3488_v58  ;;  %5172 = vmatprep.mubr.bf16.mxu0 %v11589_v31 }
 0x20c   :  { %6358 = vmatprep.subr.bf16.mxu1 %v2501_v54 }
 0x20d   :  { %6222 = vmatmul.mubr.bf16.gmra.mrb[80].mxu1 %v13670_v46  ;;  %v14195_v46 = vld [vmem:[%s19720_s0 + $0x1a8] sm:$0xff] }
 0x20e   :  { %v2453_v59 = vpop.permute.xlu0 %2452  ;;  %v2455_v38 = vpop.permute.xlu1 %2454  ;;  %6359 = vmatpush1.bf16.msra.mxu1 %v2500_v47  ;;  %6231 = vmatprep.mubr.bf16.mxu1 %v11589_v31  ;;  %v3248_v31 = vld [vmem:[%s19721_s3 + $0x3c0] sm:$0xff]  ;;  %v14215_v15 = vpack.c.bf16 %v14200_v25, %v14195_v46 }
 0x20f   :  { %v2506_v20 = vsel %vm1195_vm2, %v2451_v12, %v2453_v59  ;;  %v2507_v48 = vsel %vm1195_vm2, %v2453_v59, %v2455_v38  ;;  %v3251_v12 = vld [vmem:[%s19721_s3 + $0x3d4] sm:$0xff] }
 0x210   :  { %5301 = vmatprep.subr.bf16.mxu0 %v2506_v20  ;;  %v13750_v18 = vcombine.low %v3248_v31, %v3251_v12  ;;  %1881 = vst [vmem:[#allocation2 + $0x4e8] sm:$0xff] %v14215_v15 }
 0x212   :  { %v13697_v8 = vpop.permute.xlu0 %2456  ;;  %v2467_v49 = vpop.permute.xlu1 %2466  ;;  %v3496_v57 = vld [vmem:[#allocation2 + $0x640] sm:$0xff]  ;;  %5173 = vmatmul.mubr.bf16.gmra.mrb[84].mxu0 %v13690_v17  ;;  %19949 = vst [vmem:[#allocation50_spill] sm:$0xff] %v13750_v18 }
 0x213   :  { %19944 = vst [vmem:[#allocation45_spill] sm:$0xff] %v13697_v8  ;;  %v2508_v27 = vsel %vm1195_vm2, %v2455_v38, %v13697_v8  ;;  %2576 = vst.msk [vmem:[#allocation2 + $0x680] sm:$0xff] %vm2559_vm8, %v2467_v49  ;;  %5302 = vmatpush1.bf16.msra.mxu0 %v3496_v57  ;;  %5182 = vmatprep.mubr.bf16.mxu0 %v11591_v41  ;;  %v11597_v38 = vld [vmem:[%s19721_s3 + $0x3ec] ss:$20 sps:$4 sm:$0xff]  }
 0x214   :  { %6360 = vmatprep.subr.bf16.mxu1 %v2508_v27  ;;  %v3254_v57 = vld [vmem:[%s19721_s3 + $0x3e8] sm:$0xff]  ;;  %v3257_v27 = vld [vmem:[%s19721_s3 + $0x3fc] sm:$0xff] }
 0x215   :  { %6232 = vmatmul.mubr.bf16.gmra.mrb[84].mxu1 %v13690_v17 }
 0x216   :  { %v2469_v1 = vpop.permute.xlu0 %2468  ;;  %v2471_v21 = vpop.permute.xlu1 %2470  ;;  %6361 = vmatpush1.bf16.msra.mxu1 %v2507_v48  ;;  %6241 = vmatprep.mubr.bf16.mxu1 %v11591_v41 }
 0x217   :  { %v2513_v26 = vsel %vm1195_vm2, %v2467_v49, %v2469_v1  ;;  %v2514_v42 = vsel %vm1195_vm2, %v2469_v1, %v2471_v21  ;;  %v13770_v1 = vcombine.low %v3254_v57, %v3257_v27 }
 0x218   :  { %5303 = vmatprep.subr.bf16.mxu0 %v2513_v26 }
 0x219   :  { %19951 = vst [vmem:[#allocation52_spill] sm:$0xff] %v13770_v1 }
 0x21a   :  { %v13717_v10 = vpop.permute.xlu0 %2472  ;;  %v2483_v50 = vpop.permute.xlu1 %2482  ;;  %v3504_v19 = vld [vmem:[#allocation2 + $0x680] sm:$0xff]  ;;  %5183 = vmatmul.mubr.bf16.gmra.mrb[88].mxu0 %v13710_v24 }
 0x21b   :  { %19946 = vst [vmem:[#allocation47_spill] sm:$0xff] %v13717_v10  ;;  %v2515_v30 = vsel %vm1195_vm2, %v2471_v21, %v13717_v10  ;;  %2584 = vst.msk [vmem:[#allocation2 + $0x6c0] sm:$0xff] %vm2559_vm8, %v2483_v50  ;;  %5304 = vmatpush1.bf16.msra.mxu0 %v3504_v19  ;;  %5192 = vmatprep.mubr.bf16.mxu0 %v11593_v3  ;;  %v11652_v10 = vld [vmem:[%s19721_s3 + $0x1c0] ss:$20 sps:$4 sm:$0xff]  }
 0x21c   :  { %6362 = vmatprep.subr.bf16.mxu1 %v2515_v30 }
 0x21d   :  { %6242 = vmatmul.mubr.bf16.gmra.mrb[88].mxu1 %v13710_v24 }
 0x21e   :  { %v2485_v2 = vpop.permute.xlu0 %2484  ;;  %v2487_v14 = vpop.permute.xlu1 %2486  ;;  %6363 = vmatpush1.bf16.msra.mxu1 %v2514_v42  ;;  %6251 = vmatprep.mubr.bf16.mxu1 %v11593_v3  ;;  %v11599_v42 = vld [vmem:[%s19721_s3 + $0x414] ss:$20 sps:$4 sm:$0xff]  }
 0x21f   :  { %v2520_v16 = vsel %vm1195_vm2, %v2483_v50, %v2485_v2  ;;  %v2521_v51 = vsel %vm1195_vm2, %v2485_v2, %v2487_v14  ;;  %v11601_v2 = vld [vmem:[%s19721_s3 + $0x410] ss:$20 sps:$4 sm:$0xff]  }
 0x220   :  { %5305 = vmatprep.subr.bf16.mxu0 %v2520_v16 }
 0x222   :  { %v13737_v44 = vpop.permute.xlu0 %2488  ;;  %v2593_v36 = vpop.permute.xlu1 %2592  ;;  %v3512_v60 = vld [vmem:[#allocation2 + $0x6c0] sm:$0xff]  ;;  %5193 = vmatmul.mubr.bf16.gmra.mrb[92].mxu0 %v13730_v61 }
 0x223   :  { %19948 = vst [vmem:[#allocation49_spill] sm:$0xff] %v13737_v44  ;;  %v2522_v47 = vsel %vm1195_vm2, %v2487_v14, %v13737_v44  ;;  %2718 = vst.msk [vmem:[#allocation2 + $0x700] sm:$0xff] %vm2717_vm9, %v2593_v36  ;;  %5306 = vmatpush1.bf16.msra.mxu0 %v3512_v60  ;;  %5202 = vmatprep.mubr.bf16.mxu0 %v11595_v39 }
 0x224   :  { %6364 = vmatprep.subr.bf16.mxu1 %v2522_v47 }
 0x225   :  { %6252 = vmatmul.mubr.bf16.gmra.mrb[92].mxu1 %v13730_v61  ;;  %v14181_v61 = vld [vmem:[%s19720_s0 + $0x178] sm:$0xff] }
 0x226   :  { %v2595_v58 = vpop.permute.xlu0 %2594  ;;  %v2597_v54 = vpop.permute.xlu1 %2596  ;;  %6365 = vmatpush1.bf16.msra.mxu1 %v2521_v51  ;;  %6261 = vmatprep.mubr.bf16.mxu1 %v11595_v39  ;;  %v11602_v51 = vld [vmem:[%s19721_s3 + $0x43c] ss:$20 sps:$4 sm:$0xff]  }
 0x227   :  { %v2657_v33 = vsel %vm2656_vm10, %v2593_v36, %v2595_v58  ;;  %v2658_v59 = vsel %vm2656_vm10, %v2595_v58, %v2597_v54  ;;  %v11604_v58 = vld [vmem:[%s19721_s3 + $0x438] ss:$20 sps:$4 sm:$0xff]  }
 0x228   :  { %5307 = vmatprep.subr.bf16.mxu0 %v2657_v33 }
 0x22a   :  { %v13757_v20 = vpop.permute.xlu0 %2598  ;;  %v2609_v48 = vpop.permute.xlu1 %2608  ;;  %v3520_v41 = vld [vmem:[#allocation2 + $0x700] sm:$0xff]  ;;  %5203 = vmatmul.mubr.bf16.gmra.mrb[96].mxu0 %v13750_v18 }
 0x22b   :  { %19950 = vst [vmem:[#allocation51_spill] sm:$0xff] %v13757_v20  ;;  %v2659_v49 = vsel %vm2656_vm10, %v2597_v54, %v13757_v20  ;;  %2726 = vst.msk [vmem:[#allocation2 + $0x740] sm:$0xff] %vm2717_vm9, %v2609_v48  ;;  %5308 = vmatpush1.bf16.msra.mxu0 %v3520_v41  ;;  %5212 = vmatprep.mubr.bf16.mxu0 %v11597_v38  ;;  %v11640_v20 = vld [vmem:[%s19721_s3 + $0x120] ss:$20 sps:$4 sm:$0xff]  }
 0x22c   :  { %6366 = vmatprep.subr.bf16.mxu1 %v2659_v49 }
 0x22d   :  { %6262 = vmatmul.mubr.bf16.gmra.mrb[96].mxu1 %v13750_v18  ;;  %v14165_v18 = vld [vmem:[%s19720_s0 + $0x130] sm:$0xff] }
 0x22e   :  { %v2611_v9 = vpop.permute.xlu0 %2610  ;;  %v2613_v7 = vpop.permute.xlu1 %2612  ;;  %6367 = vmatpush1.bf16.msra.mxu1 %v2658_v59  ;;  %6271 = vmatprep.mubr.bf16.mxu1 %v11597_v38  ;;  %v11605_v59 = vld [vmem:[%s19721_s3 + $0x464] ss:$20 sps:$4 sm:$0xff]  }
 0x22f   :  { %v2664_v21 = vsel %vm2656_vm10, %v2609_v48, %v2611_v9  ;;  %v2665_v26 = vsel %vm2656_vm10, %v2611_v9, %v2613_v7  ;;  %v11607_v9 = vld [vmem:[%s19721_s3 + $0x460] ss:$20 sps:$4 sm:$0xff]  }
 0x230   :  { %5309 = vmatprep.subr.bf16.mxu0 %v2664_v21 }
 0x232   :  { %v13777_v3 = vpop.permute.xlu0 %2614  ;;  %v2625_v50 = vpop.permute.xlu1 %2624  ;;  %v3528_v19 = vld [vmem:[#allocation2 + $0x740] sm:$0xff]  ;;  %5213 = vmatmul.mubr.bf16.gmra.mrb[100].mxu0 %v13770_v1 }
 0x233   :  { %19952 = vst [vmem:[#allocation53_spill] sm:$0xff] %v13777_v3  ;;  %v2666_v30 = vsel %vm2656_vm10, %v2613_v7, %v13777_v3  ;;  %2734 = vst.msk [vmem:[#allocation2 + $0x780] sm:$0xff] %vm2717_vm9, %v2625_v50  ;;  %5310 = vmatpush1.bf16.msra.mxu0 %v3528_v19  ;;  %5222 = vmatprep.mubr.bf16.mxu0 %v11599_v42  ;;  %v11796_v19 = vld [vmem:[%s19720_s0 + $0x40] sm:$0xff] }
 0x234   :  { %6368 = vmatprep.subr.bf16.mxu1 %v2666_v30  ;;  %v11638_v3 = vld [vmem:[%s19721_s3 + $0x124] ss:$20 sps:$4 sm:$0xff]  }
 0x235   :  { %6272 = vmatmul.mubr.bf16.gmra.mrb[100].mxu1 %v13770_v1  ;;  %v11632_v1 = vld [vmem:[%s19721_s3 + $0xd4] ss:$20 sps:$4 sm:$0xff]  }
 0x236   :  { %v2627_v13 = vpop.permute.xlu0 %2626  ;;  %v2629_v52 = vpop.permute.xlu1 %2628  ;;  %6369 = vmatpush1.bf16.msra.mxu1 %v2665_v26  ;;  %6281 = vmatprep.mubr.bf16.mxu1 %v11599_v42  ;;  %v11608_v26 = vld [vmem:[%s19721_s3 + $0x48c] ss:$20 sps:$4 sm:$0xff]  }
 0x237   :  { %v2671_v14 = vsel %vm2656_vm10, %v2625_v50, %v2627_v13  ;;  %v2672_v16 = vsel %vm2656_vm10, %v2627_v13, %v2629_v52  ;;  %v11795_v42 = vld [vmem:[%s19720_s0] sm:$0xff]  ;;  %v11797_v13 = vld [vmem:[%s19720_s0 + $0x8] sm:$0xff] }
 0x238   :  { %5311 = vmatprep.subr.bf16.mxu0 %v2671_v14 }
 0x23a   :  { %v13792_v39 = vpop.permute.xlu0 %2630  ;;  %v2641_v36 = vpop.permute.xlu1 %2640  ;;  %v3536_v60 = vld [vmem:[#allocation2 + $0x780] sm:$0xff]  ;;  %5223 = vmatmul.mubr.bf16.gmra.mrb[104].mxu0 %v11601_v2 }
 0x23b   :  { %19953 = vst [vmem:[#allocation54_spill] sm:$0xff] %v13792_v39  ;;  %v2673_v47 = vsel %vm2656_vm10, %v2629_v52, %v13792_v39  ;;  %2742 = vst.msk [vmem:[#allocation2 + $0x7c0] sm:$0xff] %vm2717_vm9, %v2641_v36  ;;  %5312 = vmatpush1.bf16.msra.mxu0 %v3536_v60  ;;  %5232 = vmatprep.mubr.bf16.mxu0 %v11602_v51  ;;  %v11637_v39 = vld [vmem:[%s19721_s3 + $0xf8] ss:$20 sps:$4 sm:$0xff]  }
 0x23c   :  { %6370 = vmatprep.subr.bf16.mxu1 %v2673_v47 }
 0x23d   :  { %6282 = vmatmul.mubr.bf16.gmra.mrb[104].mxu1 %v11601_v2  ;;  %v11798_v2 = vld [vmem:[%s19720_s0 + $0x48] sm:$0xff] }
 0x23e   :  { %v2643_v31 = vpop.permute.xlu0 %2642  ;;  %v2645_v12 = vpop.permute.xlu1 %2644  ;;  %6371 = vmatpush1.bf16.msra.mxu1 %v2672_v16  ;;  %6291 = vmatprep.mubr.bf16.mxu1 %v11602_v51 }
 0x23f   :  { %v2678_v54 = vsel %vm2656_vm10, %v2641_v36, %v2643_v31  ;;  %v2679_v33 = vsel %vm2656_vm10, %v2643_v31, %v2645_v12 }
 0x240   :  { %5313 = vmatprep.subr.bf16.mxu0 %v2678_v54  ;;  %v11800_v54 = vld [vmem:[%s19720_s0 + $0xc0] sm:$0xff] }
 0x242   :  { %v13805_v38 = vpop.permute.xlu0 %2646  ;;  %v2788_v48 = vpop.permute.xlu1 %2787  ;;  %v3544_v41 = vld [vmem:[#allocation2 + $0x7c0] sm:$0xff]  ;;  %5233 = vmatmul.mubr.bf16.gmra.mrb[108].mxu0 %v11604_v58 }
 0x243   :  { %19954 = vst [vmem:[#allocation55_spill] sm:$0xff] %v13805_v38  ;;  %v2680_v49 = vsel %vm2656_vm10, %v2645_v12, %v13805_v38  ;;  %5314 = vmatpush1.bf16.msra.mxu0 %v3544_v41  ;;  %5242 = vmatprep.mubr.bf16.mxu0 %v11605_v59  ;;  %v11799_v12 = vld [vmem:[%s19720_s0 + $0x80] sm:$0xff]  ;;  %v11802_v41 = vld [vmem:[%s19720_s0 + $0x50] sm:$0xff]  ;;  %v14231_v38 = vld [vmem:[%s19720_s0 + $0x1b8] sm:$0xff] }
 0x244   :  { %6372 = vmatprep.subr.bf16.mxu1 %v2680_v49 }
 0x245   :  { %6292 = vmatmul.mubr.bf16.gmra.mrb[108].mxu1 %v11604_v58 }
 0x246   :  { %v2790_v57 = vpop.permute.xlu0 %2789  ;;  %v2792_v27 = vpop.permute.xlu1 %2791  ;;  %6373 = vmatpush1.bf16.msra.mxu1 %v2679_v33  ;;  %6301 = vmatprep.mubr.bf16.mxu1 %v11605_v59  ;;  %v11801_v59 = vld [vmem:[%s19720_s0 + $0x10] sm:$0xff] }
 0x247   :  { %v13813_v7 = vsel %vm826_vm4, %v2788_v48, %v2790_v57  ;;  %v13816_v21 = vsel %vm826_vm4, %v2790_v57, %v2792_v27  ;;  %v11803_v57 = vld [vmem:[%s19720_s0 + $0x18] sm:$0xff] }
 0x248   :  { %v2818_v50 = vmul.f32 %v11795_v42, %v13813_v7  ;;  %v2826_v30 = vmul.f32 %v11796_v19, %v13813_v7  ;;  %v2819_v52 = vmul.f32 %v11797_v13, %v13816_v21  ;;  %v2827_v14 = vmul.f32 %v11798_v2, %v13816_v21  ;;  %v11804_v42 = vld [vmem:[%s19720_s0 + $0x58] sm:$0xff]  ;;  %v11805_v19 = vld [vmem:[%s19720_s0 + $0x88] sm:$0xff] }
 0x249   :  { %v2834_v58 = vmul.f32 %v11799_v12, %v13813_v7  ;;  %v2842_v33 = vmul.f32 %v11800_v54, %v13813_v7  ;;  %v11806_v13 = vld [vmem:[%s19720_s0 + $0xc8] sm:$0xff]  ;;  %v11808_v54 = vld [vmem:[%s19720_s0 + $0xd0] sm:$0xff] }
 0x24a   :  { %v2794_v16 = vpop.permute.xlu0 %2793  ;;  %v13837_v51 = vpop.permute.xlu1 %2795  ;;  %v2882_v36 = vpack.c.bf16 %v2826_v30, %v2818_v50  ;;  %v2883_v60 = vpack.c.bf16 %v2827_v14, %v2819_v52  ;;  %5243 = vmatmul.mubr.bf16.gmra.mrb[112].mxu0 %v11607_v9  ;;  %v2835_v30 = vmul.f32 %v11805_v19, %v13816_v21  ;;  %v2843_v52 = vmul.f32 %v11806_v13, %v13816_v21  ;;  %v11610_v14 = vld [vmem:[%s19721_s3 + $0x488] ss:$20 sps:$4 sm:$0xff]  }
 0x24b   :  { %19955 = vst [vmem:[#allocation56_spill] sm:$0xff] %v13837_v51  ;;  %v13840_v47 = vsel %vm826_vm4, %v2792_v27, %v2794_v16  ;;  %v13844_v31 = vsel %vm826_vm4, %v2794_v16, %v13837_v51  ;;  %5252 = vmatprep.mubr.bf16.mxu0 %v11608_v26  ;;  %v11635_v51 = vld [vmem:[%s19721_s3 + $0xfc] ss:$20 sps:$4 sm:$0xff]  }
 0x24c   :  { %2946 = vrot.lane.b32.xlu0 %v2882_v36, %s12087_s9  ;;  %2948 = vrot.lane.b32.xlu1 %v2883_v60, %s12087_s9  ;;  %v2820_v48 = vmul.f32 %v11801_v59, %v13840_v47  ;;  %v2828_v49 = vmul.f32 %v11802_v41, %v13840_v47  ;;  %v2821_v27 = vmul.f32 %v11803_v57, %v13844_v31  ;;  %v11807_v60 = vld [vmem:[%s19720_s0 + $0x90] sm:$0xff]  ;;  %v11811_v57 = vld [vmem:[%s19720_s0 + $0x100] sm:$0xff] }
 0x24d   :  { %v2829_v50 = vmul.f32 %v11804_v42, %v13844_v31  ;;  %6302 = vmatmul.mubr.bf16.gmra.mrb[112].mxu1 %v11607_v9  ;;  %v11611_v9 = vld [vmem:[%s19721_s3 + $0x4b4] ss:$20 sps:$4 sm:$0xff]   ;;  %v2890_v36 = vpack.c.bf16 %v2842_v33, %v2834_v58  ;;  %v2836_v12 = vmul.f32 %v11807_v60, %v13840_v47  ;;  %v2891_v59 = vpack.c.bf16 %v2843_v52, %v2835_v30  ;;  %v11810_v33 = vld [vmem:[%s19720_s0 + $0xd8] sm:$0xff]  ;;  %v11812_v42 = vld [vmem:[%s19720_s0 + $0x140] sm:$0xff] }
 0x24e   :  { %v2884_v2 = vpack.c.bf16 %v2828_v49, %v2820_v48  ;;  %6311 = vmatprep.mubr.bf16.mxu1 %v11608_v26  ;;  %v2844_v26 = vmul.f32 %v11808_v54, %v13840_v47  ;;  %v11809_v48 = vld [vmem:[%s19720_s0 + $0x98] sm:$0xff]  ;;  %v2845_v41 = vmul.f32 %v11810_v33, %v13844_v31  ;;  %v11813_v30 = vld [vmem:[%s19720_s0 + $0x108] sm:$0xff]  ;;  %v11815_v60 = vld [vmem:[%s19720_s0 + $0x110] sm:$0xff] }
 0x24f   :  { %v2885_v16 = vpack.c.bf16 %v2829_v50, %v2821_v27  ;;  %v2837_v58 = vmul.f32 %v11809_v48, %v13844_v31  ;;  %v2850_v27 = vmul.f32 %v11811_v57, %v13813_v7  ;;  %v2858_v50 = vmul.f32 %v11812_v42, %v13813_v7  ;;  %v11814_v52 = vld [vmem:[%s19720_s0 + $0x148] sm:$0xff]  ;;  %v11816_v54 = vld [vmem:[%s19720_s0 + $0x150] sm:$0xff] }
 0x250   :  { %2950 = vrot.lane.b32.xlu0 %v2884_v2, %s12087_s9  ;;  %v2892_v49 = vpack.c.bf16 %v2844_v26, %v2836_v12  ;;  %v2851_v13 = vmul.f32 %v11813_v30, %v13816_v21  ;;  %v2859_v2 = vmul.f32 %v11814_v52, %v13816_v21  ;;  %v2852_v12 = vmul.f32 %v11815_v60, %v13840_v47 }
 0x251   :  { %2952 = vrot.lane.b32.xlu1 %v2885_v16, %s12087_s9  ;;  %v2893_v19 = vpack.c.bf16 %v2845_v41, %v2837_v58  ;;  %v11613_v16 = vld [vmem:[%s19721_s3 + $0x4b0] ss:$20 sps:$4 sm:$0xff]   ;;  %v2860_v26 = vmul.f32 %v11816_v54, %v13840_v47  ;;  %v11818_v58 = vld [vmem:[%s19720_s0 + $0x158] sm:$0xff] }
 0x252   :  { %5253 = vmatmul.mubr.bf16.gmra.mrb[116].mxu0 %v11610_v14  ;;  %v2861_v33 = vmul.f32 %v11818_v58, %v13844_v31  ;;  %v11825_v54 = vld [vmem:[%s19720_s0 + $0x198] sm:$0xff] }
 0x253   :  { %5262 = vmatprep.mubr.bf16.mxu0 %v11611_v9  ;;  %v2900_v41 = vpack.c.bf16 %v2860_v26, %v2852_v12  ;;  %v2869_v26 = vmul.f32 %v11825_v54, %v13844_v31 }
 0x254   :  { %2962 = vrot.lane.b32.xlu0 %v2890_v36, %s12087_s9  ;;  %v2898_v36 = vpack.c.bf16 %v2858_v50, %v2850_v27  ;;  %v11820_v27 = vld [vmem:[%s19720_s0 + $0x1c0] sm:$0xff] }
 0x255   :  { %2964 = vrot.lane.b32.xlu1 %v2891_v59, %s12087_s9  ;;  %6312 = vmatmul.mubr.bf16.gmra.mrb[116].mxu1 %v11610_v14  ;;  %v11614_v14 = vld [vmem:[%s19721_s3 + $0x4dc] ss:$20 sps:$4 sm:$0xff]   ;;  %v2874_v42 = vmul.f32 %v11820_v27, %v13813_v7 }
 0x256   :  { %6321 = vmatprep.mubr.bf16.mxu1 %v11611_v9  ;;  %v2899_v9 = vpack.c.bf16 %v2859_v2, %v2851_v13  ;;  %v11817_v59 = vld [vmem:[%s19720_s0 + $0x118] sm:$0xff]  ;;  %v11822_v13 = vld [vmem:[%s19720_s0 + $0x1c8] sm:$0xff] }
 0x257   :  { %v2853_v48 = vmul.f32 %v11817_v59, %v13844_v31  ;;  %v2875_v52 = vmul.f32 %v11822_v13, %v13816_v21  ;;  %v11619_v2 = vld [vmem:[%s19721_s3 + $0xc] ss:$20 sps:$4 sm:$0xff]  }
 0x258   :  { %2966 = vrot.lane.b32.xlu0 %v2892_v49, %s12087_s9  ;;  %v11819_v49 = vld [vmem:[%s19720_s0 + $0x180] sm:$0xff] }
 0x259   :  { %2968 = vrot.lane.b32.xlu1 %v2893_v19, %s12087_s9  ;;  %v2866_v57 = vmul.f32 %v11819_v49, %v13813_v7  ;;  %v2901_v50 = vpack.c.bf16 %v2861_v33, %v2853_v48  ;;  %v11821_v19 = vld [vmem:[%s19720_s0 + $0x188] sm:$0xff]  ;;  %v19956_v48 = vld [vmem:[#allocation4_spill] sm:$0xff] }
 0x25a   :  { %5263 = vmatmul.mubr.bf16.gmra.mrb[120].mxu0 %v11613_v16  ;;  %v2867_v30 = vmul.f32 %v11821_v19, %v13816_v21  ;;  %v11616_v7 = vld [vmem:[%s19721_s3 + $0x4d8] ss:$20 sps:$4 sm:$0xff]   ;;  %v11824_v21 = vld [vmem:[%s19720_s0 + $0x1d0] sm:$0xff]  ;;  %v13990_v58 = vsub.s32 5, %v19956_v48  ;;  %v11617_v49 = vld [vmem:[%s19721_s3 + $0x8] ss:$20 sps:$4 sm:$0xff]  }
 0x25b   :  { %5272 = vmatprep.mubr.bf16.mxu0 %v11614_v14  ;;  %v2876_v12 = vmul.f32 %v11824_v21, %v13840_v47 }
 0x25c   :  { %2978 = vrot.lane.b32.xlu0 %v2898_v36, %s12087_s9  ;;  %v11823_v36 = vld [vmem:[%s19720_s0 + $0x190] sm:$0xff] }
 0x25d   :  { %2980 = vrot.lane.b32.xlu1 %v2899_v9, %s12087_s9  ;;  %6322 = vmatmul.mubr.bf16.gmra.mrb[120].mxu1 %v11613_v16  ;;  %v2906_v16 = vpack.c.bf16 %v2874_v42, %v2866_v57  ;;  %v2868_v60 = vmul.f32 %v11823_v36, %v13840_v47  ;;  %v11826_v9 = vld [vmem:[%s19720_s0 + $0x1d8] sm:$0xff]  ;;  %v19957_v57 = vld [vmem:[#allocation5_spill] sm:$0xff]  ;;  %v14006_v42 = vsub.s32 7, %v19956_v48 }
 0x25e   :  { %6331 = vmatprep.mubr.bf16.mxu1 %v11614_v14  ;;  %v2907_v14 = vpack.c.bf16 %v2875_v52, %v2867_v30  ;;  %v2877_v59 = vmul.f32 %v11826_v9, %v13844_v31  ;;  %v11620_v31 = vld [vmem:[%s19721_s3 + $0x34] ss:$20 sps:$4 sm:$0xff]   ;;  %v593_v27 = vrot.slane %v19957_v57, %v13990_v58  ;;  %v11622_v52 = vld [vmem:[%s19721_s3 + $0x30] ss:$20 sps:$4 sm:$0xff]   ;;  %v19959_v36 = vld [vmem:[#allocation19_spill] sm:$0xff] }
 0x25f   :  { %v2908_v47 = vpack.c.bf16 %v2876_v12, %v2868_v60  ;;  %v601_v19 = vrot.slane %v19957_v57, %v14006_v42  ;;  %v19958_v30 = vld [vmem:[#allocation10_spill] sm:$0xff]  ;;  %v1525_v60 = vrot.slane %v19959_v36, %v13990_v58  ;;  %v11625_v12 = vld [vmem:[%s19721_s3 + $0x58] ss:$20 sps:$4 sm:$0xff]   ;;  %v1533_v54 = vrot.slane %v19959_v36, %v14006_v42 }
 0x260   :  { %2982 = vrot.lane.b32.xlu0 %v2900_v41, %s12087_s9  ;;  %v2909_v33 = vpack.c.bf16 %v2877_v59, %v2869_v26  ;;  %v13994_v41 = vsub.s32 6, %v19956_v48  ;;  %v1170_v13 = vrot.slane %v19958_v30, %v13990_v58  ;;  %v14047_v26 = vld [vmem:[%s19720_s0 + $0x28] sm:$0xff]  ;;  %v14067_v48 = vld [vmem:[%s19720_s0 + $0x70] sm:$0xff] }
 0x261   :  { %2984 = vrot.lane.b32.xlu1 %v2901_v50, %s12087_s9  ;;  %v14052_v9 = vld [vmem:[%s19720_s0 + $0x68] sm:$0xff] }
 0x262   :  { %5273 = vmatmul.mubr.bf16.gmra.mrb[124].mxu0 %v11616_v7  ;;  %v597_v50 = vrot.slane %v19957_v57, %v13994_v41  ;;  %v1529_v21 = vrot.slane %v19959_v36, %v13994_v41  ;;  %v14057_v59 = vpack.c.bf16 %v14052_v9, %v14047_v26  ;;  %v14134_v36 = vld [vmem:[%s19720_s0 + $0xf8] sm:$0xff] }
 0x263   :  { %5315 = vmatprep.mubr.bf16.mxu0 %v11619_v2 }
 0x264   :  { %2994 = vrot.lane.b32.xlu0 %v2906_v16, %s12087_s9  ;;  %v1178_v16 = vrot.slane %v19958_v30, %v14006_v42  ;;  %1857 = vst [vmem:[#allocation2 + $0x428] sm:$0xff] %v14057_v59 }
 0x265   :  { %2996 = vrot.lane.b32.xlu1 %v2907_v14, %s12087_s9  ;;  %6332 = vmatmul.mubr.bf16.gmra.mrb[124].mxu1 %v11616_v7  ;;  %v11623_v7 = vld [vmem:[%s19721_s3 + $0x5c] ss:$20 sps:$4 sm:$0xff]   ;;  %v11626_v14 = vld [vmem:[%s19721_s3 + $0x84] ss:$20 sps:$4 sm:$0xff]  }
 0x266   :  { %6374 = vmatprep.mubr.bf16.mxu1 %v11619_v2  ;;  %v1174_v2 = vrot.slane %v19958_v30, %v13994_v41  ;;  %v14104_v30 = vld [vmem:[%s19720_s0 + $0xe8] sm:$0xff] }
 0x268   :  { %2998 = vrot.lane.b32.xlu0 %v2908_v47, %s12087_s9  ;;  %v14062_v47 = vld [vmem:[%s19720_s0 + $0x30] sm:$0xff] }
 0x269   :  { %3000 = vrot.lane.b32.xlu1 %v2909_v33, %s12087_s9  ;;  %v14074_v33 = vld [vmem:[%s19720_s0 + $0x38] sm:$0xff] }
 0x26a   :  { %5316 = vmatmul.mubr.bf16.vlgmr.msra.gmra.mrb[0].mxu0 %v11617_v49 }
 0x26b   :  { %5325 = vmatprep.mubr.bf16.mxu0 %v11620_v31 }
 0x26c   :  { %612 = vrot.lane.b32.xlu0 %v593_v27, %s12087_s9  ;;  %v11628_v27 = vld [vmem:[%s19721_s3 + $0x80] ss:$20 sps:$4 sm:$0xff]  }
 0x26d   :  { %614 = vrot.lane.b32.xlu1 %v597_v50, %s12087_s9  ;;  %6375 = vmatmul.mubr.bf16.vlgmr.msra.gmra.mrb[0].mxu1 %v11617_v49  ;;  %v14079_v49 = vld [vmem:[%s19720_s0 + $0x78] sm:$0xff]  ;;  %v11629_v50 = vld [vmem:[%s19721_s3 + $0xac] ss:$20 sps:$4 sm:$0xff]  }
 0x26e   :  { %6384 = vmatprep.mubr.bf16.mxu1 %v11620_v31  ;;  %v14083_v31 = vpack.c.bf16 %v14067_v48, %v14062_v47  ;;  %v14087_v57 = vpack.c.bf16 %v14079_v49, %v14074_v33 }
 0x270   :  { %616 = vrot.lane.b32.xlu0 %v601_v19, %s12087_s9  ;;  %1858 = vst [vmem:[#allocation2 + $0x430] sm:$0xff] %v14083_v31  ;;  %v14099_v19 = vld [vmem:[%s19720_s0 + $0xa8] sm:$0xff]  ;;  %1859 = vst [vmem:[#allocation2 + $0x438] sm:$0xff] %v14087_v57 }
 0x271   :  { %1189 = vrot.lane.b32.xlu1 %v1170_v13, %s12088_s29  ;;  %v14110_v13 = vld [vmem:[%s19720_s0 + $0xb0] sm:$0xff] }
 0x272   :  { %5326 = vmatmul.mubr.bf16.gmra.mrb[4].mxu0 %v11622_v52 }
 0x273   :  { %5335 = vmatprep.mubr.bf16.mxu0 %v11623_v7 }
 0x274   :  { %1191 = vrot.lane.b32.xlu0 %v1174_v2, %s12088_s29 }
 0x275   :  { %6385 = vmatmul.mubr.bf16.gmra.mrb[4].mxu1 %v11622_v52  ;;  %1193 = vrot.lane.b32.xlu1 %v1178_v16, %s12088_s29  ;;  %v14115_v52 = vld [vmem:[%s19720_s0 + $0xf0] sm:$0xff]  ;;  %v14129_v16 = vld [vmem:[%s19720_s0 + $0xb8] sm:$0xff] }
 0x276   :  { %6394 = vmatprep.mubr.bf16.mxu1 %v11623_v7  ;;  %v14119_v7 = vpack.c.bf16 %v14104_v30, %v14099_v19  ;;  %v14123_v2 = vpack.c.bf16 %v14115_v52, %v14110_v13 }
 0x278   :  { %1544 = vrot.lane.b32.xlu0 %v1525_v60, %s12089_s23  ;;  %1865 = vst [vmem:[#allocation2 + $0x468] sm:$0xff] %v14119_v7  ;;  %1866 = vst [vmem:[#allocation2 + $0x470] sm:$0xff] %v14123_v2  ;;  %v14140_v60 = vld [vmem:[%s19720_s0 + $0x128] sm:$0xff] }
 0x279   :  { %1546 = vrot.lane.b32.xlu1 %v1529_v21, %s12089_s23  ;;  %v14145_v21 = vld [vmem:[%s19720_s0 + $0x168] sm:$0xff] }
 0x27a   :  { %5336 = vmatmul.mubr.bf16.gmra.mrb[8].mxu0 %v11625_v12 }
 0x27b   :  { %5345 = vmatprep.mubr.bf16.mxu0 %v11626_v14 }
 0x27c   :  { %1548 = vrot.lane.b32.xlu0 %v1533_v54, %s12089_s23  ;;  %v11631_v54 = vld [vmem:[%s19721_s3 + $0xa8] ss:$20 sps:$4 sm:$0xff]  }
 0x27d   :  { %6395 = vmatmul.mubr.bf16.gmra.mrb[8].mxu1 %v11625_v12  ;;  %v14149_v12 = vpack.c.bf16 %v14134_v36, %v14129_v16 }
 0x27e   :  { %6404 = vmatprep.mubr.bf16.mxu1 %v11626_v14  ;;  %v14153_v14 = vpack.c.bf16 %v14145_v21, %v14140_v60 }
 0x27f   :  { %1867 = vst [vmem:[#allocation2 + $0x478] sm:$0xff] %v14149_v12 }
 0x280   :  { %1873 = vst [vmem:[#allocation2 + $0x4a8] sm:$0xff] %v14153_v14 }
 0x282   :  { %5346 = vmatmul.mubr.bf16.gmra.mrb[12].mxu0 %v11628_v27 }
 0x283   :  { %5355 = vmatprep.mubr.bf16.mxu0 %v11629_v50 }
 0x285   :  { %6405 = vmatmul.mubr.bf16.gmra.mrb[12].mxu1 %v11628_v27  ;;  %v14170_v27 = vld [vmem:[%s19720_s0 + $0x170] sm:$0xff] }
 0x286   :  { %6414 = vmatprep.mubr.bf16.mxu1 %v11629_v50  ;;  %v14176_v50 = vld [vmem:[%s19720_s0 + $0x138] sm:$0xff]  ;;  %v14185_v24 = vpack.c.bf16 %v14170_v27, %v14165_v18 }
 0x287   :  { %v14189_v17 = vpack.c.bf16 %v14181_v61, %v14176_v50 }
 0x288   :  { %1874 = vst [vmem:[#allocation2 + $0x4b0] sm:$0xff] %v14185_v24 }
 0x289   :  { %1875 = vst [vmem:[#allocation2 + $0x4b8] sm:$0xff] %v14189_v17 }
 0x28a   :  { %5356 = vmatmul.mubr.bf16.gmra.mrb[16].mxu0 %v11631_v54 }
 0x28b   :  { %5365 = vmatprep.mubr.bf16.mxu0 %v11632_v1 }
 0x28d   :  { %6415 = vmatmul.mubr.bf16.gmra.mrb[16].mxu1 %v11631_v54  ;;  %v14236_v54 = vld [vmem:[%s19720_s0 + $0x1f8] sm:$0xff] }
 0x28e   :  { %6424 = vmatprep.mubr.bf16.mxu1 %v11632_v1  ;;  %v14241_v1 = vpack.c.bf16 %v14236_v54, %v14231_v38 }
 0x290   :  { %1883 = vst [vmem:[#allocation2 + $0x4f8] sm:$0xff] %v14241_v1 }
 0x292   :  { %5366 = vmatmul.mubr.bf16.gmra.mrb[20].mxu0 %v11634_v63 }
 0x293   :  { %5375 = vmatprep.mubr.bf16.mxu0 %v11635_v51 }
 0x295   :  { %6425 = vmatmul.mubr.bf16.gmra.mrb[20].mxu1 %v11634_v63  ;;  %v11641_v63 = vld [vmem:[%s19721_s3 + $0x14c] ss:$20 sps:$4 sm:$0xff]  }
 0x296   :  { %6434 = vmatprep.mubr.bf16.mxu1 %v11635_v51  ;;  %v11643_v51 = vld [vmem:[%s19721_s3 + $0x148] ss:$20 sps:$4 sm:$0xff]  }
 0x29a   :  { %5376 = vmatmul.mubr.bf16.gmra.mrb[24].mxu0 %v11637_v39 }
 0x29b   :  { %5385 = vmatprep.mubr.bf16.mxu0 %v11638_v3 }
 0x29d   :  { %6435 = vmatmul.mubr.bf16.gmra.mrb[24].mxu1 %v11637_v39  ;;  %v11644_v39 = vld [vmem:[%s19721_s3 + $0x174] ss:$20 sps:$4 sm:$0xff]  }
 0x29e   :  { %6444 = vmatprep.mubr.bf16.mxu1 %v11638_v3  ;;  %v11646_v3 = vld [vmem:[%s19721_s3 + $0x170] ss:$20 sps:$4 sm:$0xff]  }
 0x2a2   :  { %5386 = vmatmul.mubr.bf16.gmra.mrb[28].mxu0 %v11640_v20 }
 0x2a3   :  { %5395 = vmatprep.mubr.bf16.mxu0 %v11641_v63 }
 0x2a5   :  { %6445 = vmatmul.mubr.bf16.gmra.mrb[28].mxu1 %v11640_v20  ;;  %v11647_v20 = vld [vmem:[%s19721_s3 + $0x19c] ss:$20 sps:$4 sm:$0xff]  }
 0x2a6   :  { %6454 = vmatprep.mubr.bf16.mxu1 %v11641_v63  ;;  %v11649_v63 = vld [vmem:[%s19721_s3 + $0x198] ss:$20 sps:$4 sm:$0xff]  }
 0x2aa   :  { %5396 = vmatmul.mubr.bf16.gmra.mrb[32].mxu0 %v11643_v51 }
 0x2ab   :  { %5405 = vmatprep.mubr.bf16.mxu0 %v11644_v39 }
 0x2ad   :  { %6455 = vmatmul.mubr.bf16.gmra.mrb[32].mxu1 %v11643_v51  ;;  %v11650_v51 = vld [vmem:[%s19721_s3 + $0x1c4] ss:$20 sps:$4 sm:$0xff]  }
 0x2ae   :  { %6464 = vmatprep.mubr.bf16.mxu1 %v11644_v39 }
 0x2b2   :  { %5406 = vmatmul.mubr.bf16.gmra.mrb[36].mxu0 %v11646_v3 }
 0x2b3   :  { %5415 = vmatprep.mubr.bf16.mxu0 %v11647_v20 }
 0x2b5   :  { %6465 = vmatmul.mubr.bf16.gmra.mrb[36].mxu1 %v11646_v3 }
 0x2b6   :  { %6474 = vmatprep.mubr.bf16.mxu1 %v11647_v20  ;;  %v11653_v20 = vld [vmem:[%s19721_s3 + $0x1ec] ss:$20 sps:$4 sm:$0xff]  }
 0x2ba   :  { %5416 = vmatmul.mubr.bf16.gmra.mrb[40].mxu0 %v11649_v63 }
 0x2bb   :  { %5425 = vmatprep.mubr.bf16.mxu0 %v11650_v51 }
 0x2bd   :  { %6475 = vmatmul.mubr.bf16.gmra.mrb[40].mxu1 %v11649_v63 }
 0x2be   :  { %v2947_v39 = vpop.permute.xlu0 %2946  ;;  %v2949_v44 = vpop.permute.xlu1 %2948  ;;  %6484 = vmatprep.mubr.bf16.mxu1 %v11650_v51 }
 0x2bf   :  { %3072 = vst.msk [vmem:[#allocation2 + $0x800] sm:$0xff] %vm3071_vm11, %v2947_v39  ;;  %v3011_v3 = vsel %vm618_vm0, %v2947_v39, %v2949_v44  ;;  %v11655_v39 = vld [vmem:[%s19721_s3 + $0x1e8] ss:$20 sps:$4 sm:$0xff]  }
 0x2c0   :  { %5636 = vmatprep.subr.bf16.mxu0 %v3011_v3 }
 0x2c2   :  { %v2951_v8 = vpop.permute.xlu0 %2950  ;;  %5426 = vmatmul.mubr.bf16.gmra.mrb[44].mxu0 %v11652_v10 }
 0x2c3   :  { %v3012_v63 = vsel %vm618_vm0, %v2949_v44, %v2951_v8  ;;  %v14283_v40 = vpop.permute.xlu1 %2952  ;;  %5435 = vmatprep.mubr.bf16.mxu0 %v11653_v20  ;;  %v11656_v44 = vld [vmem:[%s19721_s3 + $0x214] ss:$20 sps:$4 sm:$0xff]  }
 0x2c4   :  { %19960 = vst [vmem:[#allocation4_spill] sm:$0xff] %v14283_v40  ;;  %v3013_v53 = vsel %vm618_vm0, %v2951_v8, %v14283_v40 }
 0x2c5   :  { %6485 = vmatmul.mubr.bf16.gmra.mrb[44].mxu1 %v11652_v10  ;;  %6695 = vmatprep.subr.bf16.mxu1 %v3013_v53 }
 0x2c6   :  { %v2963_v51 = vpop.permute.xlu0 %2962  ;;  %v3552_v5 = vld [vmem:[#allocation2 + $0x800] sm:$0xff]  ;;  %6696 = vmatpush1.bf16.msra.mxu1 %v3012_v63  ;;  %6494 = vmatprep.mubr.bf16.mxu1 %v11653_v20 }
 0x2c7   :  { %3080 = vst.msk [vmem:[#allocation2 + $0x840] sm:$0xff] %vm3071_vm11, %v2963_v51  ;;  %v2965_v3 = vpop.permute.xlu1 %2964  ;;  %5637 = vmatpush1.bf16.msra.mxu0 %v3552_v5 }
 0x2c8   :  { %v3018_v8 = vsel %vm618_vm0, %v2963_v51, %v2965_v3  ;;  %v11658_v51 = vld [vmem:[%s19721_s3 + $0x210] ss:$20 sps:$4 sm:$0xff]  }
 0x2c9   :  { %5638 = vmatprep.subr.bf16.mxu0 %v3018_v8 }
 0x2ca   :  { %v2967_v53 = vpop.permute.xlu0 %2966  ;;  %5436 = vmatmul.mubr.bf16.gmra.mrb[48].mxu0 %v11655_v39 }
 0x2cb   :  { %v3019_v10 = vsel %vm618_vm0, %v2965_v3, %v2967_v53  ;;  %v14296_v63 = vpop.permute.xlu1 %2968  ;;  %5445 = vmatprep.mubr.bf16.mxu0 %v11656_v44  ;;  %v11659_v3 = vld [vmem:[%s19721_s3 + $0x23c] ss:$20 sps:$4 sm:$0xff]  }
 0x2cc   :  { %19961 = vst [vmem:[#allocation5_spill] sm:$0xff] %v14296_v63  ;;  %v3020_v20 = vsel %vm618_vm0, %v2967_v53, %v14296_v63 }
 0x2cd   :  { %6495 = vmatmul.mubr.bf16.gmra.mrb[48].mxu1 %v11655_v39  ;;  %6697 = vmatprep.subr.bf16.mxu1 %v3020_v20 }
 0x2ce   :  { %v2979_v5 = vpop.permute.xlu0 %2978  ;;  %v3560_v40 = vld [vmem:[#allocation2 + $0x840] sm:$0xff]  ;;  %6698 = vmatpush1.bf16.msra.mxu1 %v3019_v10  ;;  %6504 = vmatprep.mubr.bf16.mxu1 %v11656_v44 }
 0x2cf   :  { %3088 = vst.msk [vmem:[#allocation2 + $0x880] sm:$0xff] %vm3071_vm11, %v2979_v5  ;;  %v2981_v8 = vpop.permute.xlu1 %2980  ;;  %5639 = vmatpush1.bf16.msra.mxu0 %v3560_v40 }
 0x2d0   :  { %v3025_v53 = vsel %vm618_vm0, %v2979_v5, %v2981_v8  ;;  %v11661_v5 = vld [vmem:[%s19721_s3 + $0x238] ss:$20 sps:$4 sm:$0xff]  }
 0x2d1   :  { %5640 = vmatprep.subr.bf16.mxu0 %v3025_v53 }
 0x2d2   :  { %v2983_v39 = vpop.permute.xlu0 %2982  ;;  %5446 = vmatmul.mubr.bf16.gmra.mrb[52].mxu0 %v11658_v51 }
 0x2d3   :  { %v3026_v10 = vsel %vm618_vm0, %v2981_v8, %v2983_v39  ;;  %v14309_v20 = vpop.permute.xlu1 %2984  ;;  %5455 = vmatprep.mubr.bf16.mxu0 %v11659_v3  ;;  %v11662_v8 = vld [vmem:[%s19721_s3 + $0x264] ss:$20 sps:$4 sm:$0xff]  }
 0x2d4   :  { %19962 = vst [vmem:[#allocation10_spill] sm:$0xff] %v14309_v20  ;;  %v3027_v44 = vsel %vm618_vm0, %v2983_v39, %v14309_v20 }
 0x2d5   :  { %6505 = vmatmul.mubr.bf16.gmra.mrb[52].mxu1 %v11658_v51  ;;  %6699 = vmatprep.subr.bf16.mxu1 %v3027_v44 }
 0x2d6   :  { %v2995_v40 = vpop.permute.xlu0 %2994  ;;  %v3568_v63 = vld [vmem:[#allocation2 + $0x880] sm:$0xff]  ;;  %6700 = vmatpush1.bf16.msra.mxu1 %v3026_v10  ;;  %6514 = vmatprep.mubr.bf16.mxu1 %v11659_v3 }
 0x2d7   :  { %3096 = vst.msk [vmem:[#allocation2 + $0x8c0] sm:$0xff] %vm3071_vm11, %v2995_v40  ;;  %v2997_v53 = vpop.permute.xlu1 %2996  ;;  %5641 = vmatpush1.bf16.msra.mxu0 %v3568_v63 }
 0x2d8   :  { %v3032_v39 = vsel %vm618_vm0, %v2995_v40, %v2997_v53  ;;  %v11664_v40 = vld [vmem:[%s19721_s3 + $0x260] ss:$20 sps:$4 sm:$0xff]  }
 0x2d9   :  { %5642 = vmatprep.subr.bf16.mxu0 %v3032_v39  ;;  %v19964_v39 = vld [vmem:[#allocation22_spill] sm:$0xff] }
 0x2da   :  { %v2999_v51 = vpop.permute.xlu0 %2998  ;;  %5456 = vmatmul.mubr.bf16.gmra.mrb[56].mxu0 %v11661_v5 }
 0x2db   :  { %v3033_v10 = vsel %vm618_vm0, %v2997_v53, %v2999_v51  ;;  %v14322_v44 = vpop.permute.xlu1 %3000  ;;  %5465 = vmatprep.mubr.bf16.mxu0 %v11662_v8 }
 0x2dc   :  { %19963 = vst [vmem:[#allocation19_spill] sm:$0xff] %v14322_v44  ;;  %v3034_v3 = vsel %vm618_vm0, %v2999_v51, %v14322_v44 }
 0x2dd   :  { %6515 = vmatmul.mubr.bf16.gmra.mrb[56].mxu1 %v11661_v5  ;;  %6701 = vmatprep.subr.bf16.mxu1 %v3034_v3 }
 0x2de   :  { %v613_v63 = vpop.permute.xlu0 %612  ;;  %v3576_v20 = vld [vmem:[#allocation2 + $0x8c0] sm:$0xff]  ;;  %6702 = vmatpush1.bf16.msra.mxu1 %v3033_v10  ;;  %6524 = vmatprep.mubr.bf16.mxu1 %v11662_v8 }
 0x2df   :  { %v623_v37 = vsel %vm618_vm0, %v19964_v39, %v613_v63  ;;  %v615_v53 = vpop.permute.xlu1 %614  ;;  %5643 = vmatpush1.bf16.msra.mxu0 %v3576_v20 }
 0x2e0   :  { %v624_v5 = vsel %vm618_vm0, %v613_v63, %v615_v53  ;;  %v639_v51 = vmul.f32 %v623_v37, %v14047_v26  ;;  %v647_v10 = vmul.f32 %v623_v37, %v14052_v9  ;;  %v655_v28 = vmul.f32 %v623_v37, %v14099_v19 }
 0x2e1   :  { %v640_v3 = vmul.f32 %v624_v5, %v14062_v47  ;;  %v648_v44 = vmul.f32 %v624_v5, %v14067_v48  ;;  %v663_v35 = vmul.f32 %v623_v37, %v14104_v30  ;;  %v656_v6 = vmul.f32 %v624_v5, %v14110_v13 }
 0x2e2   :  { %v617_v8 = vpop.permute.xlu0 %616  ;;  %v703_v55 = vpack.c.bf16 %v647_v10, %v639_v51  ;;  %5466 = vmatmul.mubr.bf16.gmra.mrb[60].mxu0 %v11664_v40  ;;  %v664_v34 = vmul.f32 %v624_v5, %v14115_v52  ;;  %v679_v32 = vmul.f32 %v623_v37, %v14145_v21 }
 0x2e3   :  { %v625_v39 = vsel %vm618_vm0, %v615_v53, %v617_v8  ;;  %v704_v20 = vpack.c.bf16 %v648_v44, %v640_v3  ;;  %5475 = vmatprep.mubr.bf16.mxu0 %v11665_v0  ;;  %v711_v10 = vpack.c.bf16 %v663_v35, %v655_v28  ;;  %v11668_v3 = vld [vmem:[%s19721_s3 + $0x2b4] ss:$20 sps:$4 sm:$0xff]  }
 0x2e4   :  { %772 = vrot.lane.b32.xlu1 %v703_v55, %s12091_s25  ;;  %v641_v63 = vmul.f32 %v625_v39, %v14074_v33  ;;  %v649_v43 = vmul.f32 %v625_v39, %v14079_v49  ;;  %v657_v44 = vmul.f32 %v625_v39, %v14129_v16  ;;  %v665_v53 = vmul.f32 %v625_v39, %v14134_v36  ;;  %v11667_v55 = vld [vmem:[%s19721_s3 + $0x288] ss:$20 sps:$4 sm:$0xff]  }
 0x2e5   :  { %774 = vrot.lane.b32.xlu0 %v704_v20, %s12091_s25  ;;  %6525 = vmatmul.mubr.bf16.gmra.mrb[60].mxu1 %v11664_v40  ;;  %v712_v8 = vpack.c.bf16 %v664_v34, %v656_v6  ;;  %v672_v20 = vmul.f32 %v624_v5, %v14165_v18  ;;  %v673_v35 = vmul.f32 %v625_v39, %v14176_v50 }
 0x2e6   :  { %v705_v51 = vpack.c.bf16 %v649_v43, %v641_v63  ;;  %6534 = vmatprep.mubr.bf16.mxu1 %v11665_v0  ;;  %v713_v40 = vpack.c.bf16 %v665_v53, %v657_v44  ;;  %v680_v43 = vmul.f32 %v624_v5, %v14170_v27  ;;  %v671_v63 = vmul.f32 %v623_v37, %v14140_v60  ;;  %v11670_v0 = vld [vmem:[%s19721_s3 + $0x2b0] ss:$20 sps:$4 sm:$0xff]  }
 0x2e7   :  { %v681_v28 = vmul.f32 %v625_v39, %v14181_v61  ;;  %v687_v44 = vmul.f32 %v623_v37, %v14195_v46  ;;  %v695_v53 = vmul.f32 %v623_v37, %v14200_v25 }
 0x2e8   :  { %776 = vrot.lane.b32.xlu1 %v705_v51, %s12091_s25  ;;  %v720_v34 = vpack.c.bf16 %v680_v43, %v672_v20  ;;  %v719_v6 = vpack.c.bf16 %v679_v32, %v671_v63  ;;  %v11671_v51 = vld [vmem:[%s19721_s3 + $0x2dc] ss:$20 sps:$4 sm:$0xff]   ;;  %v696_v32 = vmul.f32 %v624_v5, %v14211_v4  ;;  %v11674_v43 = vld [vmem:[%s19721_s3 + $0x304] ss:$20 sps:$4 sm:$0xff]   ;;  %v11677_v63 = vld [vmem:[%s19721_s3 + $0x32c] ss:$20 sps:$4 sm:$0xff]  }
 0x2e9   :  { %788 = vrot.lane.b32.xlu0 %v711_v10, %s12091_s25  ;;  %v721_v10 = vpack.c.bf16 %v681_v28, %v673_v35  ;;  %v19965_v35 = vld [vmem:[#allocation23_spill] sm:$0xff] }
 0x2ea   :  { %5476 = vmatmul.mubr.bf16.gmra.mrb[64].mxu0 %v11667_v55 }
 0x2eb   :  { %5485 = vmatprep.mubr.bf16.mxu0 %v11668_v3 }
 0x2ec   :  { %790 = vrot.lane.b32.xlu1 %v712_v8, %s12091_s25  ;;  %v688_v8 = vmul.f32 %v624_v5, %v14206_v45  ;;  %v11673_v5 = vld [vmem:[%s19721_s3 + $0x2d8] ss:$20 sps:$4 sm:$0xff]  }
 0x2ed   :  { %792 = vrot.lane.b32.xlu0 %v713_v40, %s12091_s25  ;;  %6535 = vmatmul.mubr.bf16.gmra.mrb[64].mxu1 %v11667_v55  ;;  %v689_v55 = vmul.f32 %v625_v39, %v14231_v38  ;;  %v727_v40 = vpack.c.bf16 %v695_v53, %v687_v44 }
 0x2ee   :  { %6544 = vmatprep.mubr.bf16.mxu1 %v11668_v3  ;;  %v697_v3 = vmul.f32 %v625_v39, %v14236_v54  ;;  %v728_v37 = vpack.c.bf16 %v696_v32, %v688_v8  ;;  %v11676_v39 = vld [vmem:[%s19721_s3 + $0x300] ss:$20 sps:$4 sm:$0xff]  }
 0x2f0   :  { %804 = vrot.lane.b32.xlu1 %v719_v6, %s12091_s25  ;;  %v729_v20 = vpack.c.bf16 %v697_v3, %v689_v55 }
 0x2f1   :  { %806 = vrot.lane.b32.xlu0 %v720_v34, %s12091_s25 }
 0x2f2   :  { %5486 = vmatmul.mubr.bf16.gmra.mrb[68].mxu0 %v11670_v0 }
 0x2f3   :  { %5495 = vmatprep.mubr.bf16.mxu0 %v11671_v51 }
 0x2f4   :  { %808 = vrot.lane.b32.xlu1 %v721_v10, %s12091_s25 }
 0x2f5   :  { %820 = vrot.lane.b32.xlu0 %v727_v40, %s12091_s25  ;;  %6545 = vmatmul.mubr.bf16.gmra.mrb[68].mxu1 %v11670_v0 }
 0x2f6   :  { %6554 = vmatprep.mubr.bf16.mxu1 %v11671_v51 }
 0x2f8   :  { %822 = vrot.lane.b32.xlu1 %v728_v37, %s12091_s25  ;;  %v11685_v37 = vld [vmem:[%s19721_s3 + $0x378] ss:$20 sps:$4 sm:$0xff]  }
 0x2f9   :  { %824 = vrot.lane.b32.xlu0 %v729_v20, %s12091_s25 }
 0x2fa   :  { %5496 = vmatmul.mubr.bf16.gmra.mrb[72].mxu0 %v11673_v5 }
 0x2fb   :  { %5505 = vmatprep.mubr.bf16.mxu0 %v11674_v43 }
 0x2fc   :  { %994 = vrot.lane.b32.xlu1 %v14057_v59, %s12090_s24  ;;  %v1190_v59 = vpop.permute.xlu1 %1189 }
 0x2fd   :  { %996 = vrot.lane.b32.xlu0 %v14083_v31, %s12090_s24  ;;  %6555 = vmatmul.mubr.bf16.gmra.mrb[72].mxu1 %v11673_v5  ;;  %v11679_v31 = vld [vmem:[%s19721_s3 + $0x328] ss:$20 sps:$4 sm:$0xff]   ;;  %v1200_v28 = vsel %vm1195_vm2, %v19965_v35, %v1190_v59  ;;  %v11686_v5 = vld [vmem:[%s19721_s3 + $0x3a4] ss:$20 sps:$4 sm:$0xff]  }
 0x2fe   :  { %6564 = vmatprep.mubr.bf16.mxu1 %v11674_v43  ;;  %v1216_v6 = vmul.f32 %v1200_v28, %v14047_v26  ;;  %v1224_v0 = vmul.f32 %v1200_v28, %v14052_v9  ;;  %v1232_v8 = vmul.f32 %v1200_v28, %v14099_v19  ;;  %v1240_v32 = vmul.f32 %v1200_v28, %v14104_v30 }
 0x300   :  { %998 = vrot.lane.b32.xlu1 %v14087_v57, %s12090_s24  ;;  %v11680_v57 = vld [vmem:[%s19721_s3 + $0x354] ss:$20 sps:$4 sm:$0xff]   ;;  %v1280_v10 = vpack.c.bf16 %v1224_v0, %v1216_v6  ;;  %v1288_v20 = vpack.c.bf16 %v1240_v32, %v1232_v8  ;;  %v1264_v0 = vmul.f32 %v1200_v28, %v14195_v46 }
 0x301   :  { %1010 = vrot.lane.b32.xlu0 %v14119_v7, %s12090_s24  ;;  %v1192_v7 = vpop.permute.xlu0 %1191  ;;  %v11688_v6 = vld [vmem:[%s19721_s3 + $0x3a0] ss:$20 sps:$4 sm:$0xff]  }
 0x302   :  { %5506 = vmatmul.mubr.bf16.gmra.mrb[76].mxu0 %v11676_v39 }
 0x303   :  { %5515 = vmatprep.mubr.bf16.mxu0 %v11677_v63 }
 0x304   :  { %1012 = vrot.lane.b32.xlu1 %v14123_v2, %s12090_s24  ;;  %v14419_v2 = vsel %vm1195_vm2, %v1190_v59, %v1192_v7 }
 0x305   :  { %1014 = vrot.lane.b32.xlu0 %v14149_v12, %s12090_s24  ;;  %6565 = vmatmul.mubr.bf16.gmra.mrb[76].mxu1 %v11676_v39  ;;  %v1194_v12 = vpop.permute.xlu1 %1193  ;;  %v1225_v34 = vmul.f32 %v14419_v2, %v14067_v48  ;;  %v1241_v3 = vmul.f32 %v14419_v2, %v14115_v52  ;;  %v1257_v59 = vmul.f32 %v14419_v2, %v14170_v27  ;;  %v1545_v35 = vpop.permute.xlu0 %1544 }
 0x306   :  { %6574 = vmatprep.mubr.bf16.mxu1 %v11677_v63  ;;  %v1249_v63 = vmul.f32 %v14419_v2, %v14165_v18 }
 0x308   :  { %1026 = vrot.lane.b32.xlu1 %v14153_v14, %s12090_s24  ;;  %v1202_v14 = vsel %vm1195_vm2, %v1192_v7, %v1194_v12 }
 0x309   :  { %1028 = vrot.lane.b32.xlu0 %v14185_v24, %s12090_s24  ;;  %v1217_v24 = vmul.f32 %v14419_v2, %v14062_v47  ;;  %v1218_v44 = vmul.f32 %v1202_v14, %v14074_v33  ;;  %v1226_v53 = vmul.f32 %v1202_v14, %v14079_v49  ;;  %v1242_v40 = vmul.f32 %v1202_v14, %v14134_v36  ;;  %v1549_v32 = vpop.permute.xlu0 %1548 }
 0x30a   :  { %5516 = vmatmul.mubr.bf16.gmra.mrb[80].mxu0 %v11679_v31  ;;  %v1250_v7 = vmul.f32 %v1202_v14, %v14176_v50  ;;  %v1258_v12 = vmul.f32 %v1202_v14, %v14181_v61  ;;  %v1266_v8 = vmul.f32 %v1202_v14, %v14231_v38 }
 0x30b   :  { %5525 = vmatprep.mubr.bf16.mxu0 %v11680_v57  ;;  %v1281_v51 = vpack.c.bf16 %v1225_v34, %v1217_v24  ;;  %v1282_v55 = vpack.c.bf16 %v1226_v53, %v1218_v44  ;;  %v1297_v24 = vpack.c.bf16 %v1257_v59, %v1249_v63  ;;  %v11689_v44 = vld [vmem:[%s19721_s3 + $0x3cc] ss:$20 sps:$4 sm:$0xff]  }
 0x30c   :  { %1030 = vrot.lane.b32.xlu1 %v14189_v17, %s12090_s24  ;;  %v11682_v17 = vld [vmem:[%s19721_s3 + $0x350] ss:$20 sps:$4 sm:$0xff]   ;;  %v1298_v53 = vpack.c.bf16 %v1258_v12, %v1250_v7 }
 0x30d   :  { %1042 = vrot.lane.b32.xlu0 %v14215_v15, %s12090_s24  ;;  %6575 = vmatmul.mubr.bf16.gmra.mrb[80].mxu1 %v11679_v31  ;;  %v11683_v15 = vld [vmem:[%s19721_s3 + $0x37c] ss:$20 sps:$4 sm:$0xff]   ;;  %v1248_v31 = vmul.f32 %v1200_v28, %v14140_v60 }
 0x30e   :  { %6584 = vmatprep.mubr.bf16.mxu1 %v11680_v57  ;;  %v1256_v57 = vmul.f32 %v1200_v28, %v14145_v21 }
 0x310   :  { %1044 = vrot.lane.b32.xlu1 %v14219_v22, %s12090_s24  ;;  %v1233_v22 = vmul.f32 %v14419_v2, %v14110_v13  ;;  %v1296_v34 = vpack.c.bf16 %v1256_v57, %v1248_v31 }
 0x311   :  { %1046 = vrot.lane.b32.xlu0 %v14241_v1, %s12090_s24  ;;  %v1234_v1 = vmul.f32 %v1202_v14, %v14129_v16 }
 0x312   :  { %5526 = vmatmul.mubr.bf16.gmra.mrb[84].mxu0 %v11682_v17  ;;  %v1289_v43 = vpack.c.bf16 %v1241_v3, %v1233_v22  ;;  %v1555_v22 = vsel %vm1550_vm3, %v12613_v62, %v1545_v35 }
 0x313   :  { %5535 = vmatprep.mubr.bf16.mxu0 %v11683_v15  ;;  %v1290_v39 = vpack.c.bf16 %v1242_v40, %v1234_v1  ;;  %v1579_v62 = vmul.f32 %v1555_v22, %v14052_v9  ;;  %v1587_v9 = vmul.f32 %v1555_v22, %v14099_v19  ;;  %v1595_v63 = vmul.f32 %v1555_v22, %v14104_v30  ;;  %v11694_v19 = vld [vmem:[%s19721_s3 + $0x3f0] ss:$20 sps:$4 sm:$0xff]  }
 0x314   :  { %1349 = vrot.lane.b32.xlu1 %v1280_v10, %s12092_s26  ;;  %v1273_v10 = vmul.f32 %v14419_v2, %v14211_v4  ;;  %v1603_v12 = vmul.f32 %v1555_v22, %v14140_v60  ;;  %v1619_v60 = vmul.f32 %v1555_v22, %v14195_v46 }
 0x315   :  { %1351 = vrot.lane.b32.xlu0 %v1281_v51, %s12092_s26  ;;  %6585 = vmatmul.mubr.bf16.gmra.mrb[84].mxu1 %v11682_v17  ;;  %v1272_v17 = vmul.f32 %v1200_v28, %v14200_v25  ;;  %v1265_v51 = vmul.f32 %v14419_v2, %v14206_v45  ;;  %v1274_v28 = vmul.f32 %v1202_v14, %v14236_v54 }
 0x316   :  { %6594 = vmatprep.mubr.bf16.mxu1 %v11683_v15  ;;  %v1547_v15 = vpop.permute.xlu1 %1546  ;;  %v1643_v30 = vpack.c.bf16 %v1595_v63, %v1587_v9 }
 0x317   :  { %v1304_v3 = vpack.c.bf16 %v1272_v17, %v1264_v0  ;;  %v1305_v1 = vpack.c.bf16 %v1273_v10, %v1265_v51  ;;  %v1557_v2 = vsel %vm1550_vm3, %v1547_v15, %v1549_v32  ;;  %v1306_v40 = vpack.c.bf16 %v1274_v28, %v1266_v8  ;;  %v11703_v8 = vld [vmem:[%s19721_s3 + $0x468] ss:$20 sps:$4 sm:$0xff]  }
 0x318   :  { %1353 = vrot.lane.b32.xlu1 %v1282_v55, %s12092_s26  ;;  %v14491_v55 = vsel %vm1550_vm3, %v1545_v35, %v1547_v15  ;;  %v1597_v57 = vmul.f32 %v1557_v2, %v14134_v36  ;;  %v1611_v35 = vmul.f32 %v1555_v22, %v14145_v21  ;;  %v1627_v21 = vmul.f32 %v1555_v22, %v14200_v25  ;;  %v11704_v28 = vld [vmem:[%s19721_s3 + $0x494] ss:$20 sps:$4 sm:$0xff]  }
 0x319   :  { %1365 = vrot.lane.b32.xlu0 %v1288_v20, %s12092_s26  ;;  %v1572_v14 = vmul.f32 %v14491_v55, %v14062_v47  ;;  %v1571_v20 = vmul.f32 %v1555_v22, %v14047_v26  ;;  %v1573_v47 = vmul.f32 %v1557_v2, %v14074_v33  ;;  %v1588_v31 = vmul.f32 %v14491_v55, %v14110_v13  ;;  %v11695_v13 = vld [vmem:[%s19721_s3 + $0x41c] ss:$20 sps:$4 sm:$0xff]   ;;  %v3282_v22 = vld [vmem:[%s19721_s3 + $0x4a4] sm:$0xff] }
 0x31a   :  { %5536 = vmatmul.mubr.bf16.gmra.mrb[88].mxu0 %v11685_v37  ;;  %v1596_v33 = vmul.f32 %v14491_v55, %v14115_v52  ;;  %v1612_v36 = vmul.f32 %v14491_v55, %v14170_v27  ;;  %v11697_v27 = vld [vmem:[%s19721_s3 + $0x418] ss:$20 sps:$4 sm:$0xff]   ;;  %v1620_v0 = vmul.f32 %v14491_v55, %v14206_v45  ;;  %v1628_v17 = vmul.f32 %v14491_v55, %v14211_v4  ;;  %v11700_v4 = vld [vmem:[%s19721_s3 + $0x440] ss:$20 sps:$4 sm:$0xff]  }
 0x31b   :  { %5545 = vmatprep.mubr.bf16.mxu0 %v11686_v5  ;;  %v1621_v15 = vmul.f32 %v1557_v2, %v14231_v38  ;;  %v1629_v46 = vmul.f32 %v1557_v2, %v14236_v54  ;;  %v1659_v25 = vpack.c.bf16 %v1627_v21, %v1619_v60  ;;  %v11701_v45 = vld [vmem:[%s19721_s3 + $0x46c] ss:$20 sps:$4 sm:$0xff]   ;;  %v1912_v38 = vrot.slane %v12932_v23, %v13990_v58 }
 0x31c   :  { %1367 = vrot.lane.b32.xlu1 %v1289_v43, %s12092_s26  ;;  %v11692_v43 = vld [vmem:[%s19721_s3 + $0x3f4] ss:$20 sps:$4 sm:$0xff]   ;;  %v1644_v52 = vpack.c.bf16 %v1596_v33, %v1588_v31  ;;  %v1916_v54 = vrot.slane %v12932_v23, %v13994_v41  ;;  %v1920_v51 = vrot.slane %v12932_v23, %v14006_v42  ;;  %v2266_v10 = vrot.slane %v12953_v29, %v13990_v58  ;;  %v11712_v60 = vld [vmem:[%s19721_s3 + $0x38] ss:$20 sps:$4 sm:$0xff]  }
 0x31d   :  { %1369 = vrot.lane.b32.xlu0 %v1290_v39, %s12092_s26  ;;  %6595 = vmatmul.mubr.bf16.gmra.mrb[88].mxu1 %v11685_v37  ;;  %v1580_v37 = vmul.f32 %v14491_v55, %v14067_v48  ;;  %v1581_v39 = vmul.f32 %v1557_v2, %v14079_v49  ;;  %v1635_v48 = vpack.c.bf16 %v1579_v62, %v1571_v20 }
 0x31e   :  { %6604 = vmatprep.mubr.bf16.mxu1 %v11686_v5  ;;  %v11691_v5 = vld [vmem:[%s19721_s3 + $0x3c8] ss:$20 sps:$4 sm:$0xff]   ;;  %v1589_v49 = vmul.f32 %v1557_v2, %v14129_v16  ;;  %v1604_v16 = vmul.f32 %v14491_v55, %v14165_v18  ;;  %v1651_v18 = vpack.c.bf16 %v1611_v35, %v1603_v12  ;;  %v2270_v23 = vrot.slane %v12953_v29, %v13994_v41  ;;  %v3279_v55 = vld [vmem:[%s19721_s3 + $0x490] sm:$0xff] }
 0x31f   :  { %v1636_v26 = vpack.c.bf16 %v1580_v37, %v1572_v14  ;;  %v1637_v59 = vpack.c.bf16 %v1581_v39, %v1573_v47  ;;  %v2274_v32 = vrot.slane %v12953_v29, %v14006_v42  ;;  %v11706_v29 = vld [vmem:[%s19721_s3 + $0x4bc] ss:$20 sps:$4 sm:$0xff]   ;;  %v11709_v37 = vld [vmem:[%s19721_s3 + $0x4e4] ss:$20 sps:$4 sm:$0xff]  }
 0x320   :  { %1381 = vrot.lane.b32.xlu1 %v1296_v34, %s12092_s26  ;;  %v1645_v7 = vpack.c.bf16 %v1597_v57, %v1589_v49  ;;  %v1613_v34 = vmul.f32 %v1557_v2, %v14181_v61  ;;  %v3291_v47 = vld [vmem:[%s19721_s3 + $0x4e0] sm:$0xff] }
 0x321   :  { %1383 = vrot.lane.b32.xlu0 %v1297_v24, %s12092_s26  ;;  %v1605_v24 = vmul.f32 %v1557_v2, %v14176_v50  ;;  %v11698_v50 = vld [vmem:[%s19721_s3 + $0x444] ss:$20 sps:$4 sm:$0xff]  }
 0x322   :  { %5546 = vmatmul.mubr.bf16.gmra.mrb[92].mxu0 %v11688_v6  ;;  %v11708_v2 = vld [vmem:[%s19721_s3 + $0x4b8] ss:$20 sps:$4 sm:$0xff]   ;;  %v19968_v57 = vld [vmem:[#allocation12_spill] sm:$0xff] }
 0x323   :  { %5555 = vmatprep.mubr.bf16.mxu0 %v11689_v44  ;;  %v1653_v61 = vpack.c.bf16 %v1613_v34, %v1605_v24 }
 0x324   :  { %1385 = vrot.lane.b32.xlu1 %v1298_v53, %s12092_s26  ;;  %v1661_v53 = vpack.c.bf16 %v1629_v46, %v1621_v15 }
 0x325   :  { %1397 = vrot.lane.b32.xlu0 %v1304_v3, %s12092_s26  ;;  %6605 = vmatmul.mubr.bf16.gmra.mrb[92].mxu1 %v11688_v6  ;;  %v1652_v6 = vpack.c.bf16 %v1612_v36, %v1604_v16  ;;  %v14598_v3 = vcombine.low %v3279_v55, %v3282_v22  ;;  %v19969_v36 = vld [vmem:[#allocation13_spill] sm:$0xff] }
 0x326   :  { %6614 = vmatprep.mubr.bf16.mxu1 %v11689_v44  ;;  %v1660_v44 = vpack.c.bf16 %v1628_v17, %v1620_v0 }
 0x327   :  { %19966 = vst [vmem:[#allocation22_spill] sm:$0xff] %v14598_v3 }
 0x328   :  { %1399 = vrot.lane.b32.xlu1 %v1305_v1, %s12092_s26 }
 0x329   :  { %1401 = vrot.lane.b32.xlu0 %v1306_v40, %s12092_s26 }
 0x32a   :  { %5556 = vmatmul.mubr.bf16.gmra.mrb[96].mxu0 %v11691_v5 }
 0x32b   :  { %5565 = vmatprep.mubr.bf16.mxu0 %v11692_v43 }
 0x32c   :  { %1704 = vrot.lane.b32.xlu1 %v1635_v48, %s12093_s27 }
 0x32d   :  { %1706 = vrot.lane.b32.xlu0 %v1636_v26, %s12093_s27  ;;  %6615 = vmatmul.mubr.bf16.gmra.mrb[96].mxu1 %v11691_v5 }
 0x32e   :  { %6624 = vmatprep.mubr.bf16.mxu1 %v11692_v43 }
 0x330   :  { %1708 = vrot.lane.b32.xlu1 %v1637_v59, %s12093_s27 }
 0x331   :  { %1720 = vrot.lane.b32.xlu0 %v1643_v30, %s12093_s27 }
 0x332   :  { %5566 = vmatmul.mubr.bf16.gmra.mrb[100].mxu0 %v11694_v19 }
 0x333   :  { %5575 = vmatprep.mubr.bf16.mxu0 %v11695_v13 }
 0x334   :  { %1722 = vrot.lane.b32.xlu1 %v1644_v52, %s12093_s27  ;;  %v11711_v52 = vld [vmem:[%s19721_s3 + $0x10] ss:$20 sps:$4 sm:$0xff]  }
 0x335   :  { %1724 = vrot.lane.b32.xlu0 %v1645_v7, %s12093_s27  ;;  %6625 = vmatmul.mubr.bf16.gmra.mrb[100].mxu1 %v11694_v19  ;;  %v14632_v19 = vld [vmem:[#allocation2 + $0xb8] sm:$0xff] }
 0x336   :  { %6634 = vmatprep.mubr.bf16.mxu1 %v11695_v13 }
 0x338   :  { %1736 = vrot.lane.b32.xlu1 %v1651_v18, %s12093_s27 }
 0x339   :  { %1738 = vrot.lane.b32.xlu0 %v1652_v6, %s12093_s27 }
 0x33a   :  { %5576 = vmatmul.mubr.bf16.gmra.mrb[104].mxu0 %v11697_v27 }
 0x33b   :  { %5585 = vmatprep.mubr.bf16.mxu0 %v11698_v50 }
 0x33c   :  { %1740 = vrot.lane.b32.xlu1 %v1653_v61, %s12093_s27 }
 0x33d   :  { %1752 = vrot.lane.b32.xlu0 %v1659_v25, %s12093_s27  ;;  %6635 = vmatmul.mubr.bf16.gmra.mrb[104].mxu1 %v11697_v27 }
 0x33e   :  { %6644 = vmatprep.mubr.bf16.mxu1 %v11698_v50  ;;  %v19970_v50 = vld [vmem:[#allocation18_spill] sm:$0xff] }
 0x340   :  { %1754 = vrot.lane.b32.xlu1 %v1660_v44, %s12093_s27  ;;  %v19971_v44 = vld [vmem:[#allocation21_spill] sm:$0xff] }
 0x341   :  { %1756 = vrot.lane.b32.xlu0 %v1661_v53, %s12093_s27 }
 0x342   :  { %5586 = vmatmul.mubr.bf16.gmra.mrb[108].mxu0 %v11700_v4 }
 0x343   :  { %5595 = vmatprep.mubr.bf16.mxu0 %v11701_v45 }
 0x344   :  { %1931 = vrot.lane.b32.xlu1 %v1912_v38, %s12093_s27  ;;  %v11713_v38 = vld [vmem:[%s19721_s3 + $0x60] ss:$20 sps:$4 sm:$0xff]  }
 0x345   :  { %1933 = vrot.lane.b32.xlu0 %v1916_v54, %s12093_s27  ;;  %6645 = vmatmul.mubr.bf16.gmra.mrb[108].mxu1 %v11700_v4 }
 0x346   :  { %6654 = vmatprep.mubr.bf16.mxu1 %v11701_v45 }
 0x348   :  { %1935 = vrot.lane.b32.xlu1 %v1920_v51, %s12093_s27 }
 0x349   :  { %2285 = vrot.lane.b32.xlu0 %v2266_v10, %s12092_s26 }
 0x34a   :  { %5596 = vmatmul.mubr.bf16.gmra.mrb[112].mxu0 %v11703_v8 }
 0x34b   :  { %5605 = vmatprep.mubr.bf16.mxu0 %v11704_v28 }
 0x34c   :  { %2287 = vrot.lane.b32.xlu1 %v2270_v23, %s12092_s26  ;;  %v19972_v23 = vld [vmem:[#allocation29_spill] sm:$0xff] }
 0x34d   :  { %6655 = vmatmul.mubr.bf16.gmra.mrb[112].mxu1 %v11703_v8  ;;  %2289 = vrot.lane.b32.xlu0 %v2274_v32, %s12092_s26 }
 0x34e   :  { %6664 = vmatprep.mubr.bf16.mxu1 %v11704_v28 }
 0x352   :  { %5606 = vmatmul.mubr.bf16.gmra.mrb[116].mxu0 %v14598_v3 }
 0x353   :  { %5615 = vmatprep.mubr.bf16.mxu0 %v11706_v29 }
 0x355   :  { %6665 = vmatmul.mubr.bf16.gmra.mrb[116].mxu1 %v14598_v3 }
 0x356   :  { %v773_v1 = vpop.permute.xlu1 %772  ;;  %6674 = vmatprep.mubr.bf16.mxu1 %v11706_v29  ;;  %v11714_v29 = vld [vmem:[%s19721_s3 + $0x88] ss:$20 sps:$4 sm:$0xff]  }
 0x357   :  { %v775_v40 = vpop.permute.xlu0 %774  ;;  %v831_v14 = vsel %vm826_vm4, %v12976_v11, %v773_v1  ;;  %v3294_v11 = vld [vmem:[%s19721_s3 + $0x4f4] sm:$0xff] }
 0x358   :  { %v832_v20 = vsel %vm826_vm4, %v773_v1, %v775_v40  ;;  %v14624_v48 = vcombine.low %v3291_v47, %v3294_v11  ;;  %v11715_v47 = vld [vmem:[%s19721_s3 + $0xb0] ss:$20 sps:$4 sm:$0xff]  }
 0x359   :  { %7048 = vmatprep.subr.bf16.mxu0 %v832_v20 }
 0x35a   :  { %v777_v62 = vpop.permute.xlu1 %776  ;;  %5616 = vmatmul.mubr.bf16.gmra.mrb[120].mxu0 %v11708_v2  ;;  %19967 = vst [vmem:[#allocation23_spill] sm:$0xff] %v14624_v48 }
 0x35b   :  { %v789_v5 = vpop.permute.xlu0 %788  ;;  %v833_v43 = vsel %vm826_vm4, %v775_v40, %v777_v62  ;;  %895 = vst.msk [vmem:[#allocation2 + $0x38] sm:$0xff] %vm826_vm4, %v777_v62  ;;  %5625 = vmatprep.mubr.bf16.mxu0 %v11709_v37  ;;  %v19973_v40 = vld [vmem:[#allocation33_spill] sm:$0xff] }
 0x35c   :  { %v838_v39 = vsel %vm826_vm4, %v12992_v56, %v789_v5 }
 0x35d   :  { %6675 = vmatmul.mubr.bf16.gmra.mrb[120].mxu1 %v11708_v2 }
 0x35e   :  { %v791_v26 = vpop.permute.xlu1 %790  ;;  %6684 = vmatprep.mubr.bf16.mxu1 %v11709_v37 }
 0x35f   :  { %v793_v9 = vpop.permute.xlu0 %792  ;;  %v839_v63 = vsel %vm826_vm4, %v789_v5, %v791_v26 }
 0x360   :  { %903 = vst.msk [vmem:[#allocation2 + $0x78] sm:$0xff] %vm826_vm4, %v793_v9  ;;  %v840_v59 = vsel %vm826_vm4, %v791_v26, %v793_v9 }
 0x362   :  { %v805_v31 = vpop.permute.xlu1 %804  ;;  %5626 = vmatmul.mubr.bf16.gmra.mrb[124].mxu0 %v14624_v48  ;;  %v3303_v33 = vld [vmem:[#allocation2 + $0x38] sm:$0xff] }
 0x363   :  { %v807_v49 = vpop.permute.xlu0 %806  ;;  %v845_v56 = vsel %vm826_vm4, %v19968_v57, %v805_v31  ;;  %5668 = vmatprep.mubr.bf16.mxu0 %v14632_v19  ;;  %8107 = vmatprep.subr.bf16.mxu1 %v3303_v33 }
 0x364   :  { %v846_v30 = vsel %vm826_vm4, %v805_v31, %v807_v49 }
 0x365   :  { %6685 = vmatmul.mubr.bf16.gmra.mrb[124].mxu1 %v14624_v48  ;;  %v11863_v48 = vld [vmem:[%s19720_s0 + $0x18] sm:$0xff] }
 0x366   :  { %v809_v13 = vpop.permute.xlu1 %808  ;;  %6727 = vmatprep.mubr.bf16.mxu1 %v14632_v19 }
 0x367   :  { %v821_v7 = vpop.permute.xlu0 %820  ;;  %v847_v16 = vsel %vm826_vm4, %v807_v49, %v809_v13  ;;  %911 = vst.msk [vmem:[#allocation2 + $0xb8] sm:$0xff] %vm826_vm4, %v809_v13  ;;  %v3311_v18 = vld [vmem:[#allocation2 + $0x78] sm:$0xff] }
 0x368   :  { %v852_v12 = vsel %vm826_vm4, %v19969_v36, %v821_v7  ;;  %v19975_v49 = vld [vmem:[#allocation15_spill] sm:$0xff] }
 0x36a   :  { %v823_v35 = vpop.permute.xlu1 %822  ;;  %9852 = vmatmul.mubr.msk.bf16.vlgmr.msra.gmra.mrb[0].mxu0 %vm4833_vm12, %v11711_v52 }
 0x36b   :  { %v825_v24 = vpop.permute.xlu0 %824  ;;  %v853_v34 = vsel %vm826_vm4, %v821_v7, %v823_v35  ;;  %7049 = vmatpush1.bf16.msra.mxu0 %v831_v14  ;;  %5678 = vmatprep.mubr.bf16.mxu0 %v14632_v19 }
 0x36c   :  { %919 = vst.msk [vmem:[#allocation2 + $0xf8] sm:$0xff] %vm826_vm4, %v825_v24  ;;  %v854_v6 = vsel %vm826_vm4, %v823_v35, %v825_v24  ;;  %7050 = vmatprep.subr.bf16.mxu0 %v839_v63  ;;  %v19976_v35 = vld [vmem:[#allocation16_spill] sm:$0xff] }
 0x36d   :  { %9884 = vmatmul.mubr.msk.bf16.vlgmr.msra.gmra.mrb[0].mxu1 %vm4833_vm12, %v11711_v52 }
 0x36e   :  { %v995_v27 = vpop.permute.xlu1 %994  ;;  %6737 = vmatprep.mubr.bf16.mxu1 %v14632_v19  ;;  %8108 = vmatpush1.bf16.msra.mxu1 %v833_v43  ;;  %v3319_v17 = vld [vmem:[#allocation2 + $0xb8] sm:$0xff] }
 0x36f   :  { %v997_v21 = vpop.permute.xlu0 %996  ;;  %v1053_v61 = vsel %vm1048_vm1, %v19970_v50, %v995_v27  ;;  %7051 = vmatpush1.bf16.msra.mxu0 %v838_v39  ;;  %8109 = vmatprep.subr.bf16.mxu1 %v3311_v18  ;;  %v19974_v39 = vld [vmem:[#allocation14_spill] sm:$0xff]  ;;  %v19977_v50 = vld [vmem:[#allocation25_spill] sm:$0xff] }
 0x370   :  { %v1054_v0 = vsel %vm1048_vm1, %v995_v27, %v997_v21  ;;  %7052 = vmatprep.subr.bf16.mxu0 %v846_v30  ;;  %v11716_v30 = vld [vmem:[%s19721_s3 + $0xd8] ss:$20 sps:$4 sm:$0xff]   ;;  %v11717_v27 = vld [vmem:[%s19721_s3 + $0x100] ss:$20 sps:$4 sm:$0xff]  }
 0x372   :  { %v999_v15 = vpop.permute.xlu1 %998  ;;  %9853 = vmatmul.mubr.msk.bf16.gmra.mrb[4].mxu0 %vm4833_vm12, %v11712_v60  ;;  %8110 = vmatpush1.bf16.msra.mxu1 %v840_v59 }
 0x373   :  { %v1011_v46 = vpop.permute.xlu0 %1010  ;;  %v14660_v25 = vsel %vm1048_vm1, %v997_v21, %v999_v15  ;;  %1117 = vst.msk [vmem:[#allocation2 + $0x138] sm:$0xff] %vm1048_vm1, %v999_v15  ;;  %7053 = vmatpush1.bf16.msra.mxu0 %v845_v56  ;;  %5688 = vmatprep.mubr.bf16.mxu0 %v14632_v19  ;;  %v3327_v4 = vld [vmem:[#allocation2 + $0xf8] sm:$0xff] }
 0x374   :  { %v1060_v53 = vsel %vm1048_vm1, %v19971_v44, %v1011_v46  ;;  %7054 = vmatprep.subr.bf16.mxu0 %v853_v34  ;;  %8111 = vmatprep.subr.bf16.mxu1 %v3319_v17 }
 0x375   :  { %9885 = vmatmul.mubr.msk.bf16.gmra.mrb[4].mxu1 %vm4833_vm12, %v11712_v60 }
 0x376   :  { %v1013_v45 = vpop.permute.xlu1 %1012  ;;  %6747 = vmatprep.mubr.bf16.mxu1 %v14632_v19  ;;  %8112 = vmatpush1.bf16.msra.mxu1 %v847_v16 }
 0x377   :  { %v1015_v54 = vpop.permute.xlu0 %1014  ;;  %v1061_v51 = vsel %vm1048_vm1, %v1011_v46, %v1013_v45  ;;  %7055 = vmatpush1.bf16.msra.mxu0 %v852_v12  ;;  %8113 = vmatprep.subr.bf16.mxu1 %v3327_v4 }
 0x378   :  { %1125 = vst.msk [vmem:[#allocation2 + $0x178] sm:$0xff] %vm1048_vm1, %v1015_v54  ;;  %v14674_v10 = vsel %vm1048_vm1, %v1013_v45, %v1015_v54  ;;  %7056 = vmatprep.subr.bf16.mxu0 %v1054_v0  ;;  %v19978_v45 = vld [vmem:[#allocation20_spill] sm:$0xff]  ;;  %v11718_v54 = vld [vmem:[%s19721_s3 + $0x128] ss:$20 sps:$4 sm:$0xff]  }
 0x37a   :  { %v1027_v8 = vpop.permute.xlu1 %1026  ;;  %9854 = vmatmul.mubr.msk.bf16.gmra.mrb[8].mxu0 %vm4833_vm12, %v11713_v38  ;;  %8114 = vmatpush1.bf16.msra.mxu1 %v854_v6  ;;  %v3335_v63 = vld [vmem:[#allocation2 + $0x138] sm:$0xff] }
 0x37b   :  { %v1029_v28 = vpop.permute.xlu0 %1028  ;;  %v1067_v32 = vsel %vm1048_vm1, %v19972_v23, %v1027_v8  ;;  %7057 = vmatpush1.bf16.msra.mxu0 %v1053_v61  ;;  %5698 = vmatprep.mubr.bf16.mxu0 %v14632_v19 }
 0x37c   :  { %v1068_v55 = vsel %vm1048_vm1, %v1027_v8, %v1029_v28  ;;  %7058 = vmatprep.subr.bf16.mxu0 %v1061_v51  ;;  %8115 = vmatprep.subr.bf16.mxu1 %v3335_v63  ;;  %v19981_v63 = vld [vmem:[#allocation27_spill] sm:$0xff] }
 0x37d   :  { %9886 = vmatmul.mubr.msk.bf16.gmra.mrb[8].mxu1 %vm4833_vm12, %v11713_v38 }
 0x37e   :  { %v1031_v22 = vpop.permute.xlu1 %1030  ;;  %6757 = vmatprep.mubr.bf16.mxu1 %v14632_v19  ;;  %8116 = vmatpush1.bf16.msra.mxu1 %v14660_v25 }
 0x37f   :  { %v1043_v1 = vpop.permute.xlu0 %1042  ;;  %v14687_v2 = vsel %vm1048_vm1, %v1029_v28, %v1031_v22  ;;  %1133 = vst.msk [vmem:[#allocation2 + $0x1b8] sm:$0xff] %vm1048_vm1, %v1031_v22  ;;  %7059 = vmatpush1.bf16.msra.mxu0 %v1060_v53  ;;  %v3343_v16 = vld [vmem:[#allocation2 + $0x178] sm:$0xff] }
 0x380   :  { %v1074_v14 = vsel %vm1048_vm1, %v19973_v40, %v1043_v1  ;;  %7060 = vmatprep.subr.bf16.mxu0 %v1068_v55  ;;  %8117 = vmatprep.subr.bf16.mxu1 %v3343_v16  ;;  %v19979_v55 = vld [vmem:[#allocation24_spill] sm:$0xff] }
 0x382   :  { %v1045_v37 = vpop.permute.xlu1 %1044  ;;  %9855 = vmatmul.mubr.msk.bf16.gmra.mrb[12].mxu0 %vm4833_vm12, %v11714_v29  ;;  %8118 = vmatpush1.bf16.msra.mxu1 %v14674_v10 }
 0x383   :  { %v1047_v20 = vpop.permute.xlu0 %1046  ;;  %v1075_v62 = vsel %vm1048_vm1, %v1043_v1, %v1045_v37  ;;  %7061 = vmatpush1.bf16.msra.mxu0 %v1067_v32  ;;  %5708 = vmatprep.mubr.bf16.mxu0 %v14632_v19 }
 0x384   :  { %1141 = vst.msk [vmem:[#allocation2 + $0x1f8] sm:$0xff] %vm1048_vm1, %v1047_v20  ;;  %v14697_v5 = vsel %vm1048_vm1, %v1045_v37, %v1047_v20  ;;  %7062 = vmatprep.subr.bf16.mxu0 %v1075_v62 }
 0x385   :  { %9887 = vmatmul.mubr.msk.bf16.gmra.mrb[12].mxu1 %vm4833_vm12, %v11714_v29 }
 0x386   :  { %v1350_v43 = vpop.permute.xlu1 %1349  ;;  %6767 = vmatprep.mubr.bf16.mxu1 %v14632_v19  ;;  %v3351_v6 = vld [vmem:[#allocation2 + $0x1b8] sm:$0xff] }
 0x387   :  { %v1352_v11 = vpop.permute.xlu0 %1351  ;;  %v1408_v26 = vsel %vm1403_vm5, %v19974_v39, %v1350_v43  ;;  %7063 = vmatpush1.bf16.msra.mxu0 %v1074_v14  ;;  %8119 = vmatprep.subr.bf16.mxu1 %v3351_v6  ;;  %v11719_v14 = vld [vmem:[%s19721_s3 + $0x150] ss:$20 sps:$4 sm:$0xff]  }
 0x388   :  { %v1409_v9 = vsel %vm1403_vm5, %v1350_v43, %v1352_v11  ;;  %8120 = vmatpush1.bf16.msra.mxu1 %v14687_v2 }
 0x389   :  { %7064 = vmatprep.subr.bf16.mxu0 %v1409_v9  ;;  %v11720_v9 = vld [vmem:[%s19721_s3 + $0x178] ss:$20 sps:$4 sm:$0xff]  }
 0x38a   :  { %v1354_v59 = vpop.permute.xlu1 %1353  ;;  %9856 = vmatmul.mubr.msk.bf16.gmra.mrb[16].mxu0 %vm4833_vm12, %v11715_v47 }
 0x38b   :  { %v1366_v31 = vpop.permute.xlu0 %1365  ;;  %v1410_v33 = vsel %vm1403_vm5, %v1352_v11, %v1354_v59  ;;  %1472 = vst.msk [vmem:[#allocation2 + $0x238] sm:$0xff] %vm1403_vm5, %v1354_v59  ;;  %7065 = vmatpush1.bf16.msra.mxu0 %v1408_v26  ;;  %5718 = vmatprep.mubr.bf16.mxu0 %v14632_v19  ;;  %v3359_v0 = vld [vmem:[#allocation2 + $0x1f8] sm:$0xff] }
 0x38c   :  { %v1415_v57 = vsel %vm1403_vm5, %v19975_v49, %v1366_v31  ;;  %8121 = vmatprep.subr.bf16.mxu1 %v3359_v0 }
 0x38d   :  { %9888 = vmatmul.mubr.msk.bf16.gmra.mrb[16].mxu1 %vm4833_vm12, %v11715_v47 }
 0x38e   :  { %v1368_v56 = vpop.permute.xlu1 %1367  ;;  %6777 = vmatprep.mubr.bf16.mxu1 %v14632_v19  ;;  %8122 = vmatpush1.bf16.msra.mxu1 %v14697_v5  ;;  %v19980_v5 = vld [vmem:[#allocation17_spill] sm:$0xff] }
 0x38f   :  { %v1370_v13 = vpop.permute.xlu0 %1369  ;;  %v1416_v52 = vsel %vm1403_vm5, %v1366_v31, %v1368_v56 }
 0x390   :  { %1480 = vst.msk [vmem:[#allocation2 + $0x278] sm:$0xff] %vm1403_vm5, %v1370_v13  ;;  %v1417_v7 = vsel %vm1403_vm5, %v1368_v56, %v1370_v13  ;;  %7066 = vmatprep.subr.bf16.mxu0 %v1416_v52 }
 0x391   :  { %7067 = vmatpush1.bf16.msra.mxu0 %v1415_v57 }
 0x392   :  { %v1382_v36 = vpop.permute.xlu1 %1381  ;;  %9857 = vmatmul.mubr.msk.bf16.gmra.mrb[20].mxu0 %vm4833_vm12, %v11716_v30  ;;  %v3367_v44 = vld [vmem:[#allocation2 + $0x238] sm:$0xff] }
 0x393   :  { %v1384_v12 = vpop.permute.xlu0 %1383  ;;  %v1422_v24 = vsel %vm1403_vm5, %v19976_v35, %v1382_v36  ;;  %5728 = vmatprep.mubr.bf16.mxu0 %v14632_v19  ;;  %8123 = vmatprep.subr.bf16.mxu1 %v3367_v44  ;;  %v14804_v35 = vld [vmem:[%s19720_s0 + $0x20] sm:$0xff] }
 0x394   :  { %v1423_v34 = vsel %vm1403_vm5, %v1382_v36, %v1384_v12  ;;  %8124 = vmatpush1.bf16.msra.mxu1 %v1410_v33  ;;  %v11721_v36 = vld [vmem:[%s19721_s3 + $0x1a0] ss:$20 sps:$4 sm:$0xff]  }
 0x395   :  { %9889 = vmatmul.mubr.msk.bf16.gmra.mrb[20].mxu1 %vm4833_vm12, %v11716_v30  ;;  %7068 = vmatprep.subr.bf16.mxu0 %v1423_v34  ;;  %v14811_v34 = vld [vmem:[%s19720_s0 + $0x60] sm:$0xff] }
 0x396   :  { %v1386_v18 = vpop.permute.xlu1 %1385  ;;  %7069 = vmatpush1.bf16.msra.mxu0 %v1422_v24  ;;  %6787 = vmatprep.mubr.bf16.mxu1 %v14632_v19 }
 0x397   :  { %v1398_v60 = vpop.permute.xlu0 %1397  ;;  %v1424_v21 = vsel %vm1403_vm5, %v1384_v12, %v1386_v18  ;;  %1488 = vst.msk [vmem:[#allocation2 + $0x2b8] sm:$0xff] %vm1403_vm5, %v1386_v18  ;;  %v3375_v10 = vld [vmem:[#allocation2 + $0x278] sm:$0xff]  ;;  %v14818_v18 = vld [vmem:[%s19720_s0 + $0x28] sm:$0xff] }
 0x398   :  { %v1429_v61 = vsel %vm1403_vm5, %v19977_v50, %v1398_v60  ;;  %8125 = vmatprep.subr.bf16.mxu1 %v3375_v10  ;;  %v14870_v10 = vld [vmem:[%s19720_s0 + $0xa8] sm:$0xff] }
 0x399   :  { %8126 = vmatpush1.bf16.msra.mxu1 %v1417_v7  ;;  %v19982_v7 = vld [vmem:[#allocation31_spill] sm:$0xff] }
 0x39a   :  { %v1400_v17 = vpop.permute.xlu1 %1399  ;;  %9858 = vmatmul.mubr.msk.bf16.gmra.mrb[24].mxu0 %vm4833_vm12, %v11717_v27 }
 0x39b   :  { %v1402_v15 = vpop.permute.xlu0 %1401  ;;  %v1430_v46 = vsel %vm1403_vm5, %v1398_v60, %v1400_v17  ;;  %5738 = vmatprep.mubr.bf16.mxu0 %v14632_v19  ;;  %v14825_v60 = vld [vmem:[%s19720_s0 + $0x68] sm:$0xff] }
 0x39c   :  { %1496 = vst.msk [vmem:[#allocation2 + $0x2f8] sm:$0xff] %vm1403_vm5, %v1402_v15  ;;  %v1431_v25 = vsel %vm1403_vm5, %v1400_v17, %v1402_v15  ;;  %7070 = vmatprep.subr.bf16.mxu0 %v1430_v46  ;;  %v14834_v15 = vld [vmem:[%s19720_s0 + $0x38] sm:$0xff] }
 0x39d   :  { %9890 = vmatmul.mubr.msk.bf16.gmra.mrb[24].mxu1 %vm4833_vm12, %v11717_v27  ;;  %7071 = vmatpush1.bf16.msra.mxu0 %v1429_v61 }
 0x39e   :  { %v1705_v53 = vpop.permute.xlu1 %1704  ;;  %6797 = vmatprep.mubr.bf16.mxu1 %v14632_v19  ;;  %v3383_v28 = vld [vmem:[#allocation2 + $0x2b8] sm:$0xff] }
 0x39f   :  { %v1707_v4 = vpop.permute.xlu0 %1706  ;;  %v1763_v38 = vsel %vm1758_vm6, %v19978_v45, %v1705_v53  ;;  %8127 = vmatprep.subr.bf16.mxu1 %v3383_v28  ;;  %v14877_v28 = vld [vmem:[%s19720_s0 + $0xe8] sm:$0xff] }
 0x3a0   :  { %v1764_v51 = vsel %vm1758_vm6, %v1705_v53, %v1707_v4  ;;  %8128 = vmatpush1.bf16.msra.mxu1 %v1424_v21 }
 0x3a1   :  { %7072 = vmatprep.subr.bf16.mxu0 %v1764_v51 }
 0x3a2   :  { %v1709_v8 = vpop.permute.xlu1 %1708  ;;  %7073 = vmatpush1.bf16.msra.mxu0 %v1763_v38  ;;  %v14861_v38 = vld [vmem:[%s19720_s0 + $0x70] sm:$0xff] }
 0x3a3   :  { %v1721_v23 = vpop.permute.xlu0 %1720  ;;  %v1765_v32 = vsel %vm1758_vm6, %v1707_v4, %v1709_v8  ;;  %1827 = vst.msk [vmem:[#allocation2 + $0x338] sm:$0xff] %vm1758_vm6, %v1709_v8  ;;  %9859 = vmatmul.mubr.msk.bf16.gmra.mrb[28].mxu0 %vm4833_vm12, %v11718_v54  ;;  %v3391_v1 = vld [vmem:[#allocation2 + $0x2f8] sm:$0xff]  ;;  %v14854_v4 = vld [vmem:[%s19720_s0 + $0x30] sm:$0xff] }
 0x3a4   :  { %v1770_v22 = vsel %vm1758_vm6, %v19979_v55, %v1721_v23  ;;  %5748 = vmatprep.mubr.bf16.mxu0 %v14632_v19  ;;  %8129 = vmatprep.subr.bf16.mxu1 %v3391_v1  ;;  %v14884_v55 = vld [vmem:[%s19720_s0 + $0xa0] sm:$0xff] }
 0x3a5   :  { %9891 = vmatmul.mubr.msk.bf16.gmra.mrb[28].mxu1 %vm4833_vm12, %v11718_v54 }
 0x3a6   :  { %v1723_v29 = vpop.permute.xlu1 %1722  ;;  %6807 = vmatprep.mubr.bf16.mxu1 %v14632_v19  ;;  %8130 = vmatpush1.bf16.msra.mxu1 %v1431_v25  ;;  %v14841_v25 = vld [vmem:[%s19720_s0 + $0x78] sm:$0xff] }
 0x3a7   :  { %v1725_v2 = vpop.permute.xlu0 %1724  ;;  %v1771_v40 = vsel %vm1758_vm6, %v1721_v23, %v1723_v29 }
 0x3a8   :  { %1835 = vst.msk [vmem:[#allocation2 + $0x378] sm:$0xff] %vm1758_vm6, %v1725_v2  ;;  %v1772_v37 = vsel %vm1758_vm6, %v1723_v29, %v1725_v2  ;;  %7074 = vmatprep.subr.bf16.mxu0 %v1771_v40  ;;  %v14891_v29 = vld [vmem:[%s19720_s0 + $0xe0] sm:$0xff]  ;;  %v11722_v2 = vld [vmem:[%s19721_s3 + $0x1c8] ss:$20 sps:$4 sm:$0xff]   ;;  %v14904_v40 = vld [vmem:[%s19720_s0 + $0xb0] sm:$0xff] }
 0x3a9   :  { %7075 = vmatpush1.bf16.msra.mxu0 %v1770_v22 }
 0x3aa   :  { %v1737_v20 = vpop.permute.xlu1 %1736  ;;  %v3399_v31 = vld [vmem:[#allocation2 + $0x338] sm:$0xff] }
 0x3ab   :  { %v1739_v62 = vpop.permute.xlu0 %1738  ;;  %v1777_v43 = vsel %vm1758_vm6, %v19980_v5, %v1737_v20  ;;  %9860 = vmatmul.mubr.msk.bf16.gmra.mrb[32].mxu0 %vm4833_vm12, %v11719_v14  ;;  %8131 = vmatprep.subr.bf16.mxu1 %v3399_v31  ;;  %v14919_v5 = vld [vmem:[%s19720_s0 + $0xb8] sm:$0xff] }
 0x3ac   :  { %v1778_v47 = vsel %vm1758_vm6, %v1737_v20, %v1739_v62  ;;  %5758 = vmatprep.mubr.bf16.mxu0 %v14632_v19  ;;  %8132 = vmatpush1.bf16.msra.mxu1 %v1765_v32 }
 0x3ad   :  { %9892 = vmatmul.mubr.msk.bf16.gmra.mrb[32].mxu1 %vm4833_vm12, %v11719_v14  ;;  %7076 = vmatprep.subr.bf16.mxu0 %v1778_v47  ;;  %v14926_v47 = vld [vmem:[%s19720_s0 + $0xf8] sm:$0xff] }
 0x3ae   :  { %v1741_v11 = vpop.permute.xlu1 %1740  ;;  %7077 = vmatpush1.bf16.msra.mxu0 %v1777_v43  ;;  %6817 = vmatprep.mubr.bf16.mxu1 %v14632_v19 }
 0x3af   :  { %v1753_v39 = vpop.permute.xlu0 %1752  ;;  %v14774_v26 = vsel %vm1758_vm6, %v1739_v62, %v1741_v11  ;;  %1843 = vst.msk [vmem:[#allocation2 + $0x3b8] sm:$0xff] %vm1758_vm6, %v1741_v11  ;;  %v3407_v30 = vld [vmem:[#allocation2 + $0x378] sm:$0xff] }
 0x3b0   :  { %v1784_v59 = vsel %vm1758_vm6, %v19981_v63, %v1753_v39  ;;  %8133 = vmatprep.subr.bf16.mxu1 %v3407_v30  ;;  %v14958_v30 = vld [vmem:[%s19720_s0 + $0x120] sm:$0xff] }
 0x3b1   :  { %8134 = vmatpush1.bf16.msra.mxu1 %v1772_v37  ;;  %v14911_v37 = vld [vmem:[%s19720_s0 + $0xf0] sm:$0xff] }
 0x3b2   :  { %v1755_v33 = vpop.permute.xlu1 %1754 }
 0x3b3   :  { %v1757_v49 = vpop.permute.xlu0 %1756  ;;  %v1785_v57 = vsel %vm1758_vm6, %v1753_v39, %v1755_v33  ;;  %9861 = vmatmul.mubr.msk.bf16.gmra.mrb[36].mxu0 %vm4833_vm12, %v11720_v9 }
 0x3b4   :  { %1851 = vst.msk [vmem:[#allocation2 + $0x3f8] sm:$0xff] %vm1758_vm6, %v1757_v49  ;;  %v14786_v56 = vsel %vm1758_vm6, %v1755_v33, %v1757_v49  ;;  %7078 = vmatprep.subr.bf16.mxu0 %v1785_v57  ;;  %5768 = vmatprep.mubr.bf16.mxu0 %v14632_v19  ;;  %v14951_v49 = vld [vmem:[%s19720_s0 + $0x168] sm:$0xff] }
 0x3b5   :  { %9893 = vmatmul.mubr.msk.bf16.gmra.mrb[36].mxu1 %vm4833_vm12, %v11720_v9  ;;  %7079 = vmatpush1.bf16.msra.mxu0 %v1784_v59  ;;  %v14935_v9 = vld [vmem:[%s19722_s1] sm:$0xff] }
 0x3b6   :  { %v1932_v13 = vpop.permute.xlu1 %1931  ;;  %6827 = vmatprep.mubr.bf16.mxu1 %v14632_v19  ;;  %v3415_v50 = vld [vmem:[#allocation2 + $0x3b8] sm:$0xff] }
 0x3b7   :  { %v1934_v52 = vpop.permute.xlu0 %1933  ;;  %v14793_v16 = vsel %vm1758_vm6, %v19982_v7, %v1932_v13  ;;  %8135 = vmatprep.subr.bf16.mxu1 %v3415_v50  ;;  %v14985_v50 = vld [vmem:[%s19720_s0 + $0x130] sm:$0xff] }
 0x3b8   :  { %v14799_v12 = vsel %vm1758_vm6, %v1932_v13, %v1934_v52  ;;  %v1956_v24 = vmul.f32 %v14804_v35, %v14793_v16  ;;  %v1964_v6 = vmul.f32 %v14811_v34, %v14793_v16  ;;  %v1972_v22 = vmul.f32 %v14884_v55, %v14793_v16  ;;  %8136 = vmatpush1.bf16.msra.mxu1 %v14774_v26  ;;  %v14944_v26 = vld [vmem:[%s19720_s0 + $0x128] sm:$0xff] }
 0x3b9   :  { %v1957_v27 = vmul.f32 %v14818_v18, %v14799_v12  ;;  %v1965_v21 = vmul.f32 %v14825_v60, %v14799_v12  ;;  %v1973_v8 = vmul.f32 %v14870_v10, %v14799_v12  ;;  %v1981_v23 = vmul.f32 %v14877_v28, %v14799_v12 }
 0x3ba   :  { %v14829_v61 = vpop.permute.xlu1 %1935  ;;  %v2020_v0 = vpack.c.bf16 %v1964_v6, %v1956_v24  ;;  %v1980_v1 = vmul.f32 %v14891_v29, %v14793_v16  ;;  %v1989_v33 = vmul.f32 %v14944_v26, %v14799_v12  ;;  %v1997_v57 = vmul.f32 %v14951_v49, %v14799_v12  ;;  %v19984_v6 = vld [vmem:[#allocation9_spill] sm:$0xff] }
 0x3bb   :  { %v2021_v17 = vpack.c.bf16 %v1965_v21, %v1957_v27  ;;  %v1959_v46 = vmul.f32 %v14834_v15, %v14829_v61  ;;  %v1967_v44 = vmul.f32 %v14841_v25, %v14829_v61  ;;  %v14847_v53 = vsel %vm1758_vm6, %v1934_v52, %v14829_v61  ;;  %9862 = vmatmul.mubr.msk.bf16.gmra.mrb[40].mxu0 %vm4833_vm12, %v11721_v36  ;;  %v3423_v59 = vld [vmem:[#allocation2 + $0x3f8] sm:$0xff]  ;;  %v14965_v52 = vld [vmem:[%s19720_s0 + $0x160] sm:$0xff] }
 0x3bc   :  { %2088 = vrot.lane.b32.xlu1 %v2020_v0, %s12089_s23  ;;  %v1958_v45 = vmul.f32 %v14854_v4, %v14847_v53  ;;  %v1966_v54 = vmul.f32 %v14861_v38, %v14847_v53  ;;  %5778 = vmatprep.mubr.bf16.mxu0 %v14632_v19  ;;  %v1974_v14 = vmul.f32 %v14904_v40, %v14847_v53  ;;  %v11723_v21 = vld [vmem:[%s19721_s3 + $0x1f0] ss:$20 sps:$4 sm:$0xff]  }
 0x3bd   :  { %2090 = vrot.lane.b32.xlu0 %v2021_v17, %s12089_s23  ;;  %v2023_v51 = vpack.c.bf16 %v1967_v44, %v1959_v46  ;;  %9894 = vmatmul.mubr.msk.bf16.gmra.mrb[40].mxu1 %vm4833_vm12, %v11721_v36  ;;  %v1982_v20 = vmul.f32 %v14911_v37, %v14847_v53  ;;  %v2029_v62 = vpack.c.bf16 %v1981_v23, %v1973_v8  ;;  %v19983_v36 = vld [vmem:[#allocation7_spill] sm:$0xff]  ;;  %v14992_v17 = vld [vmem:[%s19720_s0 + $0x170] sm:$0xff] }
 0x3be   :  { %v2022_v32 = vpack.c.bf16 %v1966_v54, %v1958_v45  ;;  %6837 = vmatprep.mubr.bf16.mxu1 %v14632_v19  ;;  %v1975_v43 = vmul.f32 %v14919_v5, %v14829_v61  ;;  %v1983_v11 = vmul.f32 %v14926_v47, %v14829_v61  ;;  %v2028_v39 = vpack.c.bf16 %v1980_v1, %v1972_v22  ;;  %v15000_v45 = vld [vmem:[%s19720_s0 + $0x138] sm:$0xff]  ;;  %v11852_v1 = vld [vmem:[%s19720_s0 + $0x8] sm:$0xff] }
 0x3bf   :  { %v2030_v63 = vpack.c.bf16 %v1982_v20, %v1974_v14  ;;  %v1988_v13 = vmul.f32 %v14958_v30, %v14793_v16  ;;  %v1996_v7 = vmul.f32 %v14965_v52, %v14793_v16  ;;  %v14972_v24 = vrot.slane %v14935_v9, %v19983_v36  ;;  %8137 = vmatprep.subr.bf16.mxu1 %v3423_v59  ;;  %v11853_v14 = vld [vmem:[%s19720_s0] sm:$0xff]  ;;  %v2286_v59 = vpop.permute.xlu0 %2285  ;;  %v11858_v36 = vld [vmem:[%s19720_s0 + $0x10] sm:$0xff] }
 0x3c0   :  { %2092 = vrot.lane.b32.xlu1 %v2022_v32, %s12089_s23  ;;  %v2031_v31 = vpack.c.bf16 %v1983_v11, %v1975_v43  ;;  %v14976_v27 = vrot.slane %v14935_v9, %v19984_v6  ;;  %v1990_v0 = vmul.f32 %v14985_v50, %v14847_v53  ;;  %v1998_v46 = vmul.f32 %v14992_v17, %v14847_v53  ;;  %v19985_v32 = vld [vmem:[#allocation6_spill] sm:$0xff]  ;;  %v15032_v43 = vld [vmem:[%s19720_s0 + $0x1a8] sm:$0xff] }
 0x3c1   :  { %2094 = vrot.lane.b32.xlu0 %v2023_v51, %s12089_s23  ;;  %v2037_v44 = vpack.c.bf16 %v1997_v57, %v1989_v33  ;;  %v1991_v54 = vmul.f32 %v15000_v45, %v14829_v61  ;;  %v15007_v51 = vld [vmem:[%s19720_s0 + $0x178] sm:$0xff]  ;;  %v2036_v23 = vpack.c.bf16 %v1996_v7, %v1988_v13  ;;  %8138 = vmatpush1.bf16.msra.mxu1 %v14786_v56  ;;  %v15053_v57 = vld [vmem:[%s19720_s0 + $0x1e0] sm:$0xff] }
 0x3c2   :  { %v1999_v8 = vmul.f32 %v15007_v51, %v14829_v61  ;;  %v15014_v22 = vrot.slane %v14935_v9, %v19985_v32  ;;  %v131_v20 = vmul.f32 %v11853_v14, %v14972_v24  ;;  %v2038_v56 = vpack.c.bf16 %v1998_v46, %v1990_v0  ;;  %v2288_v0 = vpop.permute.xlu1 %2287  ;;  %v11724_v46 = vld [vmem:[%s19721_s3 + $0x218] ss:$20 sps:$4 sm:$0xff]  }
 0x3c3   :  { %9863 = vmatmul.mubr.msk.bf16.gmra.mrb[44].mxu0 %vm4833_vm12, %v11722_v2  ;;  %v2005_v11 = vmul.f32 %v15032_v43, %v14799_v12  ;;  %v2012_v13 = vmul.f32 %v15053_v57, %v14793_v16 }
 0x3c4   :  { %2104 = vrot.lane.b32.xlu1 %v2028_v39, %s12089_s23  ;;  %5788 = vmatprep.mubr.bf16.mxu0 %v14632_v19  ;;  %v15039_v39 = vld [vmem:[%s19720_s0 + $0x1e8] sm:$0xff]  ;;  %v133_v6 = vmul.f32 %v11858_v36, %v15014_v22 }
 0x3c5   :  { %2106 = vrot.lane.b32.xlu0 %v2029_v62, %s12089_s23  ;;  %9895 = vmatmul.mubr.msk.bf16.gmra.mrb[44].mxu1 %vm4833_vm12, %v11722_v2  ;;  %v132_v2 = vmul.f32 %v11852_v1, %v14976_v27  ;;  %v2039_v62 = vpack.c.bf16 %v1999_v8, %v1991_v54  ;;  %v15080_v54 = vld [vmem:[%s19720_s0 + $0x1f8] sm:$0xff]  ;;  %v15094_v1 = vld [vmem:[%s19720_s0 + $0x1f0] sm:$0xff] }
 0x3c6   :  { %6847 = vmatprep.mubr.bf16.mxu1 %v14632_v19  ;;  %v2015_v8 = vmul.f32 %v15080_v54, %v14829_v61 }
 0x3c8   :  { %2108 = vrot.lane.b32.xlu1 %v2030_v63, %s12089_s23  ;;  %v2013_v63 = vmul.f32 %v15039_v39, %v14799_v12  ;;  %v19986_v12 = vld [vmem:[#allocation8_spill] sm:$0xff] }
 0x3c9   :  { %2110 = vrot.lane.b32.xlu0 %v2031_v31, %s12089_s23  ;;  %v15046_v31 = vld [vmem:[%s19720_s0 + $0x1a0] sm:$0xff]  ;;  %v15060_v7 = vrot.slane %v14935_v9, %v19986_v12  ;;  %v19987_v12 = vld [vmem:[#allocation11_spill] sm:$0xff] }
 0x3ca   :  { %v2004_v33 = vmul.f32 %v15046_v31, %v14793_v16  ;;  %v15073_v16 = vld [vmem:[%s19720_s0 + $0x1b8] sm:$0xff]  ;;  %v2045_v14 = vpack.c.bf16 %v2013_v63, %v2005_v11  ;;  %v15106_v36 = vrot.slane %v14935_v9, %v19987_v12 }
 0x3cb   :  { %9864 = vmatmul.mubr.msk.bf16.gmra.mrb[48].mxu0 %vm4833_vm12, %v11723_v21  ;;  %v134_v3 = vmul.f32 %v11863_v48, %v15060_v7 }
 0x3cc   :  { %2120 = vrot.lane.b32.xlu1 %v2036_v23, %s12089_s23  ;;  %5798 = vmatprep.mubr.bf16.mxu0 %v14632_v19  ;;  %v15087_v23 = vld [vmem:[%s19720_s0 + $0x1b0] sm:$0xff] }
 0x3cd   :  { %2122 = vrot.lane.b32.xlu0 %v2037_v44, %s12089_s23  ;;  %9896 = vmatmul.mubr.msk.bf16.gmra.mrb[48].mxu1 %vm4833_vm12, %v11723_v21  ;;  %v195_v21 = vadd.f32 %v132_v2, %v131_v20  ;;  %v2007_v44 = vmul.f32 %v15073_v16, %v14829_v61  ;;  %v2006_v32 = vmul.f32 %v15087_v23, %v14847_v53 }
 0x3ce   :  { %6857 = vmatprep.mubr.bf16.mxu1 %v14632_v19  ;;  %v2014_v2 = vmul.f32 %v15094_v1, %v14847_v53  ;;  %v2044_v61 = vpack.c.bf16 %v2012_v13, %v2004_v33  ;;  %v15100_v20 = vsel %vm1403_vm5, %v2286_v59, %v2288_v0  ;;  %v19988_v53 = vld [vmem:[#allocation26_spill] sm:$0xff] }
 0x3cf   :  { %v196_v11 = vadd.f32 %v195_v21, %v133_v6  ;;  %v2047_v63 = vpack.c.bf16 %v2015_v8, %v2007_v44  ;;  %v2311_v48 = vmul.f32 %v14818_v18, %v15100_v20  ;;  %v135_v44 = vmul.f32 %v14804_v35, %v15106_v36 }
 0x3d0   :  { %2124 = vrot.lane.b32.xlu1 %v2038_v56, %s12089_s23  ;;  %v15102_v56 = vpop.permute.xlu0 %2289  ;;  %v2046_v33 = vpack.c.bf16 %v2014_v2, %v2006_v32 }
 0x3d1   :  { %2126 = vrot.lane.b32.xlu0 %v2039_v62, %s12089_s23  ;;  %v15114_v62 = vsel %vm1403_vm5, %v19988_v53, %v2286_v59  ;;  %v2319_v59 = vmul.f32 %v14825_v60, %v15100_v20  ;;  %v15127_v13 = vsel %vm1403_vm5, %v2288_v0, %v15102_v56  ;;  %v197_v8 = vadd.f32 %v196_v11, %v134_v3 }
 0x3d2   :  { %v2310_v6 = vmul.f32 %v14804_v35, %v15114_v62  ;;  %v2318_v21 = vmul.f32 %v14811_v34, %v15114_v62  ;;  %v2312_v0 = vmul.f32 %v14854_v4, %v15127_v13  ;;  %v2320_v32 = vmul.f32 %v14861_v38, %v15127_v13 }
 0x3d3   :  { %9865 = vmatmul.mubr.msk.bf16.gmra.mrb[52].mxu0 %vm4833_vm12, %v11724_v46  ;;  %v2375_v2 = vpack.c.bf16 %v2319_v59, %v2311_v48  ;;  %v15151_v3 = vrot.slane %v14935_v9, %v13990_v58  ;;  %v198_v12 = vadd.f32 %v197_v8, %v135_v44  ;;  %v15164_v48 = vrot.slane %v14935_v9, %v13994_v41 }
 0x3d4   :  { %2136 = vrot.lane.b32.xlu1 %v2044_v61, %s12089_s23  ;;  %5808 = vmatprep.mubr.bf16.mxu0 %v14632_v19  ;;  %v2321_v61 = vmul.f32 %v14841_v25, %v15102_v56  ;;  %v2374_v35 = vpack.c.bf16 %v2318_v21, %v2310_v6  ;;  %v2376_v53 = vpack.c.bf16 %v2320_v32, %v2312_v0 }
 0x3d5   :  { %2138 = vrot.lane.b32.xlu0 %v2045_v14, %s12089_s23  ;;  %9897 = vmatmul.mubr.msk.bf16.gmra.mrb[52].mxu1 %vm4833_vm12, %v11724_v46  ;;  %v11725_v46 = vld [vmem:[%s19721_s3 + $0x240] ss:$20 sps:$4 sm:$0xff]   ;;  %v2313_v14 = vmul.f32 %v14834_v15, %v15102_v56  ;;  %v136_v59 = vmul.f32 %v14818_v18, %v15151_v3  ;;  %v2326_v6 = vmul.f32 %v14884_v55, %v15114_v62 }
 0x3d6   :  { %6867 = vmatprep.mubr.bf16.mxu1 %v14632_v19  ;;  %v2334_v21 = vmul.f32 %v14891_v29, %v15114_v62  ;;  %v2328_v44 = vmul.f32 %v14904_v40, %v15127_v13  ;;  %v2336_v18 = vmul.f32 %v14911_v37, %v15127_v13  ;;  %v2329_v0 = vmul.f32 %v14919_v5, %v15102_v56 }
 0x3d7   :  { %v2377_v11 = vpack.c.bf16 %v2321_v61, %v2313_v14  ;;  %v2337_v32 = vmul.f32 %v14926_v47, %v15102_v56  ;;  %v199_v14 = vadd.f32 %v198_v12, %v136_v59  ;;  %v137_v61 = vmul.f32 %v14854_v4, %v15164_v48 }
 0x3d8   :  { %2140 = vrot.lane.b32.xlu1 %v2046_v33, %s12089_s23  ;;  %v2335_v33 = vmul.f32 %v14877_v28, %v15100_v20  ;;  %v2351_v12 = vmul.f32 %v14951_v49, %v15100_v20  ;;  %v2350_v59 = vmul.f32 %v14965_v52, %v15114_v62  ;;  %v2344_v49 = vmul.f32 %v14985_v50, %v15127_v13 }
 0x3d9   :  { %2142 = vrot.lane.b32.xlu0 %v2047_v63, %s12089_s23  ;;  %v2327_v63 = vmul.f32 %v14870_v10, %v15100_v20  ;;  %v200_v4 = vadd.f32 %v199_v14, %v137_v61  ;;  %v2345_v52 = vmul.f32 %v15000_v45, %v15102_v56  ;;  %v2367_v14 = vmul.f32 %v15039_v39, %v15100_v20  ;;  %v11865_v61 = vld [vmem:[%s19720_s0 + $0x48] sm:$0xff] }
 0x3da   :  { %v2360_v39 = vmul.f32 %v15087_v23, %v15127_v13 }
 0x3db   :  { %9866 = vmatmul.mubr.msk.bf16.gmra.mrb[56].mxu0 %vm4833_vm12, %v11725_v46  ;;  %v2383_v8 = vpack.c.bf16 %v2335_v33, %v2327_v63  ;;  %v2342_v33 = vmul.f32 %v14958_v30, %v15114_v62 }
 0x3dc   :  { %2442 = vrot.lane.b32.xlu1 %v2374_v35, %s12088_s29  ;;  %5818 = vmatprep.mubr.bf16.mxu0 %v14632_v19  ;;  %v2382_v35 = vpack.c.bf16 %v2334_v21, %v2326_v6  ;;  %v11727_v6 = vld [vmem:[%s19721_s3 + $0x290] ss:$20 sps:$4 sm:$0xff]  }
 0x3dd   :  { %2444 = vrot.lane.b32.xlu0 %v2375_v2, %s12088_s29  ;;  %9898 = vmatmul.mubr.msk.bf16.gmra.mrb[56].mxu1 %vm4833_vm12, %v11725_v46  ;;  %v11726_v46 = vld [vmem:[%s19721_s3 + $0x268] ss:$20 sps:$4 sm:$0xff]   ;;  %v15188_v2 = vrot.slane %v14935_v9, %v14006_v42  ;;  %v2343_v9 = vmul.f32 %v14944_v26, %v15100_v20 }
 0x3de   :  { %6877 = vmatprep.mubr.bf16.mxu1 %v14632_v19 }
 0x3df   :  { %v138_v63 = vmul.f32 %v14834_v15, %v15188_v2  ;;  %v2352_v15 = vmul.f32 %v14992_v17, %v15127_v13  ;;  %v2391_v21 = vpack.c.bf16 %v2351_v12, %v2343_v9  ;;  %v2366_v9 = vmul.f32 %v15053_v57, %v15114_v62  ;;  %v3429_v12 = vld [vmem:[#allocation2 + $0x428] sm:$0xff] }
 0x3e0   :  { %2446 = vrot.lane.b32.xlu1 %v2376_v53, %s12088_s29  ;;  %v2384_v53 = vpack.c.bf16 %v2336_v18, %v2328_v44  ;;  %v11864_v44 = vld [vmem:[%s19720_s0 + $0x40] sm:$0xff]  ;;  %v2361_v57 = vmul.f32 %v15073_v16, %v15102_v56  ;;  %7401 = vmatprep.subr.bf16.mxu0 %v3429_v12  ;;  %v11882_v12 = vld [vmem:[%s19720_s0 + $0x90] sm:$0xff] }
 0x3e1   :  { %2448 = vrot.lane.b32.xlu0 %v2377_v11, %s12088_s29  ;;  %v2385_v11 = vpack.c.bf16 %v2337_v32, %v2329_v0  ;;  %v139_v18 = vmul.f32 %v11864_v44, %v14972_v24  ;;  %v2390_v0 = vpack.c.bf16 %v2350_v59, %v2342_v33  ;;  %v2392_v17 = vpack.c.bf16 %v2352_v15, %v2344_v49  ;;  %v11729_v59 = vld [vmem:[%s19721_s3 + $0x2e0] ss:$20 sps:$4 sm:$0xff]  }
 0x3e2   :  { %v11868_v15 = vld [vmem:[#allocation2 + $0x420] sm:$0xff]  ;;  %v11870_v44 = vld [vmem:[#allocation2 + $0x430] sm:$0xff] }
 0x3e3   :  { %9867 = vmatmul.mubr.msk.bf16.gmra.mrb[60].mxu0 %vm4833_vm12, %v11726_v46 }
 0x3e4   :  { %2458 = vrot.lane.b32.xlu1 %v2382_v35, %s12088_s29  ;;  %5828 = vmatprep.mubr.bf16.mxu0 %v14632_v19  ;;  %v140_v35 = vmul.f32 %v11865_v61, %v14976_v27  ;;  %v11875_v61 = vld [vmem:[#allocation2 + $0x478] sm:$0xff] }
 0x3e5   :  { %2460 = vrot.lane.b32.xlu0 %v2383_v8, %s12088_s29  ;;  %9899 = vmatmul.mubr.msk.bf16.gmra.mrb[60].mxu1 %vm4833_vm12, %v11726_v46  ;;  %v2353_v46 = vmul.f32 %v15007_v51, %v15102_v56  ;;  %v201_v8 = vadd.f32 %v200_v4, %v138_v63  ;;  %v2359_v51 = vmul.f32 %v15032_v43, %v15100_v20  ;;  %v11728_v43 = vld [vmem:[%s19721_s3 + $0x2b8] ss:$20 sps:$4 sm:$0xff]   ;;  %v11866_v4 = vld [vmem:[%s19720_s0 + $0x50] sm:$0xff] }
 0x3e6   :  { %6887 = vmatprep.mubr.bf16.mxu1 %v14632_v19  ;;  %v2368_v20 = vmul.f32 %v15094_v1, %v15127_v13  ;;  %v141_v63 = vmul.f32 %v11866_v4, %v15014_v22  ;;  %v149_v4 = vmul.f32 %v11882_v12, %v15014_v22 }
 0x3e7   :  { %v2393_v32 = vpack.c.bf16 %v2353_v46, %v2345_v52  ;;  %v144_v52 = vmul.f32 %v14825_v60, %v15151_v3  ;;  %v11872_v60 = vld [vmem:[#allocation2 + $0x460] sm:$0xff] }
 0x3e8   :  { %2462 = vrot.lane.b32.xlu1 %v2384_v53, %s12088_s29  ;;  %v202_v53 = vadd.f32 %v201_v8, %v139_v18  ;;  %v2400_v1 = vpack.c.bf16 %v2368_v20, %v2360_v39  ;;  %v11871_v18 = vld [vmem:[#allocation2 + $0x438] sm:$0xff]  ;;  %v145_v8 = vmul.f32 %v14861_v38, %v15164_v48  ;;  %v11731_v38 = vld [vmem:[%s19721_s3 + $0x330] ss:$20 sps:$4 sm:$0xff]  }
 0x3e9   :  { %2464 = vrot.lane.b32.xlu0 %v2385_v11, %s12088_s29  ;;  %v2358_v11 = vmul.f32 %v15046_v31, %v15114_v62  ;;  %v2399_v31 = vpack.c.bf16 %v2367_v14, %v2359_v51  ;;  %v2369_v62 = vmul.f32 %v15080_v54, %v15102_v56  ;;  %v11867_v54 = vld [vmem:[%s19720_s0 + $0x58] sm:$0xff]  ;;  %v11874_v14 = vld [vmem:[#allocation2 + $0x470] sm:$0xff] }
 0x3ea   :  { %v203_v23 = vadd.f32 %v202_v53, %v140_v35  ;;  %v142_v56 = vmul.f32 %v11867_v54, %v15060_v7  ;;  %v11876_v35 = vld [vmem:[%s19720_s0 + $0x80] sm:$0xff] }
 0x3eb   :  { %9868 = vmatmul.mubr.msk.bf16.gmra.mrb[64].mxu0 %vm4833_vm12, %v11727_v6  ;;  %v2398_v33 = vpack.c.bf16 %v2366_v9, %v2358_v11  ;;  %v2401_v16 = vpack.c.bf16 %v2369_v62, %v2361_v57  ;;  %v147_v53 = vmul.f32 %v11876_v35, %v14972_v24  ;;  %v11877_v11 = vld [vmem:[#allocation2 + $0x4a0] sm:$0xff]  ;;  %v11878_v9 = vld [vmem:[#allocation2 + $0x4a8] sm:$0xff]  ;;  %v11880_v57 = vld [vmem:[#allocation2 + $0x4b0] sm:$0xff] }
 0x3ec   :  { %2474 = vrot.lane.b32.xlu1 %v2390_v0, %s12088_s29  ;;  %5838 = vmatprep.mubr.bf16.mxu0 %v14632_v19  ;;  %v204_v13 = vadd.f32 %v203_v23, %v141_v63  ;;  %v11881_v62 = vld [vmem:[#allocation2 + $0x4b8] sm:$0xff]  ;;  %v11883_v23 = vld [vmem:[#allocation2 + $0x4e0] sm:$0xff] }
 0x3ed   :  { %2476 = vrot.lane.b32.xlu0 %v2391_v21, %s12088_s29  ;;  %9900 = vmatmul.mubr.msk.bf16.gmra.mrb[64].mxu1 %vm4833_vm12, %v11727_v6  ;;  %v143_v6 = vmul.f32 %v14811_v34, %v15106_v36  ;;  %v11869_v21 = vld [vmem:[#allocation2 + $0x428] sm:$0xff] }
 0x3ee   :  { %6897 = vmatprep.mubr.bf16.mxu1 %v14632_v19  ;;  %v205_v49 = vadd.f32 %v204_v13, %v142_v56  ;;  %v11730_v34 = vld [vmem:[%s19721_s3 + $0x308] ss:$20 sps:$4 sm:$0xff]   ;;  %v11733_v56 = vld [vmem:[%s19721_s3 + $0x380] ss:$20 sps:$4 sm:$0xff]  }
 0x3ef   :  { %v11886_v13 = vld [vmem:[#allocation2 + $0x4f0] sm:$0xff] }
 0x3f0   :  { %2478 = vrot.lane.b32.xlu1 %v2392_v17, %s12088_s29  ;;  %v206_v46 = vadd.f32 %v205_v49, %v143_v6  ;;  %v11873_v17 = vld [vmem:[#allocation2 + $0x468] sm:$0xff]  ;;  %v11887_v49 = vld [vmem:[#allocation2 + $0x4f8] sm:$0xff] }
 0x3f1   :  { %2480 = vrot.lane.b32.xlu0 %v2393_v32, %s12088_s29  ;;  %v146_v32 = vmul.f32 %v14841_v25, %v15188_v2 }
 0x3f2   :  { %v207_v0 = vadd.f32 %v206_v46, %v144_v52 }
 0x3f3   :  { %9869 = vmatmul.mubr.msk.bf16.gmra.mrb[68].mxu0 %vm4833_vm12, %v11728_v43 }
 0x3f4   :  { %2490 = vrot.lane.b32.xlu1 %v2398_v33, %s12088_s29  ;;  %5848 = vmatprep.mubr.bf16.mxu0 %v14632_v19  ;;  %v208_v51 = vadd.f32 %v207_v0, %v145_v8  ;;  %v11884_v33 = vld [vmem:[#allocation2 + $0x4e8] sm:$0xff] }
 0x3f5   :  { %2492 = vrot.lane.b32.xlu0 %v2399_v31, %s12088_s29  ;;  %9901 = vmatmul.mubr.msk.bf16.gmra.mrb[68].mxu1 %vm4833_vm12, %v11728_v43  ;;  %v11879_v43 = vld [vmem:[%s19720_s0 + $0x88] sm:$0xff] }
 0x3f6   :  { %6907 = vmatprep.mubr.bf16.mxu1 %v14632_v19  ;;  %v209_v25 = vadd.f32 %v208_v51, %v146_v32  ;;  %v148_v39 = vmul.f32 %v11879_v43, %v14976_v27  ;;  %v11732_v31 = vld [vmem:[%s19721_s3 + $0x358] ss:$20 sps:$4 sm:$0xff]  }
 0x3f8   :  { %2494 = vrot.lane.b32.xlu1 %v2400_v1, %s12088_s29  ;;  %v210_v20 = vadd.f32 %v209_v25, %v147_v53  ;;  %v11885_v1 = vld [vmem:[%s19720_s0 + $0x98] sm:$0xff]  ;;  %v11890_v53 = vld [vmem:[%s19720_s0 + $0xd0] sm:$0xff] }
 0x3f9   :  { %2496 = vrot.lane.b32.xlu0 %v2401_v16, %s12088_s29  ;;  %v150_v16 = vmul.f32 %v11885_v1, %v15060_v7  ;;  %v157_v25 = vmul.f32 %v11890_v53, %v15014_v22 }
 0x3fa   :  { %v211_v63 = vadd.f32 %v210_v20, %v148_v39 }
 0x3fb   :  { %9870 = vmatmul.mubr.msk.bf16.gmra.mrb[72].mxu0 %vm4833_vm12, %v11729_v59 }
 0x3fc   :  { %2600 = vrot.lane.b32.xlu1 %v11868_v15, %s12094_s18  ;;  %5858 = vmatprep.mubr.bf16.mxu0 %v14632_v19  ;;  %v212_v54 = vadd.f32 %v211_v63, %v149_v4  ;;  %v19991_v63 = vld [vmem:[#allocation37_spill] sm:$0xff] }
 0x3fd   :  { %2602 = vrot.lane.b32.xlu0 %v11869_v21, %s12094_s18  ;;  %9902 = vmatmul.mubr.msk.bf16.gmra.mrb[72].mxu1 %vm4833_vm12, %v11729_v59  ;;  %v19989_v59 = vld [vmem:[#allocation32_spill] sm:$0xff]  ;;  %v151_v21 = vmul.f32 %v14884_v55, %v15106_v36  ;;  %v11734_v55 = vld [vmem:[%s19721_s3 + $0x3a8] ss:$20 sps:$4 sm:$0xff]  }
 0x3fe   :  { %6917 = vmatprep.mubr.bf16.mxu1 %v14632_v19  ;;  %v2778_v6 = vrot.slane %v19989_v59, %v13990_v58  ;;  %v2782_v15 = vrot.slane %v19989_v59, %v13994_v41  ;;  %v213_v52 = vadd.f32 %v212_v54, %v150_v16  ;;  %v2786_v46 = vrot.slane %v19989_v59, %v14006_v42 }
 0x3ff   :  { %v152_v58 = vmul.f32 %v14870_v10, %v15151_v3  ;;  %v153_v42 = vmul.f32 %v14904_v40, %v15164_v48  ;;  %v154_v10 = vmul.f32 %v14919_v5, %v15188_v2  ;;  %v11888_v40 = vld [vmem:[%s19720_s0 + $0xc0] sm:$0xff]  ;;  %v11889_v5 = vld [vmem:[%s19720_s0 + $0xc8] sm:$0xff]  ;;  %v159_v16 = vmul.f32 %v14891_v29, %v15106_v36 }
 0x400   :  { %2604 = vrot.lane.b32.xlu1 %v11870_v44, %s12094_s18  ;;  %v214_v41 = vadd.f32 %v213_v52, %v151_v21  ;;  %v155_v8 = vmul.f32 %v11888_v40, %v14972_v24  ;;  %v160_v29 = vmul.f32 %v14877_v28, %v15151_v3 }
 0x401   :  { %2606 = vrot.lane.b32.xlu0 %v11871_v18, %s12094_s18  ;;  %v11735_v18 = vld [vmem:[%s19721_s3 + $0x3d0] ss:$20 sps:$4 sm:$0xff]  }
 0x403   :  { %9871 = vmatmul.mubr.msk.bf16.gmra.mrb[76].mxu0 %vm4833_vm12, %v11730_v34 }
 0x404   :  { %2616 = vrot.lane.b32.xlu1 %v11872_v60, %s12094_s18  ;;  %5868 = vmatprep.mubr.bf16.mxu0 %v14632_v19  ;;  %v156_v60 = vmul.f32 %v11889_v5, %v14976_v27 }
 0x405   :  { %2618 = vrot.lane.b32.xlu0 %v11873_v17, %s12094_s18  ;;  %9903 = vmatmul.mubr.msk.bf16.gmra.mrb[76].mxu1 %vm4833_vm12, %v11730_v34  ;;  %v215_v34 = vadd.f32 %v214_v41, %v152_v58  ;;  %v19992_v58 = vld [vmem:[#allocation39_spill] sm:$0xff] }
 0x406   :  { %6927 = vmatprep.mubr.bf16.mxu1 %v14632_v19 }
 0x407   :  { %v216_v44 = vadd.f32 %v215_v34, %v153_v42  ;;  %v11738_v42 = vld [vmem:[%s19721_s3 + $0x448] ss:$20 sps:$4 sm:$0xff]  }
 0x408   :  { %2620 = vrot.lane.b32.xlu1 %v11874_v14, %s12094_s18 }
 0x409   :  { %2622 = vrot.lane.b32.xlu0 %v11875_v61, %s12094_s18  ;;  %v217_v0 = vadd.f32 %v216_v44, %v154_v10  ;;  %v11736_v61 = vld [vmem:[%s19721_s3 + $0x3f8] ss:$20 sps:$4 sm:$0xff]  }
 0x40b   :  { %9872 = vmatmul.mubr.msk.bf16.gmra.mrb[80].mxu0 %vm4833_vm12, %v11731_v38  ;;  %v218_v17 = vadd.f32 %v217_v0, %v155_v8 }
 0x40c   :  { %2632 = vrot.lane.b32.xlu1 %v11877_v11, %s12094_s18  ;;  %5878 = vmatprep.mubr.bf16.mxu0 %v14632_v19 }
 0x40d   :  { %2634 = vrot.lane.b32.xlu0 %v11878_v9, %s12094_s18  ;;  %9904 = vmatmul.mubr.msk.bf16.gmra.mrb[80].mxu1 %vm4833_vm12, %v11731_v38  ;;  %v19990_v38 = vld [vmem:[#allocation35_spill] sm:$0xff]  ;;  %v219_v11 = vadd.f32 %v218_v17, %v156_v60 }
 0x40e   :  { %6937 = vmatprep.mubr.bf16.mxu1 %v14632_v19 }
 0x410   :  { %2636 = vrot.lane.b32.xlu1 %v11880_v57, %s12094_s18 }
 0x411   :  { %2638 = vrot.lane.b32.xlu0 %v11881_v62, %s12094_s18  ;;  %v220_v62 = vadd.f32 %v219_v11, %v157_v25  ;;  %v3431_v25 = vld [vmem:[#allocation2 + $0x438] sm:$0xff] }
 0x412   :  { %8460 = vmatprep.subr.bf16.mxu1 %v3431_v25 }
 0x413   :  { %9873 = vmatmul.mubr.msk.bf16.gmra.mrb[84].mxu0 %vm4833_vm12, %v11732_v31 }
 0x414   :  { %2648 = vrot.lane.b32.xlu1 %v11883_v23, %s12094_s18  ;;  %5888 = vmatprep.mubr.bf16.mxu0 %v14632_v19 }
 0x415   :  { %2650 = vrot.lane.b32.xlu0 %v11884_v33, %s12094_s18  ;;  %9905 = vmatmul.mubr.msk.bf16.gmra.mrb[84].mxu1 %vm4833_vm12, %v11732_v31  ;;  %v11891_v31 = vld [vmem:[%s19720_s0 + $0xd8] sm:$0xff]  ;;  %v11737_v33 = vld [vmem:[%s19721_s3 + $0x420] ss:$20 sps:$4 sm:$0xff]  }
 0x416   :  { %6947 = vmatprep.mubr.bf16.mxu1 %v14632_v19  ;;  %v158_v57 = vmul.f32 %v11891_v31, %v15060_v7 }
 0x418   :  { %2652 = vrot.lane.b32.xlu1 %v11886_v13, %s12094_s18  ;;  %v221_v54 = vadd.f32 %v220_v62, %v158_v57 }
 0x419   :  { %2654 = vrot.lane.b32.xlu0 %v11887_v49, %s12094_s18 }
 0x41b   :  { %9874 = vmatmul.mubr.msk.bf16.gmra.mrb[88].mxu0 %vm4833_vm12, %v11733_v56 }
 0x41c   :  { %2797 = vrot.lane.b32.xlu1 %v2778_v6, %s12091_s25  ;;  %5898 = vmatprep.mubr.bf16.mxu0 %v14632_v19 }
 0x41d   :  { %2799 = vrot.lane.b32.xlu0 %v2782_v15, %s12091_s25  ;;  %9906 = vmatmul.mubr.msk.bf16.gmra.mrb[88].mxu1 %vm4833_vm12, %v11733_v56  ;;  %v222_v15 = vadd.f32 %v221_v54, %v159_v16 }
 0x41e   :  { %6957 = vmatprep.mubr.bf16.mxu1 %v14632_v19 }
 0x41f   :  { %v223_v40 = vadd.f32 %v222_v15, %v160_v29  ;;  %v11893_v29 = vld [vmem:[%s19720_s0 + $0x108] sm:$0xff] }
 0x420   :  { %2801 = vrot.lane.b32.xlu1 %v2786_v46, %s12091_s25  ;;  %v164_v15 = vmul.f32 %v11893_v29, %v14976_v27 }
 0x423   :  { %9875 = vmatmul.mubr.msk.bf16.gmra.mrb[92].mxu0 %vm4833_vm12, %v11734_v55 }
 0x424   :  { %5908 = vmatprep.mubr.bf16.mxu0 %v14632_v19 }
 0x425   :  { %9907 = vmatmul.mubr.msk.bf16.gmra.mrb[92].mxu1 %vm4833_vm12, %v11734_v55 }
 0x426   :  { %6967 = vmatprep.mubr.bf16.mxu1 %v14632_v19 }
 0x42b   :  { %9876 = vmatmul.mubr.msk.bf16.gmra.mrb[96].mxu0 %vm4833_vm12, %v11735_v18 }
 0x42c   :  { %5918 = vmatprep.mubr.bf16.mxu0 %v14632_v19 }
 0x42d   :  { %9908 = vmatmul.mubr.msk.bf16.gmra.mrb[96].mxu1 %vm4833_vm12, %v11735_v18  ;;  %v161_v18 = vmul.f32 %v14911_v37, %v15164_v48 }
 0x42e   :  { %v2089_v32 = vpop.permute.xlu1 %2088  ;;  %6977 = vmatprep.mubr.bf16.mxu1 %v14632_v19 }
 0x42f   :  { %v2091_v51 = vpop.permute.xlu0 %2090  ;;  %v15388_v14 = vsel %vm1550_vm3, %v19990_v38, %v2089_v32  ;;  %v224_v38 = vadd.f32 %v223_v40, %v161_v18  ;;  %v20002_v18 = vld [vmem:[#allocation43_spill] sm:$0xff] }
 0x430   :  { %v15394_v35 = vsel %vm1550_vm3, %v2089_v32, %v2091_v51 }
 0x432   :  { %v2093_v9 = vpop.permute.xlu1 %2092 }
 0x433   :  { %v2095_v43 = vpop.permute.xlu0 %2094  ;;  %v2150_v39 = vsel %vm1550_vm3, %v2091_v51, %v2093_v9  ;;  %9877 = vmatmul.mubr.msk.bf16.gmra.mrb[100].mxu0 %vm4833_vm12, %v11736_v61  ;;  %v162_v51 = vmul.f32 %v14926_v47, %v15188_v2 }
 0x434   :  { %v2151_v20 = vsel %vm1550_vm3, %v2093_v9, %v2095_v43  ;;  %2212 = vst [vmem:[#allocation2 + $0x530] sm:$0xff] %v2150_v39  ;;  %5928 = vmatprep.mubr.bf16.mxu0 %v14632_v19  ;;  %v19993_v9 = vld [vmem:[#allocation41_spill] sm:$0xff] }
 0x435   :  { %2213 = vst [vmem:[#allocation2 + $0x538] sm:$0xff] %v2151_v20  ;;  %9909 = vmatmul.mubr.msk.bf16.gmra.mrb[100].mxu1 %vm4833_vm12, %v11736_v61  ;;  %v11739_v20 = vld [vmem:[%s19721_s3 + $0x470] ss:$20 sps:$4 sm:$0xff]  }
 0x436   :  { %v2105_v12 = vpop.permute.xlu1 %2104  ;;  %6987 = vmatprep.mubr.bf16.mxu1 %v14632_v19 }
 0x437   :  { %v2107_v4 = vpop.permute.xlu0 %2106  ;;  %v15412_v23 = vsel %vm1550_vm3, %v19991_v63, %v2105_v12  ;;  %v225_v63 = vadd.f32 %v224_v38, %v162_v51 }
 0x438   :  { %v15418_v1 = vsel %vm1550_vm3, %v2105_v12, %v2107_v4  ;;  %v11892_v12 = vld [vmem:[%s19720_s0 + $0x100] sm:$0xff] }
 0x43a   :  { %v2109_v56 = vpop.permute.xlu1 %2108 }
 0x43b   :  { %v2111_v13 = vpop.permute.xlu0 %2110  ;;  %v2157_v59 = vsel %vm1550_vm3, %v2107_v4, %v2109_v56  ;;  %9878 = vmatmul.mubr.msk.bf16.gmra.mrb[104].mxu0 %vm4833_vm12, %v11737_v33  ;;  %v163_v4 = vmul.f32 %v11892_v12, %v14972_v24 }
 0x43c   :  { %v2158_v6 = vsel %vm1550_vm3, %v2109_v56, %v2111_v13  ;;  %2220 = vst [vmem:[#allocation2 + $0x570] sm:$0xff] %v2157_v59  ;;  %5938 = vmatprep.mubr.bf16.mxu0 %v14632_v19 }
 0x43d   :  { %2221 = vst [vmem:[#allocation2 + $0x578] sm:$0xff] %v2158_v6  ;;  %9910 = vmatmul.mubr.msk.bf16.gmra.mrb[104].mxu1 %vm4833_vm12, %v11737_v33  ;;  %v15427_v49 = vpop.f32.mrb[0].mxu0 }
 0x43e   :  { %v2121_v21 = vpop.permute.xlu1 %2120  ;;  %v15431_v52 = vpop.f32.mrb[1].mxu0  ;;  %6997 = vmatprep.mubr.bf16.mxu1 %v14632_v19 }
 0x43f   :  { %v2123_v46 = vpop.permute.xlu0 %2122  ;;  %v15436_v41 = vsel %vm1550_vm3, %v19992_v58, %v2121_v21  ;;  %v15438_v55 = vpop.f32.mrb[2].mxu0 }
 0x440   :  { %v15444_v34 = vsel %vm1550_vm3, %v2121_v21, %v2123_v46  ;;  %v15446_v28 = vpop.f32.mrb[0].mxu1  ;;  %v15448_v10 = vpop.f32.mrb[3].mxu0  ;;  %v226_v21 = vadd.f32 %v225_v63, %v163_v4 }
 0x441   :  { %v15450_v44 = vpop.f32.mrb[1].mxu1 }
 0x442   :  { %v2125_v8 = vpop.permute.xlu1 %2124  ;;  %v15454_v0 = vpop.f32.mrb[2].mxu1 }
 0x443   :  { %v2127_v5 = vpop.permute.xlu0 %2126  ;;  %v2164_v60 = vsel %vm1550_vm3, %v2123_v46, %v2125_v8  ;;  %v15457_v17 = vpop.f32.mrb[3].mxu1  ;;  %9879 = vmatmul.mubr.msk.bf16.gmra.mrb[108].mxu0 %vm4833_vm12, %v11738_v42 }
 0x444   :  { %v2165_v32 = vsel %vm1550_vm3, %v2125_v8, %v2127_v5  ;;  %2228 = vst [vmem:[#allocation2 + $0x5b0] sm:$0xff] %v2164_v60  ;;  %5948 = vmatprep.mubr.bf16.mxu0 %v14632_v19  ;;  %v11740_v5 = vld [vmem:[%s19721_s3 + $0x498] ss:$20 sps:$4 sm:$0xff]  }
 0x445   :  { %2229 = vst [vmem:[#allocation2 + $0x5b8] sm:$0xff] %v2165_v32  ;;  %9911 = vmatmul.mubr.msk.bf16.gmra.mrb[108].mxu1 %vm4833_vm12, %v11738_v42  ;;  %v15463_v37 = vpop.f32.mrb[4].mxu0 }
 0x446   :  { %v2137_v61 = vpop.permute.xlu1 %2136  ;;  %v15467_v53 = vpop.f32.mrb[5].mxu0  ;;  %7007 = vmatprep.mubr.bf16.mxu1 %v14632_v19 }
 0x447   :  { %v2139_v11 = vpop.permute.xlu0 %2138  ;;  %v15472_v43 = vsel %vm1550_vm3, %v19993_v9, %v2137_v61  ;;  %v15474_v39 = vpop.f32.mrb[6].mxu0 }
 0x448   :  { %19994 = vst [vmem:[#allocation12_spill] sm:$0xff] %v15474_v39  ;;  %v15480_v47 = vsel %vm1550_vm3, %v2137_v61, %v2139_v11  ;;  %v15482_v31 = vpop.f32.mrb[4].mxu1  ;;  %v15484_v57 = vpop.f32.mrb[7].mxu0  ;;  %v11894_v61 = vld [vmem:[%s19720_s0 + $0x110] sm:$0xff] }
 0x449   :  { %19995 = vst [vmem:[#allocation13_spill] sm:$0xff] %v15482_v31  ;;  %19996 = vst [vmem:[#allocation18_spill] sm:$0xff] %v15484_v57  ;;  %v15486_v62 = vpop.f32.mrb[5].mxu1  ;;  %v165_v25 = vmul.f32 %v11894_v61, %v15014_v22  ;;  %v11741_v61 = vld [vmem:[%s19721_s3 + $0x4c0] ss:$20 sps:$4 sm:$0xff]  }
 0x44a   :  { %19997 = vst [vmem:[#allocation21_spill] sm:$0xff] %v15486_v62  ;;  %v2141_v33 = vpop.permute.xlu1 %2140  ;;  %v15492_v16 = vpop.f32.mrb[6].mxu1 }
 0x44b   :  { %19998 = vst [vmem:[#allocation29_spill] sm:$0xff] %v15492_v16  ;;  %v2143_v54 = vpop.permute.xlu0 %2142  ;;  %v2171_v56 = vsel %vm1550_vm3, %v2139_v11, %v2141_v33  ;;  %v15495_v13 = vpop.f32.mrb[7].mxu1  ;;  %9880 = vmatmul.mubr.msk.bf16.gmra.mrb[112].mxu0 %vm4833_vm12, %v11739_v20  ;;  %v227_v11 = vadd.f32 %v226_v21, %v164_v15 }
 0x44c   :  { %19999 = vst [vmem:[#allocation33_spill] sm:$0xff] %v15495_v13  ;;  %v2172_v59 = vsel %vm1550_vm3, %v2141_v33, %v2143_v54  ;;  %2236 = vst [vmem:[#allocation2 + $0x5f0] sm:$0xff] %v2171_v56  ;;  %5958 = vmatprep.mubr.bf16.mxu0 %v14632_v19  ;;  %v11895_v56 = vld [vmem:[%s19720_s0 + $0x118] sm:$0xff] }
 0x44d   :  { %2237 = vst [vmem:[#allocation2 + $0x5f8] sm:$0xff] %v2172_v59  ;;  %9912 = vmatmul.mubr.msk.bf16.gmra.mrb[112].mxu1 %vm4833_vm12, %v11739_v20  ;;  %v15501_v6 = vpop.f32.mrb[8].mxu0  ;;  %v166_v59 = vmul.f32 %v11895_v56, %v15060_v7  ;;  %v228_v29 = vadd.f32 %v227_v11, %v165_v25 }
 0x44e   :  { %20000 = vst [vmem:[#allocation14_spill] sm:$0xff] %v15501_v6  ;;  %v2443_v46 = vpop.permute.xlu1 %2442  ;;  %v15507_v58 = vpop.f32.mrb[9].mxu0  ;;  %7017 = vmatprep.mubr.bf16.mxu1 %v14632_v19  ;;  %v3453_v6 = vld [vmem:[#allocation2 + $0x4e8] sm:$0xff] }
 0x44f   :  { %20001 = vst [vmem:[#allocation15_spill] sm:$0xff] %v15507_v58  ;;  %v2445_v42 = vpop.permute.xlu0 %2444  ;;  %v15512_v40 = vsel %vm1195_vm2, %v20002_v18, %v2443_v46  ;;  %v15514_v8 = vpop.f32.mrb[10].mxu0 }
 0x450   :  { %20003 = vst [vmem:[#allocation16_spill] sm:$0xff] %v15514_v8  ;;  %v15520_v60 = vsel %vm1195_vm2, %v2443_v46, %v2445_v42  ;;  %v15522_v32 = vpop.f32.mrb[8].mxu1  ;;  %v15524_v51 = vpop.f32.mrb[11].mxu0 }
 0x451   :  { %20004 = vst [vmem:[#allocation25_spill] sm:$0xff] %v15522_v32  ;;  %20005 = vst [vmem:[#allocation20_spill] sm:$0xff] %v15524_v51  ;;  %v15526_v38 = vpop.f32.mrb[9].mxu1 }
 0x452   :  { %20006 = vst [vmem:[#allocation24_spill] sm:$0xff] %v15526_v38  ;;  %v2447_v9 = vpop.permute.xlu1 %2446  ;;  %v15532_v20 = vpop.f32.mrb[10].mxu1 }
 0x453   :  { %20007 = vst [vmem:[#allocation17_spill] sm:$0xff] %v15532_v20  ;;  %v2449_v12 = vpop.permute.xlu0 %2448  ;;  %v2504_v4 = vsel %vm1195_vm2, %v2445_v42, %v2447_v9  ;;  %v15535_v63 = vpop.f32.mrb[11].mxu1  ;;  %9881 = vmatmul.mubr.msk.bf16.gmra.mrb[116].mxu0 %vm4833_vm12, %v11740_v5  ;;  %v20011_v42 = vld [vmem:[#allocation45_spill] sm:$0xff] }
 0x454   :  { %20008 = vst [vmem:[#allocation27_spill] sm:$0xff] %v15535_v63  ;;  %v2505_v33 = vsel %vm1195_vm2, %v2447_v9, %v2449_v12  ;;  %2566 = vst [vmem:[#allocation2 + $0x630] sm:$0xff] %v2504_v4  ;;  %5968 = vmatprep.mubr.bf16.mxu0 %v14632_v19  ;;  %v167_v4 = vmul.f32 %v14958_v30, %v15106_v36 }
 0x455   :  { %2567 = vst [vmem:[#allocation2 + $0x638] sm:$0xff] %v2505_v33  ;;  %9913 = vmatmul.mubr.msk.bf16.gmra.mrb[116].mxu1 %vm4833_vm12, %v11740_v5  ;;  %v15541_v54 = vpop.f32.mrb[12].mxu0  ;;  %v229_v33 = vadd.f32 %v228_v29, %v166_v59  ;;  %v168_v59 = vmul.f32 %v14944_v26, %v15151_v3 }
 0x456   :  { %20009 = vst [vmem:[#allocation31_spill] sm:$0xff] %v15541_v54  ;;  %v2459_v15 = vpop.permute.xlu1 %2458  ;;  %v15547_v21 = vpop.f32.mrb[13].mxu0  ;;  %7027 = vmatprep.mubr.bf16.mxu1 %v14632_v19 }
 0x457   :  { %20010 = vst [vmem:[#allocation7_spill] sm:$0xff] %v15547_v21  ;;  %v2461_v46 = vpop.permute.xlu0 %2460  ;;  %v15552_v18 = vsel %vm1195_vm2, %v20011_v42, %v2459_v15  ;;  %v15554_v5 = vpop.f32.mrb[14].mxu0  ;;  %v230_v29 = vadd.f32 %v229_v33, %v167_v4 }
 0x458   :  { %20012 = vst [vmem:[#allocation9_spill] sm:$0xff] %v15554_v5  ;;  %v15560_v9 = vsel %vm1195_vm2, %v2459_v15, %v2461_v46  ;;  %v15562_v25 = vpop.f32.mrb[12].mxu1  ;;  %v15564_v11 = vpop.f32.mrb[15].mxu0 }
 0x459   :  { %20013 = vst [vmem:[#allocation6_spill] sm:$0xff] %v15562_v25  ;;  %20014 = vst [vmem:[#allocation8_spill] sm:$0xff] %v15564_v11  ;;  %v15566_v12 = vpop.f32.mrb[13].mxu1  ;;  %v20018_v11 = vld [vmem:[#allocation47_spill] sm:$0xff] }
 0x45a   :  { %20015 = vst [vmem:[#allocation11_spill] sm:$0xff] %v15566_v12  ;;  %v2463_v56 = vpop.permute.xlu1 %2462  ;;  %v15570_v42 = vpop.f32.mrb[14].mxu1 }
 0x45b   :  { %20016 = vst [vmem:[#allocation26_spill] sm:$0xff] %v15570_v42  ;;  %v2465_v5 = vpop.permute.xlu0 %2464  ;;  %v2511_v21 = vsel %vm1195_vm2, %v2461_v46, %v2463_v56  ;;  %v15573_v54 = vpop.f32.mrb[15].mxu1  ;;  %9882 = vmatmul.mubr.msk.bf16.gmra.mrb[120].mxu0 %vm4833_vm12, %v11741_v61 }
 0x45c   :  { %20017 = vst [vmem:[#allocation32_spill] sm:$0xff] %v15573_v54  ;;  %v2512_v15 = vsel %vm1195_vm2, %v2463_v56, %v2465_v5  ;;  %2574 = vst [vmem:[#allocation2 + $0x670] sm:$0xff] %v2511_v21  ;;  %5978 = vmatprep.mubr.bf16.mxu0 %v14632_v19 }
 0x45d   :  { %2575 = vst [vmem:[#allocation2 + $0x678] sm:$0xff] %v2512_v15  ;;  %9914 = vmatmul.mubr.msk.bf16.gmra.mrb[120].mxu1 %vm4833_vm12, %v11741_v61  ;;  %v15579_v30 = vpop.f32.mrb[16].mxu0  ;;  %v11742_v61 = vld [vmem:[%s19721_s3 + $0x4e8] ss:$20 sps:$4 sm:$0xff]   ;;  %v169_v15 = vmul.f32 %v14985_v50, %v15164_v48 }
 0x45e   :  { %v2475_v42 = vpop.permute.xlu1 %2474  ;;  %v15583_v46 = vpop.f32.mrb[17].mxu0  ;;  %7037 = vmatprep.mubr.bf16.mxu1 %v14632_v19 }
 0x45f   :  { %v2477_v54 = vpop.permute.xlu0 %2476  ;;  %v15588_v21 = vsel %vm1195_vm2, %v20018_v11, %v2475_v42  ;;  %v15590_v5 = vpop.f32.mrb[18].mxu0  ;;  %v231_v11 = vadd.f32 %v230_v29, %v168_v59 }
 0x460   :  { %20019 = vst [vmem:[#allocation35_spill] sm:$0xff] %v15590_v5  ;;  %v15596_v56 = vsel %vm1195_vm2, %v2475_v42, %v2477_v54  ;;  %v15598_v26 = vpop.f32.mrb[16].mxu1  ;;  %v15600_v4 = vpop.f32.mrb[19].mxu0 }
 0x461   :  { %20020 = vst [vmem:[#allocation37_spill] sm:$0xff] %v15600_v4  ;;  %v15602_v33 = vpop.f32.mrb[17].mxu1  ;;  %v11896_v4 = vld [vmem:[%s19721_s3 + $0x4] ss:$20 sps:$4 sm:$0xff]   ;;  %v232_v59 = vadd.f32 %v231_v11, %v169_v15 }
 0x462   :  { %v2479_v12 = vpop.permute.xlu1 %2478  ;;  %v15606_v25 = vpop.f32.mrb[18].mxu1  ;;  %v3428_v15 = vld [vmem:[#allocation2 + $0x420] sm:$0xff] }
 0x463   :  { %20021 = vst [vmem:[#allocation39_spill] sm:$0xff] %v15606_v25  ;;  %v2481_v5 = vpop.permute.xlu0 %2480  ;;  %v2518_v63 = vsel %vm1195_vm2, %v2477_v54, %v2479_v12  ;;  %v15609_v20 = vpop.f32.mrb[19].mxu1  ;;  %9883 = vmatmul.mubr.msk.bf16.gmra.mrb[124].mxu0 %vm4833_vm12, %v11742_v61  ;;  %v170_v54 = vmul.f32 %v15000_v45, %v15188_v2 }
 0x464   :  { %20022 = vst [vmem:[#allocation41_spill] sm:$0xff] %v15609_v20  ;;  %v2519_v42 = vsel %vm1195_vm2, %v2479_v12, %v2481_v5  ;;  %2582 = vst [vmem:[#allocation2 + $0x6b0] sm:$0xff] %v2518_v63  ;;  %7080 = vmatprep.mubr.bf16.mxu0 %v11896_v4  ;;  %v20025_v63 = vld [vmem:[#allocation49_spill] sm:$0xff] }
 0x465   :  { %2583 = vst [vmem:[#allocation2 + $0x6b8] sm:$0xff] %v2519_v42  ;;  %9915 = vmatmul.mubr.msk.bf16.gmra.mrb[124].mxu1 %vm4833_vm12, %v11742_v61  ;;  %v15617_v50 = vpop.f32.mrb[20].mxu0 }
 0x466   :  { %20023 = vst [vmem:[#allocation43_spill] sm:$0xff] %v15617_v50  ;;  %v2491_v29 = vpop.permute.xlu1 %2490  ;;  %v15621_v20 = vpop.f32.mrb[21].mxu0  ;;  %8139 = vmatprep.mubr.bf16.mxu1 %v11896_v4  ;;  %v11897_v4 = vld [vmem:[%s19720_s0 + $0x140] sm:$0xff] }
 0x467   :  { %20024 = vst [vmem:[#allocation45_spill] sm:$0xff] %v15621_v20  ;;  %v2493_v12 = vpop.permute.xlu0 %2492  ;;  %v15625_v5 = vsel %vm1195_vm2, %v20025_v63, %v2491_v29  ;;  %v15627_v25 = vpop.f32.mrb[22].mxu0  ;;  %v171_v11 = vmul.f32 %v11897_v4, %v14972_v24  ;;  %v233_v63 = vadd.f32 %v232_v59, %v170_v54  ;;  %v11899_v54 = vld [vmem:[%s19721_s3 + $0x2c] ss:$20 sps:$4 sm:$0xff]   ;;  %v3439_v59 = vld [vmem:[#allocation2 + $0x478] sm:$0xff] }
 0x468   :  { %20026 = vst [vmem:[#allocation47_spill] sm:$0xff] %v15627_v25  ;;  %v15630_v42 = vsel %vm1195_vm2, %v2491_v29, %v2493_v12  ;;  %v15632_v61 = vpop.f32.mrb[20].mxu1  ;;  %v15634_v50 = vpop.f32.mrb[23].mxu0  ;;  %v3437_v25 = vld [vmem:[#allocation2 + $0x468] sm:$0xff]  ;;  %v3436_v4 = vld [vmem:[#allocation2 + $0x460] sm:$0xff] }
 0x469   :  { %20027 = vst [vmem:[#allocation49_spill] sm:$0xff] %v15632_v61  ;;  %20028 = vst [vmem:[#allocation57_spill] sm:$0xff] %v15634_v50  ;;  %v15636_v45 = vpop.f32.mrb[21].mxu1  ;;  %v11898_v50 = vld [vmem:[%s19721_s3] ss:$20 sps:$4 sm:$0xff]  }
 0x46a   :  { %20029 = vst [vmem:[#allocation58_spill] sm:$0xff] %v15636_v45  ;;  %v2495_v20 = vpop.permute.xlu1 %2494  ;;  %v15642_v51 = vpop.f32.mrb[22].mxu1  ;;  %v3430_v45 = vld [vmem:[#allocation2 + $0x430] sm:$0xff] }
 0x46b   :  { %20030 = vst [vmem:[#allocation59_spill] sm:$0xff] %v15642_v51  ;;  %v2497_v29 = vpop.permute.xlu0 %2496  ;;  %v2525_v8 = vsel %vm1195_vm2, %v2493_v12, %v2495_v20  ;;  %v15645_v61 = vpop.f32.mrb[23].mxu1  ;;  %7081 = vmatmul.mubr.bf16.vlgmr.msra.gmra.mrb[128].mxu0 %v11898_v50  ;;  %v3445_v51 = vld [vmem:[#allocation2 + $0x4a8] sm:$0xff] }
 0x46c   :  { %20031 = vst [vmem:[#allocation60_spill] sm:$0xff] %v15645_v61  ;;  %v2526_v38 = vsel %vm1195_vm2, %v2495_v20, %v2497_v29  ;;  %2590 = vst [vmem:[#allocation2 + $0x6f0] sm:$0xff] %v2525_v8  ;;  %7402 = vmatpush1.bf16.msra.mxu0 %v3428_v15  ;;  %7090 = vmatprep.mubr.bf16.mxu0 %v11899_v54  ;;  %v11900_v61 = vld [vmem:[%s19720_s0 + $0x148] sm:$0xff]  ;;  %v234_v8 = vadd.f32 %v233_v63, %v171_v11  ;;  %v3447_v63 = vld [vmem:[#allocation2 + $0x4b8] sm:$0xff] }
 0x46d   :  { %2591 = vst [vmem:[#allocation2 + $0x6f8] sm:$0xff] %v2526_v38  ;;  %8140 = vmatmul.mubr.bf16.vlgmr.msra.gmra.mrb[128].mxu1 %v11898_v50  ;;  %v15654_v12 = vpop.f32.mrb[24].mxu0  ;;  %7403 = vmatprep.subr.bf16.mxu0 %v3437_v25  ;;  %v172_v20 = vmul.f32 %v11900_v61, %v14976_v27  ;;  %v20034_v38 = vld [vmem:[#allocation51_spill] sm:$0xff] }
 0x46e   :  { %20032 = vst [vmem:[#allocation61_spill] sm:$0xff] %v15654_v12  ;;  %v2601_v15 = vpop.permute.xlu1 %2600  ;;  %v15660_v29 = vpop.f32.mrb[25].mxu0  ;;  %8149 = vmatprep.mubr.bf16.mxu1 %v11899_v54  ;;  %8461 = vmatpush1.bf16.msra.mxu1 %v3430_v45  ;;  %v3438_v12 = vld [vmem:[#allocation2 + $0x470] sm:$0xff]  ;;  %v3444_v45 = vld [vmem:[#allocation2 + $0x4a0] sm:$0xff] }
 0x46f   :  { %20033 = vst [vmem:[#allocation62_spill] sm:$0xff] %v15660_v29  ;;  %v2603_v32 = vpop.permute.xlu0 %2602  ;;  %v15664_v50 = vsel %vm2656_vm10, %v20034_v38, %v2601_v15  ;;  %v15666_v25 = vpop.f32.mrb[26].mxu0  ;;  %8462 = vmatprep.subr.bf16.mxu1 %v3439_v59  ;;  %v11901_v38 = vld [vmem:[%s19720_s0 + $0x150] sm:$0xff] }
 0x470   :  { %20035 = vst [vmem:[#allocation51_spill] sm:$0xff] %v15666_v25  ;;  %v15669_v58 = vsel %vm2656_vm10, %v2601_v15, %v2603_v32  ;;  %v15671_v61 = vpop.f32.mrb[24].mxu1  ;;  %7404 = vmatpush1.bf16.msra.mxu0 %v3436_v4  ;;  %v15673_v11 = vpop.f32.mrb[27].mxu0  ;;  %v173_v59 = vmul.f32 %v11901_v38, %v15014_v22  ;;  %v235_v25 = vadd.f32 %v234_v8, %v172_v20  ;;  %v3455_v20 = vld [vmem:[#allocation2 + $0x4f8] sm:$0xff] }
 0x471   :  { %20036 = vst [vmem:[#allocation63_spill] sm:$0xff] %v15671_v61  ;;  %20037 = vst [vmem:[#allocation64_spill] sm:$0xff] %v15673_v11  ;;  %v15675_v54 = vpop.f32.mrb[25].mxu1  ;;  %7405 = vmatprep.subr.bf16.mxu0 %v3445_v51  ;;  %v11902_v51 = vld [vmem:[%s19721_s3 + $0x28] ss:$20 sps:$4 sm:$0xff]  }
 0x472   :  { %20038 = vst [vmem:[#allocation65_spill] sm:$0xff] %v15675_v54  ;;  %v2605_v29 = vpop.permute.xlu1 %2604  ;;  %v15681_v15 = vpop.f32.mrb[26].mxu1  ;;  %8463 = vmatpush1.bf16.msra.mxu1 %v3438_v12  ;;  %v3446_v54 = vld [vmem:[#allocation2 + $0x4b0] sm:$0xff]  ;;  %v11904_v8 = vld [vmem:[%s19720_s0 + $0x158] sm:$0xff] }
 0x473   :  { %20039 = vst [vmem:[#allocation66_spill] sm:$0xff] %v15681_v15  ;;  %v2607_v4 = vpop.permute.xlu0 %2606  ;;  %v2662_v11 = vsel %vm2656_vm10, %v2603_v32, %v2605_v29  ;;  %v15684_v61 = vpop.f32.mrb[27].mxu1  ;;  %7091 = vmatmul.mubr.bf16.gmra.mrb[132].mxu0 %v11902_v51  ;;  %8464 = vmatprep.subr.bf16.mxu1 %v3447_v63  ;;  %v11903_v12 = vld [vmem:[%s19721_s3 + $0x54] ss:$20 sps:$4 sm:$0xff]   ;;  %v3452_v32 = vld [vmem:[#allocation2 + $0x4e0] sm:$0xff]  ;;  %v174_v63 = vmul.f32 %v11904_v8, %v15060_v7 }
 0x474   :  { %20040 = vst [vmem:[#allocation67_spill] sm:$0xff] %v15684_v61  ;;  %v2663_v38 = vsel %vm2656_vm10, %v2605_v29, %v2607_v4  ;;  %2724 = vst [vmem:[#allocation2 + $0x730] sm:$0xff] %v2662_v11  ;;  %7406 = vmatpush1.bf16.msra.mxu0 %v3444_v45  ;;  %7100 = vmatprep.mubr.bf16.mxu0 %v11903_v12  ;;  %v236_v11 = vadd.f32 %v235_v25, %v173_v59  ;;  %v20042_v4 = vld [vmem:[#allocation53_spill] sm:$0xff]  ;;  %v15720_v59 = vld [vmem:[%s19720_s0 + $0x160] sm:$0xff] }
 0x475   :  { %2725 = vst [vmem:[#allocation2 + $0x738] sm:$0xff] %v2663_v38  ;;  %8150 = vmatmul.mubr.bf16.gmra.mrb[132].mxu1 %v11902_v51  ;;  %7407 = vmatprep.subr.bf16.mxu0 %v3453_v6  ;;  %v3454_v6 = vld [vmem:[#allocation2 + $0x4f0] sm:$0xff] }
 0x476   :  { %v2617_v61 = vpop.permute.xlu1 %2616  ;;  %v15697_v29 = vpop.f32.mrb[28].mxu0  ;;  %8159 = vmatprep.mubr.bf16.mxu1 %v11903_v12  ;;  %8465 = vmatpush1.bf16.msra.mxu1 %v3446_v54  ;;  %v3463_v12 = vld [vmem:[#allocation2 + $0x538] sm:$0xff] }
 0x477   :  { %20041 = vst [vmem:[#allocation68_spill] sm:$0xff] %v15697_v29  ;;  %v2619_v45 = vpop.permute.xlu0 %2618  ;;  %v15701_v15 = vsel %vm2656_vm10, %v20042_v4, %v2617_v61  ;;  %v15703_v51 = vpop.f32.mrb[29].mxu0  ;;  %8466 = vmatprep.subr.bf16.mxu1 %v3455_v20 }
 0x478   :  { %20043 = vst [vmem:[#allocation53_spill] sm:$0xff] %v15703_v51  ;;  %v15706_v38 = vsel %vm2656_vm10, %v2617_v61, %v2619_v45  ;;  %v15708_v13 = vpop.f32.mrb[28].mxu1  ;;  %7408 = vmatpush1.bf16.msra.mxu0 %v3452_v32  ;;  %v15710_v8 = vpop.f32.mrb[30].mxu0  ;;  %v175_v61 = vmul.f32 %v15720_v59, %v15106_v36  ;;  %v237_v32 = vadd.f32 %v236_v11, %v174_v63  ;;  %v11907_v63 = vld [vmem:[%s19721_s3 + $0x7c] ss:$20 sps:$4 sm:$0xff]  }
 0x479   :  { %20044 = vst [vmem:[#allocation69_spill] sm:$0xff] %v15708_v13  ;;  %20045 = vst [vmem:[#allocation70_spill] sm:$0xff] %v15710_v8  ;;  %v15712_v25 = vpop.f32.mrb[29].mxu1  ;;  %7409 = vmatprep.subr.bf16.mxu0 %v15394_v35  ;;  %v15715_v54 = vpop.f32.mrb[31].mxu0  ;;  %v11906_v35 = vld [vmem:[%s19721_s3 + $0x50] ss:$20 sps:$4 sm:$0xff]  }
 0x47a   :  { %20046 = vst [vmem:[#allocation71_spill] sm:$0xff] %v15712_v25  ;;  %20047 = vst [vmem:[#allocation72_spill] sm:$0xff] %v15715_v54  ;;  %v2621_v20 = vpop.permute.xlu1 %2620  ;;  %v15724_v4 = vpop.f32.mrb[30].mxu1  ;;  %8467 = vmatpush1.bf16.msra.mxu1 %v3454_v6  ;;  %v3462_v54 = vld [vmem:[#allocation2 + $0x530] sm:$0xff]  ;;  %v3471_v11 = vld [vmem:[#allocation2 + $0x578] sm:$0xff] }
 0x47b   :  { %20048 = vst [vmem:[#allocation73_spill] sm:$0xff] %v15724_v4  ;;  %v2623_v8 = vpop.permute.xlu0 %2622  ;;  %v2669_v25 = vsel %vm2656_vm10, %v2619_v45, %v2621_v20  ;;  %v15727_v13 = vpop.f32.mrb[31].mxu1  ;;  %7101 = vmatmul.mubr.bf16.gmra.mrb[136].mxu0 %v11906_v35  ;;  %8468 = vmatprep.subr.bf16.mxu1 %v3463_v12  ;;  %v15741_v45 = vld [vmem:[%s19720_s0 + $0x168] sm:$0xff]  ;;  %v238_v12 = vadd.f32 %v237_v32, %v175_v61  ;;  %v3479_v61 = vld [vmem:[#allocation2 + $0x5b8] sm:$0xff] }
 0x47c   :  { %20049 = vst [vmem:[#allocation74_spill] sm:$0xff] %v15727_v13  ;;  %v2670_v51 = vsel %vm2656_vm10, %v2621_v20, %v2623_v8  ;;  %2732 = vst [vmem:[#allocation2 + $0x770] sm:$0xff] %v2669_v25  ;;  %7410 = vmatpush1.bf16.msra.mxu0 %v15388_v14  ;;  %7110 = vmatprep.mubr.bf16.mxu0 %v11907_v63  ;;  %v176_v6 = vmul.f32 %v15741_v45, %v15151_v3  ;;  %v20051_v20 = vld [vmem:[#allocation54_spill] sm:$0xff] }
 0x47d   :  { %2733 = vst [vmem:[#allocation2 + $0x778] sm:$0xff] %v2670_v51  ;;  %7411 = vmatprep.subr.bf16.mxu0 %v15418_v1  ;;  %8160 = vmatmul.mubr.bf16.gmra.mrb[136].mxu1 %v11906_v35  ;;  %v3470_v35 = vld [vmem:[#allocation2 + $0x570] sm:$0xff] }
 0x47e   :  { %v2633_v8 = vpop.permute.xlu1 %2632  ;;  %v15745_v14 = vpop.f32.mrb[32].mxu0  ;;  %8169 = vmatprep.mubr.bf16.mxu1 %v11907_v63  ;;  %8469 = vmatpush1.bf16.msra.mxu1 %v3462_v54 }
 0x47f   :  { %20050 = vst [vmem:[#allocation75_spill] sm:$0xff] %v15745_v14  ;;  %v2635_v25 = vpop.permute.xlu0 %2634  ;;  %v15749_v51 = vsel %vm2656_vm10, %v20051_v20, %v2633_v8  ;;  %v15751_v1 = vpop.f32.mrb[33].mxu0  ;;  %8470 = vmatprep.subr.bf16.mxu1 %v3471_v11  ;;  %v15771_v11 = vld [vmem:[%s19720_s0 + $0x170] sm:$0xff] }
 0x480   :  { %20052 = vst [vmem:[#allocation54_spill] sm:$0xff] %v15751_v1  ;;  %v15754_v13 = vsel %vm2656_vm10, %v2633_v8, %v2635_v25  ;;  %v15756_v4 = vpop.f32.mrb[32].mxu1  ;;  %7412 = vmatpush1.bf16.msra.mxu0 %v15412_v23  ;;  %v15759_v14 = vpop.f32.mrb[34].mxu0  ;;  %v177_v23 = vmul.f32 %v15771_v11, %v15164_v48  ;;  %v239_v8 = vadd.f32 %v238_v12, %v176_v6  ;;  %v11911_v6 = vld [vmem:[%s19721_s3 + $0xa4] ss:$20 sps:$4 sm:$0xff]  }
 0x481   :  { %20053 = vst [vmem:[#allocation76_spill] sm:$0xff] %v15756_v4  ;;  %20054 = vst [vmem:[#allocation77_spill] sm:$0xff] %v15759_v14  ;;  %v15761_v54 = vpop.f32.mrb[33].mxu1  ;;  %7413 = vmatprep.subr.bf16.mxu0 %v15444_v34  ;;  %v15764_v32 = vpop.f32.mrb[35].mxu0  ;;  %v11910_v34 = vld [vmem:[%s19721_s3 + $0x78] ss:$20 sps:$4 sm:$0xff]  }
 0x482   :  { %20055 = vst [vmem:[#allocation78_spill] sm:$0xff] %v15761_v54  ;;  %20056 = vst [vmem:[#allocation79_spill] sm:$0xff] %v15764_v32  ;;  %v2637_v63 = vpop.permute.xlu1 %2636  ;;  %v15766_v20 = vpop.f32.mrb[34].mxu1  ;;  %8471 = vmatpush1.bf16.msra.mxu1 %v3470_v35  ;;  %v3487_v12 = vld [vmem:[#allocation2 + $0x5f8] sm:$0xff] }
 0x483   :  { %20057 = vst [vmem:[#allocation80_spill] sm:$0xff] %v15766_v20  ;;  %v2639_v14 = vpop.permute.xlu0 %2638  ;;  %v2676_v54 = vsel %vm2656_vm10, %v2635_v25, %v2637_v63  ;;  %v15776_v4 = vpop.f32.mrb[35].mxu1  ;;  %7111 = vmatmul.mubr.bf16.gmra.mrb[140].mxu0 %v11910_v34  ;;  %8472 = vmatprep.subr.bf16.mxu1 %v3479_v61  ;;  %v3478_v20 = vld [vmem:[#allocation2 + $0x5b0] sm:$0xff]  ;;  %v240_v61 = vadd.f32 %v239_v8, %v177_v23  ;;  %v3495_v23 = vld [vmem:[#allocation2 + $0x638] sm:$0xff] }
 0x484   :  { %20058 = vst [vmem:[#allocation81_spill] sm:$0xff] %v15776_v4  ;;  %v2677_v32 = vsel %vm2656_vm10, %v2637_v63, %v2639_v14  ;;  %2740 = vst [vmem:[#allocation2 + $0x7b0] sm:$0xff] %v2676_v54  ;;  %7414 = vmatpush1.bf16.msra.mxu0 %v15436_v41  ;;  %7120 = vmatprep.mubr.bf16.mxu0 %v11911_v6  ;;  %v15792_v14 = vld [vmem:[%s19720_s0 + $0x178] sm:$0xff] }
 0x485   :  { %2741 = vst [vmem:[#allocation2 + $0x7b8] sm:$0xff] %v2677_v32  ;;  %7415 = vmatprep.subr.bf16.mxu0 %v15480_v47  ;;  %8170 = vmatmul.mubr.bf16.gmra.mrb[140].mxu1 %v11910_v34  ;;  %v178_v41 = vmul.f32 %v15792_v14, %v15188_v2  ;;  %v20060_v63 = vld [vmem:[#allocation55_spill] sm:$0xff]  ;;  %v3486_v34 = vld [vmem:[#allocation2 + $0x5f0] sm:$0xff] }
 0x486   :  { %v2649_v25 = vpop.permute.xlu1 %2648  ;;  %v15787_v35 = vpop.f32.mrb[36].mxu0  ;;  %8179 = vmatprep.mubr.bf16.mxu1 %v11911_v6  ;;  %8473 = vmatpush1.bf16.msra.mxu1 %v3478_v20 }
 0x487   :  { %20059 = vst [vmem:[#allocation82_spill] sm:$0xff] %v15787_v35  ;;  %v2651_v54 = vpop.permute.xlu0 %2650  ;;  %v15798_v32 = vsel %vm2656_vm10, %v20060_v63, %v2649_v25  ;;  %v15800_v47 = vpop.f32.mrb[37].mxu0  ;;  %8474 = vmatprep.subr.bf16.mxu1 %v3487_v12  ;;  %v11913_v12 = vld [vmem:[%s19720_s0 + $0x180] sm:$0xff] }
 0x488   :  { %20061 = vst [vmem:[#allocation55_spill] sm:$0xff] %v15800_v47  ;;  %v15803_v6 = vsel %vm2656_vm10, %v2649_v25, %v2651_v54  ;;  %v15805_v35 = vpop.f32.mrb[36].mxu1  ;;  %7416 = vmatpush1.bf16.msra.mxu0 %v15472_v43  ;;  %v15808_v4 = vpop.f32.mrb[38].mxu0  ;;  %v179_v25 = vmul.f32 %v11913_v12, %v14972_v24  ;;  %v20068_v12 = vld [vmem:[#allocation56_spill] sm:$0xff] }
 0x489   :  { %20062 = vst [vmem:[#allocation83_spill] sm:$0xff] %v15805_v35  ;;  %20063 = vst [vmem:[#allocation84_spill] sm:$0xff] %v15808_v4  ;;  %v15810_v20 = vpop.f32.mrb[37].mxu1  ;;  %7417 = vmatprep.subr.bf16.mxu0 %v15520_v60  ;;  %v15813_v8 = vpop.f32.mrb[39].mxu0  ;;  %v241_v35 = vadd.f32 %v240_v61, %v178_v41  ;;  %v11914_v60 = vld [vmem:[%s19721_s3 + $0xa0] ss:$20 sps:$4 sm:$0xff]  }
 0x48a   :  { %20064 = vst [vmem:[#allocation85_spill] sm:$0xff] %v15810_v20  ;;  %20065 = vst [vmem:[#allocation86_spill] sm:$0xff] %v15813_v8  ;;  %v2653_v63 = vpop.permute.xlu1 %2652  ;;  %v15815_v47 = vpop.f32.mrb[38].mxu1  ;;  %8475 = vmatpush1.bf16.msra.mxu1 %v3486_v34  ;;  %v11915_v41 = vld [vmem:[%s19721_s3 + $0xcc] ss:$20 sps:$4 sm:$0xff]   ;;  %v3503_v61 = vld [vmem:[#allocation2 + $0x678] sm:$0xff] }
 0x48b   :  { %20066 = vst [vmem:[#allocation87_spill] sm:$0xff] %v15815_v47  ;;  %v2655_v43 = vpop.permute.xlu0 %2654  ;;  %v2683_v4 = vsel %vm2656_vm10, %v2651_v54, %v2653_v63  ;;  %v15822_v1 = vpop.f32.mrb[39].mxu1  ;;  %7121 = vmatmul.mubr.bf16.gmra.mrb[144].mxu0 %v11914_v60  ;;  %8476 = vmatprep.subr.bf16.mxu1 %v3495_v23  ;;  %v3494_v47 = vld [vmem:[#allocation2 + $0x630] sm:$0xff]  ;;  %v242_v23 = vadd.f32 %v241_v35, %v179_v25  ;;  %v11918_v35 = vld [vmem:[%s19720_s0 + $0x60] sm:$0xff] }
 0x48c   :  { %20067 = vst [vmem:[#allocation88_spill] sm:$0xff] %v15822_v1  ;;  %v2684_v8 = vsel %vm2656_vm10, %v2653_v63, %v2655_v43  ;;  %2748 = vst [vmem:[#allocation2 + $0x7f0] sm:$0xff] %v2683_v4  ;;  %7418 = vmatpush1.bf16.msra.mxu0 %v15512_v40  ;;  %7130 = vmatprep.mubr.bf16.mxu0 %v11915_v41  ;;  %v11916_v4 = vld [vmem:[%s19720_s0 + $0x188] sm:$0xff] }
 0x48d   :  { %2749 = vst [vmem:[#allocation2 + $0x7f8] sm:$0xff] %v2684_v8  ;;  %7419 = vmatprep.subr.bf16.mxu0 %v15560_v9  ;;  %8180 = vmatmul.mubr.bf16.gmra.mrb[144].mxu1 %v11914_v60  ;;  %v180_v40 = vmul.f32 %v11916_v4, %v14976_v27  ;;  %v3502_v9 = vld [vmem:[#allocation2 + $0x670] sm:$0xff] }
 0x48e   :  { %v2798_v54 = vpop.permute.xlu1 %2797  ;;  %v15833_v34 = vpop.f32.mrb[40].mxu0  ;;  %8189 = vmatprep.mubr.bf16.mxu1 %v11915_v41  ;;  %8477 = vmatpush1.bf16.msra.mxu1 %v3494_v47  ;;  %v11917_v41 = vld [vmem:[%s19720_s0 + $0x20] sm:$0xff] }
 0x48f   :  { %v2800_v63 = vpop.permute.xlu0 %2799  ;;  %v15841_v43 = vsel %vm826_vm4, %v20068_v12, %v2798_v54  ;;  %v15843_v8 = vpop.f32.mrb[41].mxu0  ;;  %8478 = vmatprep.subr.bf16.mxu1 %v3503_v61  ;;  %v243_v57 = vadd.f32 %v242_v23, %v180_v40  ;;  %v11925_v40 = vld [vmem:[%s19720_s0 + $0x30] sm:$0xff] }
 0x490   :  { %v15846_v60 = vsel %vm826_vm4, %v2798_v54, %v2800_v63  ;;  %v2822_v4 = vmul.f32 %v11917_v41, %v15841_v43  ;;  %v2830_v47 = vmul.f32 %v11918_v35, %v15841_v43  ;;  %v15856_v25 = vpop.f32.mrb[40].mxu1  ;;  %7420 = vmatpush1.bf16.msra.mxu0 %v15552_v18  ;;  %v15859_v61 = vpop.f32.mrb[42].mxu0  ;;  %v11919_v54 = vld [vmem:[%s19720_s0 + $0x28] sm:$0xff] }
 0x491   :  { %20069 = vst [vmem:[#allocation56_spill] sm:$0xff] %v15859_v61  ;;  %v2823_v12 = vmul.f32 %v11919_v54, %v15846_v60  ;;  %v11920_v41 = vld [vmem:[%s19720_s0 + $0x68] sm:$0xff]  ;;  %v15869_v20 = vpop.f32.mrb[41].mxu1  ;;  %7421 = vmatprep.subr.bf16.mxu0 %v15596_v56  ;;  %v15872_v35 = vpop.f32.mrb[43].mxu0  ;;  %v11921_v54 = vld [vmem:[%s19720_s0 + $0x190] sm:$0xff]  ;;  %v11922_v56 = vld [vmem:[%s19720_s0 + $0x38] sm:$0xff] }
 0x492   :  { %v2831_v1 = vmul.f32 %v11920_v41, %v15846_v60  ;;  %20070 = vst [vmem:[#allocation89_spill] sm:$0xff] %v15872_v35  ;;  %v15874_v18 = vpop.permute.xlu1 %2801  ;;  %v2886_v61 = vpack.c.bf16 %v2830_v47, %v2822_v4  ;;  %v15876_v29 = vpop.f32.mrb[42].mxu1  ;;  %v181_v16 = vmul.f32 %v11921_v54, %v15014_v22  ;;  %8479 = vmatpush1.bf16.msra.mxu1 %v3502_v9  ;;  %v11923_v4 = vld [vmem:[%s19720_s0 + $0x78] sm:$0xff] }
 0x493   :  { %20071 = vst [vmem:[#allocation90_spill] sm:$0xff] %v15876_v29  ;;  %v2825_v35 = vmul.f32 %v11922_v56, %v15874_v18  ;;  %v2833_v47 = vmul.f32 %v11923_v4, %v15874_v18  ;;  %v15892_v29 = vsel %vm826_vm4, %v2800_v63, %v15874_v18  ;;  %v15894_v54 = vpop.f32.mrb[43].mxu1  ;;  %v11926_v63 = vld [vmem:[%s19720_s0 + $0x70] sm:$0xff]  ;;  %v11928_v4 = vld [vmem:[%s19720_s0 + $0xe8] sm:$0xff] }
 0x494   :  { %v2887_v41 = vpack.c.bf16 %v2831_v1, %v2823_v12  ;;  %20072 = vst [vmem:[#allocation91_spill] sm:$0xff] %v15894_v54  ;;  %v11924_v1 = vld [vmem:[%s19721_s3 + $0xc8] ss:$20 sps:$4 sm:$0xff]   ;;  %2954 = vrot.lane.b32.xlu0 %v2886_v61, %s12087_s9  ;;  %v2824_v23 = vmul.f32 %v11925_v40, %v15892_v29  ;;  %v2832_v9 = vmul.f32 %v11926_v63, %v15892_v29 }
 0x495   :  { %7131 = vmatmul.mubr.bf16.gmra.mrb[148].mxu0 %v11924_v1  ;;  %v2889_v12 = vpack.c.bf16 %v2833_v47, %v2825_v35  ;;  %v11927_v61 = vld [vmem:[%s19720_s0 + $0xa8] sm:$0xff]  ;;  %v2847_v40 = vmul.f32 %v11928_v4, %v15846_v60  ;;  %8190 = vmatmul.mubr.bf16.gmra.mrb[148].mxu1 %v11924_v1  ;;  %v11930_v35 = vld [vmem:[%s19720_s0 + $0xe0] sm:$0xff]  ;;  %v244_v4 = vadd.f32 %v243_v57, %v181_v16 }
 0x496   :  { %7422 = vmatpush1.bf16.msra.mxu0 %v15588_v21  ;;  %2956 = vrot.lane.b32.xlu1 %v2887_v41, %s12087_s9  ;;  %v2839_v56 = vmul.f32 %v11927_v61, %v15846_v60  ;;  %v2888_v63 = vpack.c.bf16 %v2832_v9, %v2824_v23  ;;  %v11929_v21 = vld [vmem:[%s19720_s0 + $0xa0] sm:$0xff]  ;;  %v2846_v41 = vmul.f32 %v11930_v35, %v15841_v43  ;;  %v15927_v47 = vpop.f32.mrb[44].mxu0  ;;  %v11931_v1 = vld [vmem:[%s19721_s3 + $0xf4] ss:$20 sps:$4 sm:$0xff]   ;;  %v11932_v23 = vld [vmem:[%s19720_s0 + $0x198] sm:$0xff] }
 0x497   :  { %7423 = vmatprep.subr.bf16.mxu0 %v15630_v42  ;;  %v2838_v42 = vmul.f32 %v11929_v21, %v15841_v43  ;;  %v15929_v61 = vpop.f32.mrb[45].mxu0  ;;  %7140 = vmatprep.mubr.bf16.mxu0 %v11931_v1  ;;  %v182_v9 = vmul.f32 %v11932_v23, %v15060_v7  ;;  %v3511_v21 = vld [vmem:[#allocation2 + $0x6b8] sm:$0xff]  ;;  %v11934_v23 = vld [vmem:[%s19720_s0 + $0xf0] sm:$0xff] }
 0x498   :  { %8199 = vmatprep.mubr.bf16.mxu1 %v11931_v1  ;;  %2958 = vrot.lane.b32.xlu0 %v2888_v63, %s12087_s9  ;;  %v15939_v35 = vpop.f32.mrb[44].mxu1  ;;  %v15942_v54 = vpop.f32.mrb[46].mxu0  ;;  %v11933_v1 = vld [vmem:[%s19720_s0 + $0xb0] sm:$0xff]  ;;  %v2848_v57 = vmul.f32 %v11934_v23, %v15892_v29  ;;  %v2895_v16 = vpack.c.bf16 %v2847_v40, %v2839_v56 }
 0x499   :  { %20073 = vst [vmem:[#allocation92_spill] sm:$0xff] %v15942_v54  ;;  %v2840_v39 = vmul.f32 %v11933_v1, %v15892_v29  ;;  %v15953_v63 = vpop.f32.mrb[45].mxu1  ;;  %v11936_v1 = vld [vmem:[%s19720_s0 + $0xf8] sm:$0xff]  ;;  %v15963_v31 = vpop.f32.mrb[47].mxu0  ;;  %8480 = vmatprep.subr.bf16.mxu1 %v3511_v21  ;;  %v11937_v23 = vld [vmem:[%s19721_s3 + $0xf0] ss:$20 sps:$4 sm:$0xff]  }
 0x49a   :  { %7424 = vmatpush1.bf16.msra.mxu0 %v15625_v5  ;;  %2960 = vrot.lane.b32.xlu1 %v2889_v12, %s12087_s9  ;;  %v11935_v5 = vld [vmem:[%s19720_s0 + $0xb8] sm:$0xff]  ;;  %v2849_v62 = vmul.f32 %v11936_v1, %v15874_v18  ;;  %20074 = vst [vmem:[#allocation93_spill] sm:$0xff] %v15963_v31  ;;  %v2894_v12 = vpack.c.bf16 %v2846_v41, %v2838_v42  ;;  %v15966_v56 = vpop.f32.mrb[46].mxu1  ;;  %v3510_v41 = vld [vmem:[#allocation2 + $0x6b0] sm:$0xff] }
 0x49b   :  { %v2841_v54 = vmul.f32 %v11935_v5, %v15874_v18  ;;  %7425 = vmatprep.subr.bf16.mxu0 %v15669_v58  ;;  %20075 = vst [vmem:[#allocation94_spill] sm:$0xff] %v15966_v56  ;;  %v15968_v40 = vpop.f32.mrb[47].mxu1  ;;  %v15976_v5 = vld [vmem:[%s19720_s0 + $0x1a0] sm:$0xff]  ;;  %v245_v58 = vadd.f32 %v244_v4, %v182_v9  ;;  %v2896_v42 = vpack.c.bf16 %v2848_v57, %v2840_v39  ;;  %v11941_v9 = vld [vmem:[%s19721_s3 + $0x11c] ss:$20 sps:$4 sm:$0xff]  }
 0x49c   :  { %20076 = vst [vmem:[#allocation95_spill] sm:$0xff] %v15968_v40  ;;  %v183_v1 = vmul.f32 %v15976_v5, %v15106_v36  ;;  %2970 = vrot.lane.b32.xlu0 %v2894_v12, %s12087_s9  ;;  %v11939_v40 = vld [vmem:[%s19720_s0 + $0x128] sm:$0xff]  ;;  %v2863_v31 = vmul.f32 %v15741_v45, %v15846_v60  ;;  %v11940_v39 = vld [vmem:[%s19720_s0 + $0x120] sm:$0xff]  ;;  %8481 = vmatpush1.bf16.msra.mxu1 %v3510_v41 }
 0x49d   :  { %7141 = vmatmul.mubr.bf16.gmra.mrb[152].mxu0 %v11937_v23  ;;  %v2897_v21 = vpack.c.bf16 %v2849_v62, %v2841_v54  ;;  %v2855_v56 = vmul.f32 %v11939_v40, %v15846_v60  ;;  %8200 = vmatmul.mubr.bf16.gmra.mrb[152].mxu1 %v11937_v23  ;;  %v2862_v62 = vmul.f32 %v15720_v59, %v15841_v43  ;;  %v11943_v40 = vld [vmem:[%s19720_s0 + $0x130] sm:$0xff] }
 0x49e   :  { %7426 = vmatpush1.bf16.msra.mxu0 %v15664_v50  ;;  %2972 = vrot.lane.b32.xlu1 %v2895_v16, %s12087_s9  ;;  %v2854_v50 = vmul.f32 %v11940_v39, %v15841_v43  ;;  %v15996_v54 = vpop.f32.mrb[48].mxu0  ;;  %v246_v57 = vadd.f32 %v245_v58, %v183_v1  ;;  %v3519_v16 = vld [vmem:[#allocation2 + $0x6f8] sm:$0xff]  ;;  %v2856_v23 = vmul.f32 %v11943_v40, %v15892_v29  ;;  %v3518_v1 = vld [vmem:[#allocation2 + $0x6f0] sm:$0xff] }
 0x49f   :  { %7427 = vmatprep.subr.bf16.mxu0 %v15706_v38  ;;  %7150 = vmatprep.mubr.bf16.mxu0 %v11941_v9  ;;  %v16001_v45 = vpop.f32.mrb[49].mxu0  ;;  %v11942_v38 = vld [vmem:[%s19720_s0 + $0x1a8] sm:$0xff]  ;;  %v2864_v39 = vmul.f32 %v15771_v11, %v15892_v29  ;;  %v2903_v58 = vpack.c.bf16 %v2863_v31, %v2855_v56 }
 0x4a0   :  { %8209 = vmatprep.mubr.bf16.mxu1 %v11941_v9  ;;  %v184_v4 = vmul.f32 %v11942_v38, %v15151_v3  ;;  %2974 = vrot.lane.b32.xlu0 %v2896_v42, %s12087_s9  ;;  %v16008_v59 = vpop.f32.mrb[48].mxu1  ;;  %v16011_v12 = vpop.f32.mrb[50].mxu0  ;;  %v2865_v9 = vmul.f32 %v15792_v14, %v15874_v18  ;;  %v2902_v11 = vpack.c.bf16 %v2862_v62, %v2854_v50  ;;  %v11945_v56 = vld [vmem:[%s19721_s3 + $0x118] ss:$20 sps:$4 sm:$0xff]  }
 0x4a1   :  { %20077 = vst [vmem:[#allocation96_spill] sm:$0xff] %v16011_v12  ;;  %v16020_v42 = vpop.f32.mrb[49].mxu1  ;;  %v16028_v12 = vpop.f32.mrb[51].mxu0  ;;  %8482 = vmatprep.subr.bf16.mxu1 %v3519_v16  ;;  %v2871_v62 = vmul.f32 %v11942_v38, %v15846_v60  ;;  %v16049_v16 = vld [vmem:[%s19720_s0 + $0x1e8] sm:$0xff] }
 0x4a2   :  { %7428 = vmatpush1.bf16.msra.mxu0 %v15701_v15  ;;  %2976 = vrot.lane.b32.xlu1 %v2897_v21, %s12087_s9  ;;  %v11944_v15 = vld [vmem:[%s19720_s0 + $0x138] sm:$0xff]  ;;  %20078 = vst [vmem:[#allocation97_spill] sm:$0xff] %v16028_v12  ;;  %v16031_v40 = vpop.f32.mrb[50].mxu1  ;;  %v11946_v21 = vld [vmem:[%s19720_s0 + $0x1b0] sm:$0xff] }
 0x4a3   :  { %v2857_v41 = vmul.f32 %v11944_v15, %v15874_v18  ;;  %7429 = vmatprep.subr.bf16.mxu0 %v15754_v13  ;;  %20079 = vst [vmem:[#allocation98_spill] sm:$0xff] %v16031_v40  ;;  %v16033_v31 = vpop.f32.mrb[51].mxu1  ;;  %v185_v14 = vmul.f32 %v11946_v21, %v15164_v48  ;;  %v247_v15 = vadd.f32 %v246_v57, %v184_v4 }
 0x4a4   :  { %20080 = vst [vmem:[#allocation99_spill] sm:$0xff] %v16033_v31  ;;  %8483 = vmatpush1.bf16.msra.mxu1 %v3518_v1  ;;  %2986 = vrot.lane.b32.xlu0 %v2902_v11, %s12087_s9  ;;  %v2904_v13 = vpack.c.bf16 %v2864_v39, %v2856_v23  ;;  %v2879_v31 = vmul.f32 %v16049_v16, %v15846_v60  ;;  %v11949_v60 = vld [vmem:[%s19721_s3 + $0x144] ss:$20 sps:$4 sm:$0xff]  }
 0x4a5   :  { %7151 = vmatmul.mubr.bf16.gmra.mrb[156].mxu0 %v11945_v56  ;;  %v2905_v50 = vpack.c.bf16 %v2865_v9, %v2857_v41  ;;  %8210 = vmatmul.mubr.bf16.gmra.mrb[156].mxu1 %v11945_v56  ;;  %v2870_v4 = vmul.f32 %v15976_v5, %v15841_v43  ;;  %v16073_v5 = vld [vmem:[%s19720_s0 + $0x1b8] sm:$0xff]  ;;  %v248_v39 = vadd.f32 %v247_v15, %v185_v14  ;;  %v16087_v41 = vld [vmem:[%s19720_s0 + $0x1f0] sm:$0xff] }
 0x4a6   :  { %7430 = vmatpush1.bf16.msra.mxu0 %v15749_v51  ;;  %2988 = vrot.lane.b32.xlu1 %v2903_v58, %s12087_s9  ;;  %v16059_v51 = vld [vmem:[%s19720_s0 + $0x1e0] sm:$0xff]  ;;  %v16063_v57 = vpop.f32.mrb[52].mxu0  ;;  %v186_v23 = vmul.f32 %v16073_v5, %v15188_v2  ;;  %v2872_v58 = vmul.f32 %v11946_v21, %v15892_v29  ;;  %v2880_v9 = vmul.f32 %v16087_v41, %v15892_v29  ;;  %v3527_v11 = vld [vmem:[#allocation2 + $0x738] sm:$0xff] }
 0x4a7   :  { %7431 = vmatprep.subr.bf16.mxu0 %v15803_v6  ;;  %v2878_v38 = vmul.f32 %v16059_v51, %v15841_v43  ;;  %7160 = vmatprep.mubr.bf16.mxu0 %v11949_v60  ;;  %v16068_v6 = vpop.f32.mrb[53].mxu0  ;;  %v2911_v56 = vpack.c.bf16 %v2879_v31, %v2871_v62  ;;  %v11952_v29 = vld [vmem:[%s19721_s3 + $0x140] ss:$20 sps:$4 sm:$0xff]  }
 0x4a8   :  { %8219 = vmatprep.mubr.bf16.mxu1 %v11949_v60  ;;  %2990 = vrot.lane.b32.xlu0 %v2904_v13, %s12087_s9  ;;  %v16078_v43 = vpop.f32.mrb[52].mxu1  ;;  %v16081_v1 = vpop.f32.mrb[54].mxu0  ;;  %v11953_v31 = vld [vmem:[%s19720_s0 + $0x1c0] sm:$0xff]  ;;  %v249_v62 = vadd.f32 %v248_v39, %v186_v23 }
 0x4a9   :  { %20081 = vst [vmem:[#allocation100_spill] sm:$0xff] %v16081_v1  ;;  %v16092_v14 = vpop.f32.mrb[53].mxu1  ;;  %v16094_v15 = vpop.f32.mrb[55].mxu0  ;;  %8484 = vmatprep.subr.bf16.mxu1 %v3527_v11  ;;  %v2910_v13 = vpack.c.bf16 %v2878_v38, %v2870_v4  ;;  %v2912_v4 = vpack.c.bf16 %v2880_v9, %v2872_v58  ;;  %v11954_v38 = vld [vmem:[%s19721_s3 + $0x16c] ss:$20 sps:$4 sm:$0xff]   ;;  %v20125_v1 = vld [vmem:[#allocation30_spill] sm:$0xff] }
 0x4aa   :  { %7432 = vmatpush1.bf16.msra.mxu0 %v15798_v32  ;;  %2992 = vrot.lane.b32.xlu1 %v2905_v50, %s12087_s9  ;;  %20082 = vst [vmem:[#allocation101_spill] sm:$0xff] %v16094_v15  ;;  %v3526_v32 = vld [vmem:[#allocation2 + $0x730] sm:$0xff]  ;;  %v16096_v21 = vpop.f32.mrb[54].mxu1  ;;  %v187_v50 = vmul.f32 %v11953_v31, %v14972_v24  ;;  %v11955_v24 = vld [vmem:[%s19720_s0 + $0x1c8] sm:$0xff] }
 0x4ab   :  { %20083 = vst [vmem:[#allocation102_spill] sm:$0xff] %v16096_v21  ;;  %8485 = vmatpush1.bf16.msra.mxu1 %v3526_v32  ;;  %v16098_v60 = vpop.f32.mrb[55].mxu1  ;;  %v188_v23 = vmul.f32 %v11955_v24, %v14976_v27  ;;  %v3534_v31 = vld [vmem:[#allocation2 + $0x770] sm:$0xff]  ;;  %v11956_v27 = vld [vmem:[%s19721_s3 + $0x168] ss:$20 sps:$4 sm:$0xff]  }
 0x4ac   :  { %20084 = vst [vmem:[#allocation103_spill] sm:$0xff] %v16098_v60  ;;  %3002 = vrot.lane.b32.xlu0 %v2910_v13, %s12087_s9  ;;  %v250_v39 = vadd.f32 %v249_v62, %v187_v50  ;;  %v11957_v50 = vld [vmem:[%s19720_s0 + $0x1d0] sm:$0xff] }
 0x4ad   :  { %7161 = vmatmul.mubr.bf16.gmra.mrb[160].mxu0 %v11952_v29  ;;  %8220 = vmatmul.mubr.bf16.gmra.mrb[160].mxu1 %v11952_v29  ;;  %v189_v62 = vmul.f32 %v11957_v50, %v15014_v22  ;;  %v11958_v24 = vld [vmem:[%s19721_s3 + $0x194] ss:$20 sps:$4 sm:$0xff]  }
 0x4ae   :  { %7170 = vmatprep.mubr.bf16.mxu0 %v11954_v38  ;;  %3004 = vrot.lane.b32.xlu1 %v2911_v56, %s12087_s9  ;;  %v16112_v11 = vpop.f32.mrb[56].mxu0  ;;  %v3535_v56 = vld [vmem:[#allocation2 + $0x778] sm:$0xff] }
 0x4af   :  { %v16114_v32 = vpop.f32.mrb[57].mxu0  ;;  %8229 = vmatprep.mubr.bf16.mxu1 %v11954_v38  ;;  %8486 = vmatprep.subr.bf16.mxu1 %v3535_v56 }
 0x4b0   :  { %3006 = vrot.lane.b32.xlu0 %v2912_v4, %s12087_s9  ;;  %v16121_v58 = vpop.f32.mrb[56].mxu1  ;;  %v16123_v9 = vpop.f32.mrb[58].mxu0  ;;  %8487 = vmatpush1.bf16.msra.mxu1 %v3534_v31  ;;  %v251_v4 = vadd.f32 %v250_v39, %v188_v23  ;;  %v3543_v39 = vld [vmem:[#allocation2 + $0x7b8] sm:$0xff] }
 0x4b1   :  { %20085 = vst [vmem:[#allocation104_spill] sm:$0xff] %v16123_v9  ;;  %v16125_v13 = vpop.f32.mrb[57].mxu1  ;;  %v16127_v29 = vpop.f32.mrb[59].mxu0  ;;  %8488 = vmatprep.subr.bf16.mxu1 %v3543_v39  ;;  %v3542_v9 = vld [vmem:[#allocation2 + $0x7b0] sm:$0xff] }
 0x4b2   :  { %20086 = vst [vmem:[#allocation105_spill] sm:$0xff] %v16127_v29  ;;  %v16129_v38 = vpop.f32.mrb[58].mxu1  ;;  %v252_v29 = vadd.f32 %v251_v4, %v189_v62  ;;  %v11961_v4 = vld [vmem:[%s19721_s3 + $0x1bc] ss:$20 sps:$4 sm:$0xff]  }
 0x4b3   :  { %20087 = vst [vmem:[#allocation106_spill] sm:$0xff] %v16129_v38  ;;  %v16131_v60 = vpop.f32.mrb[59].mxu1 }
 0x4b4   :  { %20088 = vst [vmem:[#allocation107_spill] sm:$0xff] %v16131_v60  ;;  %v11959_v60 = vld [vmem:[%s19720_s0 + $0x1d8] sm:$0xff]  ;;  %8489 = vmatpush1.bf16.msra.mxu1 %v3542_v9 }
 0x4b5   :  { %7171 = vmatmul.mubr.bf16.gmra.mrb[164].mxu0 %v11956_v27  ;;  %8230 = vmatmul.mubr.bf16.gmra.mrb[164].mxu1 %v11956_v27  ;;  %v190_v38 = vmul.f32 %v11959_v60, %v15060_v7  ;;  %v11960_v7 = vld [vmem:[%s19721_s3 + $0x190] ss:$20 sps:$4 sm:$0xff]   ;;  %v191_v60 = vmul.f32 %v16059_v51, %v15106_v36  ;;  %v3551_v9 = vld [vmem:[#allocation2 + $0x7f8] sm:$0xff] }
 0x4b6   :  { %7180 = vmatprep.mubr.bf16.mxu0 %v11958_v24  ;;  %v16143_v56 = vpop.f32.mrb[60].mxu0  ;;  %8239 = vmatprep.mubr.bf16.mxu1 %v11958_v24 }
 0x4b7   :  { %v16145_v31 = vpop.f32.mrb[61].mxu0  ;;  %v253_v62 = vadd.f32 %v252_v29, %v190_v38  ;;  %8490 = vmatprep.subr.bf16.mxu1 %v3551_v9  ;;  %v11964_v9 = vld [vmem:[%s19721_s3 + $0x1e4] ss:$20 sps:$4 sm:$0xff]  }
 0x4b8   :  { %v16151_v22 = vpop.f32.mrb[60].mxu1  ;;  %v16153_v23 = vpop.f32.mrb[62].mxu0 }
 0x4b9   :  { %20089 = vst [vmem:[#allocation108_spill] sm:$0xff] %v16153_v23  ;;  %v16155_v50 = vpop.f32.mrb[61].mxu1  ;;  %v16157_v27 = vpop.f32.mrb[63].mxu0  ;;  %v254_v23 = vadd.f32 %v253_v62, %v191_v60  ;;  %v11963_v60 = vld [vmem:[%s19720_s0 + $0x1f8] sm:$0xff] }
 0x4ba   :  { %20090 = vst [vmem:[#allocation109_spill] sm:$0xff] %v16157_v27  ;;  %v16159_v21 = vpop.f32.mrb[62].mxu1  ;;  %v192_v27 = vmul.f32 %v16049_v16, %v15151_v3  ;;  %v193_v3 = vmul.f32 %v16087_v41, %v15164_v48  ;;  %v2881_v62 = vmul.f32 %v11963_v60, %v15874_v18  ;;  %v194_v41 = vmul.f32 %v11963_v60, %v15188_v2  ;;  %v11965_v2 = vld [vmem:[%s19721_s3 + $0x1e0] ss:$20 sps:$4 sm:$0xff]  }
 0x4bb   :  { %20091 = vst [vmem:[#allocation110_spill] sm:$0xff] %v16159_v21  ;;  %v16161_v24 = vpop.f32.mrb[63].mxu1  ;;  %v3550_v21 = vld [vmem:[#allocation2 + $0x7f0] sm:$0xff] }
 0x4bc   :  { %20092 = vst [vmem:[#allocation111_spill] sm:$0xff] %v16161_v24  ;;  %8491 = vmatpush1.bf16.msra.mxu1 %v3550_v21  ;;  %v255_v16 = vadd.f32 %v254_v23, %v192_v27  ;;  %v2873_v21 = vmul.f32 %v16073_v5, %v15874_v18 }
 0x4bd   :  { %7181 = vmatmul.mubr.bf16.gmra.mrb[168].mxu0 %v11960_v7  ;;  %8240 = vmatmul.mubr.bf16.gmra.mrb[168].mxu1 %v11960_v7 }
 0x4be   :  { %7190 = vmatprep.mubr.bf16.mxu0 %v11961_v4  ;;  %v16171_v39 = vpop.f32.mrb[64].mxu0  ;;  %8249 = vmatprep.mubr.bf16.mxu1 %v11961_v4  ;;  %v11962_v4 = vld [vmem:[%s19721_s3 + $0x1b8] ss:$20 sps:$4 sm:$0xff]   ;;  %v256_v5 = vadd.f32 %v255_v16, %v193_v3 }
 0x4bf   :  { %20093 = vst [vmem:[#allocation112_spill] sm:$0xff] %v16171_v39  ;;  %v16173_v24 = vpop.f32.mrb[65].mxu0  ;;  %v20219_v39 = vld [vmem:[#allocation50_spill] sm:$0xff] }
 0x4c0   :  { %20094 = vst [vmem:[#allocation113_spill] sm:$0xff] %v16173_v24  ;;  %v16177_v36 = vpop.f32.mrb[64].mxu1  ;;  %v16179_v51 = vpop.f32.mrb[66].mxu0  ;;  %v20210_v24 = vld [vmem:[#allocation48_spill] sm:$0xff] }
 0x4c1   :  { %20095 = vst [vmem:[#allocation114_spill] sm:$0xff] %v16177_v36  ;;  %20096 = vst [vmem:[#allocation115_spill] sm:$0xff] %v16179_v51  ;;  %v16181_v29 = vpop.f32.mrb[65].mxu1  ;;  %v16183_v38 = vpop.f32.mrb[67].mxu0 }
 0x4c2   :  { %20097 = vst [vmem:[#allocation116_spill] sm:$0xff] %v16181_v29  ;;  %20098 = vst [vmem:[#allocation117_spill] sm:$0xff] %v16183_v38  ;;  %v16185_v7 = vpop.f32.mrb[66].mxu1 }
 0x4c3   :  { %20099 = vst [vmem:[#allocation118_spill] sm:$0xff] %v16185_v7  ;;  %v16187_v15 = vpop.f32.mrb[67].mxu1 }
 0x4c4   :  { %20100 = vst [vmem:[#allocation119_spill] sm:$0xff] %v16187_v15  ;;  %v2913_v15 = vpack.c.bf16 %v2881_v62, %v2873_v21 }
 0x4c5   :  { %7191 = vmatmul.mubr.bf16.gmra.mrb[172].mxu0 %v11962_v4  ;;  %8250 = vmatmul.mubr.bf16.gmra.mrb[172].mxu1 %v11962_v4  ;;  %v257_v4 = vadd.f32 %v256_v5, %v194_v41 }
 0x4c6   :  { %7200 = vmatprep.mubr.bf16.mxu0 %v11964_v9  ;;  %v16203_v7 = vpop.f32.mrb[68].mxu0  ;;  %8259 = vmatprep.mubr.bf16.mxu1 %v11964_v9 }
 0x4c7   :  { %20101 = vst [vmem:[#allocation120_spill] sm:$0xff] %v16203_v7  ;;  %v16205_v48 = vpop.f32.mrb[69].mxu0  ;;  %3008 = vrot.lane.b32.xlu1 %v2913_v15, %s12087_s9  ;;  %v11966_v15 = vld [vmem:[%s19721_s3 + $0x20c] ss:$20 sps:$4 sm:$0xff]  }
 0x4c8   :  { %20102 = vst [vmem:[#allocation121_spill] sm:$0xff] %v16205_v48  ;;  %v16209_v23 = vpop.f32.mrb[68].mxu1  ;;  %v16211_v18 = vpop.f32.mrb[70].mxu0 }
 0x4c9   :  { %20103 = vst [vmem:[#allocation122_spill] sm:$0xff] %v16209_v23  ;;  %20104 = vst [vmem:[#allocation123_spill] sm:$0xff] %v16211_v18  ;;  %v16213_v27 = vpop.f32.mrb[69].mxu1  ;;  %v16215_v38 = vpop.f32.mrb[71].mxu0 }
 0x4ca   :  { %20105 = vst [vmem:[#allocation124_spill] sm:$0xff] %v16213_v27  ;;  %20106 = vst [vmem:[#allocation125_spill] sm:$0xff] %v16215_v38  ;;  %v16217_v21 = vpop.f32.mrb[70].mxu1 }
 0x4cb   :  { %20107 = vst [vmem:[#allocation126_spill] sm:$0xff] %v16217_v21  ;;  %v16219_v62 = vpop.f32.mrb[71].mxu1 }
 0x4cc   :  { %20108 = vst [vmem:[#allocation127_spill] sm:$0xff] %v16219_v62 }
 0x4cd   :  { %7201 = vmatmul.mubr.bf16.gmra.mrb[176].mxu0 %v11965_v2  ;;  %8260 = vmatmul.mubr.bf16.gmra.mrb[176].mxu1 %v11965_v2  ;;  %v11967_v2 = vld [vmem:[%s19721_s3 + $0x208] ss:$20 sps:$4 sm:$0xff]  }
 0x4ce   :  { %7210 = vmatprep.mubr.bf16.mxu0 %v11966_v15  ;;  %v16227_v3 = vpop.f32.mrb[72].mxu0  ;;  %8269 = vmatprep.mubr.bf16.mxu1 %v11966_v15 }
 0x4cf   :  { %20109 = vst [vmem:[#allocation128_spill] sm:$0xff] %v16227_v3  ;;  %258 = vadd.xlane.f32.xlu0 %v257_v4  ;;  %v16229_v16 = vpop.f32.mrb[73].mxu0  ;;  %v11968_v4 = vld [vmem:[%s19721_s3 + $0x234] ss:$20 sps:$4 sm:$0xff]  }
 0x4d0   :  { %20110 = vst [vmem:[#allocation129_spill] sm:$0xff] %v16229_v16  ;;  %v16231_v60 = vpop.f32.mrb[72].mxu1  ;;  %v16233_v9 = vpop.f32.mrb[74].mxu0 }
 0x4d1   :  { %20111 = vst [vmem:[#allocation130_spill] sm:$0xff] %v16231_v60  ;;  %20112 = vst [vmem:[#allocation131_spill] sm:$0xff] %v16233_v9  ;;  %v16235_v41 = vpop.f32.mrb[73].mxu1  ;;  %v16237_v5 = vpop.f32.mrb[75].mxu0 }
 0x4d2   :  { %20113 = vst [vmem:[#allocation132_spill] sm:$0xff] %v16235_v41  ;;  %20114 = vst [vmem:[#allocation133_spill] sm:$0xff] %v16237_v5  ;;  %v16239_v62 = vpop.f32.mrb[74].mxu1 }
 0x4d3   :  { %20115 = vst [vmem:[#allocation134_spill] sm:$0xff] %v16239_v62  ;;  %v16241_v21 = vpop.f32.mrb[75].mxu1 }
 0x4d4   :  { %20116 = vst [vmem:[#allocation135_spill] sm:$0xff] %v16241_v21 }
 0x4d5   :  { %7211 = vmatmul.mubr.bf16.gmra.mrb[180].mxu0 %v11967_v2  ;;  %8270 = vmatmul.mubr.bf16.gmra.mrb[180].mxu1 %v11967_v2  ;;  %v11969_v2 = vld [vmem:[%s19721_s3 + $0x25c] ss:$20 sps:$4 sm:$0xff]  }
 0x4d6   :  { %7220 = vmatprep.mubr.bf16.mxu0 %v11968_v4  ;;  %v16249_v15 = vpop.f32.mrb[76].mxu0  ;;  %8279 = vmatprep.mubr.bf16.mxu1 %v11968_v4 }
 0x4d7   :  { %20117 = vst [vmem:[#allocation136_spill] sm:$0xff] %v16249_v15  ;;  %v16251_v9 = vpop.f32.mrb[77].mxu0 }
 0x4d8   :  { %20118 = vst [vmem:[#allocation137_spill] sm:$0xff] %v16251_v9  ;;  %v16253_v5 = vpop.f32.mrb[76].mxu1  ;;  %v16255_v62 = vpop.f32.mrb[78].mxu0 }
 0x4d9   :  { %20119 = vst [vmem:[#allocation138_spill] sm:$0xff] %v16253_v5  ;;  %20120 = vst [vmem:[#allocation139_spill] sm:$0xff] %v16255_v62  ;;  %v16257_v21 = vpop.f32.mrb[77].mxu1  ;;  %v16259_v38 = vpop.f32.mrb[79].mxu0  ;;  %v20134_v5 = vld [vmem:[#allocation28_spill] sm:$0xff] }
 0x4da   :  { %20121 = vst [vmem:[#allocation140_spill] sm:$0xff] %v16257_v21  ;;  %20122 = vst [vmem:[#allocation141_spill] sm:$0xff] %v16259_v38  ;;  %v16261_v18 = vpop.f32.mrb[78].mxu1 }
 0x4db   :  { %20123 = vst [vmem:[#allocation142_spill] sm:$0xff] %v16261_v18  ;;  %v16263_v51 = vpop.f32.mrb[79].mxu1 }
 0x4dc   :  { %20124 = vst [vmem:[#allocation143_spill] sm:$0xff] %v16263_v51 }
 0x4dd   :  { %7221 = vmatmul.mubr.bf16.gmra.mrb[184].mxu0 %v20125_v1  ;;  %8280 = vmatmul.mubr.bf16.gmra.mrb[184].mxu1 %v20125_v1  ;;  %v11970_v1 = vld [vmem:[%s19721_s3 + $0x284] ss:$20 sps:$4 sm:$0xff]  }
 0x4de   :  { %7230 = vmatprep.mubr.bf16.mxu0 %v11969_v2  ;;  %v16270_v4 = vpop.f32.mrb[80].mxu0  ;;  %8289 = vmatprep.mubr.bf16.mxu1 %v11969_v2 }
 0x4df   :  { %20126 = vst [vmem:[#allocation30_spill] sm:$0xff] %v16270_v4  ;;  %v16272_v62 = vpop.f32.mrb[81].mxu0  ;;  %v20143_v4 = vld [vmem:[#allocation34_spill] sm:$0xff] }
 0x4e0   :  { %20127 = vst [vmem:[#allocation144_spill] sm:$0xff] %v16272_v62  ;;  %v16274_v40 = vpop.f32.mrb[80].mxu1  ;;  %v16276_v38 = vpop.f32.mrb[82].mxu0 }
 0x4e1   :  { %20128 = vst [vmem:[#allocation145_spill] sm:$0xff] %v16274_v40  ;;  %20129 = vst [vmem:[#allocation146_spill] sm:$0xff] %v16276_v38  ;;  %v16278_v18 = vpop.f32.mrb[81].mxu1  ;;  %v16280_v51 = vpop.f32.mrb[83].mxu0 }
 0x4e2   :  { %20130 = vst [vmem:[#allocation147_spill] sm:$0xff] %v16278_v18  ;;  %20131 = vst [vmem:[#allocation148_spill] sm:$0xff] %v16280_v51  ;;  %v16282_v12 = vpop.f32.mrb[82].mxu1 }
 0x4e3   :  { %20132 = vst [vmem:[#allocation149_spill] sm:$0xff] %v16282_v12  ;;  %v16284_v21 = vpop.f32.mrb[83].mxu1 }
 0x4e4   :  { %20133 = vst [vmem:[#allocation150_spill] sm:$0xff] %v16284_v21 }
 0x4e5   :  { %7231 = vmatmul.mubr.bf16.gmra.mrb[188].mxu0 %v20134_v5  ;;  %8290 = vmatmul.mubr.bf16.gmra.mrb[188].mxu1 %v20134_v5  ;;  %v11971_v5 = vld [vmem:[%s19721_s3 + $0x2ac] ss:$20 sps:$4 sm:$0xff]  }
 0x4e6   :  { %7240 = vmatprep.mubr.bf16.mxu0 %v11970_v1  ;;  %v16291_v2 = vpop.f32.mrb[84].mxu0  ;;  %8299 = vmatprep.mubr.bf16.mxu1 %v11970_v1 }
 0x4e7   :  { %20135 = vst [vmem:[#allocation28_spill] sm:$0xff] %v16291_v2  ;;  %v16293_v38 = vpop.f32.mrb[85].mxu0  ;;  %v20152_v2 = vld [vmem:[#allocation36_spill] sm:$0xff] }
 0x4e8   :  { %20136 = vst [vmem:[#allocation151_spill] sm:$0xff] %v16293_v38  ;;  %v16295_v18 = vpop.f32.mrb[84].mxu1  ;;  %v16297_v51 = vpop.f32.mrb[86].mxu0 }
 0x4e9   :  { %20137 = vst [vmem:[#allocation152_spill] sm:$0xff] %v16295_v18  ;;  %20138 = vst [vmem:[#allocation153_spill] sm:$0xff] %v16297_v51  ;;  %v16299_v12 = vpop.f32.mrb[85].mxu1  ;;  %v16301_v21 = vpop.f32.mrb[87].mxu0 }
 0x4ea   :  { %20139 = vst [vmem:[#allocation154_spill] sm:$0xff] %v16299_v12  ;;  %20140 = vst [vmem:[#allocation155_spill] sm:$0xff] %v16301_v21  ;;  %v16303_v40 = vpop.f32.mrb[86].mxu1 }
 0x4eb   :  { %20141 = vst [vmem:[#allocation156_spill] sm:$0xff] %v16303_v40  ;;  %v16305_v62 = vpop.f32.mrb[87].mxu1 }
 0x4ec   :  { %20142 = vst [vmem:[#allocation157_spill] sm:$0xff] %v16305_v62 }
 0x4ed   :  { %7241 = vmatmul.mubr.bf16.gmra.mrb[192].mxu0 %v20143_v4  ;;  %8300 = vmatmul.mubr.bf16.gmra.mrb[192].mxu1 %v20143_v4  ;;  %v11972_v4 = vld [vmem:[%s19721_s3 + $0x2d4] ss:$20 sps:$4 sm:$0xff]  }
 0x4ee   :  { %7250 = vmatprep.mubr.bf16.mxu0 %v11971_v5  ;;  %v16312_v1 = vpop.f32.mrb[88].mxu0  ;;  %8309 = vmatprep.mubr.bf16.mxu1 %v11971_v5 }
 0x4ef   :  { %20144 = vst [vmem:[#allocation34_spill] sm:$0xff] %v16312_v1  ;;  %v16314_v51 = vpop.f32.mrb[89].mxu0  ;;  %v20161_v1 = vld [vmem:[#allocation38_spill] sm:$0xff] }
 0x4f0   :  { %20145 = vst [vmem:[#allocation158_spill] sm:$0xff] %v16314_v51  ;;  %v16316_v12 = vpop.f32.mrb[88].mxu1  ;;  %v16318_v21 = vpop.f32.mrb[90].mxu0 }
 0x4f1   :  { %20146 = vst [vmem:[#allocation159_spill] sm:$0xff] %v16316_v12  ;;  %20147 = vst [vmem:[#allocation160_spill] sm:$0xff] %v16318_v21  ;;  %v16320_v40 = vpop.f32.mrb[89].mxu1  ;;  %v16322_v62 = vpop.f32.mrb[91].mxu0 }
 0x4f2   :  { %20148 = vst [vmem:[#allocation161_spill] sm:$0xff] %v16320_v40  ;;  %20149 = vst [vmem:[#allocation162_spill] sm:$0xff] %v16322_v62  ;;  %v16324_v18 = vpop.f32.mrb[90].mxu1 }
 0x4f3   :  { %20150 = vst [vmem:[#allocation163_spill] sm:$0xff] %v16324_v18  ;;  %v16326_v38 = vpop.f32.mrb[91].mxu1 }
 0x4f4   :  { %20151 = vst [vmem:[#allocation164_spill] sm:$0xff] %v16326_v38 }
 0x4f5   :  { %7251 = vmatmul.mubr.bf16.gmra.mrb[196].mxu0 %v20152_v2  ;;  %8310 = vmatmul.mubr.bf16.gmra.mrb[196].mxu1 %v20152_v2  ;;  %v11973_v2 = vld [vmem:[%s19721_s3 + $0x2fc] ss:$20 sps:$4 sm:$0xff]  }
 0x4f6   :  { %7260 = vmatprep.mubr.bf16.mxu0 %v11972_v4  ;;  %v16333_v5 = vpop.f32.mrb[92].mxu0  ;;  %8319 = vmatprep.mubr.bf16.mxu1 %v11972_v4 }
 0x4f7   :  { %20153 = vst [vmem:[#allocation36_spill] sm:$0xff] %v16333_v5  ;;  %v16335_v21 = vpop.f32.mrb[93].mxu0  ;;  %v20170_v5 = vld [vmem:[#allocation40_spill] sm:$0xff] }
 0x4f8   :  { %20154 = vst [vmem:[#allocation165_spill] sm:$0xff] %v16335_v21  ;;  %v16337_v40 = vpop.f32.mrb[92].mxu1  ;;  %v16339_v62 = vpop.f32.mrb[94].mxu0 }
 0x4f9   :  { %20155 = vst [vmem:[#allocation166_spill] sm:$0xff] %v16337_v40  ;;  %20156 = vst [vmem:[#allocation167_spill] sm:$0xff] %v16339_v62  ;;  %v16341_v18 = vpop.f32.mrb[93].mxu1  ;;  %v16343_v38 = vpop.f32.mrb[95].mxu0 }
 0x4fa   :  { %20157 = vst [vmem:[#allocation168_spill] sm:$0xff] %v16341_v18  ;;  %20158 = vst [vmem:[#allocation169_spill] sm:$0xff] %v16343_v38  ;;  %v16345_v12 = vpop.f32.mrb[94].mxu1 }
 0x4fb   :  { %20159 = vst [vmem:[#allocation170_spill] sm:$0xff] %v16345_v12  ;;  %v16347_v51 = vpop.f32.mrb[95].mxu1 }
 0x4fc   :  { %20160 = vst [vmem:[#allocation171_spill] sm:$0xff] %v16347_v51 }
 0x4fd   :  { %7261 = vmatmul.mubr.bf16.gmra.mrb[200].mxu0 %v20161_v1  ;;  %8320 = vmatmul.mubr.bf16.gmra.mrb[200].mxu1 %v20161_v1  ;;  %v11974_v1 = vld [vmem:[%s19721_s3 + $0x324] ss:$20 sps:$4 sm:$0xff]  }
 0x4fe   :  { %7270 = vmatprep.mubr.bf16.mxu0 %v11973_v2  ;;  %v16354_v4 = vpop.f32.mrb[96].mxu0  ;;  %8329 = vmatprep.mubr.bf16.mxu1 %v11973_v2 }
 0x4ff   :  { %20162 = vst [vmem:[#allocation38_spill] sm:$0xff] %v16354_v4  ;;  %v16356_v62 = vpop.f32.mrb[97].mxu0 }
 0x500   :  { %20163 = vst [vmem:[#allocation172_spill] sm:$0xff] %v16356_v62  ;;  %v16358_v18 = vpop.f32.mrb[96].mxu1  ;;  %v16360_v38 = vpop.f32.mrb[98].mxu0 }
 0x501   :  { %20164 = vst [vmem:[#allocation173_spill] sm:$0xff] %v16358_v18  ;;  %20165 = vst [vmem:[#allocation174_spill] sm:$0xff] %v16360_v38  ;;  %v16362_v12 = vpop.f32.mrb[97].mxu1  ;;  %v16364_v51 = vpop.f32.mrb[99].mxu0  ;;  %v20172_v38 = vld [vmem:[#allocation4_spill] sm:$0xff] }
 0x502   :  { %20166 = vst [vmem:[#allocation175_spill] sm:$0xff] %v16362_v12  ;;  %20167 = vst [vmem:[#allocation176_spill] sm:$0xff] %v16364_v51  ;;  %v16366_v40 = vpop.f32.mrb[98].mxu1 }
 0x503   :  { %20168 = vst [vmem:[#allocation177_spill] sm:$0xff] %v16366_v40  ;;  %v16368_v21 = vpop.f32.mrb[99].mxu1 }
 0x504   :  { %20169 = vst [vmem:[#allocation178_spill] sm:$0xff] %v16368_v21 }
 0x505   :  { %7271 = vmatmul.mubr.bf16.gmra.mrb[204].mxu0 %v20170_v5  ;;  %8330 = vmatmul.mubr.bf16.gmra.mrb[204].mxu1 %v20170_v5 }
 0x506   :  { %7280 = vmatprep.mubr.bf16.mxu0 %v11974_v1  ;;  %v2955_v2 = vpop.permute.xlu0 %2954  ;;  %v16375_v18 = vpop.f32.mrb[100].mxu0  ;;  %8339 = vmatprep.mubr.bf16.mxu1 %v11974_v1  ;;  %v20180_v1 = vld [vmem:[#allocation42_spill] sm:$0xff] }
 0x507   :  { %20171 = vst [vmem:[#allocation40_spill] sm:$0xff] %v16375_v18  ;;  %v16379_v12 = vsel %vm618_vm0, %v20172_v38, %v2955_v2  ;;  %v16381_v40 = vpop.f32.mrb[101].mxu0 }
 0x508   :  { %v2957_v51 = vpop.permute.xlu1 %2956  ;;  %20173 = vst [vmem:[#allocation4_spill] sm:$0xff] %v16381_v40  ;;  %v16384_v62 = vpop.f32.mrb[100].mxu1 }
 0x509   :  { %v3015_v21 = vsel %vm618_vm0, %v2955_v2, %v2957_v51  ;;  %20174 = vst [vmem:[#allocation179_spill] sm:$0xff] %v16384_v62  ;;  %v16386_v4 = vpop.f32.mrb[102].mxu0  ;;  %v16388_v9 = vpop.f32.mrb[101].mxu1 }
 0x50a   :  { %20175 = vst [vmem:[#allocation180_spill] sm:$0xff] %v16386_v4  ;;  %20176 = vst [vmem:[#allocation181_spill] sm:$0xff] %v16388_v9  ;;  %7754 = vmatprep.subr.bf16.mxu0 %v3015_v21  ;;  %v16390_v5 = vpop.f32.mrb[103].mxu0  ;;  %v2959_v18 = vpop.permute.xlu0 %2958  ;;  %v11975_v4 = vld [vmem:[%s19721_s3 + $0x34c] ss:$20 sps:$4 sm:$0xff]  }
 0x50b   :  { %20177 = vst [vmem:[#allocation182_spill] sm:$0xff] %v16390_v5  ;;  %v16392_v15 = vpop.f32.mrb[102].mxu1  ;;  %v16395_v38 = vsel %vm618_vm0, %v2957_v51, %v2959_v18  ;;  %v20182_v51 = vld [vmem:[#allocation5_spill] sm:$0xff] }
 0x50c   :  { %20178 = vst [vmem:[#allocation183_spill] sm:$0xff] %v16392_v15  ;;  %v2961_v41 = vpop.permute.xlu1 %2960  ;;  %v16397_v40 = vpop.f32.mrb[103].mxu1 }
 0x50d   :  { %20179 = vst [vmem:[#allocation184_spill] sm:$0xff] %v16397_v40  ;;  %7281 = vmatmul.mubr.bf16.gmra.mrb[208].mxu0 %v20180_v1  ;;  %v3017_v2 = vsel %vm618_vm0, %v2959_v18, %v2961_v41  ;;  %8340 = vmatmul.mubr.bf16.gmra.mrb[208].mxu1 %v20180_v1 }
 0x50e   :  { %7290 = vmatprep.mubr.bf16.mxu0 %v11975_v4  ;;  %8813 = vmatprep.subr.bf16.mxu1 %v3017_v2  ;;  %v2971_v21 = vpop.permute.xlu0 %2970  ;;  %v16405_v15 = vpop.f32.mrb[104].mxu0 }
 0x50f   :  { %20181 = vst [vmem:[#allocation42_spill] sm:$0xff] %v16405_v15  ;;  %v16409_v5 = vsel %vm618_vm0, %v20182_v51, %v2971_v21  ;;  %v16411_v9 = vpop.f32.mrb[105].mxu0  ;;  %8349 = vmatprep.mubr.bf16.mxu1 %v11975_v4  ;;  %v20190_v4 = vld [vmem:[#allocation44_spill] sm:$0xff] }
 0x510   :  { %v2973_v40 = vpop.permute.xlu1 %2972  ;;  %20183 = vst [vmem:[#allocation5_spill] sm:$0xff] %v16411_v9  ;;  %v16416_v41 = vpop.f32.mrb[104].mxu1 }
 0x511   :  { %v16414_v18 = vsel %vm618_vm0, %v2971_v21, %v2973_v40  ;;  %20184 = vst [vmem:[#allocation185_spill] sm:$0xff] %v16416_v41  ;;  %v16418_v62 = vpop.f32.mrb[106].mxu0  ;;  %v16420_v2 = vpop.f32.mrb[105].mxu1 }
 0x512   :  { %20185 = vst [vmem:[#allocation186_spill] sm:$0xff] %v16418_v62  ;;  %20186 = vst [vmem:[#allocation187_spill] sm:$0xff] %v16420_v2  ;;  %v16422_v1 = vpop.f32.mrb[107].mxu0  ;;  %v2975_v15 = vpop.permute.xlu0 %2974  ;;  %v11976_v62 = vld [vmem:[%s19721_s3 + $0x374] ss:$20 sps:$4 sm:$0xff]  }
 0x513   :  { %20187 = vst [vmem:[#allocation188_spill] sm:$0xff] %v16422_v1  ;;  %v16424_v60 = vpop.f32.mrb[106].mxu1  ;;  %v16427_v51 = vsel %vm618_vm0, %v2973_v40, %v2975_v15  ;;  %v20192_v40 = vld [vmem:[#allocation10_spill] sm:$0xff] }
 0x514   :  { %20188 = vst [vmem:[#allocation189_spill] sm:$0xff] %v16424_v60  ;;  %v2977_v16 = vpop.permute.xlu1 %2976  ;;  %v16429_v9 = vpop.f32.mrb[107].mxu1 }
 0x515   :  { %20189 = vst [vmem:[#allocation190_spill] sm:$0xff] %v16429_v9  ;;  %7291 = vmatmul.mubr.bf16.gmra.mrb[212].mxu0 %v20190_v4  ;;  %v16433_v21 = vsel %vm618_vm0, %v2975_v15, %v2977_v16  ;;  %8350 = vmatmul.mubr.bf16.gmra.mrb[212].mxu1 %v20190_v4 }
 0x516   :  { %7300 = vmatprep.mubr.bf16.mxu0 %v11976_v62  ;;  %v2987_v1 = vpop.permute.xlu0 %2986  ;;  %v16439_v60 = vpop.f32.mrb[108].mxu0  ;;  %8359 = vmatprep.mubr.bf16.mxu1 %v11976_v62  ;;  %v20200_v62 = vld [vmem:[#allocation46_spill] sm:$0xff] }
 0x517   :  { %20191 = vst [vmem:[#allocation44_spill] sm:$0xff] %v16439_v60  ;;  %v16443_v2 = vsel %vm618_vm0, %v20192_v40, %v2987_v1  ;;  %v16445_v41 = vpop.f32.mrb[109].mxu0 }
 0x518   :  { %v2989_v9 = vpop.permute.xlu1 %2988  ;;  %20193 = vst [vmem:[#allocation10_spill] sm:$0xff] %v16445_v41  ;;  %v16450_v15 = vpop.f32.mrb[108].mxu1 }
 0x519   :  { %v16448_v16 = vsel %vm618_vm0, %v2987_v1, %v2989_v9  ;;  %20194 = vst [vmem:[#allocation191_spill] sm:$0xff] %v16450_v15  ;;  %v16452_v3 = vpop.f32.mrb[110].mxu0  ;;  %v16454_v27 = vpop.f32.mrb[109].mxu1 }
 0x51a   :  { %20195 = vst [vmem:[#allocation192_spill] sm:$0xff] %v16452_v3  ;;  %20196 = vst [vmem:[#allocation193_spill] sm:$0xff] %v16454_v27  ;;  %v16456_v4 = vpop.f32.mrb[111].mxu0  ;;  %v2991_v60 = vpop.permute.xlu0 %2990  ;;  %v11977_v3 = vld [vmem:[%s19721_s3 + $0x39c] ss:$20 sps:$4 sm:$0xff]  }
 0x51b   :  { %20197 = vst [vmem:[#allocation194_spill] sm:$0xff] %v16456_v4  ;;  %v16458_v23 = vpop.f32.mrb[110].mxu1  ;;  %v16461_v40 = vsel %vm618_vm0, %v2989_v9, %v2991_v60  ;;  %v20202_v9 = vld [vmem:[#allocation19_spill] sm:$0xff] }
 0x51c   :  { %20198 = vst [vmem:[#allocation195_spill] sm:$0xff] %v16458_v23  ;;  %v2993_v48 = vpop.permute.xlu1 %2992  ;;  %v16463_v41 = vpop.f32.mrb[111].mxu1 }
 0x51d   :  { %20199 = vst [vmem:[#allocation196_spill] sm:$0xff] %v16463_v41  ;;  %7301 = vmatmul.mubr.bf16.gmra.mrb[216].mxu0 %v20200_v62  ;;  %v16467_v1 = vsel %vm618_vm0, %v2991_v60, %v2993_v48  ;;  %8360 = vmatmul.mubr.bf16.gmra.mrb[216].mxu1 %v20200_v62 }
 0x51e   :  { %7310 = vmatprep.mubr.bf16.mxu0 %v11977_v3  ;;  %v3003_v4 = vpop.permute.xlu0 %3002  ;;  %v16473_v23 = vpop.f32.mrb[112].mxu0  ;;  %8369 = vmatprep.mubr.bf16.mxu1 %v11977_v3 }
 0x51f   :  { %20201 = vst [vmem:[#allocation46_spill] sm:$0xff] %v16473_v23  ;;  %v16477_v27 = vsel %vm618_vm0, %v20202_v9, %v3003_v4  ;;  %v16479_v15 = vpop.f32.mrb[113].mxu0 }
 0x520   :  { %v3005_v41 = vpop.permute.xlu1 %3004  ;;  %20203 = vst [vmem:[#allocation19_spill] sm:$0xff] %v16479_v15  ;;  %v16484_v60 = vpop.f32.mrb[112].mxu1 }
 0x521   :  { %v16482_v48 = vsel %vm618_vm0, %v3003_v4, %v3005_v41  ;;  %20204 = vst [vmem:[#allocation197_spill] sm:$0xff] %v16484_v60  ;;  %v16486_v7 = vpop.f32.mrb[114].mxu0  ;;  %v16488_v29 = vpop.f32.mrb[113].mxu1  ;;  %v11978_v4 = vld [vmem:[%s19721_s3 + $0x3c4] ss:$20 sps:$4 sm:$0xff]  }
 0x522   :  { %20205 = vst [vmem:[#allocation198_spill] sm:$0xff] %v16486_v7  ;;  %20206 = vst [vmem:[#allocation199_spill] sm:$0xff] %v16488_v29  ;;  %v16490_v62 = vpop.f32.mrb[115].mxu0  ;;  %v16492_v23 = vpop.f32.mrb[114].mxu1 }
 0x523   :  { %20207 = vst [vmem:[#allocation200_spill] sm:$0xff] %v16490_v62  ;;  %20208 = vst [vmem:[#allocation201_spill] sm:$0xff] %v16492_v23  ;;  %v3007_v36 = vpop.permute.xlu0 %3006  ;;  %v16494_v9 = vpop.f32.mrb[115].mxu1 }
 0x524   :  { %20209 = vst [vmem:[#allocation202_spill] sm:$0xff] %v16494_v9  ;;  %v16498_v3 = vsel %vm618_vm0, %v3005_v41, %v3007_v36 }
 0x525   :  { %7311 = vmatmul.mubr.bf16.gmra.mrb[220].mxu0 %v20210_v24  ;;  %8370 = vmatmul.mubr.bf16.gmra.mrb[220].mxu1 %v20210_v24  ;;  %v11979_v24 = vld [vmem:[%s19721_s3 + $0x3ec] ss:$20 sps:$4 sm:$0xff]  }
 0x526   :  { %7320 = vmatprep.mubr.bf16.mxu0 %v11978_v4  ;;  %v16504_v7 = vpop.f32.mrb[116].mxu0  ;;  %8379 = vmatprep.mubr.bf16.mxu1 %v11978_v4 }
 0x527   :  { %20211 = vst [vmem:[#allocation48_spill] sm:$0xff] %v16504_v7  ;;  %v16506_v62 = vpop.f32.mrb[117].mxu0  ;;  %v20228_v7 = vld [vmem:[#allocation52_spill] sm:$0xff] }
 0x528   :  { %20212 = vst [vmem:[#allocation203_spill] sm:$0xff] %v16506_v62  ;;  %v16508_v23 = vpop.f32.mrb[116].mxu1  ;;  %v16510_v9 = vpop.f32.mrb[118].mxu0 }
 0x529   :  { %20213 = vst [vmem:[#allocation204_spill] sm:$0xff] %v16508_v23  ;;  %20214 = vst [vmem:[#allocation205_spill] sm:$0xff] %v16510_v9  ;;  %v16512_v29 = vpop.f32.mrb[117].mxu1  ;;  %v16514_v41 = vpop.f32.mrb[119].mxu0 }
 0x52a   :  { %20215 = vst [vmem:[#allocation206_spill] sm:$0xff] %v16512_v29  ;;  %20216 = vst [vmem:[#allocation207_spill] sm:$0xff] %v16514_v41  ;;  %v16516_v60 = vpop.f32.mrb[118].mxu1 }
 0x52b   :  { %20217 = vst [vmem:[#allocation208_spill] sm:$0xff] %v16516_v60  ;;  %v16518_v15 = vpop.f32.mrb[119].mxu1 }
 0x52c   :  { %20218 = vst [vmem:[#allocation209_spill] sm:$0xff] %v16518_v15 }
 0x52d   :  { %7321 = vmatmul.mubr.bf16.gmra.mrb[224].mxu0 %v20219_v39  ;;  %8380 = vmatmul.mubr.bf16.gmra.mrb[224].mxu1 %v20219_v39  ;;  %v11980_v39 = vld [vmem:[%s19721_s3 + $0x414] ss:$20 sps:$4 sm:$0xff]  }
 0x52e   :  { %7330 = vmatprep.mubr.bf16.mxu0 %v11979_v24  ;;  %v16525_v4 = vpop.f32.mrb[120].mxu0  ;;  %8389 = vmatprep.mubr.bf16.mxu1 %v11979_v24 }
 0x52f   :  { %20220 = vst [vmem:[#allocation50_spill] sm:$0xff] %v16525_v4  ;;  %v16527_v9 = vpop.f32.mrb[121].mxu0 }
 0x530   :  { %20221 = vst [vmem:[#allocation210_spill] sm:$0xff] %v16527_v9  ;;  %v16529_v29 = vpop.f32.mrb[120].mxu1  ;;  %v16531_v41 = vpop.f32.mrb[122].mxu0 }
 0x531   :  { %20222 = vst [vmem:[#allocation211_spill] sm:$0xff] %v16529_v29  ;;  %20223 = vst [vmem:[#allocation212_spill] sm:$0xff] %v16531_v41  ;;  %v16533_v60 = vpop.f32.mrb[121].mxu1  ;;  %v16535_v15 = vpop.f32.mrb[123].mxu0 }
 0x532   :  { %20224 = vst [vmem:[#allocation213_spill] sm:$0xff] %v16533_v60  ;;  %20225 = vst [vmem:[#allocation214_spill] sm:$0xff] %v16535_v15  ;;  %v16537_v23 = vpop.f32.mrb[122].mxu1 }
 0x533   :  { %20226 = vst [vmem:[#allocation215_spill] sm:$0xff] %v16537_v23  ;;  %v16539_v62 = vpop.f32.mrb[123].mxu1 }
 0x534   :  { %20227 = vst [vmem:[#allocation216_spill] sm:$0xff] %v16539_v62 }
 0x535   :  { %7331 = vmatmul.mubr.bf16.gmra.mrb[228].mxu0 %v20228_v7  ;;  %8390 = vmatmul.mubr.bf16.gmra.mrb[228].mxu1 %v20228_v7  ;;  %v11981_v7 = vld [vmem:[%s19721_s3 + $0x410] ss:$20 sps:$4 sm:$0xff]  }
 0x536   :  { %7340 = vmatprep.mubr.bf16.mxu0 %v11980_v39  ;;  %v16546_v24 = vpop.f32.mrb[124].mxu0  ;;  %8399 = vmatprep.mubr.bf16.mxu1 %v11980_v39 }
 0x537   :  { %20229 = vst [vmem:[#allocation52_spill] sm:$0xff] %v16546_v24  ;;  %v16548_v41 = vpop.f32.mrb[125].mxu0 }
 0x538   :  { %20230 = vst [vmem:[#allocation217_spill] sm:$0xff] %v16548_v41  ;;  %v16550_v60 = vpop.f32.mrb[124].mxu1  ;;  %v16552_v15 = vpop.f32.mrb[126].mxu0 }
 0x539   :  { %20231 = vst [vmem:[#allocation218_spill] sm:$0xff] %v16550_v60  ;;  %20232 = vst [vmem:[#allocation219_spill] sm:$0xff] %v16552_v15  ;;  %v16554_v23 = vpop.f32.mrb[125].mxu1  ;;  %v16556_v62 = vpop.f32.mrb[127].mxu0  ;;  %v11982_v15 = vld [vmem:[%s19721_s3 + $0x43c] ss:$20 sps:$4 sm:$0xff]  }
 0x53a   :  { %20233 = vst [vmem:[#allocation220_spill] sm:$0xff] %v16554_v23  ;;  %20234 = vst [vmem:[#allocation221_spill] sm:$0xff] %v16556_v62  ;;  %v16558_v29 = vpop.f32.mrb[126].mxu1  ;;  %v3009_v9 = vpop.permute.xlu1 %3008 }
 0x53b   :  { %20235 = vst [vmem:[#allocation222_spill] sm:$0xff] %v16558_v29  ;;  %v16560_v4 = vpop.f32.mrb[127].mxu1  ;;  %v16566_v39 = vsel %vm618_vm0, %v3007_v36, %v3009_v9  ;;  %v11983_v29 = vld [vmem:[%s19721_s3 + $0x438] ss:$20 sps:$4 sm:$0xff]   ;;  %v11985_v36 = vld [vmem:[%s19721_s3 + $0x460] ss:$20 sps:$4 sm:$0xff]  }
 0x53c   :  { %20236 = vst [vmem:[#allocation223_spill] sm:$0xff] %v16560_v4  ;;  %v11984_v4 = vld [vmem:[%s19721_s3 + $0x464] ss:$20 sps:$4 sm:$0xff]   ;;  %v11987_v9 = vld [vmem:[%s19721_s3 + $0x488] ss:$20 sps:$4 sm:$0xff]  }
 0x53d   :  { %7341 = vmatmul.mubr.bf16.gmra.mrb[232].mxu0 %v11981_v7  ;;  %8400 = vmatmul.mubr.bf16.gmra.mrb[232].mxu1 %v11981_v7 }
 0x53e   :  { %7350 = vmatprep.mubr.bf16.mxu0 %v11982_v15  ;;  %8409 = vmatprep.mubr.bf16.mxu1 %v11982_v15  ;;  %v11986_v15 = vld [vmem:[%s19721_s3 + $0x48c] ss:$20 sps:$4 sm:$0xff]  }
 0x545   :  { %7351 = vmatmul.mubr.bf16.gmra.mrb[236].mxu0 %v11983_v29  ;;  %8410 = vmatmul.mubr.bf16.gmra.mrb[236].mxu1 %v11983_v29  ;;  %v11988_v29 = vld [vmem:[%s19721_s3 + $0x4b4] ss:$20 sps:$4 sm:$0xff]  }
 0x546   :  { %7360 = vmatprep.mubr.bf16.mxu0 %v11984_v4  ;;  %8419 = vmatprep.mubr.bf16.mxu1 %v11984_v4  ;;  %v11989_v4 = vld [vmem:[%s19721_s3 + $0x4b0] ss:$20 sps:$4 sm:$0xff]  }
 0x54d   :  { %7361 = vmatmul.mubr.bf16.gmra.mrb[240].mxu0 %v11985_v36  ;;  %8420 = vmatmul.mubr.bf16.gmra.mrb[240].mxu1 %v11985_v36  ;;  %v11990_v36 = vld [vmem:[%s19721_s3 + $0x4dc] ss:$20 sps:$4 sm:$0xff]  }
 0x54e   :  { %7370 = vmatprep.mubr.bf16.mxu0 %v11986_v15  ;;  %8429 = vmatprep.mubr.bf16.mxu1 %v11986_v15 }
 0x555   :  { %7371 = vmatmul.mubr.bf16.gmra.mrb[244].mxu0 %v11987_v9  ;;  %8430 = vmatmul.mubr.bf16.gmra.mrb[244].mxu1 %v11987_v9  ;;  %v11991_v9 = vld [vmem:[%s19721_s3 + $0x4d8] ss:$20 sps:$4 sm:$0xff]  }
 0x556   :  { %7380 = vmatprep.mubr.bf16.mxu0 %v11988_v29  ;;  %8439 = vmatprep.mubr.bf16.mxu1 %v11988_v29  ;;  %v11992_v29 = vld [vmem:[%s19721_s3 + $0xc] ss:$20 sps:$4 sm:$0xff]  }
 0x55c   :  { %v259_v7 = vpop.xlane.xlu0 %258 }
 0x55d   :  { %7381 = vmatmul.mubr.bf16.gmra.mrb[248].mxu0 %v11989_v4  ;;  %v260_v15 = vrot.slane %v259_v7, 4  ;;  %8440 = vmatmul.mubr.bf16.gmra.mrb[248].mxu1 %v11989_v4  ;;  %v11993_v4 = vld [vmem:[%s19721_s3 + $0x8] ss:$20 sps:$4 sm:$0xff]  }
 0x55e   :  { %7390 = vmatprep.mubr.bf16.mxu0 %v11990_v36  ;;  %8449 = vmatprep.mubr.bf16.mxu1 %v11990_v36  ;;  %v12011_v36 = vld [vmem:[%s19721_s3 + $0x170] ss:$20 sps:$4 sm:$0xff]  }
 0x55f   :  { %v261_v62 = vadd.f32 %v260_v15, %v259_v7  ;;  %v12010_v7 = vld [vmem:[%s19721_s3 + $0x174] ss:$20 sps:$4 sm:$0xff]   ;;  %v12012_v15 = vld [vmem:[%s19721_s3 + $0x19c] ss:$20 sps:$4 sm:$0xff]  }
 0x561   :  { %v262_v23 = vrot.slane %v261_v62, 2 }
 0x563   :  { %v263_v60 = vadd.f32 %v262_v23, %v261_v62  ;;  %v11994_v23 = vld [vmem:[%s19721_s3 + $0x34] ss:$20 sps:$4 sm:$0xff]  }
 0x565   :  { %7391 = vmatmul.mubr.bf16.gmra.mrb[252].mxu0 %v11991_v9  ;;  %v264_v41 = vrot.slane %v263_v60, 1  ;;  %8450 = vmatmul.mubr.bf16.gmra.mrb[252].mxu1 %v11991_v9  ;;  %v12013_v9 = vld [vmem:[%s19721_s3 + $0x198] ss:$20 sps:$4 sm:$0xff]  }
 0x566   :  { %7433 = vmatprep.mubr.bf16.mxu0 %v11992_v29  ;;  %8492 = vmatprep.mubr.bf16.mxu1 %v11992_v29  ;;  %v12014_v29 = vld [vmem:[%s19721_s3 + $0x1c4] ss:$20 sps:$4 sm:$0xff]  }
 0x567   :  { %v265_v24 = vadd.f32 %v264_v41, %v263_v60  ;;  %v12008_v41 = vld [vmem:[%s19721_s3 + $0x14c] ss:$20 sps:$4 sm:$0xff]  }
 0x569   :  { %11516 = vpush %v265_v24  ;;  %v12009_v24 = vld [vmem:[%s19721_s3 + $0x148] ss:$20 sps:$4 sm:$0xff]  }
 0x56d   :  { %7434 = vmatmul.mubr.bf16.vlgmr.msra.gmra.mrb[128].mxu0 %v11993_v4  ;;  %8493 = vmatmul.mubr.bf16.vlgmr.msra.gmra.mrb[128].mxu1 %v11993_v4  ;;  %v12015_v4 = vld [vmem:[%s19721_s3 + $0x1c0] ss:$20 sps:$4 sm:$0xff]  }
 0x56e   :  { %7755 = vmatpush1.bf16.msra.mxu0 %v16379_v12  ;;  %7443 = vmatprep.mubr.bf16.mxu0 %v11994_v23  ;;  %v11995_v12 = vld [vmem:[%s19721_s3 + $0x30] ss:$20 sps:$4 sm:$0xff]  }
 0x56f   :  { %7756 = vmatprep.subr.bf16.mxu0 %v16414_v18  ;;  %8502 = vmatprep.mubr.bf16.mxu1 %v11994_v23  ;;  %v11996_v18 = vld [vmem:[%s19721_s3 + $0x5c] ss:$20 sps:$4 sm:$0xff]   ;;  %v12016_v23 = vld [vmem:[%s19721_s3 + $0x1ec] ss:$20 sps:$4 sm:$0xff]  }
 0x570   :  { %8814 = vmatpush1.bf16.msra.mxu1 %v16395_v38  ;;  %v11998_v38 = vld [vmem:[%s19721_s3 + $0x84] ss:$20 sps:$4 sm:$0xff]  }
 0x571   :  { %8815 = vmatprep.subr.bf16.mxu1 %v16433_v21  ;;  %v12002_v21 = vld [vmem:[%s19721_s3 + $0xd4] ss:$20 sps:$4 sm:$0xff]  }
 0x572   :  { %7757 = vmatpush1.bf16.msra.mxu0 %v16409_v5  ;;  %v11997_v5 = vld [vmem:[%s19721_s3 + $0x58] ss:$20 sps:$4 sm:$0xff]  }
 0x573   :  { %7758 = vmatprep.subr.bf16.mxu0 %v16448_v16  ;;  %v12003_v16 = vld [vmem:[%s19721_s3 + $0xd0] ss:$20 sps:$4 sm:$0xff]  }
 0x574   :  { %8816 = vmatpush1.bf16.msra.mxu1 %v16427_v51  ;;  %v12001_v51 = vld [vmem:[%s19721_s3 + $0xa8] ss:$20 sps:$4 sm:$0xff]  }
 0x575   :  { %7444 = vmatmul.mubr.bf16.gmra.mrb[132].mxu0 %v11995_v12  ;;  %8817 = vmatprep.subr.bf16.mxu1 %v16467_v1  ;;  %v12005_v1 = vld [vmem:[%s19721_s3 + $0xf8] ss:$20 sps:$4 sm:$0xff]  }
 0x576   :  { %7759 = vmatpush1.bf16.msra.mxu0 %v16443_v2  ;;  %7453 = vmatprep.mubr.bf16.mxu0 %v11996_v18  ;;  %v12000_v2 = vld [vmem:[%s19721_s3 + $0xac] ss:$20 sps:$4 sm:$0xff]  }
 0x577   :  { %7760 = vmatprep.subr.bf16.mxu0 %v16482_v48  ;;  %8503 = vmatmul.mubr.bf16.gmra.mrb[132].mxu1 %v11995_v12  ;;  %v12006_v48 = vld [vmem:[%s19721_s3 + $0x124] ss:$20 sps:$4 sm:$0xff]   ;;  %v12017_v12 = vld [vmem:[%s19721_s3 + $0x1e8] ss:$20 sps:$4 sm:$0xff]  }
 0x578   :  { %8512 = vmatprep.mubr.bf16.mxu1 %v11996_v18  ;;  %8818 = vmatpush1.bf16.msra.mxu1 %v16461_v40  ;;  %v12004_v40 = vld [vmem:[%s19721_s3 + $0xfc] ss:$20 sps:$4 sm:$0xff]   ;;  %v12018_v18 = vld [vmem:[%s19721_s3 + $0x214] ss:$20 sps:$4 sm:$0xff]  }
 0x579   :  { %8819 = vmatprep.subr.bf16.mxu1 %v16566_v39 }
 0x57a   :  { %7761 = vmatpush1.bf16.msra.mxu0 %v16477_v27  ;;  %v11999_v27 = vld [vmem:[%s19721_s3 + $0x80] ss:$20 sps:$4 sm:$0xff]  }
 0x57c   :  { %8820 = vmatpush1.bf16.msra.mxu1 %v16498_v3  ;;  %v12007_v3 = vld [vmem:[%s19721_s3 + $0x120] ss:$20 sps:$4 sm:$0xff]  }
 0x57d   :  { %7454 = vmatmul.mubr.bf16.gmra.mrb[136].mxu0 %v11997_v5 }
 0x57e   :  { %7463 = vmatprep.mubr.bf16.mxu0 %v11998_v38 }
 0x57f   :  { %8513 = vmatmul.mubr.bf16.gmra.mrb[136].mxu1 %v11997_v5  ;;  %v12019_v5 = vld [vmem:[%s19721_s3 + $0x210] ss:$20 sps:$4 sm:$0xff]  }
 0x580   :  { %8522 = vmatprep.mubr.bf16.mxu1 %v11998_v38  ;;  %v12020_v38 = vld [vmem:[%s19721_s3 + $0x23c] ss:$20 sps:$4 sm:$0xff]  }
 0x585   :  { %7464 = vmatmul.mubr.bf16.gmra.mrb[140].mxu0 %v11999_v27 }
 0x586   :  { %7473 = vmatprep.mubr.bf16.mxu0 %v12000_v2 }
 0x587   :  { %8523 = vmatmul.mubr.bf16.gmra.mrb[140].mxu1 %v11999_v27  ;;  %v12021_v27 = vld [vmem:[%s19721_s3 + $0x238] ss:$20 sps:$4 sm:$0xff]  }
 0x588   :  { %8532 = vmatprep.mubr.bf16.mxu1 %v12000_v2  ;;  %v12022_v2 = vld [vmem:[%s19721_s3 + $0x264] ss:$20 sps:$4 sm:$0xff]  }
 0x58d   :  { %7474 = vmatmul.mubr.bf16.gmra.mrb[144].mxu0 %v12001_v51 }
 0x58e   :  { %7483 = vmatprep.mubr.bf16.mxu0 %v12002_v21 }
 0x58f   :  { %8533 = vmatmul.mubr.bf16.gmra.mrb[144].mxu1 %v12001_v51 }
 0x590   :  { %8542 = vmatprep.mubr.bf16.mxu1 %v12002_v21  ;;  %v12023_v21 = vld [vmem:[%s19721_s3 + $0x260] ss:$20 sps:$4 sm:$0xff]  }
 0x595   :  { %7484 = vmatmul.mubr.bf16.gmra.mrb[148].mxu0 %v12003_v16 }
 0x596   :  { %7493 = vmatprep.mubr.bf16.mxu0 %v12004_v40 }
 0x597   :  { %8543 = vmatmul.mubr.bf16.gmra.mrb[148].mxu1 %v12003_v16  ;;  %v12024_v16 = vld [vmem:[%s19721_s3 + $0x28c] ss:$20 sps:$4 sm:$0xff]  }
 0x598   :  { %8552 = vmatprep.mubr.bf16.mxu1 %v12004_v40  ;;  %v12025_v40 = vld [vmem:[%s19721_s3 + $0x288] ss:$20 sps:$4 sm:$0xff]  }
 0x59a   :  { %s11517_s20 = spop %11516 }
 0x59b   :  { %s268_s22 = sadd.f32 %s11517_s20, %s19723_s5 }
 0x59d   :  { %7494 = vmatmul.mubr.bf16.gmra.mrb[152].mxu0 %v12005_v1  ;;  %s269_s27 = ssub.f32 0.0, %s268_s22 }
 0x59e   :  { %7503 = vmatprep.mubr.bf16.mxu0 %v12006_v48 }
 0x59f   :  { %8553 = vmatmul.mubr.bf16.gmra.mrb[152].mxu1 %v12005_v1  ;;  %v270_v60 = vstv %s269_s27 }
 0x5a0   :  { %8562 = vmatprep.mubr.bf16.mxu1 %v12006_v48  ;;  %v271_v62 = vmul.f32 1.442695, %v270_v60  ;;  %v12026_v48 = vld [vmem:[%s19721_s3 + $0x2b4] ss:$20 sps:$4 sm:$0xff]   ;;  %v12027_v60 = vld [vmem:[%s19721_s3 + $0x2b0] ss:$20 sps:$4 sm:$0xff]  }
 0x5a2   :  { %11743 = vpow2.f32 %v271_v62  ;;  %v12028_v62 = vld [vmem:[%s19721_s3 + $0x2dc] ss:$20 sps:$4 sm:$0xff]  }
 0x5a5   :  { %7504 = vmatmul.mubr.bf16.gmra.mrb[156].mxu0 %v12007_v3 }
 0x5a6   :  { %7513 = vmatprep.mubr.bf16.mxu0 %v12008_v41 }
 0x5a7   :  { %8563 = vmatmul.mubr.bf16.gmra.mrb[156].mxu1 %v12007_v3  ;;  %v12029_v3 = vld [vmem:[%s19721_s3 + $0x2d8] ss:$20 sps:$4 sm:$0xff]  }
 0x5a8   :  { %8572 = vmatprep.mubr.bf16.mxu1 %v12008_v41  ;;  %v12030_v41 = vld [vmem:[%s19721_s3 + $0x304] ss:$20 sps:$4 sm:$0xff]  }
 0x5ac   :  { %v11744_v39 = vpop.eup %11743 }
 0x5ad   :  { %7514 = vmatmul.mubr.bf16.gmra.mrb[160].mxu0 %v12009_v24  ;;  %11518 = vpush %v11744_v39  ;;  %v12032_v39 = vld [vmem:[%s19721_s3 + $0x32c] ss:$20 sps:$4 sm:$0xff]  }
 0x5ae   :  { %7523 = vmatprep.mubr.bf16.mxu0 %v12010_v7 }
 0x5af   :  { %8573 = vmatmul.mubr.bf16.gmra.mrb[160].mxu1 %v12009_v24  ;;  %v12031_v24 = vld [vmem:[%s19721_s3 + $0x300] ss:$20 sps:$4 sm:$0xff]  }
 0x5b0   :  { %8582 = vmatprep.mubr.bf16.mxu1 %v12010_v7  ;;  %v12033_v7 = vld [vmem:[%s19721_s3 + $0x328] ss:$20 sps:$4 sm:$0xff]  }
 0x5b5   :  { %7524 = vmatmul.mubr.bf16.gmra.mrb[164].mxu0 %v12011_v36 }
 0x5b6   :  { %7533 = vmatprep.mubr.bf16.mxu0 %v12012_v15 }
 0x5b7   :  { %8583 = vmatmul.mubr.bf16.gmra.mrb[164].mxu1 %v12011_v36  ;;  %v12034_v36 = vld [vmem:[%s19721_s3 + $0x354] ss:$20 sps:$4 sm:$0xff]  }
 0x5b8   :  { %8592 = vmatprep.mubr.bf16.mxu1 %v12012_v15  ;;  %v12035_v15 = vld [vmem:[%s19721_s3 + $0x350] ss:$20 sps:$4 sm:$0xff]  }
 0x5bd   :  { %7534 = vmatmul.mubr.bf16.gmra.mrb[168].mxu0 %v12013_v9 }
 0x5be   :  { %7543 = vmatprep.mubr.bf16.mxu0 %v12014_v29 }
 0x5bf   :  { %8593 = vmatmul.mubr.bf16.gmra.mrb[168].mxu1 %v12013_v9  ;;  %v12036_v9 = vld [vmem:[%s19721_s3 + $0x37c] ss:$20 sps:$4 sm:$0xff]  }
 0x5c0   :  { %8602 = vmatprep.mubr.bf16.mxu1 %v12014_v29  ;;  %v12037_v29 = vld [vmem:[%s19721_s3 + $0x378] ss:$20 sps:$4 sm:$0xff]  }
 0x5c5   :  { %7544 = vmatmul.mubr.bf16.gmra.mrb[172].mxu0 %v12015_v4 }
 0x5c6   :  { %7553 = vmatprep.mubr.bf16.mxu0 %v12016_v23 }
 0x5c7   :  { %8603 = vmatmul.mubr.bf16.gmra.mrb[172].mxu1 %v12015_v4  ;;  %v12038_v4 = vld [vmem:[%s19721_s3 + $0x3a4] ss:$20 sps:$4 sm:$0xff]  }
 0x5c8   :  { %8612 = vmatprep.mubr.bf16.mxu1 %v12016_v23  ;;  %v3592_v23 = vld [vmem:[%s19724_s4 + $0x40] sm:$0xff] }
 0x5cd   :  { %7554 = vmatmul.mubr.bf16.gmra.mrb[176].mxu0 %v12017_v12 }
 0x5ce   :  { %7563 = vmatprep.mubr.bf16.mxu0 %v12018_v18 }
 0x5cf   :  { %8613 = vmatmul.mubr.bf16.gmra.mrb[176].mxu1 %v12017_v12  ;;  %v3584_v12 = vld [vmem:[%s19724_s4] sm:$0xff] }
 0x5d0   :  { %8622 = vmatprep.mubr.bf16.mxu1 %v12018_v18 }
 0x5d5   :  { %7564 = vmatmul.mubr.bf16.gmra.mrb[180].mxu0 %v12019_v5 }
 0x5d6   :  { %7573 = vmatprep.mubr.bf16.mxu0 %v12020_v38 }
 0x5d7   :  { %8623 = vmatmul.mubr.bf16.gmra.mrb[180].mxu1 %v12019_v5  ;;  %v3604_v5 = vld [vmem:[%s19724_s4 + $0xa0] sm:$0xff] }
 0x5d8   :  { %8632 = vmatprep.mubr.bf16.mxu1 %v12020_v38  ;;  %v3585_v38 = vld [vmem:[%s19724_s4 + $0x8] sm:$0xff] }
 0x5dd   :  { %7574 = vmatmul.mubr.bf16.gmra.mrb[184].mxu0 %v12021_v27 }
 0x5de   :  { %7583 = vmatprep.mubr.bf16.mxu0 %v12022_v2  ;;  %s11519_s10 = spop %11518 }
 0x5df   :  { %8633 = vmatmul.mubr.bf16.gmra.mrb[184].mxu1 %v12021_v27  ;;  %s274_s26 = sadd.f32 1.0, %s11519_s10 }
 0x5e0   :  { %8642 = vmatprep.mubr.bf16.mxu1 %v12022_v2 }
 0x5e1   :  { %v275_v51 = vstv %s274_s26 }
 0x5e2   :  { %11745 = vrcp.f32 %v275_v51 }
 0x5e5   :  { %7584 = vmatmul.mubr.bf16.gmra.mrb[188].mxu0 %v12023_v21 }
 0x5e6   :  { %7593 = vmatprep.mubr.bf16.mxu0 %v12024_v16 }
 0x5e7   :  { %8643 = vmatmul.mubr.bf16.gmra.mrb[188].mxu1 %v12023_v21 }
 0x5e8   :  { %8652 = vmatprep.mubr.bf16.mxu1 %v12024_v16  ;;  %v3606_v16 = vld [vmem:[%s19724_s4 + $0xb0] sm:$0xff] }
 0x5ec   :  { %v11746_v1 = vpop.eup %11745 }
 0x5ed   :  { %7594 = vmatmul.mubr.bf16.gmra.mrb[192].mxu0 %v12025_v40  ;;  %11520 = vpush %v11746_v1  ;;  %v12039_v1 = vld [vmem:[%s19721_s3 + $0x3a0] ss:$20 sps:$4 sm:$0xff]  }
 0x5ee   :  { %7603 = vmatprep.mubr.bf16.mxu0 %v12026_v48 }
 0x5ef   :  { %8653 = vmatmul.mubr.bf16.gmra.mrb[192].mxu1 %v12025_v40  ;;  %v3586_v40 = vld [vmem:[%s19724_s4 + $0x10] sm:$0xff] }
 0x5f0   :  { %8662 = vmatprep.mubr.bf16.mxu1 %v12026_v48  ;;  %v12040_v48 = vld [vmem:[%s19721_s3 + $0x3cc] ss:$20 sps:$4 sm:$0xff]  }
 0x5f5   :  { %7604 = vmatmul.mubr.bf16.gmra.mrb[196].mxu0 %v12027_v60 }
 0x5f6   :  { %7613 = vmatprep.mubr.bf16.mxu0 %v12028_v62 }
 0x5f7   :  { %8663 = vmatmul.mubr.bf16.gmra.mrb[196].mxu1 %v12027_v60 }
 0x5f8   :  { %8672 = vmatprep.mubr.bf16.mxu1 %v12028_v62 }
 0x5fd   :  { %7614 = vmatmul.mubr.bf16.gmra.mrb[200].mxu0 %v12029_v3 }
 0x5fe   :  { %7623 = vmatprep.mubr.bf16.mxu0 %v12030_v41 }
 0x5ff   :  { %8673 = vmatmul.mubr.bf16.gmra.mrb[200].mxu1 %v12029_v3  ;;  %v3608_v3 = vld [vmem:[%s19724_s4 + $0xc0] sm:$0xff] }
 0x600   :  { %8682 = vmatprep.mubr.bf16.mxu1 %v12030_v41  ;;  %v3587_v41 = vld [vmem:[%s19724_s4 + $0x18] sm:$0xff] }
 0x605   :  { %7624 = vmatmul.mubr.bf16.gmra.mrb[204].mxu0 %v12031_v24 }
 0x606   :  { %7633 = vmatprep.mubr.bf16.mxu0 %v12032_v39 }
 0x607   :  { %8683 = vmatmul.mubr.bf16.gmra.mrb[204].mxu1 %v12031_v24 }
 0x608   :  { %8692 = vmatprep.mubr.bf16.mxu1 %v12032_v39 }
 0x60d   :  { %7634 = vmatmul.mubr.bf16.gmra.mrb[208].mxu0 %v12033_v7 }
 0x60e   :  { %7643 = vmatprep.mubr.bf16.mxu0 %v12034_v36 }
 0x60f   :  { %8693 = vmatmul.mubr.bf16.gmra.mrb[208].mxu1 %v12033_v7  ;;  %v3610_v7 = vld [vmem:[%s19724_s4 + $0xd0] sm:$0xff] }
 0x610   :  { %8702 = vmatprep.mubr.bf16.mxu1 %v12034_v36  ;;  %v3588_v36 = vld [vmem:[%s19724_s4 + $0x20] sm:$0xff] }
 0x615   :  { %7644 = vmatmul.mubr.bf16.gmra.mrb[212].mxu0 %v12035_v15 }
 0x616   :  { %7653 = vmatprep.mubr.bf16.mxu0 %v12036_v9 }
 0x617   :  { %8703 = vmatmul.mubr.bf16.gmra.mrb[212].mxu1 %v12035_v15  ;;  %v12041_v15 = vld [vmem:[%s19721_s3 + $0x3c8] ss:$20 sps:$4 sm:$0xff]  }
 0x618   :  { %8712 = vmatprep.mubr.bf16.mxu1 %v12036_v9  ;;  %v12042_v9 = vld [vmem:[%s19721_s3 + $0x3f4] ss:$20 sps:$4 sm:$0xff]  }
 0x61d   :  { %7654 = vmatmul.mubr.bf16.gmra.mrb[216].mxu0 %v12037_v29 }
 0x61e   :  { %7663 = vmatprep.mubr.bf16.mxu0 %v12038_v4  ;;  %s11521_s23 = spop %11520 }
 0x61f   :  { %8713 = vmatmul.mubr.bf16.gmra.mrb[216].mxu1 %v12037_v29  ;;  %v16762_v18 = vstv %s11521_s23 }
 0x620   :  { %8722 = vmatprep.mubr.bf16.mxu1 %v12038_v4  ;;  %v3657_v27 = vadd.f32 %v16762_v18, %v3592_v23  ;;  %v3649_v2 = vadd.f32 %v16762_v18, %v3584_v12  ;;  %v3669_v51 = vadd.f32 %v16762_v18, %v3604_v5  ;;  %v3650_v21 = vadd.f32 %v16762_v18, %v3585_v38  ;;  %v3612_v23 = vld [vmem:[%s19724_s4 + $0xe0] sm:$0xff]  ;;  %v3589_v12 = vld [vmem:[%s19724_s4 + $0x28] sm:$0xff] }
 0x621   :  { %v3671_v60 = vadd.f32 %v16762_v18, %v3606_v16  ;;  %v3651_v62 = vadd.f32 %v16762_v18, %v3586_v40  ;;  %v3673_v24 = vadd.f32 %v16762_v18, %v3608_v3  ;;  %v3652_v39 = vadd.f32 %v16762_v18, %v3587_v41  ;;  %v3618_v3 = vld [vmem:[%s19724_s4 + $0x110] sm:$0xff]  ;;  %v3593_v41 = vld [vmem:[%s19724_s4 + $0x48] sm:$0xff] }
 0x622   :  { %3755 = vperm.xlu0 %11532, %v3657_v27   ;;  %3715 = vperm.xlu1 %11531, %v3649_v2   ;;  %v3675_v29 = vadd.f32 %v16762_v18, %v3610_v7  ;;  %v3653_v4 = vadd.f32 %v16762_v18, %v3588_v36  ;;  %v3677_v5 = vadd.f32 %v16762_v18, %v3612_v23  ;;  %v3614_v27 = vld [vmem:[%s19724_s4 + $0xf0] sm:$0xff] }
 0x623   :  { %v3654_v38 = vadd.f32 %v16762_v18, %v3589_v12  ;;  %v3590_v2 = vld [vmem:[%s19724_s4 + $0x30] sm:$0xff]  ;;  %v3679_v16 = vadd.f32 %v16762_v18, %v3614_v27  ;;  %v3683_v7 = vadd.f32 %v16762_v18, %v3618_v3  ;;  %v3658_v36 = vadd.f32 %v16762_v18, %v3593_v41  ;;  %v3595_v12 = vld [vmem:[%s19724_s4 + $0x58] sm:$0xff] }
 0x624   :  { %v3655_v40 = vadd.f32 %v16762_v18, %v3590_v2  ;;  %v3622_v23 = vld [vmem:[%s19724_s4 + $0x130] sm:$0xff]  ;;  %v3660_v2 = vadd.f32 %v16762_v18, %v3595_v12 }
 0x625   :  { %7664 = vmatmul.mubr.bf16.gmra.mrb[220].mxu0 %v12039_v1  ;;  %v3687_v27 = vadd.f32 %v16762_v18, %v3622_v23 }
 0x626   :  { %7673 = vmatprep.mubr.bf16.mxu0 %v12040_v48  ;;  %3815 = vperm.xlu0 %11532, %v3669_v51   ;;  %v12043_v51 = vld [vmem:[%s19721_s3 + $0x3f0] ss:$20 sps:$4 sm:$0xff]  }
 0x627   :  { %3720 = vperm.xlu1 %11531, %v3650_v21   ;;  %8723 = vmatmul.mubr.bf16.gmra.mrb[220].mxu1 %v12039_v1  ;;  %v12044_v21 = vld [vmem:[%s19721_s3 + $0x41c] ss:$20 sps:$4 sm:$0xff]   ;;  %v3616_v1 = vld [vmem:[%s19724_s4 + $0x100] sm:$0xff] }
 0x628   :  { %8732 = vmatprep.mubr.bf16.mxu1 %v12040_v48  ;;  %v3591_v48 = vld [vmem:[%s19724_s4 + $0x38] sm:$0xff] }
 0x62a   :  { %3825 = vperm.xlu0 %11532, %v3671_v60   ;;  %v3681_v60 = vadd.f32 %v16762_v18, %v3616_v1  ;;  %v3626_v1 = vld [vmem:[%s19724_s4 + $0x150] sm:$0xff] }
 0x62b   :  { %3725 = vperm.xlu1 %11531, %v3651_v62   ;;  %v3656_v62 = vadd.f32 %v16762_v18, %v3591_v48  ;;  %v3597_v48 = vld [vmem:[%s19724_s4 + $0x68] sm:$0xff]  ;;  %v3691_v3 = vadd.f32 %v16762_v18, %v3626_v1 }
 0x62c   :  { %v3662_v41 = vadd.f32 %v16762_v18, %v3597_v48 }
 0x62d   :  { %7674 = vmatmul.mubr.bf16.gmra.mrb[224].mxu0 %v12041_v15 }
 0x62e   :  { %7683 = vmatprep.mubr.bf16.mxu0 %v12042_v9  ;;  %3835 = vperm.xlu0 %11532, %v3673_v24   ;;  %v12045_v24 = vld [vmem:[%s19721_s3 + $0x418] ss:$20 sps:$4 sm:$0xff]  }
 0x62f   :  { %3730 = vperm.xlu1 %11531, %v3652_v39   ;;  %8733 = vmatmul.mubr.bf16.gmra.mrb[224].mxu1 %v12041_v15  ;;  %v12046_v39 = vld [vmem:[%s19721_s3 + $0x444] ss:$20 sps:$4 sm:$0xff]  }
 0x630   :  { %8742 = vmatprep.mubr.bf16.mxu1 %v12042_v9  ;;  %v3620_v15 = vld [vmem:[%s19724_s4 + $0x120] sm:$0xff]  ;;  %v3594_v9 = vld [vmem:[%s19724_s4 + $0x50] sm:$0xff] }
 0x632   :  { %3845 = vperm.xlu0 %11532, %v3675_v29   ;;  %v3685_v29 = vadd.f32 %v16762_v18, %v3620_v15  ;;  %v3630_v15 = vld [vmem:[%s19724_s4 + $0x170] sm:$0xff] }
 0x633   :  { %3735 = vperm.xlu1 %11531, %v3653_v4   ;;  %v3659_v4 = vadd.f32 %v16762_v18, %v3594_v9  ;;  %v3599_v9 = vld [vmem:[%s19724_s4 + $0x78] sm:$0xff]  ;;  %v3695_v23 = vadd.f32 %v16762_v18, %v3630_v15 }
 0x634   :  { %v3664_v12 = vadd.f32 %v16762_v18, %v3599_v9  ;;  %v3640_v9 = vld [vmem:[%s19724_s4 + $0x1c0] sm:$0xff] }
 0x635   :  { %7684 = vmatmul.mubr.bf16.gmra.mrb[228].mxu0 %v12043_v51 }
 0x636   :  { %7693 = vmatprep.mubr.bf16.mxu0 %v12044_v21  ;;  %3855 = vperm.xlu0 %11532, %v3677_v5   ;;  %v12047_v5 = vld [vmem:[%s19721_s3 + $0x440] ss:$20 sps:$4 sm:$0xff]  }
 0x637   :  { %3740 = vperm.xlu1 %11531, %v3654_v38   ;;  %8743 = vmatmul.mubr.bf16.gmra.mrb[228].mxu1 %v12043_v51  ;;  %v12048_v38 = vld [vmem:[%s19721_s3 + $0x46c] ss:$20 sps:$4 sm:$0xff]  }
 0x638   :  { %8752 = vmatprep.mubr.bf16.mxu1 %v12044_v21  ;;  %v3624_v51 = vld [vmem:[%s19724_s4 + $0x140] sm:$0xff] }
 0x639   :  { %v3596_v21 = vld [vmem:[%s19724_s4 + $0x60] sm:$0xff] }
 0x63a   :  { %3865 = vperm.xlu0 %11532, %v3679_v16   ;;  %v3689_v16 = vadd.f32 %v16762_v18, %v3624_v51  ;;  %v3634_v51 = vld [vmem:[%s19724_s4 + $0x190] sm:$0xff] }
 0x63b   :  { %3745 = vperm.xlu1 %11531, %v3655_v40   ;;  %v3661_v40 = vadd.f32 %v16762_v18, %v3596_v21  ;;  %v3601_v21 = vld [vmem:[%s19724_s4 + $0x88] sm:$0xff]  ;;  %v3699_v1 = vadd.f32 %v16762_v18, %v3634_v51  ;;  %v3644_v51 = vld [vmem:[%s19724_s4 + $0x1e0] sm:$0xff] }
 0x63c   :  { %v3666_v48 = vadd.f32 %v16762_v18, %v3601_v21  ;;  %v3609_v21 = vld [vmem:[%s19724_s4 + $0xc8] sm:$0xff] }
 0x63d   :  { %7694 = vmatmul.mubr.bf16.gmra.mrb[232].mxu0 %v12045_v24 }
 0x63e   :  { %7703 = vmatprep.mubr.bf16.mxu0 %v12046_v39  ;;  %3875 = vperm.xlu0 %11532, %v3681_v60   ;;  %v12049_v60 = vld [vmem:[%s19721_s3 + $0x468] ss:$20 sps:$4 sm:$0xff]  }
 0x63f   :  { %3750 = vperm.xlu1 %11531, %v3656_v62   ;;  %8753 = vmatmul.mubr.bf16.gmra.mrb[232].mxu1 %v12045_v24  ;;  %v12050_v62 = vld [vmem:[%s19721_s3 + $0x494] ss:$20 sps:$4 sm:$0xff]   ;;  %v3628_v24 = vld [vmem:[%s19724_s4 + $0x160] sm:$0xff] }
 0x640   :  { %8762 = vmatprep.mubr.bf16.mxu1 %v12046_v39  ;;  %v3598_v39 = vld [vmem:[%s19724_s4 + $0x70] sm:$0xff] }
 0x642   :  { %3885 = vperm.xlu0 %11532, %v3683_v7   ;;  %v3693_v7 = vadd.f32 %v16762_v18, %v3628_v24  ;;  %v3638_v24 = vld [vmem:[%s19724_s4 + $0x1b0] sm:$0xff] }
 0x643   :  { %3760 = vperm.xlu1 %11531, %v3658_v36   ;;  %v3663_v36 = vadd.f32 %v16762_v18, %v3598_v39  ;;  %v3603_v39 = vld [vmem:[%s19724_s4 + $0x98] sm:$0xff] }
 0x644   :  { %v3668_v15 = vadd.f32 %v16762_v18, %v3603_v39  ;;  %v3615_v39 = vld [vmem:[%s19724_s4 + $0xf8] sm:$0xff] }
 0x645   :  { %7704 = vmatmul.mubr.bf16.gmra.mrb[236].mxu0 %v12047_v5 }
 0x646   :  { %7713 = vmatprep.mubr.bf16.mxu0 %v12048_v38  ;;  %3895 = vperm.xlu0 %11532, %v3685_v29   ;;  %v20237_v29 = vld [vmem:[#allocation22_spill] sm:$0xff] }
 0x647   :  { %3765 = vperm.xlu1 %11531, %v3659_v4   ;;  %8763 = vmatmul.mubr.bf16.gmra.mrb[236].mxu1 %v12047_v5  ;;  %v12051_v4 = vld [vmem:[%s19721_s3 + $0x4bc] ss:$20 sps:$4 sm:$0xff]   ;;  %v3632_v5 = vld [vmem:[%s19724_s4 + $0x180] sm:$0xff] }
 0x648   :  { %8772 = vmatprep.mubr.bf16.mxu1 %v12048_v38  ;;  %v3600_v38 = vld [vmem:[%s19724_s4 + $0x80] sm:$0xff] }
 0x64a   :  { %3905 = vperm.xlu0 %11532, %v3687_v27   ;;  %v3697_v27 = vadd.f32 %v16762_v18, %v3632_v5  ;;  %v3607_v5 = vld [vmem:[%s19724_s4 + $0xb8] sm:$0xff] }
 0x64b   :  { %3770 = vperm.xlu1 %11531, %v3660_v2   ;;  %v3665_v2 = vadd.f32 %v16762_v18, %v3600_v38  ;;  %v12054_v38 = vld [vmem:[%s19721_s3 + $0x10] ss:$20 sps:$4 sm:$0xff]  }
 0x64d   :  { %7714 = vmatmul.mubr.bf16.gmra.mrb[240].mxu0 %v12049_v60 }
 0x64e   :  { %7723 = vmatprep.mubr.bf16.mxu0 %v12050_v62  ;;  %3915 = vperm.xlu0 %11532, %v3689_v16   ;;  %v12052_v16 = vld [vmem:[%s19721_s3 + $0x4b8] ss:$20 sps:$4 sm:$0xff]  }
 0x64f   :  { %3775 = vperm.xlu1 %11531, %v3661_v40   ;;  %8773 = vmatmul.mubr.bf16.gmra.mrb[240].mxu1 %v12049_v60  ;;  %v12053_v40 = vld [vmem:[%s19721_s3 + $0x4e4] ss:$20 sps:$4 sm:$0xff]  }
 0x650   :  { %8782 = vmatprep.mubr.bf16.mxu1 %v12050_v62  ;;  %v3636_v60 = vld [vmem:[%s19724_s4 + $0x1a0] sm:$0xff]  ;;  %v3602_v62 = vld [vmem:[%s19724_s4 + $0x90] sm:$0xff] }
 0x652   :  { %3925 = vperm.xlu0 %11532, %v3691_v3   ;;  %v3701_v3 = vadd.f32 %v16762_v18, %v3636_v60  ;;  %v12055_v60 = vld [vmem:[%s19721_s3 + $0x38] ss:$20 sps:$4 sm:$0xff]  }
 0x653   :  { %3780 = vperm.xlu1 %11531, %v3662_v41   ;;  %v3667_v41 = vadd.f32 %v16762_v18, %v3602_v62 }
 0x655   :  { %7724 = vmatmul.mubr.bf16.gmra.mrb[244].mxu0 %v20237_v29 }
 0x656   :  { %7733 = vmatprep.mubr.bf16.mxu0 %v12051_v4  ;;  %3935 = vperm.xlu0 %11532, %v3693_v7   ;;  %v20238_v7 = vld [vmem:[#allocation23_spill] sm:$0xff] }
 0x657   :  { %3785 = vperm.xlu1 %11531, %v3663_v36   ;;  %8783 = vmatmul.mubr.bf16.gmra.mrb[244].mxu1 %v20237_v29  ;;  %v3703_v36 = vadd.f32 %v16762_v18, %v3638_v24  ;;  %v3605_v29 = vld [vmem:[%s19724_s4 + $0xa8] sm:$0xff] }
 0x658   :  { %8792 = vmatprep.mubr.bf16.mxu1 %v12051_v4  ;;  %v3705_v4 = vadd.f32 %v16762_v18, %v3640_v9 }
 0x65a   :  { %3945 = vperm.xlu0 %11532, %v3695_v23   ;;  %v3670_v23 = vadd.f32 %v16762_v18, %v3605_v29  ;;  %v3619_v29 = vld [vmem:[%s19724_s4 + $0x118] sm:$0xff] }
 0x65b   :  { %3790 = vperm.xlu1 %11531, %v3664_v12   ;;  %v3642_v12 = vld [vmem:[%s19724_s4 + $0x1d0] sm:$0xff] }
 0x65d   :  { %7734 = vmatmul.mubr.bf16.gmra.mrb[248].mxu0 %v12052_v16 }
 0x65e   :  { %7743 = vmatprep.mubr.bf16.mxu0 %v12053_v40  ;;  %3955 = vperm.xlu0 %11532, %v3697_v27   ;;  %v3707_v27 = vadd.f32 %v16762_v18, %v3642_v12  ;;  %v3621_v12 = vld [vmem:[%s19724_s4 + $0x128] sm:$0xff] }
 0x65f   :  { %3795 = vperm.xlu1 %11531, %v3665_v2   ;;  %8793 = vmatmul.mubr.bf16.gmra.mrb[248].mxu1 %v12052_v16  ;;  %v3672_v2 = vadd.f32 %v16762_v18, %v3607_v5  ;;  %v3709_v16 = vadd.f32 %v16762_v18, %v3644_v51  ;;  %v3686_v5 = vadd.f32 %v16762_v18, %v3621_v12  ;;  %v3625_v51 = vld [vmem:[%s19724_s4 + $0x148] sm:$0xff] }
 0x660   :  { %8802 = vmatprep.mubr.bf16.mxu1 %v12053_v40  ;;  %v3674_v40 = vadd.f32 %v16762_v18, %v3609_v21  ;;  %v3690_v21 = vadd.f32 %v16762_v18, %v3625_v51 }
 0x662   :  { %3965 = vperm.xlu0 %11532, %v3699_v1   ;;  %v3646_v1 = vld [vmem:[%s19724_s4 + $0x1f0] sm:$0xff] }
 0x663   :  { %3800 = vperm.xlu1 %11531, %v3666_v48   ;;  %v3611_v48 = vld [vmem:[%s19724_s4 + $0xd8] sm:$0xff]  ;;  %v3711_v62 = vadd.f32 %v16762_v18, %v3646_v1 }
 0x665   :  { %7744 = vmatmul.mubr.bf16.gmra.mrb[252].mxu0 %v20238_v7 }
 0x666   :  { %7786 = vmatprep.mubr.bf16.mxu0 %v14632_v19  ;;  %3975 = vperm.xlu0 %11532, %v3701_v3   ;;  %v3676_v3 = vadd.f32 %v16762_v18, %v3611_v48  ;;  %v3629_v48 = vld [vmem:[%s19724_s4 + $0x168] sm:$0xff] }
 0x667   :  { %3805 = vperm.xlu1 %11531, %v3667_v41   ;;  %8803 = vmatmul.mubr.bf16.gmra.mrb[252].mxu1 %v20238_v7  ;;  %v3613_v41 = vld [vmem:[%s19724_s4 + $0xe8] sm:$0xff]  ;;  %v12056_v7 = vld [vmem:[%s19721_s3 + $0x60] ss:$20 sps:$4 sm:$0xff]  }
 0x668   :  { %8845 = vmatprep.mubr.bf16.mxu1 %v14632_v19  ;;  %v3678_v24 = vadd.f32 %v16762_v18, %v3613_v41 }
 0x66a   :  { %3985 = vperm.xlu0 %11532, %v3703_v36   ;;  %v3680_v36 = vadd.f32 %v16762_v18, %v3615_v39 }
 0x66b   :  { %3810 = vperm.xlu1 %11531, %v3668_v15   ;;  %v3617_v15 = vld [vmem:[%s19724_s4 + $0x108] sm:$0xff] }
 0x66c   :  { %v3682_v9 = vadd.f32 %v16762_v18, %v3617_v15 }
 0x66d   :  { %9916 = vmatmul.mubr.msk.bf16.vlgmr.msra.gmra.mrb[128].mxu0 %vm4833_vm12, %v12054_v38 }
 0x66e   :  { %7796 = vmatprep.mubr.bf16.mxu0 %v14632_v19  ;;  %3995 = vperm.xlu0 %11532, %v3705_v4   ;;  %v12057_v4 = vld [vmem:[%s19721_s3 + $0x88] ss:$20 sps:$4 sm:$0xff]  }
 0x66f   :  { %3820 = vperm.xlu1 %11531, %v3670_v23   ;;  %9948 = vmatmul.mubr.msk.bf16.vlgmr.msra.gmra.mrb[128].mxu1 %vm4833_vm12, %v12054_v38  ;;  %v3684_v23 = vadd.f32 %v16762_v18, %v3619_v29  ;;  %v3623_v38 = vld [vmem:[%s19724_s4 + $0x138] sm:$0xff] }
 0x670   :  { %8855 = vmatprep.mubr.bf16.mxu1 %v14632_v19 }
 0x672   :  { %4005 = vperm.xlu0 %11532, %v3707_v27   ;;  %v12058_v27 = vld [vmem:[%s19721_s3 + $0xb0] ss:$20 sps:$4 sm:$0xff]  }
 0x673   :  { %3830 = vperm.xlu1 %11531, %v3672_v2   ;;  %v3688_v2 = vadd.f32 %v16762_v18, %v3623_v38 }
 0x675   :  { %9917 = vmatmul.mubr.msk.bf16.gmra.mrb[132].mxu0 %vm4833_vm12, %v12055_v60 }
 0x676   :  { %7806 = vmatprep.mubr.bf16.mxu0 %v14632_v19  ;;  %4015 = vperm.xlu0 %11532, %v3709_v16   ;;  %v3627_v16 = vld [vmem:[%s19724_s4 + $0x158] sm:$0xff] }
 0x677   :  { %3840 = vperm.xlu1 %11531, %v3674_v40   ;;  %9949 = vmatmul.mubr.msk.bf16.gmra.mrb[132].mxu1 %vm4833_vm12, %v12055_v60  ;;  %v12059_v40 = vld [vmem:[%s19721_s3 + $0xd8] ss:$20 sps:$4 sm:$0xff]   ;;  %v3692_v1 = vadd.f32 %v16762_v18, %v3627_v16  ;;  %v3694_v60 = vadd.f32 %v16762_v18, %v3629_v48 }
 0x678   :  { %8865 = vmatprep.mubr.bf16.mxu1 %v14632_v19  ;;  %v20239_v48 = vld [vmem:[#allocation13_spill] sm:$0xff] }
 0x67a   :  { %4025 = vperm.xlu0 %11532, %v3711_v62   ;;  %v3631_v62 = vld [vmem:[%s19724_s4 + $0x178] sm:$0xff] }
 0x67b   :  { %3850 = vperm.xlu1 %11531, %v3676_v3   ;;  %v12060_v3 = vld [vmem:[%s19721_s3 + $0x100] ss:$20 sps:$4 sm:$0xff]   ;;  %v3696_v41 = vadd.f32 %v16762_v18, %v3631_v62 }
 0x67d   :  { %9918 = vmatmul.mubr.msk.bf16.gmra.mrb[136].mxu0 %vm4833_vm12, %v12056_v7 }
 0x67e   :  { %7816 = vmatprep.mubr.bf16.mxu0 %v14632_v19 }
 0x67f   :  { %3860 = vperm.xlu1 %11531, %v3678_v24   ;;  %9950 = vmatmul.mubr.msk.bf16.gmra.mrb[136].mxu1 %vm4833_vm12, %v12056_v7  ;;  %v3633_v24 = vld [vmem:[%s19724_s4 + $0x188] sm:$0xff] }
 0x680   :  { %8875 = vmatprep.mubr.bf16.mxu1 %v14632_v19 }
 0x683   :  { %3870 = vperm.xlu1 %11531, %v3680_v36   ;;  %v3698_v36 = vadd.f32 %v16762_v18, %v3633_v24 }
 0x685   :  { %9919 = vmatmul.mubr.msk.bf16.gmra.mrb[140].mxu0 %vm4833_vm12, %v12057_v4 }
 0x686   :  { %7826 = vmatprep.mubr.bf16.mxu0 %v14632_v19 }
 0x687   :  { %3880 = vperm.xlu1 %11531, %v3682_v9   ;;  %9951 = vmatmul.mubr.msk.bf16.gmra.mrb[140].mxu1 %vm4833_vm12, %v12057_v4 }
 0x688   :  { %8885 = vmatprep.mubr.bf16.mxu1 %v14632_v19 }
 0x68b   :  { %3890 = vperm.xlu1 %11531, %v3684_v23   ;;  %v3635_v23 = vld [vmem:[%s19724_s4 + $0x198] sm:$0xff] }
 0x68d   :  { %9920 = vmatmul.mubr.msk.bf16.gmra.mrb[144].mxu0 %vm4833_vm12, %v12058_v27 }
 0x68e   :  { %7836 = vmatprep.mubr.bf16.mxu0 %v14632_v19 }
 0x68f   :  { %3900 = vperm.xlu1 %11531, %v3686_v5   ;;  %9952 = vmatmul.mubr.msk.bf16.gmra.mrb[144].mxu1 %vm4833_vm12, %v12058_v27 }
 0x690   :  { %8895 = vmatprep.mubr.bf16.mxu1 %v14632_v19 }
 0x693   :  { %3910 = vperm.xlu1 %11531, %v3688_v2   ;;  %v3637_v2 = vld [vmem:[%s19724_s4 + $0x1a8] sm:$0xff] }
 0x695   :  { %9921 = vmatmul.mubr.msk.bf16.gmra.mrb[148].mxu0 %vm4833_vm12, %v12059_v40 }
 0x696   :  { %7846 = vmatprep.mubr.bf16.mxu0 %v14632_v19 }
 0x697   :  { %3920 = vperm.xlu1 %11531, %v3690_v21   ;;  %9953 = vmatmul.mubr.msk.bf16.gmra.mrb[148].mxu1 %vm4833_vm12, %v12059_v40  ;;  %v3639_v40 = vld [vmem:[%s19724_s4 + $0x1b8] sm:$0xff] }
 0x698   :  { %8905 = vmatprep.mubr.bf16.mxu1 %v14632_v19  ;;  %v3704_v62 = vadd.f32 %v16762_v18, %v3639_v40  ;;  %v3645_v40 = vld [vmem:[%s19724_s4 + $0x1e8] sm:$0xff] }
 0x69b   :  { %3930 = vperm.xlu1 %11531, %v3692_v1  }
 0x69d   :  { %9922 = vmatmul.mubr.msk.bf16.gmra.mrb[152].mxu0 %vm4833_vm12, %v12060_v3 }
 0x69e   :  { %7856 = vmatprep.mubr.bf16.mxu0 %v14632_v19 }
 0x69f   :  { %3940 = vperm.xlu1 %11531, %v3694_v60   ;;  %9954 = vmatmul.mubr.msk.bf16.gmra.mrb[152].mxu1 %vm4833_vm12, %v12060_v3  ;;  %v20240_v60 = vld [vmem:[#allocation21_spill] sm:$0xff] }
 0x6a0   :  { %8915 = vmatprep.mubr.bf16.mxu1 %v14632_v19 }
 0x6a1   :  { %v17085_v39 = vpop.permute.xlu0 %3755  ;;  %v17087_v7 = vpop.permute.xlu1 %3715 }
 0x6a2   :  { %v9996_v15 = vadd.f32 %v15579_v30, %v17085_v39  ;;  %v9997_v9 = vadd.f32 %v15583_v46, %v17085_v39  ;;  %v10124_v29 = vadd.f32 %v15598_v26, %v17085_v39  ;;  %v10125_v4 = vadd.f32 %v15602_v33, %v17085_v39  ;;  %v12061_v33 = vld [vmem:[%s19721_s3 + $0x128] ss:$20 sps:$4 sm:$0xff]  }
 0x6a3   :  { %3950 = vperm.xlu1 %11531, %v3696_v41   ;;  %v9980_v12 = vadd.f32 %v15427_v49, %v17087_v7  ;;  %v9981_v30 = vadd.f32 %v15431_v52, %v17087_v7  ;;  %v10108_v46 = vadd.f32 %v15446_v28, %v17087_v7  ;;  %v10109_v26 = vadd.f32 %v15450_v44, %v17087_v7 }
 0x6a4   :  { %9230 = vst [vmem:[%s19725_s6 + $0x200] sm:$0xff] %v9996_v15  ;;  %9231 = vst [vmem:[%s19725_s6 + $0x208] sm:$0xff] %v9997_v9  ;;  %v3700_v28 = vadd.f32 %v16762_v18, %v3635_v23  ;;  %v3641_v15 = vld [vmem:[%s19724_s4 + $0x1c8] sm:$0xff]  ;;  %v20241_v9 = vld [vmem:[#allocation12_spill] sm:$0xff] }
 0x6a5   :  { %9923 = vmatmul.mubr.msk.bf16.gmra.mrb[156].mxu0 %vm4833_vm12, %v12061_v33  ;;  %9232 = vst [vmem:[%s19725_s6 + $0x210] sm:$0xff] %v10124_v29  ;;  %9233 = vst [vmem:[%s19725_s6 + $0x218] sm:$0xff] %v10125_v4  ;;  %v17138_v49 = vpop.permute.xlu0 %3815  ;;  %v20242_v4 = vld [vmem:[#allocation18_spill] sm:$0xff]  ;;  %v20243_v23 = vld [vmem:[#allocation29_spill] sm:$0xff] }
 0x6a6   :  { %7866 = vmatprep.mubr.bf16.mxu0 %v14632_v19  ;;  %9166 = vst [vmem:[%s19725_s6] sm:$0xff] %v9980_v12  ;;  %9167 = vst [vmem:[%s19725_s6 + $0x8] sm:$0xff] %v9981_v30  ;;  %v17140_v52 = vpop.permute.xlu1 %3720  ;;  %v10020_v44 = vadd.f32 %v15833_v34, %v17138_v49  ;;  %v10021_v5 = vadd.f32 %v15843_v8, %v17138_v49  ;;  %v10148_v38 = vadd.f32 %v15856_v25, %v17138_v49  ;;  %v20244_v12 = vld [vmem:[#allocation33_spill] sm:$0xff] }
 0x6a7   :  { %9168 = vst [vmem:[%s19725_s6 + $0x10] sm:$0xff] %v10108_v46  ;;  %9169 = vst [vmem:[%s19725_s6 + $0x18] sm:$0xff] %v10109_v26  ;;  %v10149_v27 = vadd.f32 %v15869_v20, %v17138_v49  ;;  %3960 = vperm.xlu1 %11531, %v3698_v36   ;;  %v9982_v51 = vadd.f32 %v15438_v55, %v17140_v52  ;;  %v9983_v34 = vadd.f32 %v15448_v10, %v17140_v52 }
 0x6a8   :  { %v10110_v8 = vadd.f32 %v15454_v0, %v17140_v52  ;;  %v10111_v25 = vadd.f32 %v15457_v17, %v17140_v52  ;;  %9955 = vmatmul.mubr.msk.bf16.gmra.mrb[156].mxu1 %vm4833_vm12, %v12061_v33  ;;  %9326 = vst [vmem:[%s19725_s6 + $0x500] sm:$0xff] %v10020_v44  ;;  %9327 = vst [vmem:[%s19725_s6 + $0x508] sm:$0xff] %v10021_v5  ;;  %v3702_v0 = vadd.f32 %v16762_v18, %v3637_v2  ;;  %v3643_v5 = vld [vmem:[%s19724_s4 + $0x1d8] sm:$0xff] }
 0x6a9   :  { %9328 = vst [vmem:[%s19725_s6 + $0x510] sm:$0xff] %v10148_v38  ;;  %9329 = vst [vmem:[%s19725_s6 + $0x518] sm:$0xff] %v10149_v27  ;;  %8925 = vmatprep.mubr.bf16.mxu1 %v14632_v19  ;;  %v17188_v55 = vpop.permute.xlu0 %3825  ;;  %v3706_v46 = vadd.f32 %v16762_v18, %v3641_v15  ;;  %v20245_v38 = vld [vmem:[#allocation14_spill] sm:$0xff]  ;;  %v20246_v2 = vld [vmem:[#allocation15_spill] sm:$0xff] }
 0x6aa   :  { %9174 = vst [vmem:[%s19725_s6 + $0x40] sm:$0xff] %v9982_v51  ;;  %9175 = vst [vmem:[%s19725_s6 + $0x48] sm:$0xff] %v9983_v34  ;;  %v17190_v10 = vpop.permute.xlu1 %3725  ;;  %v10024_v17 = vadd.f32 %v15927_v47, %v17188_v55  ;;  %v10025_v20 = vadd.f32 %v15929_v61, %v17188_v55  ;;  %v10152_v21 = vadd.f32 %v15939_v35, %v17188_v55  ;;  %v20247_v51 = vld [vmem:[#allocation25_spill] sm:$0xff]  ;;  %v20248_v34 = vld [vmem:[#allocation24_spill] sm:$0xff] }
 0x6ab   :  { %9176 = vst [vmem:[%s19725_s6 + $0x50] sm:$0xff] %v10110_v8  ;;  %9177 = vst [vmem:[%s19725_s6 + $0x58] sm:$0xff] %v10111_v25  ;;  %v10153_v16 = vadd.f32 %v15953_v63, %v17188_v55  ;;  %3970 = vperm.xlu1 %11531, %v3700_v28   ;;  %v9984_v1 = vadd.f32 %v15463_v37, %v17190_v10  ;;  %v9985_v47 = vadd.f32 %v15467_v53, %v17190_v10  ;;  %v12062_v63 = vld [vmem:[%s19721_s3 + $0x150] ss:$20 sps:$4 sm:$0xff]   ;;  %v20253_v15 = vld [vmem:[#allocation31_spill] sm:$0xff] }
 0x6ac   :  { %v10112_v61 = vadd.f32 %v20239_v48, %v17190_v10  ;;  %v10113_v35 = vadd.f32 %v20240_v60, %v17190_v10  ;;  %9342 = vst [vmem:[%s19725_s6 + $0x580] sm:$0xff] %v10024_v17  ;;  %9343 = vst [vmem:[%s19725_s6 + $0x588] sm:$0xff] %v10025_v20  ;;  %v20250_v48 = vld [vmem:[#allocation20_spill] sm:$0xff]  ;;  %v20252_v60 = vld [vmem:[#allocation27_spill] sm:$0xff] }
 0x6ad   :  { %9924 = vmatmul.mubr.msk.bf16.gmra.mrb[160].mxu0 %vm4833_vm12, %v12062_v63  ;;  %9344 = vst [vmem:[%s19725_s6 + $0x590] sm:$0xff] %v10152_v21  ;;  %9345 = vst [vmem:[%s19725_s6 + $0x598] sm:$0xff] %v10153_v16  ;;  %v17241_v37 = vpop.permute.xlu0 %3835 }
 0x6ae   :  { %7876 = vmatprep.mubr.bf16.mxu0 %v14632_v19  ;;  %9182 = vst [vmem:[%s19725_s6 + $0x80] sm:$0xff] %v9984_v1  ;;  %9183 = vst [vmem:[%s19725_s6 + $0x88] sm:$0xff] %v9985_v47  ;;  %v17243_v53 = vpop.permute.xlu1 %3730  ;;  %v10028_v3 = vadd.f32 %v15996_v54, %v17241_v37  ;;  %v10029_v41 = vadd.f32 %v16001_v45, %v17241_v37  ;;  %v10156_v24 = vadd.f32 %v16008_v59, %v17241_v37  ;;  %v20249_v1 = vld [vmem:[#allocation16_spill] sm:$0xff] }
 0x6af   :  { %9184 = vst [vmem:[%s19725_s6 + $0x90] sm:$0xff] %v10112_v61  ;;  %9185 = vst [vmem:[%s19725_s6 + $0x98] sm:$0xff] %v10113_v35  ;;  %v10157_v36 = vadd.f32 %v16020_v42, %v17241_v37  ;;  %3980 = vperm.xlu1 %11531, %v3702_v0   ;;  %v9986_v29 = vadd.f32 %v20241_v9, %v17243_v53  ;;  %v9987_v54 = vadd.f32 %v20242_v4, %v17243_v53  ;;  %v20251_v61 = vld [vmem:[#allocation17_spill] sm:$0xff]  ;;  %v20255_v4 = vld [vmem:[#allocation6_spill] sm:$0xff] }
 0x6b0   :  { %v10114_v45 = vadd.f32 %v20243_v23, %v17243_v53  ;;  %v10115_v59 = vadd.f32 %v20244_v12, %v17243_v53  ;;  %9956 = vmatmul.mubr.msk.bf16.gmra.mrb[160].mxu1 %vm4833_vm12, %v12062_v63  ;;  %9358 = vst [vmem:[%s19725_s6 + $0x600] sm:$0xff] %v10028_v3  ;;  %9359 = vst [vmem:[%s19725_s6 + $0x608] sm:$0xff] %v10029_v41  ;;  %v3708_v0 = vadd.f32 %v16762_v18, %v3643_v5  ;;  %v20260_v5 = vld [vmem:[#allocation116_spill] sm:$0xff] }
 0x6b1   :  { %9360 = vst [vmem:[%s19725_s6 + $0x610] sm:$0xff] %v10156_v24  ;;  %9361 = vst [vmem:[%s19725_s6 + $0x618] sm:$0xff] %v10157_v36  ;;  %8935 = vmatprep.mubr.bf16.mxu1 %v14632_v19  ;;  %v17291_v42 = vpop.permute.xlu0 %3845  ;;  %v3710_v63 = vadd.f32 %v16762_v18, %v3645_v40  ;;  %v3647_v36 = vld [vmem:[%s19724_s4 + $0x1f8] sm:$0xff]  ;;  %v20267_v40 = vld [vmem:[#allocation122_spill] sm:$0xff] }
 0x6b2   :  { %9190 = vst [vmem:[%s19725_s6 + $0xc0] sm:$0xff] %v9986_v29  ;;  %9191 = vst [vmem:[%s19725_s6 + $0xc8] sm:$0xff] %v9987_v54  ;;  %v17293_v30 = vpop.permute.xlu1 %3735  ;;  %v10032_v26 = vadd.f32 %v16063_v57, %v17291_v42  ;;  %v10033_v33 = vadd.f32 %v16068_v6, %v17291_v42  ;;  %v10160_v28 = vadd.f32 %v16078_v43, %v17291_v42  ;;  %v20254_v29 = vld [vmem:[#allocation7_spill] sm:$0xff] }
 0x6b3   :  { %9192 = vst [vmem:[%s19725_s6 + $0xd0] sm:$0xff] %v10114_v45  ;;  %9193 = vst [vmem:[%s19725_s6 + $0xd8] sm:$0xff] %v10115_v59  ;;  %v10161_v44 = vadd.f32 %v16092_v14, %v17291_v42  ;;  %3990 = vperm.xlu1 %11531, %v3704_v62   ;;  %v9988_v27 = vadd.f32 %v20245_v38, %v17293_v30  ;;  %v9989_v57 = vadd.f32 %v20246_v2, %v17293_v30  ;;  %v12063_v14 = vld [vmem:[%s19721_s3 + $0x178] ss:$20 sps:$4 sm:$0xff]   ;;  %v20257_v59 = vld [vmem:[#allocation112_spill] sm:$0xff] }
 0x6b4   :  { %v10116_v6 = vadd.f32 %v20247_v51, %v17293_v30  ;;  %v10117_v43 = vadd.f32 %v20248_v34, %v17293_v30  ;;  %9374 = vst [vmem:[%s19725_s6 + $0x680] sm:$0xff] %v10032_v26  ;;  %9375 = vst [vmem:[%s19725_s6 + $0x688] sm:$0xff] %v10033_v33  ;;  %v20256_v54 = vld [vmem:[#allocation11_spill] sm:$0xff]  ;;  %v3712_v12 = vadd.f32 %v16762_v18, %v3647_v36  ;;  %v20258_v26 = vld [vmem:[#allocation113_spill] sm:$0xff] }
 0x6b5   :  { %9925 = vmatmul.mubr.msk.bf16.gmra.mrb[164].mxu0 %vm4833_vm12, %v12063_v14  ;;  %9376 = vst [vmem:[%s19725_s6 + $0x690] sm:$0xff] %v10160_v28  ;;  %9377 = vst [vmem:[%s19725_s6 + $0x698] sm:$0xff] %v10161_v44  ;;  %v17344_v8 = vpop.permute.xlu0 %3855  ;;  %v20259_v28 = vld [vmem:[#allocation114_spill] sm:$0xff]  ;;  %v20264_v34 = vld [vmem:[#allocation32_spill] sm:$0xff] }
 0x6b6   :  { %7886 = vmatprep.mubr.bf16.mxu0 %v14632_v19  ;;  %9198 = vst [vmem:[%s19725_s6 + $0x100] sm:$0xff] %v9988_v27  ;;  %9199 = vst [vmem:[%s19725_s6 + $0x108] sm:$0xff] %v9989_v57  ;;  %v17346_v25 = vpop.permute.xlu1 %3740  ;;  %v10036_v17 = vadd.f32 %v16112_v11, %v17344_v8  ;;  %v10037_v20 = vadd.f32 %v16114_v32, %v17344_v8  ;;  %v10164_v21 = vadd.f32 %v16121_v58, %v17344_v8  ;;  %v20261_v27 = vld [vmem:[#allocation9_spill] sm:$0xff]  ;;  %v20262_v57 = vld [vmem:[#allocation8_spill] sm:$0xff] }
 0x6b7   :  { %9200 = vst [vmem:[%s19725_s6 + $0x110] sm:$0xff] %v10116_v6  ;;  %9201 = vst [vmem:[%s19725_s6 + $0x118] sm:$0xff] %v10117_v43  ;;  %v10165_v16 = vadd.f32 %v16125_v13, %v17344_v8  ;;  %4000 = vperm.xlu1 %11531, %v3706_v46   ;;  %v9990_v47 = vadd.f32 %v20249_v1, %v17346_v25  ;;  %v9991_v11 = vadd.f32 %v20250_v48, %v17346_v25  ;;  %v20263_v18 = vld [vmem:[#allocation26_spill] sm:$0xff] }
 0x6b8   :  { %v10118_v32 = vadd.f32 %v20251_v61, %v17346_v25  ;;  %v10119_v58 = vadd.f32 %v20252_v60, %v17346_v25  ;;  %9957 = vmatmul.mubr.msk.bf16.gmra.mrb[164].mxu1 %vm4833_vm12, %v12063_v14  ;;  %9390 = vst [vmem:[%s19725_s6 + $0x700] sm:$0xff] %v10036_v17  ;;  %9391 = vst [vmem:[%s19725_s6 + $0x708] sm:$0xff] %v10037_v20  ;;  %v20265_v17 = vld [vmem:[#allocation120_spill] sm:$0xff] }
 0x6b9   :  { %9392 = vst [vmem:[%s19725_s6 + $0x710] sm:$0xff] %v10164_v21  ;;  %9393 = vst [vmem:[%s19725_s6 + $0x718] sm:$0xff] %v10165_v16  ;;  %8945 = vmatprep.mubr.bf16.mxu1 %v14632_v19  ;;  %v17394_v13 = vpop.permute.xlu0 %3865  ;;  %v20266_v21 = vld [vmem:[#allocation121_spill] sm:$0xff] }
 0x6ba   :  { %9206 = vst [vmem:[%s19725_s6 + $0x140] sm:$0xff] %v9990_v47  ;;  %9207 = vst [vmem:[%s19725_s6 + $0x148] sm:$0xff] %v9991_v11  ;;  %v17396_v35 = vpop.permute.xlu1 %3745  ;;  %v10040_v62 = vadd.f32 %v16143_v56, %v17394_v13  ;;  %v10041_v3 = vadd.f32 %v16145_v31, %v17394_v13  ;;  %v10168_v41 = vadd.f32 %v16151_v22, %v17394_v13  ;;  %v20268_v47 = vld [vmem:[#allocation124_spill] sm:$0xff]  ;;  %v20269_v11 = vld [vmem:[#allocation35_spill] sm:$0xff] }
 0x6bb   :  { %9208 = vst [vmem:[%s19725_s6 + $0x150] sm:$0xff] %v10118_v32  ;;  %9209 = vst [vmem:[%s19725_s6 + $0x158] sm:$0xff] %v10119_v58  ;;  %v10169_v24 = vadd.f32 %v16155_v50, %v17394_v13  ;;  %4010 = vperm.xlu1 %11531, %v3708_v0   ;;  %v9992_v9 = vadd.f32 %v20253_v15, %v17396_v35  ;;  %v9993_v56 = vadd.f32 %v20254_v29, %v17396_v35  ;;  %v12064_v50 = vld [vmem:[%s19721_s3 + $0x1a0] ss:$20 sps:$4 sm:$0xff]   ;;  %v20270_v32 = vld [vmem:[#allocation37_spill] sm:$0xff] }
 0x6bc   :  { %v10120_v31 = vadd.f32 %v20255_v4, %v17396_v35  ;;  %v10121_v22 = vadd.f32 %v20256_v54, %v17396_v35  ;;  %9406 = vst [vmem:[%s19725_s6 + $0x780] sm:$0xff] %v10040_v62  ;;  %9407 = vst [vmem:[%s19725_s6 + $0x788] sm:$0xff] %v10041_v3  ;;  %v20271_v58 = vld [vmem:[#allocation39_spill] sm:$0xff]  ;;  %v20272_v62 = vld [vmem:[#allocation41_spill] sm:$0xff] }
 0x6bd   :  { %9926 = vmatmul.mubr.msk.bf16.gmra.mrb[168].mxu0 %vm4833_vm12, %v12064_v50  ;;  %9408 = vst [vmem:[%s19725_s6 + $0x790] sm:$0xff] %v10168_v41  ;;  %9409 = vst [vmem:[%s19725_s6 + $0x798] sm:$0xff] %v10169_v24  ;;  %v17447_v23 = vpop.permute.xlu0 %3875  ;;  %v12065_v41 = vld [vmem:[%s19721_s3 + $0x1c8] ss:$20 sps:$4 sm:$0xff]   ;;  %v20273_v15 = vld [vmem:[#allocation128_spill] sm:$0xff] }
 0x6be   :  { %7896 = vmatprep.mubr.bf16.mxu0 %v14632_v19  ;;  %9214 = vst [vmem:[%s19725_s6 + $0x180] sm:$0xff] %v9992_v9  ;;  %9215 = vst [vmem:[%s19725_s6 + $0x188] sm:$0xff] %v9993_v56  ;;  %v17449_v45 = vpop.permute.xlu1 %3750  ;;  %v10044_v46 = vadd.f32 %v20257_v59, %v17447_v23  ;;  %v10045_v33 = vadd.f32 %v20258_v26, %v17447_v23  ;;  %v10172_v44 = vadd.f32 %v20259_v28, %v17447_v23  ;;  %v20274_v29 = vld [vmem:[#allocation129_spill] sm:$0xff]  ;;  %v20275_v4 = vld [vmem:[#allocation130_spill] sm:$0xff] }
 0x6bf   :  { %9216 = vst [vmem:[%s19725_s6 + $0x190] sm:$0xff] %v10120_v31  ;;  %9217 = vst [vmem:[%s19725_s6 + $0x198] sm:$0xff] %v10121_v22  ;;  %v10173_v38 = vadd.f32 %v20260_v5, %v17447_v23  ;;  %4020 = vperm.xlu1 %11531, %v3710_v63   ;;  %v9994_v2 = vadd.f32 %v20261_v27, %v17449_v45  ;;  %v9995_v51 = vadd.f32 %v20262_v57, %v17449_v45  ;;  %v20276_v54 = vld [vmem:[#allocation132_spill] sm:$0xff]  ;;  %v20278_v59 = vld [vmem:[#allocation45_spill] sm:$0xff] }
 0x6c0   :  { %v10122_v6 = vadd.f32 %v20263_v18, %v17449_v45  ;;  %v10123_v43 = vadd.f32 %v20264_v34, %v17449_v45  ;;  %9958 = vmatmul.mubr.msk.bf16.gmra.mrb[168].mxu1 %vm4833_vm12, %v12064_v50  ;;  %9422 = vst [vmem:[%s19725_s6 + $0x800] sm:$0xff] %v10044_v46  ;;  %9423 = vst [vmem:[%s19725_s6 + $0x808] sm:$0xff] %v10045_v33  ;;  %v20277_v50 = vld [vmem:[#allocation43_spill] sm:$0xff]  ;;  %v20279_v26 = vld [vmem:[#allocation49_spill] sm:$0xff] }
 0x6c1   :  { %9424 = vst [vmem:[%s19725_s6 + $0x810] sm:$0xff] %v10172_v44  ;;  %9425 = vst [vmem:[%s19725_s6 + $0x818] sm:$0xff] %v10173_v38  ;;  %8955 = vmatprep.mubr.bf16.mxu1 %v14632_v19  ;;  %v17494_v14 = vpop.permute.xlu0 %3885  ;;  %v20280_v28 = vld [vmem:[#allocation58_spill] sm:$0xff]  ;;  %v20281_v27 = vld [vmem:[#allocation136_spill] sm:$0xff] }
 0x6c2   :  { %9222 = vst [vmem:[%s19725_s6 + $0x1c0] sm:$0xff] %v9994_v2  ;;  %9223 = vst [vmem:[%s19725_s6 + $0x1c8] sm:$0xff] %v9995_v51  ;;  %v17496_v0 = vpop.permute.xlu1 %3760  ;;  %v10048_v20 = vadd.f32 %v20265_v17, %v17494_v14  ;;  %v10049_v16 = vadd.f32 %v20266_v21, %v17494_v14  ;;  %v10176_v1 = vadd.f32 %v20267_v40, %v17494_v14  ;;  %v20282_v57 = vld [vmem:[#allocation137_spill] sm:$0xff]  ;;  %v20283_v18 = vld [vmem:[#allocation138_spill] sm:$0xff] }
 0x6c3   :  { %9224 = vst [vmem:[%s19725_s6 + $0x1d0] sm:$0xff] %v10122_v6  ;;  %9225 = vst [vmem:[%s19725_s6 + $0x1d8] sm:$0xff] %v10123_v43  ;;  %v10177_v48 = vadd.f32 %v20268_v47, %v17494_v14  ;;  %4030 = vperm.xlu1 %11531, %v3712_v12   ;;  %v9998_v61 = vadd.f32 %v20269_v11, %v17496_v0  ;;  %v9999_v60 = vadd.f32 %v20270_v32, %v17496_v0  ;;  %v20284_v34 = vld [vmem:[#allocation140_spill] sm:$0xff]  ;;  %v20285_v17 = vld [vmem:[#allocation47_spill] sm:$0xff] }
 0x6c4   :  { %v10126_v63 = vadd.f32 %v20271_v58, %v17496_v0  ;;  %v10127_v3 = vadd.f32 %v20272_v62, %v17496_v0  ;;  %9438 = vst [vmem:[%s19725_s6 + $0x880] sm:$0xff] %v10048_v20  ;;  %9439 = vst [vmem:[%s19725_s6 + $0x888] sm:$0xff] %v10049_v16  ;;  %v20286_v21 = vld [vmem:[#allocation57_spill] sm:$0xff]  ;;  %v20287_v40 = vld [vmem:[#allocation59_spill] sm:$0xff] }
 0x6c5   :  { %9927 = vmatmul.mubr.msk.bf16.gmra.mrb[172].mxu0 %vm4833_vm12, %v12065_v41  ;;  %9440 = vst [vmem:[%s19725_s6 + $0x890] sm:$0xff] %v10176_v1  ;;  %9441 = vst [vmem:[%s19725_s6 + $0x898] sm:$0xff] %v10177_v48  ;;  %v17543_v24 = vpop.permute.xlu0 %3895  ;;  %v20288_v47 = vld [vmem:[#allocation60_spill] sm:$0xff] }
 0x6c6   :  { %7906 = vmatprep.mubr.bf16.mxu0 %v14632_v19  ;;  %9238 = vst [vmem:[%s19725_s6 + $0x240] sm:$0xff] %v9998_v61  ;;  %9239 = vst [vmem:[%s19725_s6 + $0x248] sm:$0xff] %v9999_v60  ;;  %v17545_v36 = vpop.permute.xlu1 %3765  ;;  %v10052_v9 = vadd.f32 %v20273_v15, %v17543_v24  ;;  %v10053_v56 = vadd.f32 %v20274_v29, %v17543_v24  ;;  %v10180_v31 = vadd.f32 %v20275_v4, %v17543_v24  ;;  %v12066_v11 = vld [vmem:[%s19721_s3 + $0x1f0] ss:$20 sps:$4 sm:$0xff]   ;;  %v20292_v15 = vld [vmem:[#allocation147_spill] sm:$0xff] }
 0x6c7   :  { %9240 = vst [vmem:[%s19725_s6 + $0x250] sm:$0xff] %v10126_v63  ;;  %9241 = vst [vmem:[%s19725_s6 + $0x258] sm:$0xff] %v10127_v3  ;;  %v10181_v22 = vadd.f32 %v20276_v54, %v17543_v24  ;;  %v10000_v12 = vadd.f32 %v20277_v50, %v17545_v36  ;;  %v10001_v46 = vadd.f32 %v20278_v59, %v17545_v36  ;;  %v20289_v60 = vld [vmem:[#allocation30_spill] sm:$0xff]  ;;  %v20290_v63 = vld [vmem:[#allocation144_spill] sm:$0xff] }
 0x6c8   :  { %v10128_v33 = vadd.f32 %v20279_v26, %v17545_v36  ;;  %v10129_v44 = vadd.f32 %v20280_v28, %v17545_v36  ;;  %9959 = vmatmul.mubr.msk.bf16.gmra.mrb[172].mxu1 %vm4833_vm12, %v12065_v41  ;;  %9454 = vst [vmem:[%s19725_s6 + $0x900] sm:$0xff] %v10052_v9  ;;  %9455 = vst [vmem:[%s19725_s6 + $0x908] sm:$0xff] %v10053_v56  ;;  %v20291_v3 = vld [vmem:[#allocation145_spill] sm:$0xff]  ;;  %v20294_v4 = vld [vmem:[#allocation62_spill] sm:$0xff] }
 0x6c9   :  { %9456 = vst [vmem:[%s19725_s6 + $0x910] sm:$0xff] %v10180_v31  ;;  %9457 = vst [vmem:[%s19725_s6 + $0x918] sm:$0xff] %v10181_v22  ;;  %8965 = vmatprep.mubr.bf16.mxu1 %v14632_v19  ;;  %v17589_v5 = vpop.permute.xlu0 %3905  ;;  %v20293_v29 = vld [vmem:[#allocation61_spill] sm:$0xff]  ;;  %v20295_v54 = vld [vmem:[#allocation63_spill] sm:$0xff] }
 0x6ca   :  { %9246 = vst [vmem:[%s19725_s6 + $0x280] sm:$0xff] %v10000_v12  ;;  %9247 = vst [vmem:[%s19725_s6 + $0x288] sm:$0xff] %v10001_v46  ;;  %v17591_v38 = vpop.permute.xlu1 %3770  ;;  %v10056_v2 = vadd.f32 %v20281_v27, %v17589_v5  ;;  %v10057_v51 = vadd.f32 %v20282_v57, %v17589_v5  ;;  %v10184_v6 = vadd.f32 %v20283_v18, %v17589_v5  ;;  %v20296_v50 = vld [vmem:[#allocation65_spill] sm:$0xff]  ;;  %v20297_v26 = vld [vmem:[#allocation28_spill] sm:$0xff] }
 0x6cb   :  { %9248 = vst [vmem:[%s19725_s6 + $0x290] sm:$0xff] %v10128_v33  ;;  %9249 = vst [vmem:[%s19725_s6 + $0x298] sm:$0xff] %v10129_v44  ;;  %v10185_v43 = vadd.f32 %v20284_v34, %v17589_v5  ;;  %v10002_v20 = vadd.f32 %v20285_v17, %v17591_v38  ;;  %v10003_v16 = vadd.f32 %v20286_v21, %v17591_v38  ;;  %v20298_v28 = vld [vmem:[#allocation151_spill] sm:$0xff]  ;;  %v20299_v27 = vld [vmem:[#allocation152_spill] sm:$0xff] }
 0x6cc   :  { %v10130_v1 = vadd.f32 %v20287_v40, %v17591_v38  ;;  %v10131_v48 = vadd.f32 %v20288_v47, %v17591_v38  ;;  %9470 = vst [vmem:[%s19725_s6 + $0x980] sm:$0xff] %v10056_v2  ;;  %9471 = vst [vmem:[%s19725_s6 + $0x988] sm:$0xff] %v10057_v51  ;;  %v20300_v57 = vld [vmem:[#allocation154_spill] sm:$0xff]  ;;  %v20301_v18 = vld [vmem:[#allocation51_spill] sm:$0xff] }
 0x6cd   :  { %9928 = vmatmul.mubr.msk.bf16.gmra.mrb[176].mxu0 %vm4833_vm12, %v12066_v11  ;;  %9472 = vst [vmem:[%s19725_s6 + $0x990] sm:$0xff] %v10184_v6  ;;  %9473 = vst [vmem:[%s19725_s6 + $0x998] sm:$0xff] %v10185_v43  ;;  %v17638_v61 = vpop.permute.xlu0 %3915  ;;  %v20302_v34 = vld [vmem:[#allocation64_spill] sm:$0xff]  ;;  %v20303_v17 = vld [vmem:[#allocation66_spill] sm:$0xff] }
 0x6ce   :  { %7916 = vmatprep.mubr.bf16.mxu0 %v14632_v19  ;;  %9254 = vst [vmem:[%s19725_s6 + $0x2c0] sm:$0xff] %v10002_v20  ;;  %9255 = vst [vmem:[%s19725_s6 + $0x2c8] sm:$0xff] %v10003_v16  ;;  %v17640_v32 = vpop.permute.xlu1 %3775  ;;  %v10060_v58 = vadd.f32 %v20289_v60, %v17638_v61  ;;  %v10061_v62 = vadd.f32 %v20290_v63, %v17638_v61  ;;  %v10188_v41 = vadd.f32 %v20291_v3, %v17638_v61  ;;  %v20304_v21 = vld [vmem:[#allocation67_spill] sm:$0xff]  ;;  %v20306_v60 = vld [vmem:[#allocation158_spill] sm:$0xff] }
 0x6cf   :  { %9256 = vst [vmem:[%s19725_s6 + $0x2d0] sm:$0xff] %v10130_v1  ;;  %9257 = vst [vmem:[%s19725_s6 + $0x2d8] sm:$0xff] %v10131_v48  ;;  %v10189_v9 = vadd.f32 %v20292_v15, %v17638_v61  ;;  %v10004_v56 = vadd.f32 %v20293_v29, %v17640_v32  ;;  %v10005_v31 = vadd.f32 %v20294_v4, %v17640_v32  ;;  %v12067_v40 = vld [vmem:[%s19721_s3 + $0x218] ss:$20 sps:$4 sm:$0xff]   ;;  %v20305_v48 = vld [vmem:[#allocation34_spill] sm:$0xff] }
 0x6d0   :  { %v10132_v22 = vadd.f32 %v20295_v54, %v17640_v32  ;;  %v10133_v12 = vadd.f32 %v20296_v50, %v17640_v32  ;;  %9960 = vmatmul.mubr.msk.bf16.gmra.mrb[176].mxu1 %vm4833_vm12, %v12066_v11  ;;  %9486 = vst [vmem:[%s19725_s6 + $0xa00] sm:$0xff] %v10060_v58  ;;  %9487 = vst [vmem:[%s19725_s6 + $0xa08] sm:$0xff] %v10061_v62  ;;  %v20307_v63 = vld [vmem:[#allocation159_spill] sm:$0xff]  ;;  %v20308_v3 = vld [vmem:[#allocation161_spill] sm:$0xff] }
 0x6d1   :  { %9488 = vst [vmem:[%s19725_s6 + $0xa10] sm:$0xff] %v10188_v41  ;;  %9489 = vst [vmem:[%s19725_s6 + $0xa18] sm:$0xff] %v10189_v9  ;;  %8975 = vmatprep.mubr.bf16.mxu1 %v14632_v19  ;;  %v17684_v59 = vpop.permute.xlu0 %3925  ;;  %v20309_v15 = vld [vmem:[#allocation68_spill] sm:$0xff]  ;;  %v20310_v29 = vld [vmem:[#allocation53_spill] sm:$0xff] }
 0x6d2   :  { %9262 = vst [vmem:[%s19725_s6 + $0x300] sm:$0xff] %v10004_v56  ;;  %9263 = vst [vmem:[%s19725_s6 + $0x308] sm:$0xff] %v10005_v31  ;;  %v17686_v46 = vpop.permute.xlu1 %3780  ;;  %v10064_v33 = vadd.f32 %v20297_v26, %v17684_v59  ;;  %v10065_v44 = vadd.f32 %v20298_v28, %v17684_v59  ;;  %v10192_v2 = vadd.f32 %v20299_v27, %v17684_v59  ;;  %v20311_v4 = vld [vmem:[#allocation69_spill] sm:$0xff]  ;;  %v20312_v54 = vld [vmem:[#allocation71_spill] sm:$0xff] }
 0x6d3   :  { %9264 = vst [vmem:[%s19725_s6 + $0x310] sm:$0xff] %v10132_v22  ;;  %9265 = vst [vmem:[%s19725_s6 + $0x318] sm:$0xff] %v10133_v12  ;;  %v10193_v51 = vadd.f32 %v20300_v57, %v17684_v59  ;;  %v10006_v6 = vadd.f32 %v20301_v18, %v17686_v46  ;;  %v10007_v43 = vadd.f32 %v20302_v34, %v17686_v46  ;;  %v20313_v26 = vld [vmem:[#allocation36_spill] sm:$0xff]  ;;  %v20314_v28 = vld [vmem:[#allocation165_spill] sm:$0xff] }
 0x6d4   :  { %v10134_v20 = vadd.f32 %v20303_v17, %v17686_v46  ;;  %v10135_v16 = vadd.f32 %v20304_v21, %v17686_v46  ;;  %9502 = vst [vmem:[%s19725_s6 + $0xa80] sm:$0xff] %v10064_v33  ;;  %9503 = vst [vmem:[%s19725_s6 + $0xa88] sm:$0xff] %v10065_v44  ;;  %v20315_v27 = vld [vmem:[#allocation166_spill] sm:$0xff]  ;;  %v20316_v57 = vld [vmem:[#allocation168_spill] sm:$0xff] }
 0x6d5   :  { %9929 = vmatmul.mubr.msk.bf16.gmra.mrb[180].mxu0 %vm4833_vm12, %v12067_v40  ;;  %9504 = vst [vmem:[%s19725_s6 + $0xa90] sm:$0xff] %v10192_v2  ;;  %9505 = vst [vmem:[%s19725_s6 + $0xa98] sm:$0xff] %v10193_v51  ;;  %v17733_v1 = vpop.permute.xlu0 %3935  ;;  %v20317_v18 = vld [vmem:[#allocation70_spill] sm:$0xff]  ;;  %v20318_v34 = vld [vmem:[#allocation72_spill] sm:$0xff] }
 0x6d6   :  { %7926 = vmatprep.mubr.bf16.mxu0 %v14632_v19  ;;  %9270 = vst [vmem:[%s19725_s6 + $0x340] sm:$0xff] %v10006_v6  ;;  %9271 = vst [vmem:[%s19725_s6 + $0x348] sm:$0xff] %v10007_v43  ;;  %v17735_v47 = vpop.permute.xlu1 %3785  ;;  %v10068_v11 = vadd.f32 %v20305_v48, %v17733_v1  ;;  %v10069_v58 = vadd.f32 %v20306_v60, %v17733_v1  ;;  %v10196_v62 = vadd.f32 %v20307_v63, %v17733_v1  ;;  %v20319_v17 = vld [vmem:[#allocation73_spill] sm:$0xff]  ;;  %v20320_v21 = vld [vmem:[#allocation74_spill] sm:$0xff] }
 0x6d7   :  { %9272 = vst [vmem:[%s19725_s6 + $0x350] sm:$0xff] %v10134_v20  ;;  %9273 = vst [vmem:[%s19725_s6 + $0x358] sm:$0xff] %v10135_v16  ;;  %v10197_v41 = vadd.f32 %v20308_v3, %v17733_v1  ;;  %v10008_v9 = vadd.f32 %v20309_v15, %v17735_v47  ;;  %v10009_v56 = vadd.f32 %v20310_v29, %v17735_v47  ;;  %v20321_v60 = vld [vmem:[#allocation38_spill] sm:$0xff]  ;;  %v20322_v63 = vld [vmem:[#allocation172_spill] sm:$0xff] }
 0x6d8   :  { %v10136_v31 = vadd.f32 %v20311_v4, %v17735_v47  ;;  %v10137_v22 = vadd.f32 %v20312_v54, %v17735_v47  ;;  %9961 = vmatmul.mubr.msk.bf16.gmra.mrb[180].mxu1 %vm4833_vm12, %v12067_v40  ;;  %9518 = vst [vmem:[%s19725_s6 + $0xb00] sm:$0xff] %v10068_v11  ;;  %9519 = vst [vmem:[%s19725_s6 + $0xb08] sm:$0xff] %v10069_v58  ;;  %v12068_v40 = vld [vmem:[%s19721_s3 + $0x240] ss:$20 sps:$4 sm:$0xff]   ;;  %v20323_v3 = vld [vmem:[#allocation173_spill] sm:$0xff] }
 0x6d9   :  { %9520 = vst [vmem:[%s19725_s6 + $0xb10] sm:$0xff] %v10196_v62  ;;  %9521 = vst [vmem:[%s19725_s6 + $0xb18] sm:$0xff] %v10197_v41  ;;  %8985 = vmatprep.mubr.bf16.mxu1 %v14632_v19  ;;  %v17779_v50 = vpop.permute.xlu0 %3945  ;;  %v20324_v15 = vld [vmem:[#allocation175_spill] sm:$0xff]  ;;  %v20326_v4 = vld [vmem:[#allocation54_spill] sm:$0xff] }
 0x6da   :  { %9278 = vst [vmem:[%s19725_s6 + $0x380] sm:$0xff] %v10008_v9  ;;  %9279 = vst [vmem:[%s19725_s6 + $0x388] sm:$0xff] %v10009_v56  ;;  %v17781_v12 = vpop.permute.xlu1 %3790  ;;  %v10072_v33 = vadd.f32 %v20313_v26, %v17779_v50  ;;  %v10073_v44 = vadd.f32 %v20314_v28, %v17779_v50  ;;  %v10200_v2 = vadd.f32 %v20315_v27, %v17779_v50  ;;  %v20325_v29 = vld [vmem:[#allocation75_spill] sm:$0xff]  ;;  %v20327_v54 = vld [vmem:[#allocation76_spill] sm:$0xff] }
 0x6db   :  { %9280 = vst [vmem:[%s19725_s6 + $0x390] sm:$0xff] %v10136_v31  ;;  %9281 = vst [vmem:[%s19725_s6 + $0x398] sm:$0xff] %v10137_v22  ;;  %v10201_v51 = vadd.f32 %v20316_v57, %v17779_v50  ;;  %v10010_v6 = vadd.f32 %v20317_v18, %v17781_v12  ;;  %v10011_v43 = vadd.f32 %v20318_v34, %v17781_v12  ;;  %v20328_v26 = vld [vmem:[#allocation78_spill] sm:$0xff]  ;;  %v20330_v27 = vld [vmem:[#allocation40_spill] sm:$0xff] }
 0x6dc   :  { %v10138_v20 = vadd.f32 %v20319_v17, %v17781_v12  ;;  %v10139_v16 = vadd.f32 %v20320_v21, %v17781_v12  ;;  %9534 = vst [vmem:[%s19725_s6 + $0xb80] sm:$0xff] %v10072_v33  ;;  %9535 = vst [vmem:[%s19725_s6 + $0xb88] sm:$0xff] %v10073_v44  ;;  %v20331_v57 = vld [vmem:[#allocation4_spill] sm:$0xff]  ;;  %v20332_v18 = vld [vmem:[#allocation179_spill] sm:$0xff] }
 0x6dd   :  { %9930 = vmatmul.mubr.msk.bf16.gmra.mrb[184].mxu0 %vm4833_vm12, %v12068_v40  ;;  %9536 = vst [vmem:[%s19725_s6 + $0xb90] sm:$0xff] %v10200_v2  ;;  %9537 = vst [vmem:[%s19725_s6 + $0xb98] sm:$0xff] %v10201_v51  ;;  %v17828_v48 = vpop.permute.xlu0 %3955  ;;  %v20333_v34 = vld [vmem:[#allocation181_spill] sm:$0xff]  ;;  %v20335_v21 = vld [vmem:[#allocation79_spill] sm:$0xff] }
 0x6de   :  { %7936 = vmatprep.mubr.bf16.mxu0 %v14632_v19  ;;  %9286 = vst [vmem:[%s19725_s6 + $0x3c0] sm:$0xff] %v10010_v6  ;;  %9287 = vst [vmem:[%s19725_s6 + $0x3c8] sm:$0xff] %v10011_v43  ;;  %v17830_v11 = vpop.permute.xlu1 %3795  ;;  %v10076_v58 = vadd.f32 %v20321_v60, %v17828_v48  ;;  %v10077_v62 = vadd.f32 %v20322_v63, %v17828_v48  ;;  %v10204_v41 = vadd.f32 %v20323_v3, %v17828_v48  ;;  %v20334_v17 = vld [vmem:[#allocation77_spill] sm:$0xff] }
 0x6df   :  { %9288 = vst [vmem:[%s19725_s6 + $0x3d0] sm:$0xff] %v10138_v20  ;;  %9289 = vst [vmem:[%s19725_s6 + $0x3d8] sm:$0xff] %v10139_v16  ;;  %v10205_v9 = vadd.f32 %v20324_v15, %v17828_v48  ;;  %v10012_v56 = vadd.f32 %v20325_v29, %v17830_v11  ;;  %v10013_v31 = vadd.f32 %v20326_v4, %v17830_v11  ;;  %v20339_v15 = vld [vmem:[#allocation42_spill] sm:$0xff]  ;;  %v20340_v29 = vld [vmem:[#allocation5_spill] sm:$0xff] }
 0x6e0   :  { %v10140_v22 = vadd.f32 %v20327_v54, %v17830_v11  ;;  %v10141_v33 = vadd.f32 %v20328_v26, %v17830_v11  ;;  %9962 = vmatmul.mubr.msk.bf16.gmra.mrb[184].mxu1 %vm4833_vm12, %v12068_v40  ;;  %9550 = vst [vmem:[%s19725_s6 + $0xc00] sm:$0xff] %v10076_v58  ;;  %9551 = vst [vmem:[%s19725_s6 + $0xc08] sm:$0xff] %v10077_v62  ;;  %v20336_v40 = vld [vmem:[#allocation80_spill] sm:$0xff]  ;;  %v20337_v58 = vld [vmem:[#allocation81_spill] sm:$0xff] }
 0x6e1   :  { %9552 = vst [vmem:[%s19725_s6 + $0xc10] sm:$0xff] %v10204_v41  ;;  %9553 = vst [vmem:[%s19725_s6 + $0xc18] sm:$0xff] %v10205_v9  ;;  %8995 = vmatprep.mubr.bf16.mxu1 %v14632_v19  ;;  %v17874_v28 = vpop.permute.xlu0 %3965  ;;  %v12069_v62 = vld [vmem:[%s19721_s3 + $0x268] ss:$20 sps:$4 sm:$0xff]   ;;  %v20343_v26 = vld [vmem:[#allocation82_spill] sm:$0xff] }
 0x6e2   :  { %9294 = vst [vmem:[%s19725_s6 + $0x400] sm:$0xff] %v10012_v56  ;;  %9295 = vst [vmem:[%s19725_s6 + $0x408] sm:$0xff] %v10013_v31  ;;  %v17876_v44 = vpop.permute.xlu1 %3800  ;;  %v10080_v2 = vadd.f32 %v20330_v27, %v17874_v28  ;;  %v10081_v51 = vadd.f32 %v20331_v57, %v17874_v28  ;;  %v10208_v6 = vadd.f32 %v20332_v18, %v17874_v28  ;;  %v20341_v4 = vld [vmem:[#allocation185_spill] sm:$0xff]  ;;  %v20342_v54 = vld [vmem:[#allocation187_spill] sm:$0xff] }
 0x6e3   :  { %9296 = vst [vmem:[%s19725_s6 + $0x410] sm:$0xff] %v10140_v22  ;;  %9297 = vst [vmem:[%s19725_s6 + $0x418] sm:$0xff] %v10141_v33  ;;  %v10209_v43 = vadd.f32 %v20333_v34, %v17874_v28  ;;  %v10014_v20 = vadd.f32 %v20334_v17, %v17876_v44  ;;  %v10015_v16 = vadd.f32 %v20335_v21, %v17876_v44  ;;  %v20344_v27 = vld [vmem:[#allocation55_spill] sm:$0xff]  ;;  %v20346_v18 = vld [vmem:[#allocation85_spill] sm:$0xff] }
 0x6e4   :  { %20329 = vst [vmem:[#allocation22_spill] sm:$0xff] %v17874_v28  ;;  %v10142_v60 = vadd.f32 %v20336_v40, %v17876_v44  ;;  %v10143_v63 = vadd.f32 %v20337_v58, %v17876_v44  ;;  %9566 = vst [vmem:[%s19725_s6 + $0xc80] sm:$0xff] %v10080_v2  ;;  %v20345_v57 = vld [vmem:[#allocation83_spill] sm:$0xff]  ;;  %v20348_v17 = vld [vmem:[#allocation44_spill] sm:$0xff] }
 0x6e5   :  { %9931 = vmatmul.mubr.msk.bf16.gmra.mrb[188].mxu0 %vm4833_vm12, %v12069_v62  ;;  %9567 = vst [vmem:[%s19725_s6 + $0xc88] sm:$0xff] %v10081_v51  ;;  %9568 = vst [vmem:[%s19725_s6 + $0xc90] sm:$0xff] %v10208_v6  ;;  %v17923_v3 = vpop.permute.xlu0 %3975  ;;  %v20349_v21 = vld [vmem:[#allocation10_spill] sm:$0xff]  ;;  %v20350_v40 = vld [vmem:[#allocation191_spill] sm:$0xff] }
 0x6e6   :  { %9569 = vst [vmem:[%s19725_s6 + $0xc98] sm:$0xff] %v10209_v43  ;;  %7946 = vmatprep.mubr.bf16.mxu0 %v14632_v19  ;;  %9302 = vst [vmem:[%s19725_s6 + $0x440] sm:$0xff] %v10014_v20  ;;  %v17925_v41 = vpop.permute.xlu1 %3805  ;;  %v10084_v9 = vadd.f32 %v20339_v15, %v17923_v3  ;;  %v10085_v56 = vadd.f32 %v20340_v29, %v17923_v3  ;;  %v10212_v31 = vadd.f32 %v20341_v4, %v17923_v3  ;;  %v20351_v58 = vld [vmem:[#allocation193_spill] sm:$0xff] }
 0x6e7   :  { %9303 = vst [vmem:[%s19725_s6 + $0x448] sm:$0xff] %v10015_v16  ;;  %9304 = vst [vmem:[%s19725_s6 + $0x450] sm:$0xff] %v10142_v60  ;;  %v10213_v22 = vadd.f32 %v20342_v54, %v17923_v3  ;;  %v10016_v33 = vadd.f32 %v20343_v26, %v17925_v41  ;;  %v10017_v2 = vadd.f32 %v20344_v27, %v17925_v41  ;;  %v20357_v27 = vld [vmem:[#allocation46_spill] sm:$0xff] }
 0x6e8   :  { %9305 = vst [vmem:[%s19725_s6 + $0x458] sm:$0xff] %v10143_v63  ;;  %20338 = vst [vmem:[#allocation23_spill] sm:$0xff] %v17923_v3  ;;  %v10144_v51 = vadd.f32 %v20345_v57, %v17925_v41  ;;  %v10145_v6 = vadd.f32 %v20346_v18, %v17925_v41  ;;  %9963 = vmatmul.mubr.msk.bf16.gmra.mrb[188].mxu1 %vm4833_vm12, %v12069_v62  ;;  %v20352_v62 = vld [vmem:[#allocation84_spill] sm:$0xff]  ;;  %v20358_v57 = vld [vmem:[#allocation19_spill] sm:$0xff] }
 0x6e9   :  { %9582 = vst [vmem:[%s19725_s6 + $0xd00] sm:$0xff] %v10084_v9  ;;  %9583 = vst [vmem:[%s19725_s6 + $0xd08] sm:$0xff] %v10085_v56  ;;  %9005 = vmatprep.mubr.bf16.mxu1 %v14632_v19  ;;  %v17969_v34 = vpop.permute.xlu0 %3985  ;;  %v20353_v9 = vld [vmem:[#allocation86_spill] sm:$0xff]  ;;  %v20354_v56 = vld [vmem:[#allocation87_spill] sm:$0xff] }
 0x6ea   :  { %9584 = vst [vmem:[%s19725_s6 + $0xd10] sm:$0xff] %v10212_v31  ;;  %9585 = vst [vmem:[%s19725_s6 + $0xd18] sm:$0xff] %v10213_v22  ;;  %v17971_v43 = vpop.permute.xlu1 %3810  ;;  %v10088_v20 = vadd.f32 %v20348_v17, %v17969_v34  ;;  %v10089_v16 = vadd.f32 %v20349_v21, %v17969_v34  ;;  %v10216_v60 = vadd.f32 %v20350_v40, %v17969_v34  ;;  %v20355_v31 = vld [vmem:[#allocation88_spill] sm:$0xff]  ;;  %v20359_v18 = vld [vmem:[#allocation197_spill] sm:$0xff] }
 0x6eb   :  { %9310 = vst [vmem:[%s19725_s6 + $0x480] sm:$0xff] %v10016_v33  ;;  %9311 = vst [vmem:[%s19725_s6 + $0x488] sm:$0xff] %v10017_v2  ;;  %v10217_v63 = vadd.f32 %v20351_v58, %v17969_v34  ;;  %v10018_v15 = vadd.f32 %v20352_v62, %v17971_v43  ;;  %v10019_v29 = vadd.f32 %v20353_v9, %v17971_v43  ;;  %v12070_v22 = vld [vmem:[%s19721_s3 + $0x290] ss:$20 sps:$4 sm:$0xff]   ;;  %v20360_v17 = vld [vmem:[#allocation199_spill] sm:$0xff] }
 0x6ec   :  { %9312 = vst [vmem:[%s19725_s6 + $0x490] sm:$0xff] %v10144_v51  ;;  %9313 = vst [vmem:[%s19725_s6 + $0x498] sm:$0xff] %v10145_v6  ;;  %v10146_v4 = vadd.f32 %v20354_v56, %v17971_v43  ;;  %v10147_v54 = vadd.f32 %v20355_v31, %v17971_v43  ;;  %v20361_v21 = vld [vmem:[#allocation56_spill] sm:$0xff]  ;;  %v20362_v40 = vld [vmem:[#allocation89_spill] sm:$0xff] }
 0x6ed   :  { %20347 = vst [vmem:[#allocation13_spill] sm:$0xff] %v17969_v34  ;;  %9932 = vmatmul.mubr.msk.bf16.gmra.mrb[192].mxu0 %vm4833_vm12, %v12070_v22  ;;  %9598 = vst [vmem:[%s19725_s6 + $0xd80] sm:$0xff] %v10088_v20  ;;  %v18018_v26 = vpop.permute.xlu0 %3995  ;;  %v20363_v58 = vld [vmem:[#allocation90_spill] sm:$0xff]  ;;  %v20364_v62 = vld [vmem:[#allocation91_spill] sm:$0xff] }
 0x6ee   :  { %9599 = vst [vmem:[%s19725_s6 + $0xd88] sm:$0xff] %v10089_v16  ;;  %9600 = vst [vmem:[%s19725_s6 + $0xd90] sm:$0xff] %v10216_v60  ;;  %7956 = vmatprep.mubr.bf16.mxu0 %v14632_v19  ;;  %v18020_v33 = vpop.permute.xlu1 %3820  ;;  %v10092_v2 = vadd.f32 %v20357_v27, %v18018_v26  ;;  %v10093_v51 = vadd.f32 %v20358_v57, %v18018_v26  ;;  %v10220_v6 = vadd.f32 %v20359_v18, %v18018_v26  ;;  %v20366_v56 = vld [vmem:[#allocation48_spill] sm:$0xff]  ;;  %v20367_v31 = vld [vmem:[#allocation203_spill] sm:$0xff] }
 0x6ef   :  { %9601 = vst [vmem:[%s19725_s6 + $0xd98] sm:$0xff] %v10217_v63  ;;  %9318 = vst [vmem:[%s19725_s6 + $0x4c0] sm:$0xff] %v10018_v15  ;;  %v10221_v20 = vadd.f32 %v20360_v17, %v18018_v26  ;;  %v10022_v16 = vadd.f32 %v20361_v21, %v18020_v33  ;;  %v10023_v60 = vadd.f32 %v20362_v40, %v18020_v33  ;;  %v20446_v3 = vld [vmem:[#allocation190_spill] sm:$0xff] }
 0x6f0   :  { %9319 = vst [vmem:[%s19725_s6 + $0x4c8] sm:$0xff] %v10019_v29  ;;  %9320 = vst [vmem:[%s19725_s6 + $0x4d0] sm:$0xff] %v10146_v4  ;;  %v10150_v63 = vadd.f32 %v20363_v58, %v18020_v33  ;;  %v10151_v15 = vadd.f32 %v20364_v62, %v18020_v33  ;;  %9964 = vmatmul.mubr.msk.bf16.gmra.mrb[192].mxu1 %vm4833_vm12, %v12070_v22  ;;  %v20368_v22 = vld [vmem:[#allocation204_spill] sm:$0xff]  ;;  %v20375_v62 = vld [vmem:[#allocation50_spill] sm:$0xff] }
 0x6f1   :  { %9321 = vst [vmem:[%s19725_s6 + $0x4d8] sm:$0xff] %v10147_v54  ;;  %20356 = vst [vmem:[#allocation21_spill] sm:$0xff] %v18018_v26  ;;  %9015 = vmatprep.mubr.bf16.mxu1 %v14632_v19  ;;  %v18064_v9 = vpop.permute.xlu0 %4005  ;;  %v20436_v26 = vld [vmem:[#allocation178_spill] sm:$0xff] }
 0x6f2   :  { %9614 = vst [vmem:[%s19725_s6 + $0xe00] sm:$0xff] %v10092_v2  ;;  %9615 = vst [vmem:[%s19725_s6 + $0xe08] sm:$0xff] %v10093_v51  ;;  %v18066_v29 = vpop.permute.xlu1 %3830  ;;  %v10096_v4 = vadd.f32 %v20366_v56, %v18064_v9  ;;  %v10097_v54 = vadd.f32 %v20367_v31, %v18064_v9  ;;  %v10224_v27 = vadd.f32 %v20368_v22, %v18064_v9  ;;  %v20369_v2 = vld [vmem:[#allocation206_spill] sm:$0xff]  ;;  %v20370_v51 = vld [vmem:[#allocation92_spill] sm:$0xff] }
 0x6f3   :  { %9616 = vst [vmem:[%s19725_s6 + $0xe10] sm:$0xff] %v10220_v6  ;;  %9617 = vst [vmem:[%s19725_s6 + $0xe18] sm:$0xff] %v10221_v20  ;;  %v10225_v57 = vadd.f32 %v20369_v2, %v18064_v9  ;;  %v10026_v18 = vadd.f32 %v20370_v51, %v18066_v29  ;;  %v20371_v6 = vld [vmem:[#allocation93_spill] sm:$0xff]  ;;  %v20372_v20 = vld [vmem:[#allocation94_spill] sm:$0xff] }
 0x6f4   :  { %9334 = vst [vmem:[%s19725_s6 + $0x540] sm:$0xff] %v10022_v16  ;;  %9335 = vst [vmem:[%s19725_s6 + $0x548] sm:$0xff] %v10023_v60  ;;  %v10027_v17 = vadd.f32 %v20371_v6, %v18066_v29  ;;  %v10154_v21 = vadd.f32 %v20372_v20, %v18066_v29  ;;  %v20373_v16 = vld [vmem:[#allocation95_spill] sm:$0xff]  ;;  %v20376_v56 = vld [vmem:[#allocation210_spill] sm:$0xff] }
 0x6f5   :  { %9336 = vst [vmem:[%s19725_s6 + $0x550] sm:$0xff] %v10150_v63  ;;  %9337 = vst [vmem:[%s19725_s6 + $0x558] sm:$0xff] %v10151_v15  ;;  %v10155_v40 = vadd.f32 %v20373_v16, %v18066_v29  ;;  %v12071_v60 = vld [vmem:[%s19721_s3 + $0x2b8] ss:$20 sps:$4 sm:$0xff]   ;;  %v18113_v58 = vpop.permute.xlu0 %4015  ;;  %v20379_v2 = vld [vmem:[#allocation96_spill] sm:$0xff] }
 0x6f6   :  { %20365 = vst [vmem:[#allocation12_spill] sm:$0xff] %v18064_v9  ;;  %9933 = vmatmul.mubr.msk.bf16.gmra.mrb[196].mxu0 %vm4833_vm12, %v12071_v60  ;;  %9630 = vst [vmem:[%s19725_s6 + $0xe80] sm:$0xff] %v10096_v4  ;;  %v18115_v63 = vpop.permute.xlu1 %3840  ;;  %v10100_v15 = vadd.f32 %v20375_v62, %v18113_v58  ;;  %v10101_v4 = vadd.f32 %v20376_v56, %v18113_v58  ;;  %v20377_v31 = vld [vmem:[#allocation211_spill] sm:$0xff]  ;;  %v20378_v22 = vld [vmem:[#allocation213_spill] sm:$0xff] }
 0x6f7   :  { %9631 = vst [vmem:[%s19725_s6 + $0xe88] sm:$0xff] %v10097_v54  ;;  %9632 = vst [vmem:[%s19725_s6 + $0xe90] sm:$0xff] %v10224_v27  ;;  %7966 = vmatprep.mubr.bf16.mxu0 %v14632_v19  ;;  %v10228_v54 = vadd.f32 %v20377_v31, %v18113_v58  ;;  %v10229_v27 = vadd.f32 %v20378_v22, %v18113_v58  ;;  %v20380_v51 = vld [vmem:[#allocation97_spill] sm:$0xff]  ;;  %v20381_v6 = vld [vmem:[#allocation98_spill] sm:$0xff] }
 0x6f8   :  { %9633 = vst [vmem:[%s19725_s6 + $0xe98] sm:$0xff] %v10225_v57  ;;  %9350 = vst [vmem:[%s19725_s6 + $0x5c0] sm:$0xff] %v10026_v18  ;;  %v10030_v57 = vadd.f32 %v20379_v2, %v18115_v63  ;;  %v10031_v18 = vadd.f32 %v20380_v51, %v18115_v63  ;;  %v20382_v20 = vld [vmem:[#allocation99_spill] sm:$0xff]  ;;  %9965 = vmatmul.mubr.msk.bf16.gmra.mrb[196].mxu1 %vm4833_vm12, %v12071_v60  ;;  %v20384_v60 = vld [vmem:[#allocation52_spill] sm:$0xff] }
 0x6f9   :  { %9351 = vst [vmem:[%s19725_s6 + $0x5c8] sm:$0xff] %v10027_v17  ;;  %9352 = vst [vmem:[%s19725_s6 + $0x5d0] sm:$0xff] %v10154_v21  ;;  %v10158_v17 = vadd.f32 %v20381_v6, %v18115_v63  ;;  %v10159_v21 = vadd.f32 %v20382_v20, %v18115_v63  ;;  %9025 = vmatprep.mubr.bf16.mxu1 %v14632_v19  ;;  %v18159_v16 = vpop.permute.xlu0 %4025 }
 0x6fa   :  { %9353 = vst [vmem:[%s19725_s6 + $0x5d8] sm:$0xff] %v10155_v40  ;;  %20374 = vst [vmem:[#allocation18_spill] sm:$0xff] %v18113_v58  ;;  %v18161_v40 = vpop.permute.xlu1 %3850  ;;  %v10104_v62 = vadd.f32 %v20384_v60, %v18159_v16  ;;  %v20427_v58 = vld [vmem:[#allocation164_spill] sm:$0xff] }
 0x6fb   :  { %9646 = vst [vmem:[%s19725_s6 + $0xf00] sm:$0xff] %v10100_v15  ;;  %9647 = vst [vmem:[%s19725_s6 + $0xf08] sm:$0xff] %v10101_v4  ;;  %v20385_v15 = vld [vmem:[#allocation217_spill] sm:$0xff]  ;;  %v20386_v4 = vld [vmem:[#allocation218_spill] sm:$0xff] }
 0x6fc   :  { %9648 = vst [vmem:[%s19725_s6 + $0xf10] sm:$0xff] %v10228_v54  ;;  %9649 = vst [vmem:[%s19725_s6 + $0xf18] sm:$0xff] %v10229_v27  ;;  %v10105_v56 = vadd.f32 %v20385_v15, %v18159_v16  ;;  %v10232_v31 = vadd.f32 %v20386_v4, %v18159_v16  ;;  %v20387_v54 = vld [vmem:[#allocation220_spill] sm:$0xff] }
 0x6fd   :  { %9366 = vst [vmem:[%s19725_s6 + $0x640] sm:$0xff] %v10030_v57  ;;  %9367 = vst [vmem:[%s19725_s6 + $0x648] sm:$0xff] %v10031_v18  ;;  %v10233_v22 = vadd.f32 %v20387_v54, %v18159_v16  ;;  %v20388_v27 = vld [vmem:[#allocation100_spill] sm:$0xff]  ;;  %v20389_v57 = vld [vmem:[#allocation101_spill] sm:$0xff] }
 0x6fe   :  { %9368 = vst [vmem:[%s19725_s6 + $0x650] sm:$0xff] %v10158_v17  ;;  %9369 = vst [vmem:[%s19725_s6 + $0x658] sm:$0xff] %v10159_v21  ;;  %v10034_v2 = vadd.f32 %v20388_v27, %v18161_v40  ;;  %v10035_v51 = vadd.f32 %v20389_v57, %v18161_v40  ;;  %v20390_v18 = vld [vmem:[#allocation102_spill] sm:$0xff]  ;;  %v20391_v17 = vld [vmem:[#allocation103_spill] sm:$0xff]  ;;  %v18208_v60 = vpop.permute.xlu1 %3860 }
 0x6ff   :  { %20383 = vst [vmem:[#allocation29_spill] sm:$0xff] %v18159_v16  ;;  %v10162_v6 = vadd.f32 %v20390_v18, %v18161_v40  ;;  %v10163_v20 = vadd.f32 %v20391_v17, %v18161_v40  ;;  %v12072_v21 = vld [vmem:[%s19721_s3 + $0x2e0] ss:$20 sps:$4 sm:$0xff]   ;;  %9662 = vst [vmem:[%s19725_s6 + $0xf80] sm:$0xff] %v10104_v62  ;;  %v20397_v18 = vld [vmem:[#allocation109_spill] sm:$0xff] }
 0x700   :  { %9934 = vmatmul.mubr.msk.bf16.gmra.mrb[200].mxu0 %vm4833_vm12, %v12072_v21  ;;  %9663 = vst [vmem:[%s19725_s6 + $0xf88] sm:$0xff] %v10105_v56  ;;  %9664 = vst [vmem:[%s19725_s6 + $0xf90] sm:$0xff] %v10232_v31  ;;  %v20392_v62 = vld [vmem:[#allocation104_spill] sm:$0xff]  ;;  %v20393_v56 = vld [vmem:[#allocation105_spill] sm:$0xff]  ;;  %9966 = vmatmul.mubr.msk.bf16.gmra.mrb[200].mxu1 %vm4833_vm12, %v12072_v21 }
 0x701   :  { %9665 = vst [vmem:[%s19725_s6 + $0xf98] sm:$0xff] %v10233_v22  ;;  %7976 = vmatprep.mubr.bf16.mxu0 %v14632_v19  ;;  %9382 = vst [vmem:[%s19725_s6 + $0x6c0] sm:$0xff] %v10034_v2  ;;  %v10038_v15 = vadd.f32 %v20392_v62, %v18208_v60  ;;  %v10039_v4 = vadd.f32 %v20393_v56, %v18208_v60  ;;  %v20394_v31 = vld [vmem:[#allocation106_spill] sm:$0xff]  ;;  %v20395_v22 = vld [vmem:[#allocation107_spill] sm:$0xff]  ;;  %9035 = vmatprep.mubr.bf16.mxu1 %v14632_v19 }
 0x702   :  { %9383 = vst [vmem:[%s19725_s6 + $0x6c8] sm:$0xff] %v10035_v51  ;;  %9384 = vst [vmem:[%s19725_s6 + $0x6d0] sm:$0xff] %v10162_v6  ;;  %v10166_v54 = vadd.f32 %v20394_v31, %v18208_v60  ;;  %v10167_v27 = vadd.f32 %v20395_v22, %v18208_v60  ;;  %v18232_v2 = vpop.permute.xlu1 %3870  ;;  %v20396_v57 = vld [vmem:[#allocation108_spill] sm:$0xff]  ;;  %v20398_v17 = vld [vmem:[#allocation110_spill] sm:$0xff] }
 0x703   :  { %9385 = vst [vmem:[%s19725_s6 + $0x6d8] sm:$0xff] %v10163_v20  ;;  %9398 = vst [vmem:[%s19725_s6 + $0x740] sm:$0xff] %v10038_v15  ;;  %v10042_v51 = vadd.f32 %v20396_v57, %v18232_v2  ;;  %v10043_v6 = vadd.f32 %v20397_v18, %v18232_v2  ;;  %v10170_v20 = vadd.f32 %v20398_v17, %v18232_v2  ;;  %v20399_v21 = vld [vmem:[#allocation111_spill] sm:$0xff] }
 0x704   :  { %9399 = vst [vmem:[%s19725_s6 + $0x748] sm:$0xff] %v10039_v4  ;;  %9400 = vst [vmem:[%s19725_s6 + $0x750] sm:$0xff] %v10166_v54  ;;  %v10171_v62 = vadd.f32 %v20399_v21, %v18232_v2  ;;  %v12073_v15 = vld [vmem:[%s19721_s3 + $0x308] ss:$20 sps:$4 sm:$0xff]  }
 0x705   :  { %9401 = vst [vmem:[%s19725_s6 + $0x758] sm:$0xff] %v10167_v27  ;;  %9414 = vst [vmem:[%s19725_s6 + $0x7c0] sm:$0xff] %v10042_v51  ;;  %v20400_v4 = vld [vmem:[#allocation115_spill] sm:$0xff]  ;;  %v20401_v54 = vld [vmem:[#allocation117_spill] sm:$0xff] }
 0x706   :  { %9415 = vst [vmem:[%s19725_s6 + $0x7c8] sm:$0xff] %v10043_v6  ;;  %9416 = vst [vmem:[%s19725_s6 + $0x7d0] sm:$0xff] %v10170_v20  ;;  %v18259_v56 = vpop.permute.xlu1 %3880  ;;  %v20402_v27 = vld [vmem:[#allocation118_spill] sm:$0xff]  ;;  %v20403_v51 = vld [vmem:[#allocation119_spill] sm:$0xff] }
 0x707   :  { %9417 = vst [vmem:[%s19725_s6 + $0x7d8] sm:$0xff] %v10171_v62  ;;  %v10046_v31 = vadd.f32 %v20400_v4, %v18259_v56  ;;  %v10047_v22 = vadd.f32 %v20401_v54, %v18259_v56  ;;  %v10174_v57 = vadd.f32 %v20402_v27, %v18259_v56  ;;  %v10175_v18 = vadd.f32 %v20403_v51, %v18259_v56  ;;  %v20404_v17 = vld [vmem:[#allocation123_spill] sm:$0xff]  ;;  %v20405_v21 = vld [vmem:[#allocation125_spill] sm:$0xff] }
 0x708   :  { %9935 = vmatmul.mubr.msk.bf16.gmra.mrb[204].mxu0 %vm4833_vm12, %v12073_v15  ;;  %9967 = vmatmul.mubr.msk.bf16.gmra.mrb[204].mxu1 %vm4833_vm12, %v12073_v15  ;;  %v20406_v15 = vld [vmem:[#allocation126_spill] sm:$0xff] }
 0x709   :  { %7986 = vmatprep.mubr.bf16.mxu0 %v14632_v19  ;;  %9430 = vst [vmem:[%s19725_s6 + $0x840] sm:$0xff] %v10046_v31  ;;  %9431 = vst [vmem:[%s19725_s6 + $0x848] sm:$0xff] %v10047_v22  ;;  %9045 = vmatprep.mubr.bf16.mxu1 %v14632_v19  ;;  %v20407_v31 = vld [vmem:[#allocation127_spill] sm:$0xff]  ;;  %v12074_v22 = vld [vmem:[%s19721_s3 + $0x330] ss:$20 sps:$4 sm:$0xff]  }
 0x70a   :  { %9432 = vst [vmem:[%s19725_s6 + $0x850] sm:$0xff] %v10174_v57  ;;  %9433 = vst [vmem:[%s19725_s6 + $0x858] sm:$0xff] %v10175_v18  ;;  %v18283_v6 = vpop.permute.xlu1 %3890  ;;  %v20408_v57 = vld [vmem:[#allocation131_spill] sm:$0xff]  ;;  %v20409_v18 = vld [vmem:[#allocation133_spill] sm:$0xff] }
 0x70b   :  { %v10050_v20 = vadd.f32 %v20404_v17, %v18283_v6  ;;  %v10051_v62 = vadd.f32 %v20405_v21, %v18283_v6  ;;  %v10178_v4 = vadd.f32 %v20406_v15, %v18283_v6  ;;  %v10179_v54 = vadd.f32 %v20407_v31, %v18283_v6  ;;  %v20412_v31 = vld [vmem:[#allocation139_spill] sm:$0xff] }
 0x70d   :  { %9446 = vst [vmem:[%s19725_s6 + $0x8c0] sm:$0xff] %v10050_v20  ;;  %9447 = vst [vmem:[%s19725_s6 + $0x8c8] sm:$0xff] %v10051_v62  ;;  %v20410_v20 = vld [vmem:[#allocation134_spill] sm:$0xff]  ;;  %v20411_v62 = vld [vmem:[#allocation135_spill] sm:$0xff] }
 0x70e   :  { %9448 = vst [vmem:[%s19725_s6 + $0x8d0] sm:$0xff] %v10178_v4  ;;  %9449 = vst [vmem:[%s19725_s6 + $0x8d8] sm:$0xff] %v10179_v54  ;;  %v18310_v27 = vpop.permute.xlu1 %3900 }
 0x70f   :  { %v10054_v51 = vadd.f32 %v20408_v57, %v18310_v27  ;;  %v10055_v17 = vadd.f32 %v20409_v18, %v18310_v27  ;;  %v10182_v21 = vadd.f32 %v20410_v20, %v18310_v27  ;;  %v10183_v15 = vadd.f32 %v20411_v62, %v18310_v27 }
 0x710   :  { %9936 = vmatmul.mubr.msk.bf16.gmra.mrb[208].mxu0 %vm4833_vm12, %v12074_v22  ;;  %9968 = vmatmul.mubr.msk.bf16.gmra.mrb[208].mxu1 %vm4833_vm12, %v12074_v22  ;;  %v20413_v22 = vld [vmem:[#allocation141_spill] sm:$0xff] }
 0x711   :  { %7996 = vmatprep.mubr.bf16.mxu0 %v14632_v19  ;;  %9462 = vst [vmem:[%s19725_s6 + $0x940] sm:$0xff] %v10054_v51  ;;  %9463 = vst [vmem:[%s19725_s6 + $0x948] sm:$0xff] %v10055_v17  ;;  %9055 = vmatprep.mubr.bf16.mxu1 %v14632_v19  ;;  %v20414_v51 = vld [vmem:[#allocation142_spill] sm:$0xff]  ;;  %v20415_v17 = vld [vmem:[#allocation143_spill] sm:$0xff] }
 0x712   :  { %9464 = vst [vmem:[%s19725_s6 + $0x950] sm:$0xff] %v10182_v21  ;;  %9465 = vst [vmem:[%s19725_s6 + $0x958] sm:$0xff] %v10183_v15  ;;  %v18334_v4 = vpop.permute.xlu1 %3910  ;;  %v12075_v21 = vld [vmem:[%s19721_s3 + $0x358] ss:$20 sps:$4 sm:$0xff]   ;;  %v20416_v15 = vld [vmem:[#allocation146_spill] sm:$0xff] }
 0x713   :  { %v10058_v54 = vadd.f32 %v20412_v31, %v18334_v4  ;;  %v10059_v57 = vadd.f32 %v20413_v22, %v18334_v4  ;;  %v10186_v18 = vadd.f32 %v20414_v51, %v18334_v4  ;;  %v10187_v20 = vadd.f32 %v20415_v17, %v18334_v4  ;;  %v20419_v17 = vld [vmem:[#allocation150_spill] sm:$0xff] }
 0x715   :  { %9478 = vst [vmem:[%s19725_s6 + $0x9c0] sm:$0xff] %v10058_v54  ;;  %9479 = vst [vmem:[%s19725_s6 + $0x9c8] sm:$0xff] %v10059_v57  ;;  %v20417_v54 = vld [vmem:[#allocation148_spill] sm:$0xff]  ;;  %v20418_v57 = vld [vmem:[#allocation149_spill] sm:$0xff] }
 0x716   :  { %9480 = vst [vmem:[%s19725_s6 + $0x9d0] sm:$0xff] %v10186_v18  ;;  %9481 = vst [vmem:[%s19725_s6 + $0x9d8] sm:$0xff] %v10187_v20  ;;  %v18361_v62 = vpop.permute.xlu1 %3920 }
 0x717   :  { %v10062_v31 = vadd.f32 %v20416_v15, %v18361_v62  ;;  %v10063_v22 = vadd.f32 %v20417_v54, %v18361_v62  ;;  %v10190_v51 = vadd.f32 %v20418_v57, %v18361_v62  ;;  %v10191_v18 = vadd.f32 %v20419_v17, %v18361_v62  ;;  %v20423_v17 = vld [vmem:[#allocation157_spill] sm:$0xff] }
 0x718   :  { %9937 = vmatmul.mubr.msk.bf16.gmra.mrb[212].mxu0 %vm4833_vm12, %v12075_v21  ;;  %9969 = vmatmul.mubr.msk.bf16.gmra.mrb[212].mxu1 %vm4833_vm12, %v12075_v21  ;;  %v20420_v21 = vld [vmem:[#allocation153_spill] sm:$0xff] }
 0x719   :  { %8006 = vmatprep.mubr.bf16.mxu0 %v14632_v19  ;;  %9494 = vst [vmem:[%s19725_s6 + $0xa40] sm:$0xff] %v10062_v31  ;;  %9495 = vst [vmem:[%s19725_s6 + $0xa48] sm:$0xff] %v10063_v22  ;;  %9065 = vmatprep.mubr.bf16.mxu1 %v14632_v19  ;;  %v20421_v31 = vld [vmem:[#allocation155_spill] sm:$0xff]  ;;  %v20422_v22 = vld [vmem:[#allocation156_spill] sm:$0xff] }
 0x71a   :  { %9496 = vst [vmem:[%s19725_s6 + $0xa50] sm:$0xff] %v10190_v51  ;;  %9497 = vst [vmem:[%s19725_s6 + $0xa58] sm:$0xff] %v10191_v18  ;;  %v18385_v20 = vpop.permute.xlu1 %3930  ;;  %v12076_v18 = vld [vmem:[%s19721_s3 + $0x380] ss:$20 sps:$4 sm:$0xff]  }
 0x71b   :  { %v10066_v15 = vadd.f32 %v20420_v21, %v18385_v20  ;;  %v10067_v54 = vadd.f32 %v20421_v31, %v18385_v20  ;;  %v10194_v57 = vadd.f32 %v20422_v22, %v18385_v20  ;;  %v10195_v51 = vadd.f32 %v20423_v17, %v18385_v20  ;;  %v20424_v31 = vld [vmem:[#allocation160_spill] sm:$0xff] }
 0x71d   :  { %9510 = vst [vmem:[%s19725_s6 + $0xac0] sm:$0xff] %v10066_v15  ;;  %9511 = vst [vmem:[%s19725_s6 + $0xac8] sm:$0xff] %v10067_v54  ;;  %v20425_v15 = vld [vmem:[#allocation162_spill] sm:$0xff]  ;;  %v20426_v54 = vld [vmem:[#allocation163_spill] sm:$0xff] }
 0x71e   :  { %9512 = vst [vmem:[%s19725_s6 + $0xad0] sm:$0xff] %v10194_v57  ;;  %9513 = vst [vmem:[%s19725_s6 + $0xad8] sm:$0xff] %v10195_v51  ;;  %v18412_v21 = vpop.permute.xlu1 %3940  ;;  %v20428_v51 = vld [vmem:[#allocation167_spill] sm:$0xff] }
 0x71f   :  { %v10070_v22 = vadd.f32 %v20424_v31, %v18412_v21  ;;  %v10071_v17 = vadd.f32 %v20425_v15, %v18412_v21  ;;  %v10198_v16 = vadd.f32 %v20426_v54, %v18412_v21  ;;  %v10199_v57 = vadd.f32 %v20427_v58, %v18412_v21  ;;  %v20429_v31 = vld [vmem:[#allocation169_spill] sm:$0xff]  ;;  %v20430_v15 = vld [vmem:[#allocation170_spill] sm:$0xff]  ;;  %v20431_v54 = vld [vmem:[#allocation171_spill] sm:$0xff] }
 0x720   :  { %9938 = vmatmul.mubr.msk.bf16.gmra.mrb[216].mxu0 %vm4833_vm12, %v12076_v18  ;;  %9970 = vmatmul.mubr.msk.bf16.gmra.mrb[216].mxu1 %vm4833_vm12, %v12076_v18 }
 0x721   :  { %8016 = vmatprep.mubr.bf16.mxu0 %v14632_v19  ;;  %9526 = vst [vmem:[%s19725_s6 + $0xb40] sm:$0xff] %v10070_v22  ;;  %9527 = vst [vmem:[%s19725_s6 + $0xb48] sm:$0xff] %v10071_v17  ;;  %9075 = vmatprep.mubr.bf16.mxu1 %v14632_v19 }
 0x722   :  { %9528 = vst [vmem:[%s19725_s6 + $0xb50] sm:$0xff] %v10198_v16  ;;  %9529 = vst [vmem:[%s19725_s6 + $0xb58] sm:$0xff] %v10199_v57  ;;  %v18436_v58 = vpop.permute.xlu1 %3950  ;;  %v12077_v57 = vld [vmem:[%s19721_s3 + $0x3a8] ss:$20 sps:$4 sm:$0xff]  }
 0x723   :  { %v10074_v18 = vadd.f32 %v20428_v51, %v18436_v58  ;;  %v10075_v22 = vadd.f32 %v20429_v31, %v18436_v58  ;;  %v10202_v17 = vadd.f32 %v20430_v15, %v18436_v58  ;;  %v10203_v16 = vadd.f32 %v20431_v54, %v18436_v58  ;;  %v20433_v31 = vld [vmem:[#allocation174_spill] sm:$0xff] }
 0x725   :  { %9542 = vst [vmem:[%s19725_s6 + $0xbc0] sm:$0xff] %v10074_v18  ;;  %9543 = vst [vmem:[%s19725_s6 + $0xbc8] sm:$0xff] %v10075_v22  ;;  %v20434_v18 = vld [vmem:[#allocation176_spill] sm:$0xff]  ;;  %v20435_v22 = vld [vmem:[#allocation177_spill] sm:$0xff] }
 0x726   :  { %9544 = vst [vmem:[%s19725_s6 + $0xbd0] sm:$0xff] %v10202_v17  ;;  %9545 = vst [vmem:[%s19725_s6 + $0xbd8] sm:$0xff] %v10203_v16  ;;  %v18463_v51 = vpop.permute.xlu1 %3960  ;;  %v20438_v16 = vld [vmem:[#allocation180_spill] sm:$0xff] }
 0x727   :  { %20432 = vst [vmem:[#allocation33_spill] sm:$0xff] %v18463_v51  ;;  %v10078_v15 = vadd.f32 %v20433_v31, %v18463_v51  ;;  %v10079_v54 = vadd.f32 %v20434_v18, %v18463_v51  ;;  %v10206_v9 = vadd.f32 %v20435_v22, %v18463_v51  ;;  %v10207_v17 = vadd.f32 %v20436_v26, %v18463_v51  ;;  %v20439_v31 = vld [vmem:[#allocation182_spill] sm:$0xff]  ;;  %v20440_v18 = vld [vmem:[#allocation183_spill] sm:$0xff]  ;;  %v20441_v22 = vld [vmem:[#allocation184_spill] sm:$0xff] }
 0x728   :  { %9939 = vmatmul.mubr.msk.bf16.gmra.mrb[220].mxu0 %vm4833_vm12, %v12077_v57  ;;  %9971 = vmatmul.mubr.msk.bf16.gmra.mrb[220].mxu1 %vm4833_vm12, %v12077_v57 }
 0x729   :  { %8026 = vmatprep.mubr.bf16.mxu0 %v14632_v19  ;;  %9558 = vst [vmem:[%s19725_s6 + $0xc40] sm:$0xff] %v10078_v15  ;;  %9559 = vst [vmem:[%s19725_s6 + $0xc48] sm:$0xff] %v10079_v54  ;;  %9085 = vmatprep.mubr.bf16.mxu1 %v14632_v19 }
 0x72a   :  { %9560 = vst [vmem:[%s19725_s6 + $0xc50] sm:$0xff] %v10206_v9  ;;  %9561 = vst [vmem:[%s19725_s6 + $0xc58] sm:$0xff] %v10207_v17  ;;  %v18487_v26 = vpop.permute.xlu1 %3970  ;;  %v12078_v17 = vld [vmem:[%s19721_s3 + $0x3d0] ss:$20 sps:$4 sm:$0xff]  }
 0x72b   :  { %20437 = vst [vmem:[#allocation14_spill] sm:$0xff] %v18487_v26  ;;  %v10082_v57 = vadd.f32 %v20438_v16, %v18487_v26  ;;  %v10083_v15 = vadd.f32 %v20439_v31, %v18487_v26  ;;  %v10210_v54 = vadd.f32 %v20440_v18, %v18487_v26  ;;  %v10211_v9 = vadd.f32 %v20441_v22, %v18487_v26  ;;  %v20443_v31 = vld [vmem:[#allocation186_spill] sm:$0xff] }
 0x72d   :  { %9574 = vst [vmem:[%s19725_s6 + $0xcc0] sm:$0xff] %v10082_v57  ;;  %9575 = vst [vmem:[%s19725_s6 + $0xcc8] sm:$0xff] %v10083_v15  ;;  %v20444_v57 = vld [vmem:[#allocation188_spill] sm:$0xff]  ;;  %v20445_v15 = vld [vmem:[#allocation189_spill] sm:$0xff] }
 0x72e   :  { %9576 = vst [vmem:[%s19725_s6 + $0xcd0] sm:$0xff] %v10210_v54  ;;  %9577 = vst [vmem:[%s19725_s6 + $0xcd8] sm:$0xff] %v10211_v9  ;;  %v18514_v16 = vpop.permute.xlu1 %3980  ;;  %v20448_v9 = vld [vmem:[#allocation192_spill] sm:$0xff] }
 0x72f   :  { %20442 = vst [vmem:[#allocation15_spill] sm:$0xff] %v18514_v16  ;;  %v10086_v18 = vadd.f32 %v20443_v31, %v18514_v16  ;;  %v10087_v22 = vadd.f32 %v20444_v57, %v18514_v16  ;;  %v10214_v34 = vadd.f32 %v20445_v15, %v18514_v16  ;;  %v10215_v54 = vadd.f32 %v20446_v3, %v18514_v16  ;;  %v20449_v31 = vld [vmem:[#allocation194_spill] sm:$0xff]  ;;  %v20450_v57 = vld [vmem:[#allocation195_spill] sm:$0xff]  ;;  %v20451_v15 = vld [vmem:[#allocation196_spill] sm:$0xff] }
 0x730   :  { %9940 = vmatmul.mubr.msk.bf16.gmra.mrb[224].mxu0 %vm4833_vm12, %v12078_v17  ;;  %9972 = vmatmul.mubr.msk.bf16.gmra.mrb[224].mxu1 %vm4833_vm12, %v12078_v17  ;;  %v20456_v16 = vld [vmem:[#allocation202_spill] sm:$0xff] }
 0x731   :  { %8036 = vmatprep.mubr.bf16.mxu0 %v14632_v19  ;;  %9590 = vst [vmem:[%s19725_s6 + $0xd40] sm:$0xff] %v10086_v18  ;;  %9591 = vst [vmem:[%s19725_s6 + $0xd48] sm:$0xff] %v10087_v22  ;;  %9095 = vmatprep.mubr.bf16.mxu1 %v14632_v19 }
 0x732   :  { %9592 = vst [vmem:[%s19725_s6 + $0xd50] sm:$0xff] %v10214_v34  ;;  %9593 = vst [vmem:[%s19725_s6 + $0xd58] sm:$0xff] %v10215_v54  ;;  %v18538_v3 = vpop.permute.xlu1 %3990  ;;  %v12079_v54 = vld [vmem:[%s19721_s3 + $0x3f8] ss:$20 sps:$4 sm:$0xff]  }
 0x733   :  { %20447 = vst [vmem:[#allocation25_spill] sm:$0xff] %v18538_v3  ;;  %v10090_v17 = vadd.f32 %v20448_v9, %v18538_v3  ;;  %v10091_v18 = vadd.f32 %v20449_v31, %v18538_v3  ;;  %v10218_v22 = vadd.f32 %v20450_v57, %v18538_v3  ;;  %v10219_v34 = vadd.f32 %v20451_v15, %v18538_v3  ;;  %v20453_v31 = vld [vmem:[#allocation198_spill] sm:$0xff] }
 0x735   :  { %9606 = vst [vmem:[%s19725_s6 + $0xdc0] sm:$0xff] %v10090_v17  ;;  %9607 = vst [vmem:[%s19725_s6 + $0xdc8] sm:$0xff] %v10091_v18  ;;  %v20454_v17 = vld [vmem:[#allocation200_spill] sm:$0xff]  ;;  %v20455_v18 = vld [vmem:[#allocation201_spill] sm:$0xff] }
 0x736   :  { %9608 = vst [vmem:[%s19725_s6 + $0xdd0] sm:$0xff] %v10218_v22  ;;  %9609 = vst [vmem:[%s19725_s6 + $0xdd8] sm:$0xff] %v10219_v34  ;;  %v18565_v9 = vpop.permute.xlu1 %4000  ;;  %v20458_v34 = vld [vmem:[#allocation205_spill] sm:$0xff] }
 0x737   :  { %20452 = vst [vmem:[#allocation24_spill] sm:$0xff] %v18565_v9  ;;  %v10094_v57 = vadd.f32 %v20453_v31, %v18565_v9  ;;  %v10095_v15 = vadd.f32 %v20454_v17, %v18565_v9  ;;  %v10222_v3 = vadd.f32 %v20455_v18, %v18565_v9  ;;  %v10223_v22 = vadd.f32 %v20456_v16, %v18565_v9  ;;  %v20459_v31 = vld [vmem:[#allocation207_spill] sm:$0xff]  ;;  %v20460_v17 = vld [vmem:[#allocation208_spill] sm:$0xff]  ;;  %v20461_v18 = vld [vmem:[#allocation209_spill] sm:$0xff] }
 0x738   :  { %9941 = vmatmul.mubr.msk.bf16.gmra.mrb[228].mxu0 %vm4833_vm12, %v12079_v54  ;;  %9973 = vmatmul.mubr.msk.bf16.gmra.mrb[228].mxu1 %vm4833_vm12, %v12079_v54  ;;  %v20466_v9 = vld [vmem:[#allocation216_spill] sm:$0xff] }
 0x739   :  { %8046 = vmatprep.mubr.bf16.mxu0 %v14632_v19  ;;  %9622 = vst [vmem:[%s19725_s6 + $0xe40] sm:$0xff] %v10094_v57  ;;  %9623 = vst [vmem:[%s19725_s6 + $0xe48] sm:$0xff] %v10095_v15  ;;  %9105 = vmatprep.mubr.bf16.mxu1 %v14632_v19 }
 0x73a   :  { %9624 = vst [vmem:[%s19725_s6 + $0xe50] sm:$0xff] %v10222_v3  ;;  %9625 = vst [vmem:[%s19725_s6 + $0xe58] sm:$0xff] %v10223_v22  ;;  %v18589_v16 = vpop.permute.xlu1 %4010  ;;  %v12080_v22 = vld [vmem:[%s19721_s3 + $0x420] ss:$20 sps:$4 sm:$0xff]  }
 0x73b   :  { %20457 = vst [vmem:[#allocation16_spill] sm:$0xff] %v18589_v16  ;;  %v10098_v54 = vadd.f32 %v20458_v34, %v18589_v16  ;;  %v10099_v57 = vadd.f32 %v20459_v31, %v18589_v16  ;;  %v10226_v15 = vadd.f32 %v20460_v17, %v18589_v16  ;;  %v10227_v3 = vadd.f32 %v20461_v18, %v18589_v16  ;;  %v20463_v31 = vld [vmem:[#allocation212_spill] sm:$0xff] }
 0x73d   :  { %9638 = vst [vmem:[%s19725_s6 + $0xec0] sm:$0xff] %v10098_v54  ;;  %9639 = vst [vmem:[%s19725_s6 + $0xec8] sm:$0xff] %v10099_v57  ;;  %v20464_v54 = vld [vmem:[#allocation214_spill] sm:$0xff]  ;;  %v20465_v57 = vld [vmem:[#allocation215_spill] sm:$0xff] }
 0x73e   :  { %9640 = vst [vmem:[%s19725_s6 + $0xed0] sm:$0xff] %v10226_v15  ;;  %9641 = vst [vmem:[%s19725_s6 + $0xed8] sm:$0xff] %v10227_v3  ;;  %v18616_v34 = vpop.permute.xlu1 %4020 }
 0x73f   :  { %20462 = vst [vmem:[#allocation20_spill] sm:$0xff] %v18616_v34  ;;  %v10102_v17 = vadd.f32 %v20463_v31, %v18616_v34  ;;  %v10103_v18 = vadd.f32 %v20464_v54, %v18616_v34  ;;  %v10230_v16 = vadd.f32 %v20465_v57, %v18616_v34  ;;  %v10231_v15 = vadd.f32 %v20466_v9, %v18616_v34  ;;  %v20470_v34 = vld [vmem:[#allocation223_spill] sm:$0xff] }
 0x740   :  { %9942 = vmatmul.mubr.msk.bf16.gmra.mrb[232].mxu0 %vm4833_vm12, %v12080_v22  ;;  %v7788_v26 = vpop.f32.mrb[128].mxu0  ;;  %9974 = vmatmul.mubr.msk.bf16.gmra.mrb[232].mxu1 %vm4833_vm12, %v12080_v22 }
 0x741   :  { %8056 = vmatprep.mubr.bf16.mxu0 %v14632_v19  ;;  %v10236_v3 = vadd.f32 %v7788_v26, %v17087_v7  ;;  %v7790_v28 = vpop.f32.mrb[129].mxu0  ;;  %9654 = vst [vmem:[%s19725_s6 + $0xf40] sm:$0xff] %v10102_v17  ;;  %9655 = vst [vmem:[%s19725_s6 + $0xf48] sm:$0xff] %v10103_v18  ;;  %9115 = vmatprep.mubr.bf16.mxu1 %v14632_v19  ;;  %v20468_v18 = vld [vmem:[#allocation221_spill] sm:$0xff] }
 0x742   :  { %9656 = vst [vmem:[%s19725_s6 + $0xf50] sm:$0xff] %v10230_v16  ;;  %9657 = vst [vmem:[%s19725_s6 + $0xf58] sm:$0xff] %v10231_v15  ;;  %v10237_v9 = vadd.f32 %v7790_v28, %v17087_v7  ;;  %v7792_v26 = vpop.f32.mrb[130].mxu0  ;;  %v18642_v22 = vpop.permute.xlu1 %4030  ;;  %v20467_v16 = vld [vmem:[#allocation219_spill] sm:$0xff]  ;;  %v20469_v28 = vld [vmem:[#allocation222_spill] sm:$0xff] }
 0x743   :  { %9170 = vst [vmem:[%s19725_s6 + $0x20] sm:$0xff] %v10236_v3  ;;  %v10238_v31 = vadd.f32 %v7792_v26, %v17140_v52  ;;  %v7794_v17 = vpop.f32.mrb[131].mxu0  ;;  %v10106_v54 = vadd.f32 %v20467_v16, %v18642_v22  ;;  %v10107_v57 = vadd.f32 %v20468_v18, %v18642_v22  ;;  %v10234_v15 = vadd.f32 %v20469_v28, %v18642_v22  ;;  %v8847_v3 = vpop.f32.mrb[128].mxu1  ;;  %v12081_v28 = vld [vmem:[%s19721_s3 + $0x448] ss:$20 sps:$4 sm:$0xff]  }
 0x744   :  { %v10235_v51 = vadd.f32 %v20470_v34, %v18642_v22  ;;  %9171 = vst [vmem:[%s19725_s6 + $0x28] sm:$0xff] %v10237_v9  ;;  %v10364_v26 = vadd.f32 %v8847_v3, %v17087_v7  ;;  %v8849_v16 = vpop.f32.mrb[129].mxu1  ;;  %v10239_v18 = vadd.f32 %v7794_v17, %v17140_v52 }
 0x745   :  { %9178 = vst [vmem:[%s19725_s6 + $0x60] sm:$0xff] %v10238_v31  ;;  %9670 = vst [vmem:[%s19725_s6 + $0xfc0] sm:$0xff] %v10106_v54  ;;  %v10365_v34 = vadd.f32 %v8849_v16, %v17087_v7  ;;  %v8851_v9 = vpop.f32.mrb[130].mxu1 }
 0x746   :  { %9671 = vst [vmem:[%s19725_s6 + $0xfc8] sm:$0xff] %v10107_v57  ;;  %9672 = vst [vmem:[%s19725_s6 + $0xfd0] sm:$0xff] %v10234_v15  ;;  %v10366_v31 = vadd.f32 %v8851_v9, %v17140_v52  ;;  %v8853_v17 = vpop.f32.mrb[131].mxu1  ;;  %v12082_v9 = vld [vmem:[%s19721_s3 + $0x470] ss:$20 sps:$4 sm:$0xff]  }
 0x747   :  { %9673 = vst [vmem:[%s19725_s6 + $0xfd8] sm:$0xff] %v10235_v51  ;;  %9172 = vst [vmem:[%s19725_s6 + $0x30] sm:$0xff] %v10364_v26  ;;  %v10367_v7 = vadd.f32 %v8853_v17, %v17140_v52 }
 0x748   :  { %9943 = vmatmul.mubr.msk.bf16.gmra.mrb[236].mxu0 %vm4833_vm12, %v12081_v28  ;;  %9179 = vst [vmem:[%s19725_s6 + $0x68] sm:$0xff] %v10239_v18  ;;  %9173 = vst [vmem:[%s19725_s6 + $0x38] sm:$0xff] %v10365_v34  ;;  %v7798_v51 = vpop.f32.mrb[132].mxu0  ;;  %9975 = vmatmul.mubr.msk.bf16.gmra.mrb[236].mxu1 %vm4833_vm12, %v12081_v28 }
 0x749   :  { %8066 = vmatprep.mubr.bf16.mxu0 %v14632_v19  ;;  %9180 = vst [vmem:[%s19725_s6 + $0x70] sm:$0xff] %v10366_v31  ;;  %v10240_v54 = vadd.f32 %v7798_v51, %v17190_v10  ;;  %v7800_v57 = vpop.f32.mrb[133].mxu0  ;;  %9181 = vst [vmem:[%s19725_s6 + $0x78] sm:$0xff] %v10367_v7  ;;  %9125 = vmatprep.mubr.bf16.mxu1 %v14632_v19 }
 0x74a   :  { %v10241_v15 = vadd.f32 %v7800_v57, %v17190_v10  ;;  %v7802_v3 = vpop.f32.mrb[134].mxu0  ;;  %v8857_v16 = vpop.f32.mrb[132].mxu1 }
 0x74b   :  { %9186 = vst [vmem:[%s19725_s6 + $0xa0] sm:$0xff] %v10240_v54  ;;  %v10242_v52 = vadd.f32 %v7802_v3, %v17243_v53  ;;  %v7804_v26 = vpop.f32.mrb[135].mxu0  ;;  %v10368_v28 = vadd.f32 %v8857_v16, %v17190_v10  ;;  %v8859_v34 = vpop.f32.mrb[133].mxu1 }
 0x74c   :  { %9187 = vst [vmem:[%s19725_s6 + $0xa8] sm:$0xff] %v10241_v15  ;;  %v10243_v18 = vadd.f32 %v7804_v26, %v17243_v53  ;;  %v10369_v31 = vadd.f32 %v8859_v34, %v17190_v10  ;;  %v8861_v17 = vpop.f32.mrb[134].mxu1 }
 0x74d   :  { %9194 = vst [vmem:[%s19725_s6 + $0xe0] sm:$0xff] %v10242_v52  ;;  %9188 = vst [vmem:[%s19725_s6 + $0xb0] sm:$0xff] %v10368_v28  ;;  %v10370_v7 = vadd.f32 %v8861_v17, %v17243_v53  ;;  %v8863_v51 = vpop.f32.mrb[135].mxu1 }
 0x74e   :  { %9195 = vst [vmem:[%s19725_s6 + $0xe8] sm:$0xff] %v10243_v18  ;;  %9189 = vst [vmem:[%s19725_s6 + $0xb8] sm:$0xff] %v10369_v31  ;;  %v10371_v10 = vadd.f32 %v8863_v51, %v17243_v53 }
 0x74f   :  { %9196 = vst [vmem:[%s19725_s6 + $0xf0] sm:$0xff] %v10370_v7 }
 0x750   :  { %9944 = vmatmul.mubr.msk.bf16.gmra.mrb[240].mxu0 %vm4833_vm12, %v12082_v9  ;;  %v7808_v54 = vpop.f32.mrb[136].mxu0  ;;  %9976 = vmatmul.mubr.msk.bf16.gmra.mrb[240].mxu1 %vm4833_vm12, %v12082_v9  ;;  %9197 = vst [vmem:[%s19725_s6 + $0xf8] sm:$0xff] %v10371_v10  ;;  %v12083_v9 = vld [vmem:[%s19721_s3 + $0x498] ss:$20 sps:$4 sm:$0xff]  }
 0x751   :  { %8076 = vmatprep.mubr.bf16.mxu0 %v14632_v19  ;;  %v10244_v57 = vadd.f32 %v7808_v54, %v17293_v30  ;;  %v7810_v15 = vpop.f32.mrb[137].mxu0  ;;  %9135 = vmatprep.mubr.bf16.mxu1 %v14632_v19 }
 0x752   :  { %v10245_v3 = vadd.f32 %v7810_v15, %v17293_v30  ;;  %v7812_v52 = vpop.f32.mrb[138].mxu0  ;;  %v8867_v16 = vpop.f32.mrb[136].mxu1 }
 0x753   :  { %9202 = vst [vmem:[%s19725_s6 + $0x120] sm:$0xff] %v10244_v57  ;;  %v10246_v53 = vadd.f32 %v7812_v52, %v17346_v25  ;;  %v7814_v26 = vpop.f32.mrb[139].mxu0  ;;  %v10372_v28 = vadd.f32 %v8867_v16, %v17293_v30  ;;  %v8869_v34 = vpop.f32.mrb[137].mxu1 }
 0x754   :  { %9203 = vst [vmem:[%s19725_s6 + $0x128] sm:$0xff] %v10245_v3  ;;  %v10247_v18 = vadd.f32 %v7814_v26, %v17346_v25  ;;  %v10373_v31 = vadd.f32 %v8869_v34, %v17293_v30  ;;  %v8871_v17 = vpop.f32.mrb[138].mxu1 }
 0x755   :  { %9210 = vst [vmem:[%s19725_s6 + $0x160] sm:$0xff] %v10246_v53  ;;  %9204 = vst [vmem:[%s19725_s6 + $0x130] sm:$0xff] %v10372_v28  ;;  %v10374_v7 = vadd.f32 %v8871_v17, %v17346_v25  ;;  %v8873_v51 = vpop.f32.mrb[139].mxu1  ;;  %v12084_v28 = vld [vmem:[%s19721_s3 + $0x4c0] ss:$20 sps:$4 sm:$0xff]  }
 0x756   :  { %9211 = vst [vmem:[%s19725_s6 + $0x168] sm:$0xff] %v10247_v18  ;;  %9205 = vst [vmem:[%s19725_s6 + $0x138] sm:$0xff] %v10373_v31  ;;  %v10375_v30 = vadd.f32 %v8873_v51, %v17346_v25 }
 0x757   :  { %9212 = vst [vmem:[%s19725_s6 + $0x170] sm:$0xff] %v10374_v7 }
 0x758   :  { %9945 = vmatmul.mubr.msk.bf16.gmra.mrb[244].mxu0 %vm4833_vm12, %v12083_v9  ;;  %v7818_v10 = vpop.f32.mrb[140].mxu0  ;;  %9977 = vmatmul.mubr.msk.bf16.gmra.mrb[244].mxu1 %vm4833_vm12, %v12083_v9  ;;  %9213 = vst [vmem:[%s19725_s6 + $0x178] sm:$0xff] %v10375_v30 }
 0x759   :  { %8086 = vmatprep.mubr.bf16.mxu0 %v14632_v19  ;;  %v10248_v54 = vadd.f32 %v7818_v10, %v17396_v35  ;;  %v7820_v57 = vpop.f32.mrb[141].mxu0  ;;  %9145 = vmatprep.mubr.bf16.mxu1 %v14632_v19 }
 0x75a   :  { %v10249_v15 = vadd.f32 %v7820_v57, %v17396_v35  ;;  %v7822_v3 = vpop.f32.mrb[142].mxu0  ;;  %v8877_v53 = vpop.f32.mrb[140].mxu1 }
 0x75b   :  { %9218 = vst [vmem:[%s19725_s6 + $0x1a0] sm:$0xff] %v10248_v54  ;;  %v10250_v25 = vadd.f32 %v7822_v3, %v17449_v45  ;;  %v7824_v52 = vpop.f32.mrb[143].mxu0  ;;  %v10376_v16 = vadd.f32 %v8877_v53, %v17396_v35  ;;  %v8879_v18 = vpop.f32.mrb[141].mxu1 }
 0x75c   :  { %9219 = vst [vmem:[%s19725_s6 + $0x1a8] sm:$0xff] %v10249_v15  ;;  %v10251_v26 = vadd.f32 %v7824_v52, %v17449_v45  ;;  %v10377_v34 = vadd.f32 %v8879_v18, %v17396_v35  ;;  %v8881_v9 = vpop.f32.mrb[142].mxu1  ;;  %v12085_v52 = vld [vmem:[%s19721_s3 + $0x4e8] ss:$20 sps:$4 sm:$0xff]  }
 0x75d   :  { %9226 = vst [vmem:[%s19725_s6 + $0x1e0] sm:$0xff] %v10250_v25  ;;  %9220 = vst [vmem:[%s19725_s6 + $0x1b0] sm:$0xff] %v10376_v16  ;;  %v10378_v31 = vadd.f32 %v8881_v9, %v17449_v45  ;;  %v8883_v17 = vpop.f32.mrb[143].mxu1 }
 0x75e   :  { %9227 = vst [vmem:[%s19725_s6 + $0x1e8] sm:$0xff] %v10251_v26  ;;  %9221 = vst [vmem:[%s19725_s6 + $0x1b8] sm:$0xff] %v10377_v34  ;;  %v10379_v35 = vadd.f32 %v8883_v17, %v17449_v45 }
 0x75f   :  { %9228 = vst [vmem:[%s19725_s6 + $0x1f0] sm:$0xff] %v10378_v31 }
 0x760   :  { %9946 = vmatmul.mubr.msk.bf16.gmra.mrb[248].mxu0 %vm4833_vm12, %v12084_v28  ;;  %v7828_v7 = vpop.f32.mrb[144].mxu0  ;;  %9978 = vmatmul.mubr.msk.bf16.gmra.mrb[248].mxu1 %vm4833_vm12, %v12084_v28  ;;  %9229 = vst [vmem:[%s19725_s6 + $0x1f8] sm:$0xff] %v10379_v35 }
 0x761   :  { %8096 = vmatprep.mubr.bf16.mxu0 %v14632_v19  ;;  %v10252_v51 = vadd.f32 %v7828_v7, %v17085_v39  ;;  %v7830_v30 = vpop.f32.mrb[145].mxu0  ;;  %9155 = vmatprep.mubr.bf16.mxu1 %v14632_v19 }
 0x762   :  { %v10253_v10 = vadd.f32 %v7830_v30, %v17085_v39  ;;  %v7832_v54 = vpop.f32.mrb[146].mxu0  ;;  %v8887_v15 = vpop.f32.mrb[144].mxu1 }
 0x763   :  { %9234 = vst [vmem:[%s19725_s6 + $0x220] sm:$0xff] %v10252_v51  ;;  %v10254_v45 = vadd.f32 %v7832_v54, %v17496_v0  ;;  %v7834_v57 = vpop.f32.mrb[147].mxu0  ;;  %v10380_v25 = vadd.f32 %v8887_v15, %v17085_v39  ;;  %v8889_v19 = vpop.f32.mrb[145].mxu1 }
 0x764   :  { %9235 = vst [vmem:[%s19725_s6 + $0x228] sm:$0xff] %v10253_v10  ;;  %v10255_v3 = vadd.f32 %v7834_v57, %v17496_v0  ;;  %v10381_v53 = vadd.f32 %v8889_v19, %v17085_v39  ;;  %v8891_v26 = vpop.f32.mrb[146].mxu1 }
 0x765   :  { %9242 = vst [vmem:[%s19725_s6 + $0x260] sm:$0xff] %v10254_v45  ;;  %9236 = vst [vmem:[%s19725_s6 + $0x230] sm:$0xff] %v10380_v25  ;;  %v10382_v16 = vadd.f32 %v8891_v26, %v17496_v0  ;;  %v8893_v18 = vpop.f32.mrb[147].mxu1 }
 0x766   :  { %9243 = vst [vmem:[%s19725_s6 + $0x268] sm:$0xff] %v10255_v3  ;;  %9237 = vst [vmem:[%s19725_s6 + $0x238] sm:$0xff] %v10381_v53  ;;  %v10383_v28 = vadd.f32 %v8893_v18, %v17496_v0 }
 0x767   :  { %9244 = vst [vmem:[%s19725_s6 + $0x270] sm:$0xff] %v10382_v16 }
 0x768   :  { %9947 = vmatmul.mubr.msk.bf16.gmra.mrb[252].mxu0 %vm4833_vm12, %v12085_v52  ;;  %v7838_v34 = vpop.f32.mrb[148].mxu0  ;;  %9979 = vmatmul.mubr.msk.bf16.gmra.mrb[252].mxu1 %vm4833_vm12, %v12085_v52  ;;  %9245 = vst [vmem:[%s19725_s6 + $0x278] sm:$0xff] %v10383_v28 }
 0x769   :  { %v10256_v39 = vadd.f32 %v7838_v34, %v17545_v36  ;;  %v7840_v9 = vpop.f32.mrb[149].mxu0 }
 0x76a   :  { %v10257_v31 = vadd.f32 %v7840_v9, %v17545_v36  ;;  %v7842_v17 = vpop.f32.mrb[150].mxu0  ;;  %v8897_v7 = vpop.f32.mrb[148].mxu1 }
 0x76b   :  { %9250 = vst [vmem:[%s19725_s6 + $0x2a0] sm:$0xff] %v10256_v39  ;;  %v10258_v0 = vadd.f32 %v7842_v17, %v17591_v38  ;;  %v7844_v35 = vpop.f32.mrb[151].mxu0  ;;  %v10384_v30 = vadd.f32 %v8897_v7, %v17545_v36  ;;  %v8899_v10 = vpop.f32.mrb[149].mxu1 }
 0x76c   :  { %9251 = vst [vmem:[%s19725_s6 + $0x2a8] sm:$0xff] %v10257_v31  ;;  %v10259_v51 = vadd.f32 %v7844_v35, %v17591_v38  ;;  %v10385_v54 = vadd.f32 %v8899_v10, %v17545_v36  ;;  %v8901_v45 = vpop.f32.mrb[150].mxu1 }
 0x76d   :  { %9258 = vst [vmem:[%s19725_s6 + $0x2e0] sm:$0xff] %v10258_v0  ;;  %9252 = vst [vmem:[%s19725_s6 + $0x2b0] sm:$0xff] %v10384_v30  ;;  %v10386_v57 = vadd.f32 %v8901_v45, %v17591_v38  ;;  %v8903_v15 = vpop.f32.mrb[151].mxu1 }
 0x76e   :  { %9259 = vst [vmem:[%s19725_s6 + $0x2e8] sm:$0xff] %v10259_v51  ;;  %9253 = vst [vmem:[%s19725_s6 + $0x2b8] sm:$0xff] %v10385_v54  ;;  %v10387_v3 = vadd.f32 %v8903_v15, %v17591_v38 }
 0x76f   :  { %9260 = vst [vmem:[%s19725_s6 + $0x2f0] sm:$0xff] %v10386_v57 }
 0x770   :  { %v7848_v25 = vpop.f32.mrb[152].mxu0  ;;  %9261 = vst [vmem:[%s19725_s6 + $0x2f8] sm:$0xff] %v10387_v3 }
 0x771   :  { %v10260_v36 = vadd.f32 %v7848_v25, %v17640_v32  ;;  %v7850_v19 = vpop.f32.mrb[153].mxu0 }
 0x772   :  { %v10261_v52 = vadd.f32 %v7850_v19, %v17640_v32  ;;  %v7852_v53 = vpop.f32.mrb[154].mxu0  ;;  %v8907_v16 = vpop.f32.mrb[152].mxu1 }
 0x773   :  { %9266 = vst [vmem:[%s19725_s6 + $0x320] sm:$0xff] %v10260_v36  ;;  %v10262_v38 = vadd.f32 %v7852_v53, %v17686_v46  ;;  %v7854_v26 = vpop.f32.mrb[155].mxu0  ;;  %v10388_v28 = vadd.f32 %v8907_v16, %v17640_v32  ;;  %v8909_v34 = vpop.f32.mrb[153].mxu1 }
 0x774   :  { %9267 = vst [vmem:[%s19725_s6 + $0x328] sm:$0xff] %v10261_v52  ;;  %v10263_v18 = vadd.f32 %v7854_v26, %v17686_v46  ;;  %v10389_v39 = vadd.f32 %v8909_v34, %v17640_v32  ;;  %v8911_v9 = vpop.f32.mrb[154].mxu1 }
 0x775   :  { %9274 = vst [vmem:[%s19725_s6 + $0x360] sm:$0xff] %v10262_v38  ;;  %9268 = vst [vmem:[%s19725_s6 + $0x330] sm:$0xff] %v10388_v28  ;;  %v10390_v31 = vadd.f32 %v8911_v9, %v17686_v46  ;;  %v8913_v17 = vpop.f32.mrb[155].mxu1 }
 0x776   :  { %9275 = vst [vmem:[%s19725_s6 + $0x368] sm:$0xff] %v10263_v18  ;;  %9269 = vst [vmem:[%s19725_s6 + $0x338] sm:$0xff] %v10389_v39  ;;  %v10391_v0 = vadd.f32 %v8913_v17, %v17686_v46 }
 0x777   :  { %9276 = vst [vmem:[%s19725_s6 + $0x370] sm:$0xff] %v10390_v31 }
 0x778   :  { %v7858_v35 = vpop.f32.mrb[156].mxu0  ;;  %9277 = vst [vmem:[%s19725_s6 + $0x378] sm:$0xff] %v10391_v0 }
 0x779   :  { %v10264_v32 = vadd.f32 %v7858_v35, %v17735_v47  ;;  %v7860_v7 = vpop.f32.mrb[157].mxu0 }
 0x77a   :  { %v10265_v51 = vadd.f32 %v7860_v7, %v17735_v47  ;;  %v7862_v30 = vpop.f32.mrb[158].mxu0 }
 0x77b   :  { %9282 = vst [vmem:[%s19725_s6 + $0x3a0] sm:$0xff] %v10264_v32  ;;  %v10266_v46 = vadd.f32 %v7862_v30, %v17781_v12  ;;  %v7864_v10 = vpop.f32.mrb[159].mxu0  ;;  %v8917_v54 = vpop.f32.mrb[156].mxu1 }
 0x77c   :  { %9283 = vst [vmem:[%s19725_s6 + $0x3a8] sm:$0xff] %v10265_v51  ;;  %v10267_v45 = vadd.f32 %v7864_v10, %v17781_v12  ;;  %v10392_v57 = vadd.f32 %v8917_v54, %v17735_v47  ;;  %v8919_v15 = vpop.f32.mrb[157].mxu1 }
 0x77d   :  { %9290 = vst [vmem:[%s19725_s6 + $0x3e0] sm:$0xff] %v10266_v46  ;;  %v10393_v3 = vadd.f32 %v8919_v15, %v17735_v47  ;;  %v8921_v25 = vpop.f32.mrb[158].mxu1 }
 0x77e   :  { %9291 = vst [vmem:[%s19725_s6 + $0x3e8] sm:$0xff] %v10267_v45  ;;  %9284 = vst [vmem:[%s19725_s6 + $0x3b0] sm:$0xff] %v10392_v57  ;;  %v10394_v36 = vadd.f32 %v8921_v25, %v17781_v12  ;;  %v8923_v19 = vpop.f32.mrb[159].mxu1 }
 0x77f   :  { %9285 = vst [vmem:[%s19725_s6 + $0x3b8] sm:$0xff] %v10393_v3  ;;  %v10395_v52 = vadd.f32 %v8923_v19, %v17781_v12 }
 0x780   :  { %v7868_v53 = vpop.f32.mrb[160].mxu0  ;;  %9292 = vst [vmem:[%s19725_s6 + $0x3f0] sm:$0xff] %v10394_v36 }
 0x781   :  { %v10268_v47 = vadd.f32 %v7868_v53, %v17830_v11  ;;  %v7870_v38 = vpop.f32.mrb[161].mxu0  ;;  %9293 = vst [vmem:[%s19725_s6 + $0x3f8] sm:$0xff] %v10395_v52 }
 0x782   :  { %v10269_v26 = vadd.f32 %v7870_v38, %v17830_v11  ;;  %v7872_v16 = vpop.f32.mrb[162].mxu0 }
 0x783   :  { %9298 = vst [vmem:[%s19725_s6 + $0x420] sm:$0xff] %v10268_v47  ;;  %v10270_v12 = vadd.f32 %v7872_v16, %v17876_v44  ;;  %v7874_v18 = vpop.f32.mrb[163].mxu0  ;;  %v8927_v28 = vpop.f32.mrb[160].mxu1 }
 0x784   :  { %9299 = vst [vmem:[%s19725_s6 + $0x428] sm:$0xff] %v10269_v26  ;;  %v10271_v34 = vadd.f32 %v7874_v18, %v17876_v44  ;;  %v10396_v39 = vadd.f32 %v8927_v28, %v17830_v11  ;;  %v8929_v9 = vpop.f32.mrb[161].mxu1 }
 0x785   :  { %9306 = vst [vmem:[%s19725_s6 + $0x460] sm:$0xff] %v10270_v12  ;;  %v10397_v31 = vadd.f32 %v8929_v9, %v17830_v11  ;;  %v8931_v17 = vpop.f32.mrb[162].mxu1 }
 0x786   :  { %9307 = vst [vmem:[%s19725_s6 + $0x468] sm:$0xff] %v10271_v34  ;;  %9300 = vst [vmem:[%s19725_s6 + $0x430] sm:$0xff] %v10396_v39  ;;  %v10398_v0 = vadd.f32 %v8931_v17, %v17876_v44  ;;  %v8933_v35 = vpop.f32.mrb[163].mxu1 }
 0x787   :  { %9301 = vst [vmem:[%s19725_s6 + $0x438] sm:$0xff] %v10397_v31  ;;  %v10399_v32 = vadd.f32 %v8933_v35, %v17876_v44 }
 0x788   :  { %v7878_v7 = vpop.f32.mrb[164].mxu0  ;;  %9308 = vst [vmem:[%s19725_s6 + $0x470] sm:$0xff] %v10398_v0 }
 0x789   :  { %v10272_v11 = vadd.f32 %v7878_v7, %v17925_v41  ;;  %v7880_v51 = vpop.f32.mrb[165].mxu0  ;;  %9309 = vst [vmem:[%s19725_s6 + $0x478] sm:$0xff] %v10399_v32 }
 0x78a   :  { %v10273_v30 = vadd.f32 %v7880_v51, %v17925_v41  ;;  %v7882_v46 = vpop.f32.mrb[166].mxu0 }
 0x78b   :  { %9314 = vst [vmem:[%s19725_s6 + $0x4a0] sm:$0xff] %v10272_v11  ;;  %v10274_v44 = vadd.f32 %v7882_v46, %v17971_v43  ;;  %v7884_v10 = vpop.f32.mrb[167].mxu0  ;;  %v8937_v54 = vpop.f32.mrb[164].mxu1 }
 0x78c   :  { %9315 = vst [vmem:[%s19725_s6 + $0x4a8] sm:$0xff] %v10273_v30  ;;  %v10275_v45 = vadd.f32 %v7884_v10, %v17971_v43  ;;  %v10400_v57 = vadd.f32 %v8937_v54, %v17925_v41  ;;  %v8939_v15 = vpop.f32.mrb[165].mxu1 }
 0x78d   :  { %9322 = vst [vmem:[%s19725_s6 + $0x4e0] sm:$0xff] %v10274_v44  ;;  %v10401_v3 = vadd.f32 %v8939_v15, %v17925_v41  ;;  %v8941_v25 = vpop.f32.mrb[166].mxu1 }
 0x78e   :  { %9323 = vst [vmem:[%s19725_s6 + $0x4e8] sm:$0xff] %v10275_v45  ;;  %9316 = vst [vmem:[%s19725_s6 + $0x4b0] sm:$0xff] %v10400_v57  ;;  %v10402_v36 = vadd.f32 %v8941_v25, %v17971_v43  ;;  %v8943_v19 = vpop.f32.mrb[167].mxu1 }
 0x78f   :  { %9317 = vst [vmem:[%s19725_s6 + $0x4b8] sm:$0xff] %v10401_v3  ;;  %v10403_v52 = vadd.f32 %v8943_v19, %v17971_v43 }
 0x790   :  { %v7888_v53 = vpop.f32.mrb[168].mxu0  ;;  %9324 = vst [vmem:[%s19725_s6 + $0x4f0] sm:$0xff] %v10402_v36 }
 0x791   :  { %v10276_v41 = vadd.f32 %v7888_v53, %v17138_v49  ;;  %v7890_v47 = vpop.f32.mrb[169].mxu0  ;;  %9325 = vst [vmem:[%s19725_s6 + $0x4f8] sm:$0xff] %v10403_v52 }
 0x792   :  { %v10277_v38 = vadd.f32 %v7890_v47, %v17138_v49  ;;  %v7892_v26 = vpop.f32.mrb[170].mxu0 }
 0x793   :  { %9330 = vst [vmem:[%s19725_s6 + $0x520] sm:$0xff] %v10276_v41  ;;  %v10278_v43 = vadd.f32 %v7892_v26, %v18020_v33  ;;  %v7894_v16 = vpop.f32.mrb[171].mxu0  ;;  %v8947_v12 = vpop.f32.mrb[168].mxu1 }
 0x794   :  { %9331 = vst [vmem:[%s19725_s6 + $0x528] sm:$0xff] %v10277_v38  ;;  %v10279_v18 = vadd.f32 %v7894_v16, %v18020_v33  ;;  %v10404_v28 = vadd.f32 %v8947_v12, %v17138_v49  ;;  %v8949_v34 = vpop.f32.mrb[169].mxu1 }
 0x795   :  { %9338 = vst [vmem:[%s19725_s6 + $0x560] sm:$0xff] %v10278_v43  ;;  %v10405_v39 = vadd.f32 %v8949_v34, %v17138_v49  ;;  %v8951_v9 = vpop.f32.mrb[170].mxu1 }
 0x796   :  { %9339 = vst [vmem:[%s19725_s6 + $0x568] sm:$0xff] %v10279_v18  ;;  %9332 = vst [vmem:[%s19725_s6 + $0x530] sm:$0xff] %v10404_v28  ;;  %v10406_v31 = vadd.f32 %v8951_v9, %v18020_v33  ;;  %v8953_v17 = vpop.f32.mrb[171].mxu1 }
 0x797   :  { %9333 = vst [vmem:[%s19725_s6 + $0x538] sm:$0xff] %v10405_v39  ;;  %v10407_v0 = vadd.f32 %v8953_v17, %v18020_v33 }
 0x798   :  { %v7898_v35 = vpop.f32.mrb[172].mxu0  ;;  %9340 = vst [vmem:[%s19725_s6 + $0x570] sm:$0xff] %v10406_v31 }
 0x799   :  { %v10280_v49 = vadd.f32 %v7898_v35, %v17188_v55  ;;  %v7900_v32 = vpop.f32.mrb[173].mxu0  ;;  %9341 = vst [vmem:[%s19725_s6 + $0x578] sm:$0xff] %v10407_v0 }
 0x79a   :  { %v10281_v7 = vadd.f32 %v7900_v32, %v17188_v55  ;;  %v7902_v11 = vpop.f32.mrb[174].mxu0 }
 0x79b   :  { %9346 = vst [vmem:[%s19725_s6 + $0x5a0] sm:$0xff] %v10280_v49  ;;  %v10282_v33 = vadd.f32 %v7902_v11, %v18066_v29  ;;  %v7904_v51 = vpop.f32.mrb[175].mxu0  ;;  %v8957_v30 = vpop.f32.mrb[172].mxu1 }
 0x79c   :  { %9347 = vst [vmem:[%s19725_s6 + $0x5a8] sm:$0xff] %v10281_v7  ;;  %v10283_v46 = vadd.f32 %v7904_v51, %v18066_v29  ;;  %v10408_v44 = vadd.f32 %v8957_v30, %v17188_v55  ;;  %v8959_v10 = vpop.f32.mrb[173].mxu1 }
 0x79d   :  { %9354 = vst [vmem:[%s19725_s6 + $0x5e0] sm:$0xff] %v10282_v33  ;;  %v10409_v54 = vadd.f32 %v8959_v10, %v17188_v55  ;;  %v8961_v45 = vpop.f32.mrb[174].mxu1 }
 0x79e   :  { %9355 = vst [vmem:[%s19725_s6 + $0x5e8] sm:$0xff] %v10283_v46  ;;  %9348 = vst [vmem:[%s19725_s6 + $0x5b0] sm:$0xff] %v10408_v44  ;;  %v10410_v57 = vadd.f32 %v8961_v45, %v18066_v29  ;;  %v8963_v15 = vpop.f32.mrb[175].mxu1 }
 0x79f   :  { %9349 = vst [vmem:[%s19725_s6 + $0x5b8] sm:$0xff] %v10409_v54  ;;  %v10411_v3 = vadd.f32 %v8963_v15, %v18066_v29 }
 0x7a0   :  { %v7908_v25 = vpop.f32.mrb[176].mxu0  ;;  %9356 = vst [vmem:[%s19725_s6 + $0x5f0] sm:$0xff] %v10410_v57 }
 0x7a1   :  { %v10284_v55 = vadd.f32 %v7908_v25, %v17241_v37  ;;  %v7910_v36 = vpop.f32.mrb[177].mxu0  ;;  %9357 = vst [vmem:[%s19725_s6 + $0x5f8] sm:$0xff] %v10411_v3 }
 0x7a2   :  { %v10285_v19 = vadd.f32 %v7910_v36, %v17241_v37  ;;  %v7912_v52 = vpop.f32.mrb[178].mxu0 }
 0x7a3   :  { %9362 = vst [vmem:[%s19725_s6 + $0x620] sm:$0xff] %v10284_v55  ;;  %v10286_v29 = vadd.f32 %v7912_v52, %v18115_v63  ;;  %v7914_v53 = vpop.f32.mrb[179].mxu0  ;;  %v8967_v41 = vpop.f32.mrb[176].mxu1 }
 0x7a4   :  { %9363 = vst [vmem:[%s19725_s6 + $0x628] sm:$0xff] %v10285_v19  ;;  %v10287_v47 = vadd.f32 %v7914_v53, %v18115_v63  ;;  %v10412_v38 = vadd.f32 %v8967_v41, %v17241_v37  ;;  %v8969_v26 = vpop.f32.mrb[177].mxu1 }
 0x7a5   :  { %9370 = vst [vmem:[%s19725_s6 + $0x660] sm:$0xff] %v10286_v29  ;;  %v10413_v43 = vadd.f32 %v8969_v26, %v17241_v37  ;;  %v8971_v16 = vpop.f32.mrb[178].mxu1 }
 0x7a6   :  { %9371 = vst [vmem:[%s19725_s6 + $0x668] sm:$0xff] %v10287_v47  ;;  %9364 = vst [vmem:[%s19725_s6 + $0x630] sm:$0xff] %v10412_v38  ;;  %v10414_v12 = vadd.f32 %v8971_v16, %v18115_v63  ;;  %v8973_v18 = vpop.f32.mrb[179].mxu1 }
 0x7a7   :  { %9365 = vst [vmem:[%s19725_s6 + $0x638] sm:$0xff] %v10413_v43  ;;  %v10415_v28 = vadd.f32 %v8973_v18, %v18115_v63 }
 0x7a8   :  { %v7918_v34 = vpop.f32.mrb[180].mxu0  ;;  %9372 = vst [vmem:[%s19725_s6 + $0x670] sm:$0xff] %v10414_v12 }
 0x7a9   :  { %v10288_v37 = vadd.f32 %v7918_v34, %v17291_v42  ;;  %v7920_v39 = vpop.f32.mrb[181].mxu0  ;;  %9373 = vst [vmem:[%s19725_s6 + $0x678] sm:$0xff] %v10415_v28 }
 0x7aa   :  { %v10289_v9 = vadd.f32 %v7920_v39, %v17291_v42  ;;  %v7922_v31 = vpop.f32.mrb[182].mxu0 }
 0x7ab   :  { %9378 = vst [vmem:[%s19725_s6 + $0x6a0] sm:$0xff] %v10288_v37  ;;  %v10290_v63 = vadd.f32 %v7922_v31, %v18161_v40  ;;  %v7924_v17 = vpop.f32.mrb[183].mxu0  ;;  %v8977_v0 = vpop.f32.mrb[180].mxu1 }
 0x7ac   :  { %9379 = vst [vmem:[%s19725_s6 + $0x6a8] sm:$0xff] %v10289_v9  ;;  %v10291_v35 = vadd.f32 %v7924_v17, %v18161_v40  ;;  %v10416_v49 = vadd.f32 %v8977_v0, %v17291_v42  ;;  %v8979_v32 = vpop.f32.mrb[181].mxu1 }
 0x7ad   :  { %9386 = vst [vmem:[%s19725_s6 + $0x6e0] sm:$0xff] %v10290_v63  ;;  %v10417_v7 = vadd.f32 %v8979_v32, %v17291_v42  ;;  %v8981_v11 = vpop.f32.mrb[182].mxu1 }
 0x7ae   :  { %9387 = vst [vmem:[%s19725_s6 + $0x6e8] sm:$0xff] %v10291_v35  ;;  %9380 = vst [vmem:[%s19725_s6 + $0x6b0] sm:$0xff] %v10416_v49  ;;  %v10418_v33 = vadd.f32 %v8981_v11, %v18161_v40  ;;  %v8983_v51 = vpop.f32.mrb[183].mxu1 }
 0x7af   :  { %9381 = vst [vmem:[%s19725_s6 + $0x6b8] sm:$0xff] %v10417_v7  ;;  %v10419_v30 = vadd.f32 %v8983_v51, %v18161_v40 }
 0x7b0   :  { %v7928_v46 = vpop.f32.mrb[184].mxu0  ;;  %9388 = vst [vmem:[%s19725_s6 + $0x6f0] sm:$0xff] %v10418_v33 }
 0x7b1   :  { %v10292_v42 = vadd.f32 %v7928_v46, %v17344_v8  ;;  %v7930_v44 = vpop.f32.mrb[185].mxu0  ;;  %9389 = vst [vmem:[%s19725_s6 + $0x6f8] sm:$0xff] %v10419_v30 }
 0x7b2   :  { %v10293_v10 = vadd.f32 %v7930_v44, %v17344_v8  ;;  %v7932_v54 = vpop.f32.mrb[186].mxu0 }
 0x7b3   :  { %9394 = vst [vmem:[%s19725_s6 + $0x720] sm:$0xff] %v10292_v42  ;;  %v10294_v40 = vadd.f32 %v7932_v54, %v18208_v60  ;;  %v7934_v45 = vpop.f32.mrb[187].mxu0  ;;  %v8987_v57 = vpop.f32.mrb[184].mxu1 }
 0x7b4   :  { %9395 = vst [vmem:[%s19725_s6 + $0x728] sm:$0xff] %v10293_v10  ;;  %v10295_v15 = vadd.f32 %v7934_v45, %v18208_v60  ;;  %v10420_v3 = vadd.f32 %v8987_v57, %v17344_v8  ;;  %v8989_v25 = vpop.f32.mrb[185].mxu1 }
 0x7b5   :  { %9402 = vst [vmem:[%s19725_s6 + $0x760] sm:$0xff] %v10294_v40  ;;  %v10421_v55 = vadd.f32 %v8989_v25, %v17344_v8  ;;  %v8991_v36 = vpop.f32.mrb[186].mxu1 }
 0x7b6   :  { %9403 = vst [vmem:[%s19725_s6 + $0x768] sm:$0xff] %v10295_v15  ;;  %9396 = vst [vmem:[%s19725_s6 + $0x730] sm:$0xff] %v10420_v3  ;;  %v10422_v19 = vadd.f32 %v8991_v36, %v18208_v60  ;;  %v8993_v52 = vpop.f32.mrb[187].mxu1 }
 0x7b7   :  { %9397 = vst [vmem:[%s19725_s6 + $0x738] sm:$0xff] %v10421_v55  ;;  %v10423_v29 = vadd.f32 %v8993_v52, %v18208_v60 }
 0x7b8   :  { %v7938_v53 = vpop.f32.mrb[188].mxu0  ;;  %9404 = vst [vmem:[%s19725_s6 + $0x770] sm:$0xff] %v10422_v19 }
 0x7b9   :  { %v10296_v8 = vadd.f32 %v7938_v53, %v17394_v13  ;;  %v7940_v41 = vpop.f32.mrb[189].mxu0  ;;  %9405 = vst [vmem:[%s19725_s6 + $0x778] sm:$0xff] %v10423_v29 }
 0x7ba   :  { %v10297_v47 = vadd.f32 %v7940_v41, %v17394_v13  ;;  %v7942_v38 = vpop.f32.mrb[190].mxu0 }
 0x7bb   :  { %9410 = vst [vmem:[%s19725_s6 + $0x7a0] sm:$0xff] %v10296_v8  ;;  %v10298_v60 = vadd.f32 %v7942_v38, %v18232_v2  ;;  %v7944_v26 = vpop.f32.mrb[191].mxu0  ;;  %v8997_v43 = vpop.f32.mrb[188].mxu1 }
 0x7bc   :  { %9411 = vst [vmem:[%s19725_s6 + $0x7a8] sm:$0xff] %v10297_v47  ;;  %v10299_v16 = vadd.f32 %v7944_v26, %v18232_v2  ;;  %v10424_v12 = vadd.f32 %v8997_v43, %v17394_v13  ;;  %v8999_v18 = vpop.f32.mrb[189].mxu1 }
 0x7bd   :  { %9418 = vst [vmem:[%s19725_s6 + $0x7e0] sm:$0xff] %v10298_v60  ;;  %v10425_v28 = vadd.f32 %v8999_v18, %v17394_v13  ;;  %v9001_v34 = vpop.f32.mrb[190].mxu1 }
 0x7be   :  { %9419 = vst [vmem:[%s19725_s6 + $0x7e8] sm:$0xff] %v10299_v16  ;;  %9412 = vst [vmem:[%s19725_s6 + $0x7b0] sm:$0xff] %v10424_v12  ;;  %v10426_v37 = vadd.f32 %v9001_v34, %v18232_v2  ;;  %v9003_v39 = vpop.f32.mrb[191].mxu1 }
 0x7bf   :  { %9413 = vst [vmem:[%s19725_s6 + $0x7b8] sm:$0xff] %v10425_v28  ;;  %v10427_v9 = vadd.f32 %v9003_v39, %v18232_v2 }
 0x7c0   :  { %v7948_v31 = vpop.f32.mrb[192].mxu0  ;;  %9420 = vst [vmem:[%s19725_s6 + $0x7f0] sm:$0xff] %v10426_v37 }
 0x7c1   :  { %v10300_v13 = vadd.f32 %v7948_v31, %v17447_v23  ;;  %v7950_v63 = vpop.f32.mrb[193].mxu0  ;;  %9421 = vst [vmem:[%s19725_s6 + $0x7f8] sm:$0xff] %v10427_v9 }
 0x7c2   :  { %v10301_v17 = vadd.f32 %v7950_v63, %v17447_v23  ;;  %v7952_v0 = vpop.f32.mrb[194].mxu0 }
 0x7c3   :  { %9426 = vst [vmem:[%s19725_s6 + $0x820] sm:$0xff] %v10300_v13  ;;  %v10302_v2 = vadd.f32 %v7952_v0, %v18259_v56  ;;  %v7954_v35 = vpop.f32.mrb[195].mxu0  ;;  %v9007_v49 = vpop.f32.mrb[192].mxu1 }
 0x7c4   :  { %9427 = vst [vmem:[%s19725_s6 + $0x828] sm:$0xff] %v10301_v17  ;;  %v10303_v32 = vadd.f32 %v7954_v35, %v18259_v56  ;;  %v10428_v7 = vadd.f32 %v9007_v49, %v17447_v23  ;;  %v9009_v11 = vpop.f32.mrb[193].mxu1 }
 0x7c5   :  { %9434 = vst [vmem:[%s19725_s6 + $0x860] sm:$0xff] %v10302_v2  ;;  %v10429_v33 = vadd.f32 %v9009_v11, %v17447_v23  ;;  %v9011_v51 = vpop.f32.mrb[194].mxu1 }
 0x7c6   :  { %9435 = vst [vmem:[%s19725_s6 + $0x868] sm:$0xff] %v10303_v32  ;;  %9428 = vst [vmem:[%s19725_s6 + $0x830] sm:$0xff] %v10428_v7  ;;  %v10430_v30 = vadd.f32 %v9011_v51, %v18259_v56  ;;  %v9013_v46 = vpop.f32.mrb[195].mxu1 }
 0x7c7   :  { %9429 = vst [vmem:[%s19725_s6 + $0x838] sm:$0xff] %v10429_v33  ;;  %v10431_v42 = vadd.f32 %v9013_v46, %v18259_v56 }
 0x7c8   :  { %9436 = vst [vmem:[%s19725_s6 + $0x870] sm:$0xff] %v10430_v30 }
 0x7c9   :  { %v7958_v44 = vpop.f32.mrb[196].mxu0  ;;  %9437 = vst [vmem:[%s19725_s6 + $0x878] sm:$0xff] %v10431_v42 }
 0x7ca   :  { %v10304_v23 = vadd.f32 %v7958_v44, %v17494_v14  ;;  %v7960_v10 = vpop.f32.mrb[197].mxu0 }
 0x7cb   :  { %v10305_v54 = vadd.f32 %v7960_v10, %v17494_v14  ;;  %v7962_v40 = vpop.f32.mrb[198].mxu0  ;;  %v9017_v57 = vpop.f32.mrb[196].mxu1 }
 0x7cc   :  { %9442 = vst [vmem:[%s19725_s6 + $0x8a0] sm:$0xff] %v10304_v23  ;;  %v10306_v56 = vadd.f32 %v7962_v40, %v18283_v6  ;;  %v7964_v45 = vpop.f32.mrb[199].mxu0  ;;  %v10432_v3 = vadd.f32 %v9017_v57, %v17494_v14  ;;  %v9019_v25 = vpop.f32.mrb[197].mxu1 }
 0x7cd   :  { %9443 = vst [vmem:[%s19725_s6 + $0x8a8] sm:$0xff] %v10305_v54  ;;  %v10307_v15 = vadd.f32 %v7964_v45, %v18283_v6  ;;  %v10433_v55 = vadd.f32 %v9019_v25, %v17494_v14  ;;  %v9021_v36 = vpop.f32.mrb[198].mxu1 }
 0x7ce   :  { %9450 = vst [vmem:[%s19725_s6 + $0x8e0] sm:$0xff] %v10306_v56  ;;  %9444 = vst [vmem:[%s19725_s6 + $0x8b0] sm:$0xff] %v10432_v3  ;;  %v10434_v19 = vadd.f32 %v9021_v36, %v18283_v6  ;;  %v9023_v52 = vpop.f32.mrb[199].mxu1 }
 0x7cf   :  { %9451 = vst [vmem:[%s19725_s6 + $0x8e8] sm:$0xff] %v10307_v15  ;;  %9445 = vst [vmem:[%s19725_s6 + $0x8b8] sm:$0xff] %v10433_v55  ;;  %v10435_v29 = vadd.f32 %v9023_v52, %v18283_v6 }
 0x7d0   :  { %9452 = vst [vmem:[%s19725_s6 + $0x8f0] sm:$0xff] %v10434_v19 }
 0x7d1   :  { %9453 = vst [vmem:[%s19725_s6 + $0x8f8] sm:$0xff] %v10435_v29 }
 0x7d3   :  { %v7968_v53 = vpop.f32.mrb[200].mxu0  ;;  %v9027_v60 = vpop.f32.mrb[200].mxu1 }
 0x7d4   :  { %v10308_v14 = vadd.f32 %v7968_v53, %v17543_v24  ;;  %v7970_v8 = vpop.f32.mrb[201].mxu0  ;;  %v10436_v43 = vadd.f32 %v9027_v60, %v17543_v24  ;;  %v9029_v16 = vpop.f32.mrb[201].mxu1 }
 0x7d5   :  { %v10309_v41 = vadd.f32 %v7970_v8, %v17543_v24  ;;  %v7972_v47 = vpop.f32.mrb[202].mxu0  ;;  %v10437_v12 = vadd.f32 %v9029_v16, %v17543_v24  ;;  %v9031_v18 = vpop.f32.mrb[202].mxu1 }
 0x7d6   :  { %9458 = vst [vmem:[%s19725_s6 + $0x920] sm:$0xff] %v10308_v14  ;;  %v10310_v6 = vadd.f32 %v7972_v47, %v18310_v27  ;;  %v7974_v38 = vpop.f32.mrb[203].mxu0  ;;  %9460 = vst [vmem:[%s19725_s6 + $0x930] sm:$0xff] %v10436_v43  ;;  %v10438_v28 = vadd.f32 %v9031_v18, %v18310_v27  ;;  %v9033_v34 = vpop.f32.mrb[203].mxu1 }
 0x7d7   :  { %9459 = vst [vmem:[%s19725_s6 + $0x928] sm:$0xff] %v10309_v41  ;;  %v10311_v26 = vadd.f32 %v7974_v38, %v18310_v27  ;;  %9461 = vst [vmem:[%s19725_s6 + $0x938] sm:$0xff] %v10437_v12  ;;  %v10439_v37 = vadd.f32 %v9033_v34, %v18310_v27 }
 0x7d8   :  { %9466 = vst [vmem:[%s19725_s6 + $0x960] sm:$0xff] %v10310_v6  ;;  %9468 = vst [vmem:[%s19725_s6 + $0x970] sm:$0xff] %v10438_v28 }
 0x7d9   :  { %9467 = vst [vmem:[%s19725_s6 + $0x968] sm:$0xff] %v10311_v26  ;;  %9469 = vst [vmem:[%s19725_s6 + $0x978] sm:$0xff] %v10439_v37 }
 0x7db   :  { %v7978_v39 = vpop.f32.mrb[204].mxu0  ;;  %v9037_v17 = vpop.f32.mrb[204].mxu1 }
 0x7dc   :  { %v10312_v24 = vadd.f32 %v7978_v39, %v17589_v5  ;;  %v7980_v9 = vpop.f32.mrb[205].mxu0  ;;  %v10440_v2 = vadd.f32 %v9037_v17, %v17589_v5  ;;  %v9039_v35 = vpop.f32.mrb[205].mxu1 }
 0x7dd   :  { %v10313_v31 = vadd.f32 %v7980_v9, %v17589_v5  ;;  %v7982_v13 = vpop.f32.mrb[206].mxu0  ;;  %v10441_v49 = vadd.f32 %v9039_v35, %v17589_v5  ;;  %v9041_v32 = vpop.f32.mrb[206].mxu1 }
 0x7de   :  { %9474 = vst [vmem:[%s19725_s6 + $0x9a0] sm:$0xff] %v10312_v24  ;;  %v10314_v27 = vadd.f32 %v7982_v13, %v18334_v4  ;;  %v7984_v63 = vpop.f32.mrb[207].mxu0  ;;  %9476 = vst [vmem:[%s19725_s6 + $0x9b0] sm:$0xff] %v10440_v2  ;;  %v10442_v7 = vadd.f32 %v9041_v32, %v18334_v4  ;;  %v9043_v11 = vpop.f32.mrb[207].mxu1 }
 0x7df   :  { %9475 = vst [vmem:[%s19725_s6 + $0x9a8] sm:$0xff] %v10313_v31  ;;  %v10315_v0 = vadd.f32 %v7984_v63, %v18334_v4  ;;  %9477 = vst [vmem:[%s19725_s6 + $0x9b8] sm:$0xff] %v10441_v49  ;;  %v10443_v33 = vadd.f32 %v9043_v11, %v18334_v4 }
 0x7e0   :  { %9482 = vst [vmem:[%s19725_s6 + $0x9e0] sm:$0xff] %v10314_v27  ;;  %9484 = vst [vmem:[%s19725_s6 + $0x9f0] sm:$0xff] %v10442_v7 }
 0x7e1   :  { %9483 = vst [vmem:[%s19725_s6 + $0x9e8] sm:$0xff] %v10315_v0  ;;  %9485 = vst [vmem:[%s19725_s6 + $0x9f8] sm:$0xff] %v10443_v33 }
 0x7e3   :  { %v7988_v51 = vpop.f32.mrb[208].mxu0  ;;  %v9047_v23 = vpop.f32.mrb[208].mxu1 }
 0x7e4   :  { %v10316_v5 = vadd.f32 %v7988_v51, %v17638_v61  ;;  %v7990_v30 = vpop.f32.mrb[209].mxu0  ;;  %v10444_v54 = vadd.f32 %v9047_v23, %v17638_v61  ;;  %v9049_v40 = vpop.f32.mrb[209].mxu1 }
 0x7e5   :  { %v10317_v46 = vadd.f32 %v7990_v30, %v17638_v61  ;;  %v7992_v42 = vpop.f32.mrb[210].mxu0  ;;  %v10445_v56 = vadd.f32 %v9049_v40, %v17638_v61  ;;  %v9051_v45 = vpop.f32.mrb[210].mxu1 }
 0x7e6   :  { %9490 = vst [vmem:[%s19725_s6 + $0xa20] sm:$0xff] %v10316_v5  ;;  %v10318_v4 = vadd.f32 %v7992_v42, %v18361_v62  ;;  %v7994_v44 = vpop.f32.mrb[211].mxu0  ;;  %9492 = vst [vmem:[%s19725_s6 + $0xa30] sm:$0xff] %v10444_v54  ;;  %v10446_v57 = vadd.f32 %v9051_v45, %v18361_v62  ;;  %v9053_v15 = vpop.f32.mrb[211].mxu1 }
 0x7e7   :  { %9491 = vst [vmem:[%s19725_s6 + $0xa28] sm:$0xff] %v10317_v46  ;;  %v10319_v10 = vadd.f32 %v7994_v44, %v18361_v62  ;;  %9493 = vst [vmem:[%s19725_s6 + $0xa38] sm:$0xff] %v10445_v56  ;;  %v10447_v3 = vadd.f32 %v9053_v15, %v18361_v62 }
 0x7e8   :  { %9498 = vst [vmem:[%s19725_s6 + $0xa60] sm:$0xff] %v10318_v4  ;;  %9500 = vst [vmem:[%s19725_s6 + $0xa70] sm:$0xff] %v10446_v57 }
 0x7e9   :  { %9499 = vst [vmem:[%s19725_s6 + $0xa68] sm:$0xff] %v10319_v10  ;;  %9501 = vst [vmem:[%s19725_s6 + $0xa78] sm:$0xff] %v10447_v3 }
 0x7eb   :  { %v7998_v25 = vpop.f32.mrb[212].mxu0  ;;  %v9057_v29 = vpop.f32.mrb[212].mxu1 }
 0x7ec   :  { %v10320_v61 = vadd.f32 %v7998_v25, %v17684_v59  ;;  %v8000_v55 = vpop.f32.mrb[213].mxu0  ;;  %v10448_v14 = vadd.f32 %v9057_v29, %v17684_v59  ;;  %v9059_v8 = vpop.f32.mrb[213].mxu1 }
 0x7ed   :  { %v10321_v36 = vadd.f32 %v8000_v55, %v17684_v59  ;;  %v8002_v19 = vpop.f32.mrb[214].mxu0  ;;  %v10449_v41 = vadd.f32 %v9059_v8, %v17684_v59  ;;  %v9061_v47 = vpop.f32.mrb[214].mxu1 }
 0x7ee   :  { %9506 = vst [vmem:[%s19725_s6 + $0xaa0] sm:$0xff] %v10320_v61  ;;  %v10322_v62 = vadd.f32 %v8002_v19, %v18385_v20  ;;  %v8004_v52 = vpop.f32.mrb[215].mxu0  ;;  %9508 = vst [vmem:[%s19725_s6 + $0xab0] sm:$0xff] %v10448_v14  ;;  %v10450_v6 = vadd.f32 %v9061_v47, %v18385_v20  ;;  %v9063_v38 = vpop.f32.mrb[215].mxu1 }
 0x7ef   :  { %9507 = vst [vmem:[%s19725_s6 + $0xaa8] sm:$0xff] %v10321_v36  ;;  %v10323_v53 = vadd.f32 %v8004_v52, %v18385_v20  ;;  %9509 = vst [vmem:[%s19725_s6 + $0xab8] sm:$0xff] %v10449_v41  ;;  %v10451_v60 = vadd.f32 %v9063_v38, %v18385_v20 }
 0x7f0   :  { %9514 = vst [vmem:[%s19725_s6 + $0xae0] sm:$0xff] %v10322_v62  ;;  %9516 = vst [vmem:[%s19725_s6 + $0xaf0] sm:$0xff] %v10450_v6 }
 0x7f1   :  { %9515 = vst [vmem:[%s19725_s6 + $0xae8] sm:$0xff] %v10323_v53  ;;  %9517 = vst [vmem:[%s19725_s6 + $0xaf8] sm:$0xff] %v10451_v60  ;;  %v20473_v53 = vld [vmem:[#allocation14_spill] sm:$0xff] }
 0x7f3   :  { %v8008_v26 = vpop.f32.mrb[216].mxu0  ;;  %v9067_v28 = vpop.f32.mrb[216].mxu1 }
 0x7f4   :  { %v10324_v59 = vadd.f32 %v8008_v26, %v17733_v1  ;;  %v8010_v43 = vpop.f32.mrb[217].mxu0  ;;  %v10452_v37 = vadd.f32 %v9067_v28, %v17733_v1  ;;  %v9069_v39 = vpop.f32.mrb[217].mxu1 }
 0x7f5   :  { %v10325_v16 = vadd.f32 %v8010_v43, %v17733_v1  ;;  %v8012_v12 = vpop.f32.mrb[218].mxu0  ;;  %v10453_v24 = vadd.f32 %v9069_v39, %v17733_v1  ;;  %v9071_v9 = vpop.f32.mrb[218].mxu1  ;;  %v20475_v39 = vld [vmem:[#allocation15_spill] sm:$0xff] }
 0x7f6   :  { %9522 = vst [vmem:[%s19725_s6 + $0xb20] sm:$0xff] %v10324_v59  ;;  %v10326_v20 = vadd.f32 %v8012_v12, %v18412_v21  ;;  %v8014_v18 = vpop.f32.mrb[219].mxu0  ;;  %9524 = vst [vmem:[%s19725_s6 + $0xb30] sm:$0xff] %v10452_v37  ;;  %v10454_v31 = vadd.f32 %v9071_v9, %v18412_v21  ;;  %v9073_v13 = vpop.f32.mrb[219].mxu1 }
 0x7f7   :  { %9523 = vst [vmem:[%s19725_s6 + $0xb28] sm:$0xff] %v10325_v16  ;;  %v10327_v34 = vadd.f32 %v8014_v18, %v18412_v21  ;;  %9525 = vst [vmem:[%s19725_s6 + $0xb38] sm:$0xff] %v10453_v24  ;;  %v10455_v27 = vadd.f32 %v9073_v13, %v18412_v21 }
 0x7f8   :  { %9530 = vst [vmem:[%s19725_s6 + $0xb60] sm:$0xff] %v10326_v20  ;;  %9532 = vst [vmem:[%s19725_s6 + $0xb70] sm:$0xff] %v10454_v31  ;;  %v20474_v20 = vld [vmem:[#allocation23_spill] sm:$0xff] }
 0x7f9   :  { %9531 = vst [vmem:[%s19725_s6 + $0xb68] sm:$0xff] %v10327_v34  ;;  %9533 = vst [vmem:[%s19725_s6 + $0xb78] sm:$0xff] %v10455_v27 }
 0x7fb   :  { %v8018_v63 = vpop.f32.mrb[220].mxu0  ;;  %v9077_v49 = vpop.f32.mrb[220].mxu1 }
 0x7fc   :  { %v10328_v1 = vadd.f32 %v8018_v63, %v17779_v50  ;;  %v8020_v17 = vpop.f32.mrb[221].mxu0  ;;  %v10456_v7 = vadd.f32 %v9077_v49, %v17779_v50  ;;  %v9079_v11 = vpop.f32.mrb[221].mxu1  ;;  %v20476_v49 = vld [vmem:[#allocation13_spill] sm:$0xff] }
 0x7fd   :  { %v10329_v0 = vadd.f32 %v8020_v17, %v17779_v50  ;;  %v8022_v2 = vpop.f32.mrb[222].mxu0  ;;  %v10457_v33 = vadd.f32 %v9079_v11, %v17779_v50  ;;  %v9081_v51 = vpop.f32.mrb[222].mxu1 }
 0x7fe   :  { %9538 = vst [vmem:[%s19725_s6 + $0xba0] sm:$0xff] %v10328_v1  ;;  %v10330_v21 = vadd.f32 %v8022_v2, %v18436_v58  ;;  %v8024_v35 = vpop.f32.mrb[223].mxu0  ;;  %9540 = vst [vmem:[%s19725_s6 + $0xbb0] sm:$0xff] %v10456_v7  ;;  %v10458_v5 = vadd.f32 %v9081_v51, %v18436_v58  ;;  %v9083_v30 = vpop.f32.mrb[223].mxu1  ;;  %v20477_v51 = vld [vmem:[#allocation25_spill] sm:$0xff] }
 0x7ff   :  { %9539 = vst [vmem:[%s19725_s6 + $0xba8] sm:$0xff] %v10329_v0  ;;  %v10331_v32 = vadd.f32 %v8024_v35, %v18436_v58  ;;  %9541 = vst [vmem:[%s19725_s6 + $0xbb8] sm:$0xff] %v10457_v33  ;;  %v10459_v46 = vadd.f32 %v9083_v30, %v18436_v58  ;;  %v20471_v58 = vld [vmem:[#allocation33_spill] sm:$0xff] }
 0x800   :  { %9546 = vst [vmem:[%s19725_s6 + $0xbe0] sm:$0xff] %v10330_v21  ;;  %9548 = vst [vmem:[%s19725_s6 + $0xbf0] sm:$0xff] %v10458_v5 }
 0x801   :  { %9547 = vst [vmem:[%s19725_s6 + $0xbe8] sm:$0xff] %v10331_v32  ;;  %9549 = vst [vmem:[%s19725_s6 + $0xbf8] sm:$0xff] %v10459_v46 }
 0x803   :  { %v8028_v42 = vpop.f32.mrb[224].mxu0  ;;  %v9087_v40 = vpop.f32.mrb[224].mxu1 }
 0x804   :  { %v10332_v50 = vadd.f32 %v8028_v42, %v17828_v48  ;;  %v8030_v4 = vpop.f32.mrb[225].mxu0  ;;  %v10460_v45 = vadd.f32 %v9087_v40, %v17828_v48  ;;  %v9089_v57 = vpop.f32.mrb[225].mxu1 }
 0x805   :  { %v10333_v44 = vadd.f32 %v8030_v4, %v17828_v48  ;;  %v8032_v23 = vpop.f32.mrb[226].mxu0  ;;  %v10461_v15 = vadd.f32 %v9089_v57, %v17828_v48  ;;  %v9091_v3 = vpop.f32.mrb[226].mxu1  ;;  %v20472_v48 = vld [vmem:[#allocation22_spill] sm:$0xff] }
 0x806   :  { %9554 = vst [vmem:[%s19725_s6 + $0xc20] sm:$0xff] %v10332_v50  ;;  %v10334_v10 = vadd.f32 %v8032_v23, %v20471_v58  ;;  %v8034_v54 = vpop.f32.mrb[227].mxu0  ;;  %9556 = vst [vmem:[%s19725_s6 + $0xc30] sm:$0xff] %v10460_v45  ;;  %v10462_v25 = vadd.f32 %v9091_v3, %v20471_v58  ;;  %v9093_v61 = vpop.f32.mrb[227].mxu1 }
 0x807   :  { %9555 = vst [vmem:[%s19725_s6 + $0xc28] sm:$0xff] %v10333_v44  ;;  %v10335_v56 = vadd.f32 %v8034_v54, %v20471_v58  ;;  %9557 = vst [vmem:[%s19725_s6 + $0xc38] sm:$0xff] %v10461_v15  ;;  %v10463_v55 = vadd.f32 %v9093_v61, %v20471_v58 }
 0x808   :  { %9562 = vst [vmem:[%s19725_s6 + $0xc60] sm:$0xff] %v10334_v10  ;;  %9564 = vst [vmem:[%s19725_s6 + $0xc70] sm:$0xff] %v10462_v25  ;;  %v20479_v25 = vld [vmem:[#allocation24_spill] sm:$0xff] }
 0x809   :  { %9563 = vst [vmem:[%s19725_s6 + $0xc68] sm:$0xff] %v10335_v56  ;;  %9565 = vst [vmem:[%s19725_s6 + $0xc78] sm:$0xff] %v10463_v55  ;;  %v20478_v56 = vld [vmem:[#allocation21_spill] sm:$0xff] }
 0x80b   :  { %v8038_v36 = vpop.f32.mrb[228].mxu0  ;;  %v9097_v41 = vpop.f32.mrb[228].mxu1 }
 0x80c   :  { %v10336_v19 = vadd.f32 %v8038_v36, %v20472_v48  ;;  %v8040_v62 = vpop.f32.mrb[229].mxu0  ;;  %v10464_v6 = vadd.f32 %v9097_v41, %v20472_v48  ;;  %v9099_v38 = vpop.f32.mrb[229].mxu1 }
 0x80d   :  { %v10337_v52 = vadd.f32 %v8040_v62, %v20472_v48  ;;  %v8042_v29 = vpop.f32.mrb[230].mxu0  ;;  %v10465_v60 = vadd.f32 %v9099_v38, %v20472_v48  ;;  %v9101_v26 = vpop.f32.mrb[230].mxu1 }
 0x80e   :  { %9570 = vst [vmem:[%s19725_s6 + $0xca0] sm:$0xff] %v10336_v19  ;;  %v10338_v14 = vadd.f32 %v8042_v29, %v20473_v53  ;;  %v8044_v8 = vpop.f32.mrb[231].mxu0  ;;  %9572 = vst [vmem:[%s19725_s6 + $0xcb0] sm:$0xff] %v10464_v6  ;;  %v10466_v59 = vadd.f32 %v9101_v26, %v20473_v53  ;;  %v9103_v43 = vpop.f32.mrb[231].mxu1 }
 0x80f   :  { %9571 = vst [vmem:[%s19725_s6 + $0xca8] sm:$0xff] %v10337_v52  ;;  %v10339_v47 = vadd.f32 %v8044_v8, %v20473_v53  ;;  %9573 = vst [vmem:[%s19725_s6 + $0xcb8] sm:$0xff] %v10465_v60  ;;  %v10467_v16 = vadd.f32 %v9103_v43, %v20473_v53 }
 0x810   :  { %9578 = vst [vmem:[%s19725_s6 + $0xce0] sm:$0xff] %v10338_v14  ;;  %9580 = vst [vmem:[%s19725_s6 + $0xcf0] sm:$0xff] %v10466_v59  ;;  %v20481_v59 = vld [vmem:[#allocation16_spill] sm:$0xff] }
 0x811   :  { %9579 = vst [vmem:[%s19725_s6 + $0xce8] sm:$0xff] %v10339_v47  ;;  %9581 = vst [vmem:[%s19725_s6 + $0xcf8] sm:$0xff] %v10467_v16  ;;  %v20480_v47 = vld [vmem:[#allocation12_spill] sm:$0xff] }
 0x813   :  { %v8048_v12 = vpop.f32.mrb[232].mxu0  ;;  %v9107_v31 = vpop.f32.mrb[232].mxu1 }
 0x814   :  { %v10340_v18 = vadd.f32 %v8048_v12, %v20474_v20  ;;  %v8050_v28 = vpop.f32.mrb[233].mxu0  ;;  %v10468_v27 = vadd.f32 %v9107_v31, %v20474_v20  ;;  %v9109_v63 = vpop.f32.mrb[233].mxu1 }
 0x815   :  { %v10341_v34 = vadd.f32 %v8050_v28, %v20474_v20  ;;  %v8052_v37 = vpop.f32.mrb[234].mxu0  ;;  %v10469_v1 = vadd.f32 %v9109_v63, %v20474_v20  ;;  %v9111_v17 = vpop.f32.mrb[234].mxu1 }
 0x816   :  { %9586 = vst [vmem:[%s19725_s6 + $0xd20] sm:$0xff] %v10340_v18  ;;  %v10342_v24 = vadd.f32 %v8052_v37, %v20475_v39  ;;  %v8054_v9 = vpop.f32.mrb[235].mxu0  ;;  %9588 = vst [vmem:[%s19725_s6 + $0xd30] sm:$0xff] %v10468_v27  ;;  %v10470_v0 = vadd.f32 %v9111_v17, %v20475_v39  ;;  %v9113_v2 = vpop.f32.mrb[235].mxu1 }
 0x817   :  { %9587 = vst [vmem:[%s19725_s6 + $0xd28] sm:$0xff] %v10341_v34  ;;  %v10343_v13 = vadd.f32 %v8054_v9, %v20475_v39  ;;  %9589 = vst [vmem:[%s19725_s6 + $0xd38] sm:$0xff] %v10469_v1  ;;  %v10471_v21 = vadd.f32 %v9113_v2, %v20475_v39 }
 0x818   :  { %9594 = vst [vmem:[%s19725_s6 + $0xd60] sm:$0xff] %v10342_v24  ;;  %9596 = vst [vmem:[%s19725_s6 + $0xd70] sm:$0xff] %v10470_v0  ;;  %v20483_v0 = vld [vmem:[#allocation20_spill] sm:$0xff] }
 0x819   :  { %9595 = vst [vmem:[%s19725_s6 + $0xd68] sm:$0xff] %v10343_v13  ;;  %9597 = vst [vmem:[%s19725_s6 + $0xd78] sm:$0xff] %v10471_v21  ;;  %v20482_v13 = vld [vmem:[#allocation18_spill] sm:$0xff] }
 0x81b   :  { %v8058_v35 = vpop.f32.mrb[236].mxu0  ;;  %v9117_v46 = vpop.f32.mrb[236].mxu1 }
 0x81c   :  { %v10344_v32 = vadd.f32 %v8058_v35, %v20476_v49  ;;  %v8060_v7 = vpop.f32.mrb[237].mxu0  ;;  %v10472_v50 = vadd.f32 %v9117_v46, %v20476_v49  ;;  %v9119_v4 = vpop.f32.mrb[237].mxu1 }
 0x81d   :  { %v10345_v11 = vadd.f32 %v8060_v7, %v20476_v49  ;;  %v8062_v33 = vpop.f32.mrb[238].mxu0  ;;  %v10473_v44 = vadd.f32 %v9119_v4, %v20476_v49  ;;  %v9121_v23 = vpop.f32.mrb[238].mxu1 }
 0x81e   :  { %9602 = vst [vmem:[%s19725_s6 + $0xda0] sm:$0xff] %v10344_v32  ;;  %v10346_v5 = vadd.f32 %v8062_v33, %v20477_v51  ;;  %v8064_v30 = vpop.f32.mrb[239].mxu0  ;;  %9604 = vst [vmem:[%s19725_s6 + $0xdb0] sm:$0xff] %v10472_v50  ;;  %v10474_v58 = vadd.f32 %v9121_v23, %v20477_v51  ;;  %v9123_v10 = vpop.f32.mrb[239].mxu1 }
 0x81f   :  { %9603 = vst [vmem:[%s19725_s6 + $0xda8] sm:$0xff] %v10345_v11  ;;  %v10347_v42 = vadd.f32 %v8064_v30, %v20477_v51  ;;  %9605 = vst [vmem:[%s19725_s6 + $0xdb8] sm:$0xff] %v10473_v44  ;;  %v10475_v54 = vadd.f32 %v9123_v10, %v20477_v51 }
 0x820   :  { %9610 = vst [vmem:[%s19725_s6 + $0xde0] sm:$0xff] %v10346_v5  ;;  %9612 = vst [vmem:[%s19725_s6 + $0xdf0] sm:$0xff] %v10474_v58 }
 0x821   :  { %9611 = vst [vmem:[%s19725_s6 + $0xde8] sm:$0xff] %v10347_v42  ;;  %9613 = vst [vmem:[%s19725_s6 + $0xdf8] sm:$0xff] %v10475_v54  ;;  %v20484_v42 = vld [vmem:[#allocation29_spill] sm:$0xff] }
 0x823   :  { %v8068_v40 = vpop.f32.mrb[240].mxu0  ;;  %v9127_v36 = vpop.f32.mrb[240].mxu1 }
 0x824   :  { %v10348_v45 = vadd.f32 %v8068_v40, %v20478_v56  ;;  %v8070_v57 = vpop.f32.mrb[241].mxu0  ;;  %v10476_v19 = vadd.f32 %v9127_v36, %v20478_v56  ;;  %v9129_v62 = vpop.f32.mrb[241].mxu1 }
 0x825   :  { %v10349_v15 = vadd.f32 %v8070_v57, %v20478_v56  ;;  %v8072_v3 = vpop.f32.mrb[242].mxu0  ;;  %v10477_v52 = vadd.f32 %v9129_v62, %v20478_v56  ;;  %v9131_v29 = vpop.f32.mrb[242].mxu1 }
 0x826   :  { %9618 = vst [vmem:[%s19725_s6 + $0xe20] sm:$0xff] %v10348_v45  ;;  %v10350_v61 = vadd.f32 %v8072_v3, %v20479_v25  ;;  %v8074_v55 = vpop.f32.mrb[243].mxu0  ;;  %9620 = vst [vmem:[%s19725_s6 + $0xe30] sm:$0xff] %v10476_v19  ;;  %v10478_v53 = vadd.f32 %v9131_v29, %v20479_v25  ;;  %v9133_v14 = vpop.f32.mrb[243].mxu1 }
 0x827   :  { %9619 = vst [vmem:[%s19725_s6 + $0xe28] sm:$0xff] %v10349_v15  ;;  %v10351_v48 = vadd.f32 %v8074_v55, %v20479_v25  ;;  %9621 = vst [vmem:[%s19725_s6 + $0xe38] sm:$0xff] %v10477_v52  ;;  %v10479_v8 = vadd.f32 %v9133_v14, %v20479_v25 }
 0x828   :  { %9626 = vst [vmem:[%s19725_s6 + $0xe60] sm:$0xff] %v10350_v61  ;;  %9628 = vst [vmem:[%s19725_s6 + $0xe70] sm:$0xff] %v10478_v53 }
 0x829   :  { %9627 = vst [vmem:[%s19725_s6 + $0xe68] sm:$0xff] %v10351_v48  ;;  %9629 = vst [vmem:[%s19725_s6 + $0xe78] sm:$0xff] %v10479_v8 }
 0x82b   :  { %v8078_v41 = vpop.f32.mrb[244].mxu0  ;;  %v9137_v12 = vpop.f32.mrb[244].mxu1 }
 0x82c   :  { %v10352_v6 = vadd.f32 %v8078_v41, %v20480_v47  ;;  %v8080_v38 = vpop.f32.mrb[245].mxu0  ;;  %v10480_v18 = vadd.f32 %v9137_v12, %v20480_v47  ;;  %v9139_v28 = vpop.f32.mrb[245].mxu1 }
 0x82d   :  { %v10353_v60 = vadd.f32 %v8080_v38, %v20480_v47  ;;  %v8082_v26 = vpop.f32.mrb[246].mxu0  ;;  %v10481_v34 = vadd.f32 %v9139_v28, %v20480_v47  ;;  %v9141_v37 = vpop.f32.mrb[246].mxu1 }
 0x82e   :  { %9634 = vst [vmem:[%s19725_s6 + $0xea0] sm:$0xff] %v10352_v6  ;;  %v10354_v43 = vadd.f32 %v8082_v26, %v20481_v59  ;;  %v8084_v16 = vpop.f32.mrb[247].mxu0  ;;  %9636 = vst [vmem:[%s19725_s6 + $0xeb0] sm:$0xff] %v10480_v18  ;;  %v10482_v39 = vadd.f32 %v9141_v37, %v20481_v59  ;;  %v9143_v24 = vpop.f32.mrb[247].mxu1 }
 0x82f   :  { %9635 = vst [vmem:[%s19725_s6 + $0xea8] sm:$0xff] %v10353_v60  ;;  %v10355_v20 = vadd.f32 %v8084_v16, %v20481_v59  ;;  %9637 = vst [vmem:[%s19725_s6 + $0xeb8] sm:$0xff] %v10481_v34  ;;  %v10483_v9 = vadd.f32 %v9143_v24, %v20481_v59 }
 0x830   :  { %9642 = vst [vmem:[%s19725_s6 + $0xee0] sm:$0xff] %v10354_v43  ;;  %9644 = vst [vmem:[%s19725_s6 + $0xef0] sm:$0xff] %v10482_v39 }
 0x831   :  { %9643 = vst [vmem:[%s19725_s6 + $0xee8] sm:$0xff] %v10355_v20  ;;  %9645 = vst [vmem:[%s19725_s6 + $0xef8] sm:$0xff] %v10483_v9 }
 0x833   :  { %v8088_v31 = vpop.f32.mrb[248].mxu0  ;;  %v9147_v35 = vpop.f32.mrb[248].mxu1 }
 0x834   :  { %v10356_v27 = vadd.f32 %v8088_v31, %v20482_v13  ;;  %v8090_v63 = vpop.f32.mrb[249].mxu0  ;;  %v10484_v32 = vadd.f32 %v9147_v35, %v20482_v13  ;;  %v9149_v7 = vpop.f32.mrb[249].mxu1 }
 0x835   :  { %v10357_v1 = vadd.f32 %v8090_v63, %v20482_v13  ;;  %v8092_v17 = vpop.f32.mrb[250].mxu0  ;;  %v10485_v11 = vadd.f32 %v9149_v7, %v20482_v13  ;;  %v9151_v33 = vpop.f32.mrb[250].mxu1 }
 0x836   :  { %9650 = vst [vmem:[%s19725_s6 + $0xf20] sm:$0xff] %v10356_v27  ;;  %v10358_v2 = vadd.f32 %v8092_v17, %v20483_v0  ;;  %v8094_v21 = vpop.f32.mrb[251].mxu0  ;;  %9652 = vst [vmem:[%s19725_s6 + $0xf30] sm:$0xff] %v10484_v32  ;;  %v10486_v51 = vadd.f32 %v9151_v33, %v20483_v0  ;;  %v9153_v5 = vpop.f32.mrb[251].mxu1 }
 0x837   :  { %9651 = vst [vmem:[%s19725_s6 + $0xf28] sm:$0xff] %v10357_v1  ;;  %v10359_v49 = vadd.f32 %v8094_v21, %v20483_v0  ;;  %9653 = vst [vmem:[%s19725_s6 + $0xf38] sm:$0xff] %v10485_v11  ;;  %v10487_v30 = vadd.f32 %v9153_v5, %v20483_v0 }
 0x838   :  { %9658 = vst [vmem:[%s19725_s6 + $0xf60] sm:$0xff] %v10358_v2  ;;  %9660 = vst [vmem:[%s19725_s6 + $0xf70] sm:$0xff] %v10486_v51 }
 0x839   :  { %9659 = vst [vmem:[%s19725_s6 + $0xf68] sm:$0xff] %v10359_v49  ;;  %9661 = vst [vmem:[%s19725_s6 + $0xf78] sm:$0xff] %v10487_v30 }
 0x83b   :  { %v8098_v46 = vpop.f32.mrb[252].mxu0  ;;  %v9157_v54 = vpop.f32.mrb[252].mxu1 }
 0x83c   :  { %v10360_v50 = vadd.f32 %v8098_v46, %v20484_v42  ;;  %v8100_v4 = vpop.f32.mrb[253].mxu0  ;;  %v10488_v56 = vadd.f32 %v9157_v54, %v20484_v42  ;;  %v9159_v45 = vpop.f32.mrb[253].mxu1 }
 0x83d   :  { %v10361_v44 = vadd.f32 %v8100_v4, %v20484_v42  ;;  %v8102_v23 = vpop.f32.mrb[254].mxu0  ;;  %v10489_v57 = vadd.f32 %v9159_v45, %v20484_v42  ;;  %v9161_v15 = vpop.f32.mrb[254].mxu1 }
 0x83e   :  { %9666 = vst [vmem:[%s19725_s6 + $0xfa0] sm:$0xff] %v10360_v50  ;;  %v10362_v58 = vadd.f32 %v8102_v23, %v18642_v22  ;;  %v8104_v10 = vpop.f32.mrb[255].mxu0  ;;  %9668 = vst [vmem:[%s19725_s6 + $0xfb0] sm:$0xff] %v10488_v56  ;;  %v10490_v3 = vadd.f32 %v9161_v15, %v18642_v22  ;;  %v9163_v25 = vpop.f32.mrb[255].mxu1 }
 0x83f   :  { %9667 = vst [vmem:[%s19725_s6 + $0xfa8] sm:$0xff] %v10361_v44  ;;  %v10363_v40 = vadd.f32 %v8104_v10, %v18642_v22  ;;  %9669 = vst [vmem:[%s19725_s6 + $0xfb8] sm:$0xff] %v10489_v57  ;;  %v10491_v61 = vadd.f32 %v9163_v25, %v18642_v22 }
 0x840   :  { %9674 = vst [vmem:[%s19725_s6 + $0xfe0] sm:$0xff] %v10362_v58  ;;  %9676 = vst [vmem:[%s19725_s6 + $0xff0] sm:$0xff] %v10490_v3 }
 0x841   :  { %9675 = vst [vmem:[%s19725_s6 + $0xfe8] sm:$0xff] %v10363_v40  ;;  %9677 = vst [vmem:[%s19725_s6 + $0xff8] sm:$0xff] %v10491_v61 }

</bundles_post_ra>
